<compile_context>
chip_gen: v7x
topology: tpu7x:2x2x1
jax: 0.10.0
libtpu: 0.0.40
codegen_flags: <defaults>
</compile_context>

<pallas_src>
import functools

import jax
import jax.numpy as jnp
from jax.experimental import pallas as pl


# ----------------------------------------------------------------------------
# Model configuration (static Python constants so jit sees static shapes)
# ----------------------------------------------------------------------------
IN_CH = 3
IMG_HW = 32
BASE_CH = 8
N_BLOCKS = 4
NZ_FEAT = 32
NUM_VERTS = 40           # mean_shape.shape[0]
NUM_FACES = 60
TEX_SIZE = 6
SCALE_BIAS = 0.75        # perspective=False
LRELU_SLOPE = 0.2

CHANS = [IN_CH] + [BASE_CH * (2 ** i) for i in range(N_BLOCKS)]
OUT_HW = IMG_HW // (2 ** N_BLOCKS)
OUT_SHAPE = CHANS[-1] * OUT_HW * OUT_HW      # convEncoder.out_shape = 256
SHAPE_DIM = NUM_VERTS * 3                    # 120
HEAD_W = 128                                 # lane-dense fused head (120 + 7 + pad)
NUM_INDEP = NUM_VERTS                        # symmetric_mesh=False -> all independent


# ----------------------------------------------------------------------------
# Pallas kernel 1: fused 3x3 / stride-2 / pad-1 conv  +  bias  +  LeakyReLU
# ----------------------------------------------------------------------------
def _conv3x3_s2_kernel(ph_ref, w_ref, b_ref, o_ref, *, rows, wh, slope):
    """Fused conv block.

    ph_ref : (2, 2, rows + wh + 1, Cin) f32 phase-decomposed padded image,
             ph[py, px, n*Hh*Wh + r*Wh + c, :] = x_pad[n, 2r+py, 2c+px, :]
    w_ref  : (9, Cin, Cout) bf16 tap-major weights (tap index = dy*3 + dx)
    b_ref  : (1, Cout) f32
    o_ref  : (rows, Cout) f32; valid output rows are n*Hh*Wh + i*Wh + j.
    """
    acc = jnp.zeros(o_ref.shape, jnp.float32)
    for dy in range(3):
        for dx in range(3):
            # Tap (dy, dx) reads phase (dy%2, dx%2) at row offset s; the valid
            # output entries then sit at the SAME local row for every tap,
            # so the 9 dots accumulate directly.
            s = (dy // 2) * wh + (dx // 2)
            lhs = ph_ref[dy % 2, dx % 2, pl.ds(s, rows), :].astype(jnp.bfloat16)
            acc = acc + jnp.dot(lhs, w_ref[dy * 3 + dx],
                                preferred_element_type=jnp.float32)
    acc = acc + b_ref[...]                              # f32 epilogue
    acc = jnp.where(acc >= 0.0, acc, slope * acc)       # fused LeakyReLU
    o_ref[...] = acc.astype(o_ref.dtype)


def conv3x3_s2_lrelu(x_nhwc, w_taps, b_row, slope=LRELU_SLOPE):
    """x:(N,H,W,Cin) f32 -> (N,H/2,W/2,Cout) f32, conv3x3 s2 p1 + LeakyReLU."""
    nb, h, w, cin = x_nhwc.shape
    cout = w_taps.shape[-1]
    ho, wo = h // 2, w // 2
    hh, wh = ho + 1, wo + 1                                  # (H+2)//2, (W+2)//2

    xp = jnp.pad(x_nhwc, ((0, 0), (1, 1), (1, 1), (0, 0)))   # (N, H+2, W+2, Cin)
    # phase (space-to-depth) re-layout: same bytes as xp, fuses under jit.
    ph = xp.reshape(nb, hh, 2, wh, 2, cin).transpose(2, 4, 0, 1, 3, 5)
    ph = ph.reshape(2, 2, nb * hh * wh, cin)
    rows = nb * hh * wh
    ph = jnp.pad(ph, ((0, 0), (0, 0), (0, wh + 1), (0, 0)))  # slack for tap offsets

    out2d = pl.pallas_call(
        functools.partial(_conv3x3_s2_kernel, rows=rows, wh=wh, slope=slope),
        out_shape=jax.ShapeDtypeStruct((rows, cout), jnp.float32),
    )(ph, w_taps, b_row)

    # drop the per-row / per-image halo rows (cheap XLA slice under jit)
    return out2d.reshape(nb, hh, wh, cout)[:, :ho, :wo, :]


# ----------------------------------------------------------------------------
# Pallas kernel 2: fused FC tail (shape + pose branches in one call)
#   out = (lrelu(lrelu(X@W1+b1)@W2+b2))@W3 + b3      (W2, W3 block-structured)
# ----------------------------------------------------------------------------
def _fc_tail_kernel(x_ref, w1_ref, b1_ref, w2_ref, b2_ref, w3_ref, b3_ref,
                    o_ref, *, slope):
    h = jnp.dot(x_ref[...], w1_ref[...], preferred_element_type=jnp.float32)
    h = h + b1_ref[...]
    h = jnp.where(h >= 0.0, h, slope * h).astype(w2_ref.dtype)

    h = jnp.dot(h, w2_ref[...], preferred_element_type=jnp.float32)
    h = h + b2_ref[...]
    h = jnp.where(h >= 0.0, h, slope * h).astype(w3_ref.dtype)

    out = jnp.dot(h, w3_ref[...], preferred_element_type=jnp.float32)
    o_ref[...] = out + b3_ref[...]


def fc_tail(feat_bf16, p):
    nb = feat_bf16.shape[0]
    return pl.pallas_call(
        functools.partial(_fc_tail_kernel, slope=LRELU_SLOPE),
        out_shape=jax.ShapeDtypeStruct((nb, HEAD_W), jnp.float32),
    )(feat_bf16, p["w1"], p["b1"], p["w2"], p["b2"], p["w3"], p["b3"])


# ----------------------------------------------------------------------------
# Parameters: deterministic synthetic init, weight layout hoisted here
# ----------------------------------------------------------------------------
def init_params(key):
    keys = iter(jax.random.split(key, 32))

    def rnd(shape, scale=0.05):
        return jax.random.normal(next(keys), shape, jnp.float32) * scale

    params = {}

    # ConvEncoder: 4 blocks of conv3x3 stride-2 + LeakyReLU, channels doubling
    conv = []
    for i in range(N_BLOCKS):
        cin, cout = CHANS[i], CHANS[i + 1]
        w_oihw = rnd((cout, cin, 3, 3))                     # PyTorch layout
        b = rnd((cout,))
        # hoisted re-layout: (Cout,Cin,kh,kw) -> tap-major (9, Cin, Cout) bf16
        w_taps = jnp.transpose(w_oihw, (2, 3, 1, 0)).reshape(9, cin, cout)
        conv.append((w_taps.astype(jnp.bfloat16),
                     b.reshape(1, cout).astype(jnp.float32)))
    params["conv"] = conv

    # --- shape branch: fc_stack(OUT_SHAPE, nz, 2) -> Linear(nz, NUM_VERTS*3)
    ws1, bs1 = rnd((OUT_SHAPE, NZ_FEAT)), rnd((NZ_FEAT,))
    ws2, bs2 = rnd((NZ_FEAT, NZ_FEAT)), rnd((NZ_FEAT,))
    wsp, bsp = rnd((NZ_FEAT, SHAPE_DIM)), rnd((SHAPE_DIM,))
    # --- pose branch: fc_stack(OUT_SHAPE, nz, 2) -> Linear(nz, 7)
    wp1, bp1 = rnd((OUT_SHAPE, NZ_FEAT)), rnd((NZ_FEAT,))
    wp2, bp2 = rnd((NZ_FEAT, NZ_FEAT)), rnd((NZ_FEAT,))
    wcp, bcp = rnd((NZ_FEAT, 7)), rnd((7,))

    # fused layer 1: columns [shape | pose]
    params["w1"] = jnp.concatenate([ws1, wp1], axis=1).astype(jnp.bfloat16)
    params["b1"] = jnp.concatenate([bs1, bp1]).reshape(1, -1)
    # fused layer 2: block-diagonal
    w2 = jnp.zeros((2 * NZ_FEAT, 2 * NZ_FEAT), jnp.float32)
    w2 = w2.at[:NZ_FEAT, :NZ_FEAT].set(ws2).at[NZ_FEAT:, NZ_FEAT:].set(wp2)
    params["w2"] = w2.astype(jnp.bfloat16)
    params["b2"] = jnp.concatenate([bs2, bp2]).reshape(1, -1)
    # fused heads into one lane-dense 128-wide slab: [shape(120) | cam(7) | pad]
    w3 = jnp.zeros((2 * NZ_FEAT, HEAD_W), jnp.float32)
    w3 = w3.at[:NZ_FEAT, :SHAPE_DIM].set(wsp)
    w3 = w3.at[NZ_FEAT:, SHAPE_DIM:SHAPE_DIM + 7].set(wcp)
    params["w3"] = w3.astype(jnp.bfloat16)
    b3 = jnp.zeros((1, HEAD_W), jnp.float32)
    b3 = b3.at[0, :SHAPE_DIM].set(bsp).at[0, SHAPE_DIM:SHAPE_DIM + 7].set(bcp)
    params["b3"] = b3

    # symmetry bookkeeping (symmetric_mesh=False -> identity permutation)
    params["ilr_idx_inv"] = jnp.arange(NUM_VERTS, dtype=jnp.int32)
    return params


# ----------------------------------------------------------------------------
# symmetrize_mesh (pure gather glue, matches PyTorch semantics)
# ----------------------------------------------------------------------------
def symmetrize_mesh(verts, ilr_idx_inv):
    indep = verts[..., :NUM_INDEP, :]
    left = verts[..., NUM_INDEP:, :]
    right = left * jnp.array([-1.0, 1.0, 1.0], verts.dtype)
    ilr = jnp.concatenate([indep, left, right], axis=-2)
    return jnp.take(ilr, ilr_idx_inv, axis=-2)


# ----------------------------------------------------------------------------
# Forward pass
# ----------------------------------------------------------------------------
def shape_cam_tex_net_forward(params, img_nchw):
    """img: (N, C, H, W) float32 -> (shape, texture, cam_bx7)."""
    nb = img_nchw.shape[0]

    # --- ConvEncoder (4 fused Pallas conv blocks) ---
    x = jnp.transpose(img_nchw, (0, 2, 3, 1)).astype(jnp.float32)   # NCHW->NHWC
    for w_taps, b_row in params["conv"]:
        x = conv3x3_s2_lrelu(x, w_taps, b_row)
    feat_flat = jnp.transpose(x, (0, 3, 1, 2)).reshape(nb, -1)      # NCHW flatten
    assert feat_flat.shape[1] == OUT_SHAPE
    feat_bf16 = feat_flat.astype(jnp.bfloat16)

    # --- fused shapePred + posePred tail (one Pallas call) ---
    head = fc_tail(feat_bf16, params)                               # (N, 128) f32

    shape = head[:, :SHAPE_DIM].reshape(nb, NUM_VERTS, 3)
    shape = symmetrize_mesh(shape, params["ilr_idx_inv"])

    cam = head[:, SHAPE_DIM:SHAPE_DIM + 7]
    scale = cam[:, 0:1] + SCALE_BIAS
    trans = cam[:, 1:3]
    quat = cam[:, 3:7]
    quat = quat / jnp.maximum(jnp.linalg.norm(quat, axis=-1, keepdims=True), 1e-12)
    cam_bx7 = jnp.concatenate([scale, trans, quat], axis=-1)

    # --- texture (pred_texture=False branch of the PyTorch forward) ---
    texture = jnp.zeros((nb, NUM_FACES, TEX_SIZE, TEX_SIZE), img_nchw.dtype)

    return shape, texture, cam_bx7


# ----------------------------------------------------------------------------
if __name__ == "__main__":
    key = jax.random.PRNGKey(0)
    kp, kx = jax.random.split(key)
    params = init_params(kp)
    img = jax.random.normal(kx, (2, IN_CH, IMG_HW, IMG_HW), jnp.float32)

    fwd = jax.jit(shape_cam_tex_net_forward)
    shape, texture, cam_bx7 = fwd(params, img)
    jax.block_until_ready((shape, texture, cam_bx7))

    assert shape.shape == (2, NUM_VERTS, 3)
    assert texture.shape == (2, NUM_FACES, TEX_SIZE, TEX_SIZE)
    assert cam_bx7.shape == (2, 7)
    assert bool(jnp.all(jnp.isfinite(shape)))
    assert bool(jnp.all(jnp.isfinite(cam_bx7)))
    print("KERNEL_OK")
</pallas_src>

<mosaic_0001>
module attributes {stable_mosaic.version = 11 : i64} {
  func.func @_conv3x3_s2_kernel(%arg0: memref<2x2x596x3xf32, #tpu.memory_space<vmem>>, %arg1: memref<9x3x8xbf16, #tpu.memory_space<vmem>>, %arg2: memref<1x8xf32, #tpu.memory_space<vmem>>, %arg3: memref<578x8xf32, #tpu.memory_space<vmem>>) attributes {dimension_semantics = [], scalar_prefetch = 0 : i64, scratch_operands = 0 : i64, tpu.core_type = #tpu.core_type<tc>} {
    %cst = arith.constant 0.000000e+00 : f32
    %0 = vector.broadcast %cst : f32 to vector<578x8xf32>
    %c0 = arith.constant 0 : index
    %c0_0 = arith.constant 0 : index
    %c0_1 = arith.constant 0 : index
    %c0_2 = arith.constant 0 : index
    %1 = vector.load %arg0[%c0, %c0_0, %c0_1, %c0_2] : memref<2x2x596x3xf32, #tpu.memory_space<vmem>>, vector<1x1x578x3xf32>
    %2 = vector.shape_cast %1 : vector<1x1x578x3xf32> to vector<578x3xf32>
    %3 = arith.truncf %2 : vector<578x3xf32> to vector<578x3xbf16>
    %c0_3 = arith.constant 0 : index
    %c0_4 = arith.constant 0 : index
    %c0_5 = arith.constant 0 : index
    %4 = vector.load %arg1[%c0_3, %c0_4, %c0_5] : memref<9x3x8xbf16, #tpu.memory_space<vmem>>, vector<1x3x8xbf16>
    %5 = vector.shape_cast %4 : vector<1x3x8xbf16> to vector<3x8xbf16>
    %cst_6 = arith.constant dense<0.000000e+00> : vector<578x8xf32>
    %6 = tpu.matmul %3, %5, %cst_6 {dimension_numbers = #tpu.dot_dimension_numbers<[1], [0], [0], [1], [0, 0, 1, 1], [], []>} : vector<578x3xbf16>, vector<3x8xbf16>, vector<578x8xf32> -> vector<578x8xf32>
    %7 = arith.addf %0, %6 : vector<578x8xf32>
    %c0_7 = arith.constant 0 : index
    %c1 = arith.constant 1 : index
    %c0_8 = arith.constant 0 : index
    %c0_9 = arith.constant 0 : index
    %8 = vector.load %arg0[%c0_7, %c1, %c0_8, %c0_9] : memref<2x2x596x3xf32, #tpu.memory_space<vmem>>, vector<1x1x578x3xf32>
    %9 = vector.shape_cast %8 : vector<1x1x578x3xf32> to vector<578x3xf32>
    %10 = arith.truncf %9 : vector<578x3xf32> to vector<578x3xbf16>
    %c1_10 = arith.constant 1 : index
    %c0_11 = arith.constant 0 : index
    %c0_12 = arith.constant 0 : index
    %11 = vector.load %arg1[%c1_10, %c0_11, %c0_12] : memref<9x3x8xbf16, #tpu.memory_space<vmem>>, vector<1x3x8xbf16>
    %12 = vector.shape_cast %11 : vector<1x3x8xbf16> to vector<3x8xbf16>
    %cst_13 = arith.constant dense<0.000000e+00> : vector<578x8xf32>
    %13 = tpu.matmul %10, %12, %cst_13 {dimension_numbers = #tpu.dot_dimension_numbers<[1], [0], [0], [1], [0, 0, 1, 1], [], []>} : vector<578x3xbf16>, vector<3x8xbf16>, vector<578x8xf32> -> vector<578x8xf32>
    %14 = arith.addf %7, %13 : vector<578x8xf32>
    %c0_14 = arith.constant 0 : index
    %c0_15 = arith.constant 0 : index
    %c1_16 = arith.constant 1 : index
    %c0_17 = arith.constant 0 : index
    %15 = vector.load %arg0[%c0_14, %c0_15, %c1_16, %c0_17] : memref<2x2x596x3xf32, #tpu.memory_space<vmem>>, vector<1x1x578x3xf32>
    %16 = vector.shape_cast %15 : vector<1x1x578x3xf32> to vector<578x3xf32>
    %17 = arith.truncf %16 : vector<578x3xf32> to vector<578x3xbf16>
    %c2 = arith.constant 2 : index
    %c0_18 = arith.constant 0 : index
    %c0_19 = arith.constant 0 : index
    %18 = vector.load %arg1[%c2, %c0_18, %c0_19] : memref<9x3x8xbf16, #tpu.memory_space<vmem>>, vector<1x3x8xbf16>
    %19 = vector.shape_cast %18 : vector<1x3x8xbf16> to vector<3x8xbf16>
    %cst_20 = arith.constant dense<0.000000e+00> : vector<578x8xf32>
    %20 = tpu.matmul %17, %19, %cst_20 {dimension_numbers = #tpu.dot_dimension_numbers<[1], [0], [0], [1], [0, 0, 1, 1], [], []>} : vector<578x3xbf16>, vector<3x8xbf16>, vector<578x8xf32> -> vector<578x8xf32>
    %21 = arith.addf %14, %20 : vector<578x8xf32>
    %c1_21 = arith.constant 1 : index
    %c0_22 = arith.constant 0 : index
    %c0_23 = arith.constant 0 : index
    %c0_24 = arith.constant 0 : index
    %22 = vector.load %arg0[%c1_21, %c0_22, %c0_23, %c0_24] : memref<2x2x596x3xf32, #tpu.memory_space<vmem>>, vector<1x1x578x3xf32>
    %23 = vector.shape_cast %22 : vector<1x1x578x3xf32> to vector<578x3xf32>
    %24 = arith.truncf %23 : vector<578x3xf32> to vector<578x3xbf16>
    %c3 = arith.constant 3 : index
    %c0_25 = arith.constant 0 : index
    %c0_26 = arith.constant 0 : index
    %25 = vector.load %arg1[%c3, %c0_25, %c0_26] : memref<9x3x8xbf16, #tpu.memory_space<vmem>>, vector<1x3x8xbf16>
    %26 = vector.shape_cast %25 : vector<1x3x8xbf16> to vector<3x8xbf16>
    %cst_27 = arith.constant dense<0.000000e+00> : vector<578x8xf32>
    %27 = tpu.matmul %24, %26, %cst_27 {dimension_numbers = #tpu.dot_dimension_numbers<[1], [0], [0], [1], [0, 0, 1, 1], [], []>} : vector<578x3xbf16>, vector<3x8xbf16>, vector<578x8xf32> -> vector<578x8xf32>
    %28 = arith.addf %21, %27 : vector<578x8xf32>
    %c1_28 = arith.constant 1 : index
    %c1_29 = arith.constant 1 : index
    %c0_30 = arith.constant 0 : index
    %c0_31 = arith.constant 0 : index
    %29 = vector.load %arg0[%c1_28, %c1_29, %c0_30, %c0_31] : memref<2x2x596x3xf32, #tpu.memory_space<vmem>>, vector<1x1x578x3xf32>
    %30 = vector.shape_cast %29 : vector<1x1x578x3xf32> to vector<578x3xf32>
    %31 = arith.truncf %30 : vector<578x3xf32> to vector<578x3xbf16>
    %c4 = arith.constant 4 : index
    %c0_32 = arith.constant 0 : index
    %c0_33 = arith.constant 0 : index
    %32 = vector.load %arg1[%c4, %c0_32, %c0_33] : memref<9x3x8xbf16, #tpu.memory_space<vmem>>, vector<1x3x8xbf16>
    %33 = vector.shape_cast %32 : vector<1x3x8xbf16> to vector<3x8xbf16>
    %cst_34 = arith.constant dense<0.000000e+00> : vector<578x8xf32>
    %34 = tpu.matmul %31, %33, %cst_34 {dimension_numbers = #tpu.dot_dimension_numbers<[1], [0], [0], [1], [0, 0, 1, 1], [], []>} : vector<578x3xbf16>, vector<3x8xbf16>, vector<578x8xf32> -> vector<578x8xf32>
    %35 = arith.addf %28, %34 : vector<578x8xf32>
    %c1_35 = arith.constant 1 : index
    %c0_36 = arith.constant 0 : index
    %c1_37 = arith.constant 1 : index
    %c0_38 = arith.constant 0 : index
    %36 = vector.load %arg0[%c1_35, %c0_36, %c1_37, %c0_38] : memref<2x2x596x3xf32, #tpu.memory_space<vmem>>, vector<1x1x578x3xf32>
    %37 = vector.shape_cast %36 : vector<1x1x578x3xf32> to vector<578x3xf32>
    %38 = arith.truncf %37 : vector<578x3xf32> to vector<578x3xbf16>
    %c5 = arith.constant 5 : index
    %c0_39 = arith.constant 0 : index
    %c0_40 = arith.constant 0 : index
    %39 = vector.load %arg1[%c5, %c0_39, %c0_40] : memref<9x3x8xbf16, #tpu.memory_space<vmem>>, vector<1x3x8xbf16>
    %40 = vector.shape_cast %39 : vector<1x3x8xbf16> to vector<3x8xbf16>
    %cst_41 = arith.constant dense<0.000000e+00> : vector<578x8xf32>
    %41 = tpu.matmul %38, %40, %cst_41 {dimension_numbers = #tpu.dot_dimension_numbers<[1], [0], [0], [1], [0, 0, 1, 1], [], []>} : vector<578x3xbf16>, vector<3x8xbf16>, vector<578x8xf32> -> vector<578x8xf32>
    %42 = arith.addf %35, %41 : vector<578x8xf32>
    %c0_42 = arith.constant 0 : index
    %c0_43 = arith.constant 0 : index
    %c17 = arith.constant 17 : index
    %c0_44 = arith.constant 0 : index
    %43 = vector.load %arg0[%c0_42, %c0_43, %c17, %c0_44] : memref<2x2x596x3xf32, #tpu.memory_space<vmem>>, vector<1x1x578x3xf32>
    %44 = vector.shape_cast %43 : vector<1x1x578x3xf32> to vector<578x3xf32>
    %45 = arith.truncf %44 : vector<578x3xf32> to vector<578x3xbf16>
    %c6 = arith.constant 6 : index
    %c0_45 = arith.constant 0 : index
    %c0_46 = arith.constant 0 : index
    %46 = vector.load %arg1[%c6, %c0_45, %c0_46] : memref<9x3x8xbf16, #tpu.memory_space<vmem>>, vector<1x3x8xbf16>
    %47 = vector.shape_cast %46 : vector<1x3x8xbf16> to vector<3x8xbf16>
    %cst_47 = arith.constant dense<0.000000e+00> : vector<578x8xf32>
    %48 = tpu.matmul %45, %47, %cst_47 {dimension_numbers = #tpu.dot_dimension_numbers<[1], [0], [0], [1], [0, 0, 1, 1], [], []>} : vector<578x3xbf16>, vector<3x8xbf16>, vector<578x8xf32> -> vector<578x8xf32>
    %49 = arith.addf %42, %48 : vector<578x8xf32>
    %c0_48 = arith.constant 0 : index
    %c1_49 = arith.constant 1 : index
    %c17_50 = arith.constant 17 : index
    %c0_51 = arith.constant 0 : index
    %50 = vector.load %arg0[%c0_48, %c1_49, %c17_50, %c0_51] : memref<2x2x596x3xf32, #tpu.memory_space<vmem>>, vector<1x1x578x3xf32>
    %51 = vector.shape_cast %50 : vector<1x1x578x3xf32> to vector<578x3xf32>
    %52 = arith.truncf %51 : vector<578x3xf32> to vector<578x3xbf16>
    %c7 = arith.constant 7 : index
    %c0_52 = arith.constant 0 : index
    %c0_53 = arith.constant 0 : index
    %53 = vector.load %arg1[%c7, %c0_52, %c0_53] : memref<9x3x8xbf16, #tpu.memory_space<vmem>>, vector<1x3x8xbf16>
    %54 = vector.shape_cast %53 : vector<1x3x8xbf16> to vector<3x8xbf16>
    %cst_54 = arith.constant dense<0.000000e+00> : vector<578x8xf32>
    %55 = tpu.matmul %52, %54, %cst_54 {dimension_numbers = #tpu.dot_dimension_numbers<[1], [0], [0], [1], [0, 0, 1, 1], [], []>} : vector<578x3xbf16>, vector<3x8xbf16>, vector<578x8xf32> -> vector<578x8xf32>
    %56 = arith.addf %49, %55 : vector<578x8xf32>
    %c0_55 = arith.constant 0 : index
    %c0_56 = arith.constant 0 : index
    %c18 = arith.constant 18 : index
    %c0_57 = arith.constant 0 : index
    %57 = vector.load %arg0[%c0_55, %c0_56, %c18, %c0_57] : memref<2x2x596x3xf32, #tpu.memory_space<vmem>>, vector<1x1x578x3xf32>
    %58 = vector.shape_cast %57 : vector<1x1x578x3xf32> to vector<578x3xf32>
    %59 = arith.truncf %58 : vector<578x3xf32> to vector<578x3xbf16>
    %c8 = arith.constant 8 : index
    %c0_58 = arith.constant 0 : index
    %c0_59 = arith.constant 0 : index
    %60 = vector.load %arg1[%c8, %c0_58, %c0_59] : memref<9x3x8xbf16, #tpu.memory_space<vmem>>, vector<1x3x8xbf16>
    %61 = vector.shape_cast %60 : vector<1x3x8xbf16> to vector<3x8xbf16>
    %cst_60 = arith.constant dense<0.000000e+00> : vector<578x8xf32>
    %62 = tpu.matmul %59, %61, %cst_60 {dimension_numbers = #tpu.dot_dimension_numbers<[1], [0], [0], [1], [0, 0, 1, 1], [], []>} : vector<578x3xbf16>, vector<3x8xbf16>, vector<578x8xf32> -> vector<578x8xf32>
    %63 = arith.addf %56, %62 : vector<578x8xf32>
    %c0_61 = arith.constant 0 : index
    %c0_62 = arith.constant 0 : index
    %64 = vector.load %arg2[%c0_61, %c0_62] : memref<1x8xf32, #tpu.memory_space<vmem>>, vector<1x8xf32>
    %65 = vector.broadcast %64 : vector<1x8xf32> to vector<578x8xf32>
    %66 = arith.addf %63, %65 : vector<578x8xf32>
    %cst_63 = arith.constant 0.000000e+00 : f32
    %67 = vector.broadcast %cst_63 : f32 to vector<578x8xf32>
    %68 = arith.cmpf oge, %66, %67 : vector<578x8xf32>
    %cst_64 = arith.constant 2.000000e-01 : f32
    %69 = vector.broadcast %cst_64 : f32 to vector<578x8xf32>
    %70 = arith.mulf %69, %66 : vector<578x8xf32>
    %71 = arith.select %68, %66, %70 : vector<578x8xi1>, vector<578x8xf32>
    %c0_65 = arith.constant 0 : index
    %c0_66 = arith.constant 0 : index
    %72 = vector.load %arg3[%c0_65, %c0_66] : memref<578x8xf32, #tpu.memory_space<vmem>>, vector<578x8xf32>
    tpu.vector_store %arg3[%c0_65, %c0_66], %71 {strides = array<i32>} : memref<578x8xf32, #tpu.memory_space<vmem>>, vector<578x8xf32>,
    return
  }
}

module attributes {stable_mosaic.version = 11 : i64} {
  func.func @_conv3x3_s2_kernel(%arg0: memref<2x2x172x8xf32, #tpu.memory_space<vmem>>, %arg1: memref<9x8x16xbf16, #tpu.memory_space<vmem>>, %arg2: memref<1x16xf32, #tpu.memory_space<vmem>>, %arg3: memref<162x16xf32, #tpu.memory_space<vmem>>) attributes {dimension_semantics = [], scalar_prefetch = 0 : i64, scratch_operands = 0 : i64, tpu.core_type = #tpu.core_type<tc>} {
    %cst = arith.constant 0.000000e+00 : f32
    %0 = vector.broadcast %cst : f32 to vector<162x16xf32>
    %c0 = arith.constant 0 : index
    %c0_0 = arith.constant 0 : index
    %c0_1 = arith.constant 0 : index
    %c0_2 = arith.constant 0 : index
    %1 = vector.load %arg0[%c0, %c0_0, %c0_1, %c0_2] : memref<2x2x172x8xf32, #tpu.memory_space<vmem>>, vector<1x1x162x8xf32>
    %2 = vector.shape_cast %1 : vector<1x1x162x8xf32> to vector<162x8xf32>
    %3 = arith.truncf %2 : vector<162x8xf32> to vector<162x8xbf16>
    %c0_3 = arith.constant 0 : index
    %c0_4 = arith.constant 0 : index
    %c0_5 = arith.constant 0 : index
    %4 = vector.load %arg1[%c0_3, %c0_4, %c0_5] : memref<9x8x16xbf16, #tpu.memory_space<vmem>>, vector<1x8x16xbf16>
    %5 = vector.shape_cast %4 : vector<1x8x16xbf16> to vector<8x16xbf16>
    %cst_6 = arith.constant dense<0.000000e+00> : vector<162x16xf32>
    %6 = tpu.matmul %3, %5, %cst_6 {dimension_numbers = #tpu.dot_dimension_numbers<[1], [0], [0], [1], [0, 0, 1, 1], [], []>} : vector<162x8xbf16>, vector<8x16xbf16>, vector<162x16xf32> -> vector<162x16xf32>
    %7 = arith.addf %0, %6 : vector<162x16xf32>
    %c0_7 = arith.constant 0 : index
    %c1 = arith.constant 1 : index
    %c0_8 = arith.constant 0 : index
    %c0_9 = arith.constant 0 : index
    %8 = vector.load %arg0[%c0_7, %c1, %c0_8, %c0_9] : memref<2x2x172x8xf32, #tpu.memory_space<vmem>>, vector<1x1x162x8xf32>
    %9 = vector.shape_cast %8 : vector<1x1x162x8xf32> to vector<162x8xf32>
    %10 = arith.truncf %9 : vector<162x8xf32> to vector<162x8xbf16>
    %c1_10 = arith.constant 1 : index
    %c0_11 = arith.constant 0 : index
    %c0_12 = arith.constant 0 : index
    %11 = vector.load %arg1[%c1_10, %c0_11, %c0_12] : memref<9x8x16xbf16, #tpu.memory_space<vmem>>, vector<1x8x16xbf16>
    %12 = vector.shape_cast %11 : vector<1x8x16xbf16> to vector<8x16xbf16>
    %cst_13 = arith.constant dense<0.000000e+00> : vector<162x16xf32>
    %13 = tpu.matmul %10, %12, %cst_13 {dimension_numbers = #tpu.dot_dimension_numbers<[1], [0], [0], [1], [0, 0, 1, 1], [], []>} : vector<162x8xbf16>, vector<8x16xbf16>, vector<162x16xf32> -> vector<162x16xf32>
    %14 = arith.addf %7, %13 : vector<162x16xf32>
    %c0_14 = arith.constant 0 : index
    %c0_15 = arith.constant 0 : index
    %c1_16 = arith.constant 1 : index
    %c0_17 = arith.constant 0 : index
    %15 = vector.load %arg0[%c0_14, %c0_15, %c1_16, %c0_17] : memref<2x2x172x8xf32, #tpu.memory_space<vmem>>, vector<1x1x162x8xf32>
    %16 = vector.shape_cast %15 : vector<1x1x162x8xf32> to vector<162x8xf32>
    %17 = arith.truncf %16 : vector<162x8xf32> to vector<162x8xbf16>
    %c2 = arith.constant 2 : index
    %c0_18 = arith.constant 0 : index
    %c0_19 = arith.constant 0 : index
    %18 = vector.load %arg1[%c2, %c0_18, %c0_19] : memref<9x8x16xbf16, #tpu.memory_space<vmem>>, vector<1x8x16xbf16>
    %19 = vector.shape_cast %18 : vector<1x8x16xbf16> to vector<8x16xbf16>
    %cst_20 = arith.constant dense<0.000000e+00> : vector<162x16xf32>
    %20 = tpu.matmul %17, %19, %cst_20 {dimension_numbers = #tpu.dot_dimension_numbers<[1], [0], [0], [1], [0, 0, 1, 1], [], []>} : vector<162x8xbf16>, vector<8x16xbf16>, vector<162x16xf32> -> vector<162x16xf32>
    %21 = arith.addf %14, %20 : vector<162x16xf32>
    %c1_21 = arith.constant 1 : index
    %c0_22 = arith.constant 0 : index
    %c0_23 = arith.constant 0 : index
    %c0_24 = arith.constant 0 : index
    %22 = vector.load %arg0[%c1_21, %c0_22, %c0_23, %c0_24] : memref<2x2x172x8xf32, #tpu.memory_space<vmem>>, vector<1x1x162x8xf32>
    %23 = vector.shape_cast %22 : vector<1x1x162x8xf32> to vector<162x8xf32>
    %24 = arith.truncf %23 : vector<162x8xf32> to vector<162x8xbf16>
    %c3 = arith.constant 3 : index
    %c0_25 = arith.constant 0 : index
    %c0_26 = arith.constant 0 : index
    %25 = vector.load %arg1[%c3, %c0_25, %c0_26] : memref<9x8x16xbf16, #tpu.memory_space<vmem>>, vector<1x8x16xbf16>
    %26 = vector.shape_cast %25 : vector<1x8x16xbf16> to vector<8x16xbf16>
    %cst_27 = arith.constant dense<0.000000e+00> : vector<162x16xf32>
    %27 = tpu.matmul %24, %26, %cst_27 {dimension_numbers = #tpu.dot_dimension_numbers<[1], [0], [0], [1], [0, 0, 1, 1], [], []>} : vector<162x8xbf16>, vector<8x16xbf16>, vector<162x16xf32> -> vector<162x16xf32>
    %28 = arith.addf %21, %27 : vector<162x16xf32>
    %c1_28 = arith.constant 1 : index
    %c1_29 = arith.constant 1 : index
    %c0_30 = arith.constant 0 : index
    %c0_31 = arith.constant 0 : index
    %29 = vector.load %arg0[%c1_28, %c1_29, %c0_30, %c0_31] : memref<2x2x172x8xf32, #tpu.memory_space<vmem>>, vector<1x1x162x8xf32>
    %30 = vector.shape_cast %29 : vector<1x1x162x8xf32> to vector<162x8xf32>
    %31 = arith.truncf %30 : vector<162x8xf32> to vector<162x8xbf16>
    %c4 = arith.constant 4 : index
    %c0_32 = arith.constant 0 : index
    %c0_33 = arith.constant 0 : index
    %32 = vector.load %arg1[%c4, %c0_32, %c0_33] : memref<9x8x16xbf16, #tpu.memory_space<vmem>>, vector<1x8x16xbf16>
    %33 = vector.shape_cast %32 : vector<1x8x16xbf16> to vector<8x16xbf16>
    %cst_34 = arith.constant dense<0.000000e+00> : vector<162x16xf32>
    %34 = tpu.matmul %31, %33, %cst_34 {dimension_numbers = #tpu.dot_dimension_numbers<[1], [0], [0], [1], [0, 0, 1, 1], [], []>} : vector<162x8xbf16>, vector<8x16xbf16>, vector<162x16xf32> -> vector<162x16xf32>
    %35 = arith.addf %28, %34 : vector<162x16xf32>
    %c1_35 = arith.constant 1 : index
    %c0_36 = arith.constant 0 : index
    %c1_37 = arith.constant 1 : index
    %c0_38 = arith.constant 0 : index
    %36 = vector.load %arg0[%c1_35, %c0_36, %c1_37, %c0_38] : memref<2x2x172x8xf32, #tpu.memory_space<vmem>>, vector<1x1x162x8xf32>
    %37 = vector.shape_cast %36 : vector<1x1x162x8xf32> to vector<162x8xf32>
    %38 = arith.truncf %37 : vector<162x8xf32> to vector<162x8xbf16>
    %c5 = arith.constant 5 : index
    %c0_39 = arith.constant 0 : index
    %c0_40 = arith.constant 0 : index
    %39 = vector.load %arg1[%c5, %c0_39, %c0_40] : memref<9x8x16xbf16, #tpu.memory_space<vmem>>, vector<1x8x16xbf16>
    %40 = vector.shape_cast %39 : vector<1x8x16xbf16> to vector<8x16xbf16>
    %cst_41 = arith.constant dense<0.000000e+00> : vector<162x16xf32>
    %41 = tpu.matmul %38, %40, %cst_41 {dimension_numbers = #tpu.dot_dimension_numbers<[1], [0], [0], [1], [0, 0, 1, 1], [], []>} : vector<162x8xbf16>, vector<8x16xbf16>, vector<162x16xf32> -> vector<162x16xf32>
    %42 = arith.addf %35, %41 : vector<162x16xf32>
    %c0_42 = arith.constant 0 : index
    %c0_43 = arith.constant 0 : index
    %c9 = arith.constant 9 : index
    %c0_44 = arith.constant 0 : index
    %43 = vector.load %arg0[%c0_42, %c0_43, %c9, %c0_44] : memref<2x2x172x8xf32, #tpu.memory_space<vmem>>, vector<1x1x162x8xf32>
    %44 = vector.shape_cast %43 : vector<1x1x162x8xf32> to vector<162x8xf32>
    %45 = arith.truncf %44 : vector<162x8xf32> to vector<162x8xbf16>
    %c6 = arith.constant 6 : index
    %c0_45 = arith.constant 0 : index
    %c0_46 = arith.constant 0 : index
    %46 = vector.load %arg1[%c6, %c0_45, %c0_46] : memref<9x8x16xbf16, #tpu.memory_space<vmem>>, vector<1x8x16xbf16>
    %47 = vector.shape_cast %46 : vector<1x8x16xbf16> to vector<8x16xbf16>
    %cst_47 = arith.constant dense<0.000000e+00> : vector<162x16xf32>
    %48 = tpu.matmul %45, %47, %cst_47 {dimension_numbers = #tpu.dot_dimension_numbers<[1], [0], [0], [1], [0, 0, 1, 1], [], []>} : vector<162x8xbf16>, vector<8x16xbf16>, vector<162x16xf32> -> vector<162x16xf32>
    %49 = arith.addf %42, %48 : vector<162x16xf32>
    %c0_48 = arith.constant 0 : index
    %c1_49 = arith.constant 1 : index
    %c9_50 = arith.constant 9 : index
    %c0_51 = arith.constant 0 : index
    %50 = vector.load %arg0[%c0_48, %c1_49, %c9_50, %c0_51] : memref<2x2x172x8xf32, #tpu.memory_space<vmem>>, vector<1x1x162x8xf32>
    %51 = vector.shape_cast %50 : vector<1x1x162x8xf32> to vector<162x8xf32>
    %52 = arith.truncf %51 : vector<162x8xf32> to vector<162x8xbf16>
    %c7 = arith.constant 7 : index
    %c0_52 = arith.constant 0 : index
    %c0_53 = arith.constant 0 : index
    %53 = vector.load %arg1[%c7, %c0_52, %c0_53] : memref<9x8x16xbf16, #tpu.memory_space<vmem>>, vector<1x8x16xbf16>
    %54 = vector.shape_cast %53 : vector<1x8x16xbf16> to vector<8x16xbf16>
    %cst_54 = arith.constant dense<0.000000e+00> : vector<162x16xf32>
    %55 = tpu.matmul %52, %54, %cst_54 {dimension_numbers = #tpu.dot_dimension_numbers<[1], [0], [0], [1], [0, 0, 1, 1], [], []>} : vector<162x8xbf16>, vector<8x16xbf16>, vector<162x16xf32> -> vector<162x16xf32>
    %56 = arith.addf %49, %55 : vector<162x16xf32>
    %c0_55 = arith.constant 0 : index
    %c0_56 = arith.constant 0 : index
    %c10 = arith.constant 10 : index
    %c0_57 = arith.constant 0 : index
    %57 = vector.load %arg0[%c0_55, %c0_56, %c10, %c0_57] : memref<2x2x172x8xf32, #tpu.memory_space<vmem>>, vector<1x1x162x8xf32>
    %58 = vector.shape_cast %57 : vector<1x1x162x8xf32> to vector<162x8xf32>
    %59 = arith.truncf %58 : vector<162x8xf32> to vector<162x8xbf16>
    %c8 = arith.constant 8 : index
    %c0_58 = arith.constant 0 : index
    %c0_59 = arith.constant 0 : index
    %60 = vector.load %arg1[%c8, %c0_58, %c0_59] : memref<9x8x16xbf16, #tpu.memory_space<vmem>>, vector<1x8x16xbf16>
    %61 = vector.shape_cast %60 : vector<1x8x16xbf16> to vector<8x16xbf16>
    %cst_60 = arith.constant dense<0.000000e+00> : vector<162x16xf32>
    %62 = tpu.matmul %59, %61, %cst_60 {dimension_numbers = #tpu.dot_dimension_numbers<[1], [0], [0], [1], [0, 0, 1, 1], [], []>} : vector<162x8xbf16>, vector<8x16xbf16>, vector<162x16xf32> -> vector<162x16xf32>
    %63 = arith.addf %56, %62 : vector<162x16xf32>
    %c0_61 = arith.constant 0 : index
    %c0_62 = arith.constant 0 : index
    %64 = vector.load %arg2[%c0_61, %c0_62] : memref<1x16xf32, #tpu.memory_space<vmem>>, vector<1x16xf32>
    %65 = vector.broadcast %64 : vector<1x16xf32> to vector<162x16xf32>
    %66 = arith.addf %63, %65 : vector<162x16xf32>
    %cst_63 = arith.constant 0.000000e+00 : f32
    %67 = vector.broadcast %cst_63 : f32 to vector<162x16xf32>
    %68 = arith.cmpf oge, %66, %67 : vector<162x16xf32>
    %cst_64 = arith.constant 2.000000e-01 : f32
    %69 = vector.broadcast %cst_64 : f32 to vector<162x16xf32>
    %70 = arith.mulf %69, %66 : vector<162x16xf32>
    %71 = arith.select %68, %66, %70 : vector<162x16xi1>, vector<162x16xf32>
    %c0_65 = arith.constant 0 : index
    %c0_66 = arith.constant 0 : index
    %72 = vector.load %arg3[%c0_65, %c0_66] : memref<162x16xf32, #tpu.memory_space<vmem>>, vector<162x16xf32>
    tpu.vector_store %arg3[%c0_65, %c0_66], %71 {strides = array<i32>} : memref<162x16xf32, #tpu.memory_space<vmem>>, vector<162x16xf32>,
    return
  }
}

module attributes {stable_mosaic.version = 11 : i64} {
  func.func @_conv3x3_s2_kernel(%arg0: memref<2x2x56x16xf32, #tpu.memory_space<vmem>>, %arg1: memref<9x16x32xbf16, #tpu.memory_space<vmem>>, %arg2: memref<1x32xf32, #tpu.memory_space<vmem>>, %arg3: memref<50x32xf32, #tpu.memory_space<vmem>>) attributes {dimension_semantics = [], scalar_prefetch = 0 : i64, scratch_operands = 0 : i64, tpu.core_type = #tpu.core_type<tc>} {
    %cst = arith.constant 0.000000e+00 : f32
    %0 = vector.broadcast %cst : f32 to vector<50x32xf32>
    %c0 = arith.constant 0 : index
    %c0_0 = arith.constant 0 : index
    %c0_1 = arith.constant 0 : index
    %c0_2 = arith.constant 0 : index
    %1 = vector.load %arg0[%c0, %c0_0, %c0_1, %c0_2] : memref<2x2x56x16xf32, #tpu.memory_space<vmem>>, vector<1x1x50x16xf32>
    %2 = vector.shape_cast %1 : vector<1x1x50x16xf32> to vector<50x16xf32>
    %3 = arith.truncf %2 : vector<50x16xf32> to vector<50x16xbf16>
    %c0_3 = arith.constant 0 : index
    %c0_4 = arith.constant 0 : index
    %c0_5 = arith.constant 0 : index
    %4 = vector.load %arg1[%c0_3, %c0_4, %c0_5] : memref<9x16x32xbf16, #tpu.memory_space<vmem>>, vector<1x16x32xbf16>
    %5 = vector.shape_cast %4 : vector<1x16x32xbf16> to vector<16x32xbf16>
    %cst_6 = arith.constant dense<0.000000e+00> : vector<50x32xf32>
    %6 = tpu.matmul %3, %5, %cst_6 {dimension_numbers = #tpu.dot_dimension_numbers<[1], [0], [0], [1], [0, 0, 1, 1], [], []>} : vector<50x16xbf16>, vector<16x32xbf16>, vector<50x32xf32> -> vector<50x32xf32>
    %7 = arith.addf %0, %6 : vector<50x32xf32>
    %c0_7 = arith.constant 0 : index
    %c1 = arith.constant 1 : index
    %c0_8 = arith.constant 0 : index
    %c0_9 = arith.constant 0 : index
    %8 = vector.load %arg0[%c0_7, %c1, %c0_8, %c0_9] : memref<2x2x56x16xf32, #tpu.memory_space<vmem>>, vector<1x1x50x16xf32>
    %9 = vector.shape_cast %8 : vector<1x1x50x16xf32> to vector<50x16xf32>
    %10 = arith.truncf %9 : vector<50x16xf32> to vector<50x16xbf16>
    %c1_10 = arith.constant 1 : index
    %c0_11 = arith.constant 0 : index
    %c0_12 = arith.constant 0 : index
    %11 = vector.load %arg1[%c1_10, %c0_11, %c0_12] : memref<9x16x32xbf16, #tpu.memory_space<vmem>>, vector<1x16x32xbf16>
    %12 = vector.shape_cast %11 : vector<1x16x32xbf16> to vector<16x32xbf16>
    %cst_13 = arith.constant dense<0.000000e+00> : vector<50x32xf32>
    %13 = tpu.matmul %10, %12, %cst_13 {dimension_numbers = #tpu.dot_dimension_numbers<[1], [0], [0], [1], [0, 0, 1, 1], [], []>} : vector<50x16xbf16>, vector<16x32xbf16>, vector<50x32xf32> -> vector<50x32xf32>
    %14 = arith.addf %7, %13 : vector<50x32xf32>
    %c0_14 = arith.constant 0 : index
    %c0_15 = arith.constant 0 : index
    %c1_16 = arith.constant 1 : index
    %c0_17 = arith.constant 0 : index
    %15 = vector.load %arg0[%c0_14, %c0_15, %c1_16, %c0_17] : memref<2x2x56x16xf32, #tpu.memory_space<vmem>>, vector<1x1x50x16xf32>
    %16 = vector.shape_cast %15 : vector<1x1x50x16xf32> to vector<50x16xf32>
    %17 = arith.truncf %16 : vector<50x16xf32> to vector<50x16xbf16>
    %c2 = arith.constant 2 : index
    %c0_18 = arith.constant 0 : index
    %c0_19 = arith.constant 0 : index
    %18 = vector.load %arg1[%c2, %c0_18, %c0_19] : memref<9x16x32xbf16, #tpu.memory_space<vmem>>, vector<1x16x32xbf16>
    %19 = vector.shape_cast %18 : vector<1x16x32xbf16> to vector<16x32xbf16>
    %cst_20 = arith.constant dense<0.000000e+00> : vector<50x32xf32>
    %20 = tpu.matmul %17, %19, %cst_20 {dimension_numbers = #tpu.dot_dimension_numbers<[1], [0], [0], [1], [0, 0, 1, 1], [], []>} : vector<50x16xbf16>, vector<16x32xbf16>, vector<50x32xf32> -> vector<50x32xf32>
    %21 = arith.addf %14, %20 : vector<50x32xf32>
    %c1_21 = arith.constant 1 : index
    %c0_22 = arith.constant 0 : index
    %c0_23 = arith.constant 0 : index
    %c0_24 = arith.constant 0 : index
    %22 = vector.load %arg0[%c1_21, %c0_22, %c0_23, %c0_24] : memref<2x2x56x16xf32, #tpu.memory_space<vmem>>, vector<1x1x50x16xf32>
    %23 = vector.shape_cast %22 : vector<1x1x50x16xf32> to vector<50x16xf32>
    %24 = arith.truncf %23 : vector<50x16xf32> to vector<50x16xbf16>
    %c3 = arith.constant 3 : index
    %c0_25 = arith.constant 0 : index
    %c0_26 = arith.constant 0 : index
    %25 = vector.load %arg1[%c3, %c0_25, %c0_26] : memref<9x16x32xbf16, #tpu.memory_space<vmem>>, vector<1x16x32xbf16>
    %26 = vector.shape_cast %25 : vector<1x16x32xbf16> to vector<16x32xbf16>
    %cst_27 = arith.constant dense<0.000000e+00> : vector<50x32xf32>
    %27 = tpu.matmul %24, %26, %cst_27 {dimension_numbers = #tpu.dot_dimension_numbers<[1], [0], [0], [1], [0, 0, 1, 1], [], []>} : vector<50x16xbf16>, vector<16x32xbf16>, vector<50x32xf32> -> vector<50x32xf32>
    %28 = arith.addf %21, %27 : vector<50x32xf32>
    %c1_28 = arith.constant 1 : index
    %c1_29 = arith.constant 1 : index
    %c0_30 = arith.constant 0 : index
    %c0_31 = arith.constant 0 : index
    %29 = vector.load %arg0[%c1_28, %c1_29, %c0_30, %c0_31] : memref<2x2x56x16xf32, #tpu.memory_space<vmem>>, vector<1x1x50x16xf32>
    %30 = vector.shape_cast %29 : vector<1x1x50x16xf32> to vector<50x16xf32>
    %31 = arith.truncf %30 : vector<50x16xf32> to vector<50x16xbf16>
    %c4 = arith.constant 4 : index
    %c0_32 = arith.constant 0 : index
    %c0_33 = arith.constant 0 : index
    %32 = vector.load %arg1[%c4, %c0_32, %c0_33] : memref<9x16x32xbf16, #tpu.memory_space<vmem>>, vector<1x16x32xbf16>
    %33 = vector.shape_cast %32 : vector<1x16x32xbf16> to vector<16x32xbf16>
    %cst_34 = arith.constant dense<0.000000e+00> : vector<50x32xf32>
    %34 = tpu.matmul %31, %33, %cst_34 {dimension_numbers = #tpu.dot_dimension_numbers<[1], [0], [0], [1], [0, 0, 1, 1], [], []>} : vector<50x16xbf16>, vector<16x32xbf16>, vector<50x32xf32> -> vector<50x32xf32>
    %35 = arith.addf %28, %34 : vector<50x32xf32>
    %c1_35 = arith.constant 1 : index
    %c0_36 = arith.constant 0 : index
    %c1_37 = arith.constant 1 : index
    %c0_38 = arith.constant 0 : index
    %36 = vector.load %arg0[%c1_35, %c0_36, %c1_37, %c0_38] : memref<2x2x56x16xf32, #tpu.memory_space<vmem>>, vector<1x1x50x16xf32>
    %37 = vector.shape_cast %36 : vector<1x1x50x16xf32> to vector<50x16xf32>
    %38 = arith.truncf %37 : vector<50x16xf32> to vector<50x16xbf16>
    %c5 = arith.constant 5 : index
    %c0_39 = arith.constant 0 : index
    %c0_40 = arith.constant 0 : index
    %39 = vector.load %arg1[%c5, %c0_39, %c0_40] : memref<9x16x32xbf16, #tpu.memory_space<vmem>>, vector<1x16x32xbf16>
    %40 = vector.shape_cast %39 : vector<1x16x32xbf16> to vector<16x32xbf16>
    %cst_41 = arith.constant dense<0.000000e+00> : vector<50x32xf32>
    %41 = tpu.matmul %38, %40, %cst_41 {dimension_numbers = #tpu.dot_dimension_numbers<[1], [0], [0], [1], [0, 0, 1, 1], [], []>} : vector<50x16xbf16>, vector<16x32xbf16>, vector<50x32xf32> -> vector<50x32xf32>
    %42 = arith.addf %35, %41 : vector<50x32xf32>
    %c0_42 = arith.constant 0 : index
    %c0_43 = arith.constant 0 : index
    %c5_44 = arith.constant 5 : index
    %c0_45 = arith.constant 0 : index
    %43 = vector.load %arg0[%c0_42, %c0_43, %c5_44, %c0_45] : memref<2x2x56x16xf32, #tpu.memory_space<vmem>>, vector<1x1x50x16xf32>
    %44 = vector.shape_cast %43 : vector<1x1x50x16xf32> to vector<50x16xf32>
    %45 = arith.truncf %44 : vector<50x16xf32> to vector<50x16xbf16>
    %c6 = arith.constant 6 : index
    %c0_46 = arith.constant 0 : index
    %c0_47 = arith.constant 0 : index
    %46 = vector.load %arg1[%c6, %c0_46, %c0_47] : memref<9x16x32xbf16, #tpu.memory_space<vmem>>, vector<1x16x32xbf16>
    %47 = vector.shape_cast %46 : vector<1x16x32xbf16> to vector<16x32xbf16>
    %cst_48 = arith.constant dense<0.000000e+00> : vector<50x32xf32>
    %48 = tpu.matmul %45, %47, %cst_48 {dimension_numbers = #tpu.dot_dimension_numbers<[1], [0], [0], [1], [0, 0, 1, 1], [], []>} : vector<50x16xbf16>, vector<16x32xbf16>, vector<50x32xf32> -> vector<50x32xf32>
    %49 = arith.addf %42, %48 : vector<50x32xf32>
    %c0_49 = arith.constant 0 : index
    %c1_50 = arith.constant 1 : index
    %c5_51 = arith.constant 5 : index
    %c0_52 = arith.constant 0 : index
    %50 = vector.load %arg0[%c0_49, %c1_50, %c5_51, %c0_52] : memref<2x2x56x16xf32, #tpu.memory_space<vmem>>, vector<1x1x50x16xf32>
    %51 = vector.shape_cast %50 : vector<1x1x50x16xf32> to vector<50x16xf32>
    %52 = arith.truncf %51 : vector<50x16xf32> to vector<50x16xbf16>
    %c7 = arith.constant 7 : index
    %c0_53 = arith.constant 0 : index
    %c0_54 = arith.constant 0 : index
    %53 = vector.load %arg1[%c7, %c0_53, %c0_54] : memref<9x16x32xbf16, #tpu.memory_space<vmem>>, vector<1x16x32xbf16>
    %54 = vector.shape_cast %53 : vector<1x16x32xbf16> to vector<16x32xbf16>
    %cst_55 = arith.constant dense<0.000000e+00> : vector<50x32xf32>
    %55 = tpu.matmul %52, %54, %cst_55 {dimension_numbers = #tpu.dot_dimension_numbers<[1], [0], [0], [1], [0, 0, 1, 1], [], []>} : vector<50x16xbf16>, vector<16x32xbf16>, vector<50x32xf32> -> vector<50x32xf32>
    %56 = arith.addf %49, %55 : vector<50x32xf32>
    %c0_56 = arith.constant 0 : index
    %c0_57 = arith.constant 0 : index
    %c6_58 = arith.constant 6 : index
    %c0_59 = arith.constant 0 : index
    %57 = vector.load %arg0[%c0_56, %c0_57, %c6_58, %c0_59] : memref<2x2x56x16xf32, #tpu.memory_space<vmem>>, vector<1x1x50x16xf32>
    %58 = vector.shape_cast %57 : vector<1x1x50x16xf32> to vector<50x16xf32>
    %59 = arith.truncf %58 : vector<50x16xf32> to vector<50x16xbf16>
    %c8 = arith.constant 8 : index
    %c0_60 = arith.constant 0 : index
    %c0_61 = arith.constant 0 : index
    %60 = vector.load %arg1[%c8, %c0_60, %c0_61] : memref<9x16x32xbf16, #tpu.memory_space<vmem>>, vector<1x16x32xbf16>
    %61 = vector.shape_cast %60 : vector<1x16x32xbf16> to vector<16x32xbf16>
    %cst_62 = arith.constant dense<0.000000e+00> : vector<50x32xf32>
    %62 = tpu.matmul %59, %61, %cst_62 {dimension_numbers = #tpu.dot_dimension_numbers<[1], [0], [0], [1], [0, 0, 1, 1], [], []>} : vector<50x16xbf16>, vector<16x32xbf16>, vector<50x32xf32> -> vector<50x32xf32>
    %63 = arith.addf %56, %62 : vector<50x32xf32>
    %c0_63 = arith.constant 0 : index
    %c0_64 = arith.constant 0 : index
    %64 = vector.load %arg2[%c0_63, %c0_64] : memref<1x32xf32, #tpu.memory_space<vmem>>, vector<1x32xf32>
    %65 = vector.broadcast %64 : vector<1x32xf32> to vector<50x32xf32>
    %66 = arith.addf %63, %65 : vector<50x32xf32>
    %cst_65 = arith.constant 0.000000e+00 : f32
    %67 = vector.broadcast %cst_65 : f32 to vector<50x32xf32>
    %68 = arith.cmpf oge, %66, %67 : vector<50x32xf32>
    %cst_66 = arith.constant 2.000000e-01 : f32
    %69 = vector.broadcast %cst_66 : f32 to vector<50x32xf32>
    %70 = arith.mulf %69, %66 : vector<50x32xf32>
    %71 = arith.select %68, %66, %70 : vector<50x32xi1>, vector<50x32xf32>
    %c0_67 = arith.constant 0 : index
    %c0_68 = arith.constant 0 : index
    %72 = vector.load %arg3[%c0_67, %c0_68] : memref<50x32xf32, #tpu.memory_space<vmem>>, vector<50x32xf32>
    tpu.vector_store %arg3[%c0_67, %c0_68], %71 {strides = array<i32>} : memref<50x32xf32, #tpu.memory_space<vmem>>, vector<50x32xf32>,
    return
  }
}

module attributes {stable_mosaic.version = 11 : i64} {
  func.func @_conv3x3_s2_kernel(%arg0: memref<2x2x22x32xf32, #tpu.memory_space<vmem>>, %arg1: memref<9x32x64xbf16, #tpu.memory_space<vmem>>, %arg2: memref<1x64xf32, #tpu.memory_space<vmem>>, %arg3: memref<18x64xf32, #tpu.memory_space<vmem>>) attributes {dimension_semantics = [], scalar_prefetch = 0 : i64, scratch_operands = 0 : i64, tpu.core_type = #tpu.core_type<tc>} {
    %cst = arith.constant 0.000000e+00 : f32
    %0 = vector.broadcast %cst : f32 to vector<18x64xf32>
    %c0 = arith.constant 0 : index
    %c0_0 = arith.constant 0 : index
    %c0_1 = arith.constant 0 : index
    %c0_2 = arith.constant 0 : index
    %1 = vector.load %arg0[%c0, %c0_0, %c0_1, %c0_2] : memref<2x2x22x32xf32, #tpu.memory_space<vmem>>, vector<1x1x18x32xf32>
    %2 = vector.shape_cast %1 : vector<1x1x18x32xf32> to vector<18x32xf32>
    %3 = arith.truncf %2 : vector<18x32xf32> to vector<18x32xbf16>
    %c0_3 = arith.constant 0 : index
    %c0_4 = arith.constant 0 : index
    %c0_5 = arith.constant 0 : index
    %4 = vector.load %arg1[%c0_3, %c0_4, %c0_5] : memref<9x32x64xbf16, #tpu.memory_space<vmem>>, vector<1x32x64xbf16>
    %5 = vector.shape_cast %4 : vector<1x32x64xbf16> to vector<32x64xbf16>
    %cst_6 = arith.constant dense<0.000000e+00> : vector<18x64xf32>
    %6 = tpu.matmul %3, %5, %cst_6 {dimension_numbers = #tpu.dot_dimension_numbers<[1], [0], [0], [1], [0, 0, 1, 1], [], []>} : vector<18x32xbf16>, vector<32x64xbf16>, vector<18x64xf32> -> vector<18x64xf32>
    %7 = arith.addf %0, %6 : vector<18x64xf32>
    %c0_7 = arith.constant 0 : index
    %c1 = arith.constant 1 : index
    %c0_8 = arith.constant 0 : index
    %c0_9 = arith.constant 0 : index
    %8 = vector.load %arg0[%c0_7, %c1, %c0_8, %c0_9] : memref<2x2x22x32xf32, #tpu.memory_space<vmem>>, vector<1x1x18x32xf32>
    %9 = vector.shape_cast %8 : vector<1x1x18x32xf32> to vector<18x32xf32>
    %10 = arith.truncf %9 : vector<18x32xf32> to vector<18x32xbf16>
    %c1_10 = arith.constant 1 : index
    %c0_11 = arith.constant 0 : index
    %c0_12 = arith.constant 0 : index
    %11 = vector.load %arg1[%c1_10, %c0_11, %c0_12] : memref<9x32x64xbf16, #tpu.memory_space<vmem>>, vector<1x32x64xbf16>
    %12 = vector.shape_cast %11 : vector<1x32x64xbf16> to vector<32x64xbf16>
    %cst_13 = arith.constant dense<0.000000e+00> : vector<18x64xf32>
    %13 = tpu.matmul %10, %12, %cst_13 {dimension_numbers = #tpu.dot_dimension_numbers<[1], [0], [0], [1], [0, 0, 1, 1], [], []>} : vector<18x32xbf16>, vector<32x64xbf16>, vector<18x64xf32> -> vector<18x64xf32>
    %14 = arith.addf %7, %13 : vector<18x64xf32>
    %c0_14 = arith.constant 0 : index
    %c0_15 = arith.constant 0 : index
    %c1_16 = arith.constant 1 : index
    %c0_17 = arith.constant 0 : index
    %15 = vector.load %arg0[%c0_14, %c0_15, %c1_16, %c0_17] : memref<2x2x22x32xf32, #tpu.memory_space<vmem>>, vector<1x1x18x32xf32>
    %16 = vector.shape_cast %15 : vector<1x1x18x32xf32> to vector<18x32xf32>
    %17 = arith.truncf %16 : vector<18x32xf32> to vector<18x32xbf16>
    %c2 = arith.constant 2 : index
    %c0_18 = arith.constant 0 : index
    %c0_19 = arith.constant 0 : index
    %18 = vector.load %arg1[%c2, %c0_18, %c0_19] : memref<9x32x64xbf16, #tpu.memory_space<vmem>>, vector<1x32x64xbf16>
    %19 = vector.shape_cast %18 : vector<1x32x64xbf16> to vector<32x64xbf16>
    %cst_20 = arith.constant dense<0.000000e+00> : vector<18x64xf32>
    %20 = tpu.matmul %17, %19, %cst_20 {dimension_numbers = #tpu.dot_dimension_numbers<[1], [0], [0], [1], [0, 0, 1, 1], [], []>} : vector<18x32xbf16>, vector<32x64xbf16>, vector<18x64xf32> -> vector<18x64xf32>
    %21 = arith.addf %14, %20 : vector<18x64xf32>
    %c1_21 = arith.constant 1 : index
    %c0_22 = arith.constant 0 : index
    %c0_23 = arith.constant 0 : index
    %c0_24 = arith.constant 0 : index
    %22 = vector.load %arg0[%c1_21, %c0_22, %c0_23, %c0_24] : memref<2x2x22x32xf32, #tpu.memory_space<vmem>>, vector<1x1x18x32xf32>
    %23 = vector.shape_cast %22 : vector<1x1x18x32xf32> to vector<18x32xf32>
    %24 = arith.truncf %23 : vector<18x32xf32> to vector<18x32xbf16>
    %c3 = arith.constant 3 : index
    %c0_25 = arith.constant 0 : index
    %c0_26 = arith.constant 0 : index
    %25 = vector.load %arg1[%c3, %c0_25, %c0_26] : memref<9x32x64xbf16, #tpu.memory_space<vmem>>, vector<1x32x64xbf16>
    %26 = vector.shape_cast %25 : vector<1x32x64xbf16> to vector<32x64xbf16>
    %cst_27 = arith.constant dense<0.000000e+00> : vector<18x64xf32>
    %27 = tpu.matmul %24, %26, %cst_27 {dimension_numbers = #tpu.dot_dimension_numbers<[1], [0], [0], [1], [0, 0, 1, 1], [], []>} : vector<18x32xbf16>, vector<32x64xbf16>, vector<18x64xf32> -> vector<18x64xf32>
    %28 = arith.addf %21, %27 : vector<18x64xf32>
    %c1_28 = arith.constant 1 : index
    %c1_29 = arith.constant 1 : index
    %c0_30 = arith.constant 0 : index
    %c0_31 = arith.constant 0 : index
    %29 = vector.load %arg0[%c1_28, %c1_29, %c0_30, %c0_31] : memref<2x2x22x32xf32, #tpu.memory_space<vmem>>, vector<1x1x18x32xf32>
    %30 = vector.shape_cast %29 : vector<1x1x18x32xf32> to vector<18x32xf32>
    %31 = arith.truncf %30 : vector<18x32xf32> to vector<18x32xbf16>
    %c4 = arith.constant 4 : index
    %c0_32 = arith.constant 0 : index
    %c0_33 = arith.constant 0 : index
    %32 = vector.load %arg1[%c4, %c0_32, %c0_33] : memref<9x32x64xbf16, #tpu.memory_space<vmem>>, vector<1x32x64xbf16>
    %33 = vector.shape_cast %32 : vector<1x32x64xbf16> to vector<32x64xbf16>
    %cst_34 = arith.constant dense<0.000000e+00> : vector<18x64xf32>
    %34 = tpu.matmul %31, %33, %cst_34 {dimension_numbers = #tpu.dot_dimension_numbers<[1], [0], [0], [1], [0, 0, 1, 1], [], []>} : vector<18x32xbf16>, vector<32x64xbf16>, vector<18x64xf32> -> vector<18x64xf32>
    %35 = arith.addf %28, %34 : vector<18x64xf32>
    %c1_35 = arith.constant 1 : index
    %c0_36 = arith.constant 0 : index
    %c1_37 = arith.constant 1 : index
    %c0_38 = arith.constant 0 : index
    %36 = vector.load %arg0[%c1_35, %c0_36, %c1_37, %c0_38] : memref<2x2x22x32xf32, #tpu.memory_space<vmem>>, vector<1x1x18x32xf32>
    %37 = vector.shape_cast %36 : vector<1x1x18x32xf32> to vector<18x32xf32>
    %38 = arith.truncf %37 : vector<18x32xf32> to vector<18x32xbf16>
    %c5 = arith.constant 5 : index
    %c0_39 = arith.constant 0 : index
    %c0_40 = arith.constant 0 : index
    %39 = vector.load %arg1[%c5, %c0_39, %c0_40] : memref<9x32x64xbf16, #tpu.memory_space<vmem>>, vector<1x32x64xbf16>
    %40 = vector.shape_cast %39 : vector<1x32x64xbf16> to vector<32x64xbf16>
    %cst_41 = arith.constant dense<0.000000e+00> : vector<18x64xf32>
    %41 = tpu.matmul %38, %40, %cst_41 {dimension_numbers = #tpu.dot_dimension_numbers<[1], [0], [0], [1], [0, 0, 1, 1], [], []>} : vector<18x32xbf16>, vector<32x64xbf16>, vector<18x64xf32> -> vector<18x64xf32>
    %42 = arith.addf %35, %41 : vector<18x64xf32>
    %c0_42 = arith.constant 0 : index
    %c0_43 = arith.constant 0 : index
    %c3_44 = arith.constant 3 : index
    %c0_45 = arith.constant 0 : index
    %43 = vector.load %arg0[%c0_42, %c0_43, %c3_44, %c0_45] : memref<2x2x22x32xf32, #tpu.memory_space<vmem>>, vector<1x1x18x32xf32>
    %44 = vector.shape_cast %43 : vector<1x1x18x32xf32> to vector<18x32xf32>
    %45 = arith.truncf %44 : vector<18x32xf32> to vector<18x32xbf16>
    %c6 = arith.constant 6 : index
    %c0_46 = arith.constant 0 : index
    %c0_47 = arith.constant 0 : index
    %46 = vector.load %arg1[%c6, %c0_46, %c0_47] : memref<9x32x64xbf16, #tpu.memory_space<vmem>>, vector<1x32x64xbf16>
    %47 = vector.shape_cast %46 : vector<1x32x64xbf16> to vector<32x64xbf16>
    %cst_48 = arith.constant dense<0.000000e+00> : vector<18x64xf32>
    %48 = tpu.matmul %45, %47, %cst_48 {dimension_numbers = #tpu.dot_dimension_numbers<[1], [0], [0], [1], [0, 0, 1, 1], [], []>} : vector<18x32xbf16>, vector<32x64xbf16>, vector<18x64xf32> -> vector<18x64xf32>
    %49 = arith.addf %42, %48 : vector<18x64xf32>
    %c0_49 = arith.constant 0 : index
    %c1_50 = arith.constant 1 : index
    %c3_51 = arith.constant 3 : index
    %c0_52 = arith.constant 0 : index
    %50 = vector.load %arg0[%c0_49, %c1_50, %c3_51, %c0_52] : memref<2x2x22x32xf32, #tpu.memory_space<vmem>>, vector<1x1x18x32xf32>
    %51 = vector.shape_cast %50 : vector<1x1x18x32xf32> to vector<18x32xf32>
    %52 = arith.truncf %51 : vector<18x32xf32> to vector<18x32xbf16>
    %c7 = arith.constant 7 : index
    %c0_53 = arith.constant 0 : index
    %c0_54 = arith.constant 0 : index
    %53 = vector.load %arg1[%c7, %c0_53, %c0_54] : memref<9x32x64xbf16, #tpu.memory_space<vmem>>, vector<1x32x64xbf16>
    %54 = vector.shape_cast %53 : vector<1x32x64xbf16> to vector<32x64xbf16>
    %cst_55 = arith.constant dense<0.000000e+00> : vector<18x64xf32>
    %55 = tpu.matmul %52, %54, %cst_55 {dimension_numbers = #tpu.dot_dimension_numbers<[1], [0], [0], [1], [0, 0, 1, 1], [], []>} : vector<18x32xbf16>, vector<32x64xbf16>, vector<18x64xf32> -> vector<18x64xf32>
    %56 = arith.addf %49, %55 : vector<18x64xf32>
    %c0_56 = arith.constant 0 : index
    %c0_57 = arith.constant 0 : index
    %c4_58 = arith.constant 4 : index
    %c0_59 = arith.constant 0 : index
    %57 = vector.load %arg0[%c0_56, %c0_57, %c4_58, %c0_59] : memref<2x2x22x32xf32, #tpu.memory_space<vmem>>, vector<1x1x18x32xf32>
    %58 = vector.shape_cast %57 : vector<1x1x18x32xf32> to vector<18x32xf32>
    %59 = arith.truncf %58 : vector<18x32xf32> to vector<18x32xbf16>
    %c8 = arith.constant 8 : index
    %c0_60 = arith.constant 0 : index
    %c0_61 = arith.constant 0 : index
    %60 = vector.load %arg1[%c8, %c0_60, %c0_61] : memref<9x32x64xbf16, #tpu.memory_space<vmem>>, vector<1x32x64xbf16>
    %61 = vector.shape_cast %60 : vector<1x32x64xbf16> to vector<32x64xbf16>
    %cst_62 = arith.constant dense<0.000000e+00> : vector<18x64xf32>
    %62 = tpu.matmul %59, %61, %cst_62 {dimension_numbers = #tpu.dot_dimension_numbers<[1], [0], [0], [1], [0, 0, 1, 1], [], []>} : vector<18x32xbf16>, vector<32x64xbf16>, vector<18x64xf32> -> vector<18x64xf32>
    %63 = arith.addf %56, %62 : vector<18x64xf32>
    %c0_63 = arith.constant 0 : index
    %c0_64 = arith.constant 0 : index
    %64 = vector.load %arg2[%c0_63, %c0_64] : memref<1x64xf32, #tpu.memory_space<vmem>>, vector<1x64xf32>
    %65 = vector.broadcast %64 : vector<1x64xf32> to vector<18x64xf32>
    %66 = arith.addf %63, %65 : vector<18x64xf32>
    %cst_65 = arith.constant 0.000000e+00 : f32
    %67 = vector.broadcast %cst_65 : f32 to vector<18x64xf32>
    %68 = arith.cmpf oge, %66, %67 : vector<18x64xf32>
    %cst_66 = arith.constant 2.000000e-01 : f32
    %69 = vector.broadcast %cst_66 : f32 to vector<18x64xf32>
    %70 = arith.mulf %69, %66 : vector<18x64xf32>
    %71 = arith.select %68, %66, %70 : vector<18x64xi1>, vector<18x64xf32>
    %c0_67 = arith.constant 0 : index
    %c0_68 = arith.constant 0 : index
    %72 = vector.load %arg3[%c0_67, %c0_68] : memref<18x64xf32, #tpu.memory_space<vmem>>, vector<18x64xf32>
    tpu.vector_store %arg3[%c0_67, %c0_68], %71 {strides = array<i32>} : memref<18x64xf32, #tpu.memory_space<vmem>>, vector<18x64xf32>,
    return
  }
}

module attributes {stable_mosaic.version = 11 : i64} {
  func.func @_fc_tail_kernel(%arg0: memref<2x256xbf16, #tpu.memory_space<vmem>>, %arg1: memref<256x64xbf16, #tpu.memory_space<vmem>>, %arg2: memref<1x64xf32, #tpu.memory_space<vmem>>, %arg3: memref<64x64xbf16, #tpu.memory_space<vmem>>, %arg4: memref<1x64xf32, #tpu.memory_space<vmem>>, %arg5: memref<64x128xbf16, #tpu.memory_space<vmem>>, %arg6: memref<1x128xf32, #tpu.memory_space<vmem>>, %arg7: memref<2x128xf32, #tpu.memory_space<vmem>>) attributes {dimension_semantics = [], scalar_prefetch = 0 : i64, scratch_operands = 0 : i64, tpu.core_type = #tpu.core_type<tc>} {
    %c0 = arith.constant 0 : index
    %c0_0 = arith.constant 0 : index
    %0 = vector.load %arg0[%c0, %c0_0] : memref<2x256xbf16, #tpu.memory_space<vmem>>, vector<2x256xbf16>
    %c0_1 = arith.constant 0 : index
    %c0_2 = arith.constant 0 : index
    %1 = vector.load %arg1[%c0_1, %c0_2] : memref<256x64xbf16, #tpu.memory_space<vmem>>, vector<256x64xbf16>
    %cst = arith.constant dense<0.000000e+00> : vector<2x64xf32>
    %2 = tpu.matmul %0, %1, %cst {dimension_numbers = #tpu.dot_dimension_numbers<[1], [0], [0], [1], [0, 0, 1, 1], [], []>} : vector<2x256xbf16>, vector<256x64xbf16>, vector<2x64xf32> -> vector<2x64xf32>
    %c0_3 = arith.constant 0 : index
    %c0_4 = arith.constant 0 : index
    %3 = vector.load %arg2[%c0_3, %c0_4] : memref<1x64xf32, #tpu.memory_space<vmem>>, vector<1x64xf32>
    %4 = vector.broadcast %3 : vector<1x64xf32> to vector<2x64xf32>
    %5 = arith.addf %2, %4 : vector<2x64xf32>
    %cst_5 = arith.constant 0.000000e+00 : f32
    %6 = vector.broadcast %cst_5 : f32 to vector<2x64xf32>
    %7 = arith.cmpf oge, %5, %6 : vector<2x64xf32>
    %cst_6 = arith.constant 2.000000e-01 : f32
    %8 = vector.broadcast %cst_6 : f32 to vector<2x64xf32>
    %9 = arith.mulf %8, %5 : vector<2x64xf32>
    %10 = arith.select %7, %5, %9 : vector<2x64xi1>, vector<2x64xf32>
    %11 = arith.truncf %10 : vector<2x64xf32> to vector<2x64xbf16>
    %c0_7 = arith.constant 0 : index
    %c0_8 = arith.constant 0 : index
    %12 = vector.load %arg3[%c0_7, %c0_8] : memref<64x64xbf16, #tpu.memory_space<vmem>>, vector<64x64xbf16>
    %cst_9 = arith.constant dense<0.000000e+00> : vector<2x64xf32>
    %13 = tpu.matmul %11, %12, %cst_9 {dimension_numbers = #tpu.dot_dimension_numbers<[1], [0], [0], [1], [0, 0, 1, 1], [], []>} : vector<2x64xbf16>, vector<64x64xbf16>, vector<2x64xf32> -> vector<2x64xf32>
    %c0_10 = arith.constant 0 : index
    %c0_11 = arith.constant 0 : index
    %14 = vector.load %arg4[%c0_10, %c0_11] : memref<1x64xf32, #tpu.memory_space<vmem>>, vector<1x64xf32>
    %15 = vector.broadcast %14 : vector<1x64xf32> to vector<2x64xf32>
    %16 = arith.addf %13, %15 : vector<2x64xf32>
    %cst_12 = arith.constant 0.000000e+00 : f32
    %17 = vector.broadcast %cst_12 : f32 to vector<2x64xf32>
    %18 = arith.cmpf oge, %16, %17 : vector<2x64xf32>
    %cst_13 = arith.constant 2.000000e-01 : f32
    %19 = vector.broadcast %cst_13 : f32 to vector<2x64xf32>
    %20 = arith.mulf %19, %16 : vector<2x64xf32>
    %21 = arith.select %18, %16, %20 : vector<2x64xi1>, vector<2x64xf32>
    %22 = arith.truncf %21 : vector<2x64xf32> to vector<2x64xbf16>
    %c0_14 = arith.constant 0 : index
    %c0_15 = arith.constant 0 : index
    %23 = vector.load %arg5[%c0_14, %c0_15] : memref<64x128xbf16, #tpu.memory_space<vmem>>, vector<64x128xbf16>
    %cst_16 = arith.constant dense<0.000000e+00> : vector<2x128xf32>
    %24 = tpu.matmul %22, %23, %cst_16 {dimension_numbers = #tpu.dot_dimension_numbers<[1], [0], [0], [1], [0, 0, 1, 1], [], []>} : vector<2x64xbf16>, vector<64x128xbf16>, vector<2x128xf32> -> vector<2x128xf32>
    %c0_17 = arith.constant 0 : index
    %c0_18 = arith.constant 0 : index
    %25 = vector.load %arg6[%c0_17, %c0_18] : memref<1x128xf32, #tpu.memory_space<vmem>>, vector<1x128xf32>
    %26 = vector.broadcast %25 : vector<1x128xf32> to vector<2x128xf32>
    %27 = arith.addf %24, %26 : vector<2x128xf32>
    %c0_19 = arith.constant 0 : index
    %c0_20 = arith.constant 0 : index
    %28 = vector.load %arg7[%c0_19, %c0_20] : memref<2x128xf32, #tpu.memory_space<vmem>>, vector<2x128xf32>
    tpu.vector_store %arg7[%c0_19, %c0_20], %27 {strides = array<i32>} : memref<2x128xf32, #tpu.memory_space<vmem>>, vector<2x128xf32>,
    return
  }
}

</mosaic_0001>

<bundles_post_ra>
// kernel: shape_cam_tex_net_forward.6
= control target key start
LH: loop header
LB: loop body
LE: loop exit
PB: predicated region body
PF: predicated region fallthrough
CT: control target
= control target key end

     0   :  { %vm117_vm0 = vcmask 1043456   ;;  %v2733_v0 = vmov 0.0   ;;  %vm2734_vm1 = vmmov 0   ;;  %vm83_vm2 = vcmask 64512   ;;  %s4045_s1 = inlined_call_operand.vmem [shape: bf16[9,8,16], index: 1, kind: input, shape index: {}]   ;;  %s4046_s0 = inlined_call_operand.vmem [shape: f32[2,2,172,8], index: 0, kind: input, shape index: {}]   ;;  %s4047_s2 = inlined_call_operand.vmem [shape: f32[1,16], index: 2, kind: input, shape index: {}]   ;;  %s4048_s3 = inlined_call_operand.vmem [shape: f32[162,16], index: 3, kind: output, shape index: {}]  }
   0x1   :  { %2315 = vmatprep.subr.bf16.mxu0 %v2733_v0  ;;  %2729 = vmatprep.subr.bf16.mxu1 %v2733_v0  ;;  %v2015_v1 = vld [vmem:[%s4045_s1 + $0x4] sm:$0xf]  ;;  %v1994_v2 = vld [vmem:[%s4046_s0 + $0xb0] sm:$0xff]  ;;  %v1995_v3 = vld [vmem:[%s4046_s0 + $0xb8] sm:$0xff]  ;;  %vm1967_vm4 = vcmask 130048  }
   0x2   :  { %v119_v4 = vsel %vm117_vm0, %v2015_v1, 0  ;;  %2317 = vmatprep.mubr.msk.bf16.mxu0 %vm2734_vm1, %v2733_v0  ;;  %2341 = vmatprep.mubr.msk.bf16.mxu1 %vm2734_vm1, %v2733_v0  ;;  %v70_v5 = vpack.c.bf16 %v1995_v3, %v1994_v2  ;;  %v2006_v6 = vld [vmem:[%s4046_s0 + $0x110] sm:$0xff]  ;;  %v2007_v7 = vld [vmem:[%s4046_s0 + $0x118] sm:$0xff]  ;;  %v2038_v8 = vld [vmem:[%s4045_s1 + $0x8] sm:$0xf] }
   0x3   :  { %2316 = vmatpush3.bf16.msra.mxu0 %v119_v4  ;;  %2730 = vmatpush3.bf16.msra.mxu1 %v119_v4  ;;  %v76_v9 = vpack.c.bf16 %v2007_v7, %v2006_v6  ;;  %v47_v10 = vld [vmem:[%s4045_s1] sm:$0xf]  ;;  %v465_v11 = vsel %vm117_vm0, %v2038_v8, 0  ;;  %v1997_v14 = vld [vmem:[%s4046_s0 + $0xc8] sm:$0xff]  ;;  %v1998_v19 = vld [vmem:[%s4046_s0 + $0xd0] sm:$0xff] }
   0x4   :  { %2407 = vmatprep.subr.bf16.mxu0 %v2733_v0  ;;  %2361 = vmatprep.subr.bf16.mxu1 %v2733_v0  ;;  %v275_v12 = vsel %vm117_vm0, %v47_v10, 0  ;;  %v1996_v13 = vld [vmem:[%s4046_s0 + $0xc0] sm:$0xff]  ;;  %v2009_v16 = vld [vmem:[%s4046_s0 + $0x128] sm:$0xff]  ;;  %v1999_v20 = vld [vmem:[%s4046_s0 + $0xd8] sm:$0xff] }
   0x5   :  { %v2008_v15 = vld [vmem:[%s4046_s0 + $0x120] sm:$0xff]  ;;  %v71_v17 = vpack.c.bf16 %v1997_v14, %v1996_v13  ;;  %v2010_v21 = vld [vmem:[%s4046_s0 + $0x130] sm:$0xff]  ;;  %v2011_v22 = vld [vmem:[%s4046_s0 + $0x138] sm:$0xff]  ;;  %v72_v23 = vpack.c.bf16 %v1999_v20, %v1998_v19 }
   0x6   :  { %2318 = vmatmul.mubr.msk.bf16.vlgmr.msra.gmra.mrb[0].mxu0 %vm83_vm2, %v70_v5  ;;  %2342 = vmatmul.mubr.msk.bf16.vlgmr.msra.gmra.mrb[0].mxu1 %vm83_vm2, %v76_v9  ;;  %v77_v18 = vpack.c.bf16 %v2009_v16, %v2008_v15  ;;  %v78_v24 = vpack.c.bf16 %v2011_v22, %v2010_v21  ;;  %v2000_v25 = vld [vmem:[%s4046_s0 + $0xe0] sm:$0xff]  ;;  %v2001_v26 = vld [vmem:[%s4046_s0 + $0xe8] sm:$0xff]  ;;  %v2002_v31 = vld [vmem:[%s4046_s0 + $0xf0] sm:$0xff] }
   0x7   :  { %2408 = vmatpush3.bf16.msra.mxu0 %v465_v11  ;;  %2321 = vmatprep.mubr.msk.bf16.mxu0 %vm2734_vm1, %v2733_v0  ;;  %v2012_v27 = vld [vmem:[%s4046_s0 + $0x140] sm:$0xff]  ;;  %v2013_v28 = vld [vmem:[%s4046_s0 + $0x148] sm:$0xff]  ;;  %v73_v29 = vpack.c.bf16 %v2001_v26, %v2000_v25  ;;  %v2003_v32 = vld [vmem:[%s4046_s0 + $0xf8] sm:$0xff] }
   0x8   :  { %2345 = vmatprep.mubr.msk.bf16.mxu1 %vm2734_vm1, %v2733_v0  ;;  %2362 = vmatpush3.bf16.msra.mxu1 %v275_v12  ;;  %v79_v30 = vpack.c.bf16 %v2013_v28, %v2012_v27  ;;  %v2014_v33 = vld [vmem:[%s4046_s0 + $0x150] sm:$0x3]  ;;  %v74_v34 = vpack.c.bf16 %v2003_v32, %v2002_v31  ;;  %v2004_v36 = vld [vmem:[%s4046_s0 + $0x100] sm:$0xff]  ;;  %v2005_v37 = vld [vmem:[%s4046_s0 + $0x108] sm:$0xff] }
   0x9   :  { %2453 = vmatprep.subr.bf16.mxu1 %v2733_v0  ;;  %2499 = vmatprep.subr.bf16.mxu0 %v2733_v0  ;;  %v80_v35 = vpack.c.bf16 %v2014_v33, %v2014_v33  ;;  %v15_v38 = vld [vmem:[%s4046_s0] sm:$0xff]  ;;  %v16_v39 = vld [vmem:[%s4046_s0 + $0x8] sm:$0xff]  ;;  %v75_v40 = vpack.c.bf16 %v2005_v37, %v2004_v36  ;;  %v17_v44 = vld [vmem:[%s4046_s0 + $0x10] sm:$0xff] }
   0xa   :  { %v36_v41 = vpack.c.bf16 %v16_v39, %v15_v38  ;;  %v2071_v42 = vld [vmem:[%s4045_s1 + $0xc] sm:$0xf]  ;;  %v18_v45 = vld [vmem:[%s4046_s0 + $0x18] sm:$0xff]  ;;  %v397_v46 = vld [vmem:[%s4046_s0 + $0x1] sm:$0xff] }
   0xb   :  { %v677_v43 = vsel %vm117_vm0, %v2071_v42, 0  ;;  %v2898_v47 = vld [vmem:[%s4046_s0 + $0x9] sm:$0xff]  ;;  %v37_v49 = vpack.c.bf16 %v18_v45, %v17_v44  ;;  %v19_v52 = vld [vmem:[%s4046_s0 + $0x20] sm:$0xff]  ;;  %v2919_v54 = vld [vmem:[%s4046_s0 + $0x11] sm:$0xff] }
   0xc   :  { %v2104_v48 = vld [vmem:[%s4045_s1 + $0x10] sm:$0xf]  ;;  %v418_v50 = vpack.c.bf16 %v2898_v47, %v397_v46  ;;  %v20_v53 = vld [vmem:[%s4046_s0 + $0x28] sm:$0xff]  ;;  %v2924_v55 = vld [vmem:[%s4046_s0 + $0x19] sm:$0xff] }
   0xd   :  { %v889_v51 = vsel %vm117_vm0, %v2104_v48, 0  ;;  %v38_v56 = vpack.c.bf16 %v20_v53, %v19_v52  ;;  %v419_v57 = vpack.c.bf16 %v2924_v55, %v2919_v54  ;;  %v21_v58 = vld [vmem:[%s4046_s0 + $0x30] sm:$0xff]  ;;  %v22_v59 = vld [vmem:[%s4046_s0 + $0x38] sm:$0xff]  ;;  %v2946_v60 = vld [vmem:[%s4046_s0 + $0x21] sm:$0xff] }
   0xe   :  { %2322 = vmatmul.mubr.msk.bf16.gmra.mrb[4].mxu0 %vm83_vm2, %v71_v17  ;;  %2346 = vmatmul.mubr.msk.bf16.gmra.mrb[4].mxu1 %vm83_vm2, %v77_v18  ;;  %v2951_v61 = vld [vmem:[%s4046_s0 + $0x29] sm:$0xff]  ;;  %v39_v62 = vpack.c.bf16 %v22_v59, %v21_v58  ;;  %v23_v1 = vld [vmem:[%s4046_s0 + $0x40] sm:$0xff]  ;;  %v2970_v3 = vld [vmem:[%s4046_s0 + $0x31] sm:$0xff] }
   0xf   :  { %2325 = vmatprep.mubr.msk.bf16.mxu0 %vm2734_vm1, %v2733_v0  ;;  %2349 = vmatprep.mubr.msk.bf16.mxu1 %vm2734_vm1, %v2733_v0  ;;  %v420_v63 = vpack.c.bf16 %v2951_v61, %v2946_v60  ;;  %v24_v2 = vld [vmem:[%s4046_s0 + $0x48] sm:$0xff]  ;;  %v2975_v4 = vld [vmem:[%s4046_s0 + $0x39] sm:$0xff]  ;;  %v25_v7 = vld [vmem:[%s4046_s0 + $0x50] sm:$0xff] }
  0x10   :  { %v40_v5 = vpack.c.bf16 %v24_v2, %v23_v1  ;;  %v421_v6 = vpack.c.bf16 %v2975_v4, %v2970_v3  ;;  %v26_v8 = vld [vmem:[%s4046_s0 + $0x58] sm:$0xff]  ;;  %v2994_v9 = vld [vmem:[%s4046_s0 + $0x41] sm:$0xff]  ;;  %v2999_v10 = vld [vmem:[%s4046_s0 + $0x49] sm:$0xff] }
  0x11   :  { %v41_v11 = vpack.c.bf16 %v26_v8, %v25_v7  ;;  %v422_v12 = vpack.c.bf16 %v2999_v10, %v2994_v9  ;;  %v27_v13 = vld [vmem:[%s4046_s0 + $0x60] sm:$0xff]  ;;  %v28_v14 = vld [vmem:[%s4046_s0 + $0x68] sm:$0xff]  ;;  %v3018_v15 = vld [vmem:[%s4046_s0 + $0x51] sm:$0xff] }
  0x12   :  { %v3023_v16 = vld [vmem:[%s4046_s0 + $0x59] sm:$0xff]  ;;  %v42_v17 = vpack.c.bf16 %v28_v14, %v27_v13  ;;  %v29_v19 = vld [vmem:[%s4046_s0 + $0x70] sm:$0xff]  ;;  %v3042_v21 = vld [vmem:[%s4046_s0 + $0x61] sm:$0xff] }
  0x13   :  { %v423_v18 = vpack.c.bf16 %v3023_v16, %v3018_v15  ;;  %v30_v20 = vld [vmem:[%s4046_s0 + $0x78] sm:$0xff]  ;;  %v3047_v22 = vld [vmem:[%s4046_s0 + $0x69] sm:$0xff]  ;;  %v31_v25 = vld [vmem:[%s4046_s0 + $0x80] sm:$0xff] }
  0x14   :  { %v32_v26 = vld [vmem:[%s4046_s0 + $0x88] sm:$0xff]  ;;  %v3066_v27 = vld [vmem:[%s4046_s0 + $0x71] sm:$0xff]  ;;  %v3071_v28 = vld [vmem:[%s4046_s0 + $0x79] sm:$0xff] }
  0x15   :  { %v33_v31 = vld [vmem:[%s4046_s0 + $0x90] sm:$0xff]  ;;  %v34_v32 = vld [vmem:[%s4046_s0 + $0x98] sm:$0xff]  ;;  %v3090_v33 = vld [vmem:[%s4046_s0 + $0x81] sm:$0xff] }
  0x16   :  { %2326 = vmatmul.mubr.msk.bf16.gmra.mrb[8].mxu0 %vm83_vm2, %v72_v23  ;;  %2350 = vmatmul.mubr.msk.bf16.gmra.mrb[8].mxu1 %vm83_vm2, %v78_v24  ;;  %v43_v23 = vpack.c.bf16 %v30_v20, %v29_v19  ;;  %v424_v24 = vpack.c.bf16 %v3047_v22, %v3042_v21  ;;  %v35_v37 = vld [vmem:[%s4046_s0 + $0xa0] sm:$0x3]  ;;  %v3111_v38 = vld [vmem:[%s4046_s0 + $0x91] sm:$0xff]  ;;  %v2051_v44 = vld [vmem:[%s4046_s0 + $0x168] sm:$0xff] }
  0x17   :  { %2329 = vmatprep.mubr.msk.bf16.mxu0 %vm2734_vm1, %v2733_v0  ;;  %2353 = vmatprep.mubr.msk.bf16.mxu1 %vm2734_vm1, %v2733_v0  ;;  %v3116_v39 = vld [vmem:[%s4046_s0 + $0x99] sm:$0xff]  ;;  %v417_v42 = vld [vmem:[%s4046_s0 + $0xa1] sm:$0x3]  ;;  %v2137_v48 = vld [vmem:[%s4045_s1 + $0x14] sm:$0xf] }
  0x18   :  { %v428_v45 = vpack.c.bf16 %v417_v42, %v417_v42  ;;  %v2083_v52 = vld [vmem:[%s4046_s0 + $0x210] sm:$0xff]  ;;  %v2084_v53 = vld [vmem:[%s4046_s0 + $0x218] sm:$0xff]  ;;  %v2085_v1 = vld [vmem:[%s4046_s0 + $0x220] sm:$0xff] }
  0x19   :  { %v842_v58 = vpack.c.bf16 %v2084_v53, %v2083_v52  ;;  %v2086_v2 = vld [vmem:[%s4046_s0 + $0x228] sm:$0xff]  ;;  %v2056_v7 = vld [vmem:[%s4046_s0 + $0x190] sm:$0xff]  ;;  %v2057_v8 = vld [vmem:[%s4046_s0 + $0x198] sm:$0xff] }
  0x1a   :  { %v633_v13 = vpack.c.bf16 %v2057_v8, %v2056_v7  ;;  %v2089_v19 = vld [vmem:[%s4046_s0 + $0x240] sm:$0xff]  ;;  %v2090_v20 = vld [vmem:[%s4046_s0 + $0x248] sm:$0xff] }
  0x1b   :  { %v2097_v52 = vld [vmem:[%s4046_s0 + $0x280] sm:$0xff]  ;;  %v2098_v53 = vld [vmem:[%s4046_s0 + $0x288] sm:$0xff] }
  0x1c   :  { %v2102_v7 = vld [vmem:[%s4046_s0 + $0x2a8] sm:$0xff] }
  0x1e   :  { %2330 = vmatmul.mubr.msk.bf16.gmra.mrb[12].mxu0 %vm83_vm2, %v73_v29  ;;  %2354 = vmatmul.mubr.msk.bf16.gmra.mrb[12].mxu1 %vm83_vm2, %v79_v30  ;;  %v44_v29 = vpack.c.bf16 %v32_v26, %v31_v25  ;;  %v425_v30 = vpack.c.bf16 %v3071_v28, %v3066_v27  ;;  %v2060_v25 = vld [vmem:[%s4046_s0 + $0x1b0] sm:$0xff]  ;;  %v2061_v26 = vld [vmem:[%s4046_s0 + $0x1b8] sm:$0xff] }
  0x1f   :  { %2333 = vmatprep.mubr.msk.bf16.mxu0 %vm2734_vm1, %v2733_v0  ;;  %2357 = vmatprep.mubr.msk.bf16.mxu1 %vm2734_vm1, %v2733_v0 }
  0x26   :  { %2334 = vmatmul.mubr.msk.bf16.gmra.mrb[16].mxu0 %vm83_vm2, %v74_v34  ;;  %2358 = vmatmul.mubr.msk.bf16.gmra.mrb[16].mxu1 %vm83_vm2, %v80_v35  ;;  %v3095_v34 = vld [vmem:[%s4046_s0 + $0x89] sm:$0xff]  ;;  %v45_v35 = vpack.c.bf16 %v34_v32, %v33_v31  ;;  %v635_v31 = vpack.c.bf16 %v2061_v26, %v2060_v25  ;;  %v2182_v25 = vld [vmem:[%s4045_s1 + $0x1c] sm:$0xf] }
  0x27   :  { %2337 = vmatprep.mubr.msk.bf16.mxu0 %vm2734_vm1, %v2733_v0  ;;  %2363 = vmatprep.mubr.msk.bf16.mxu1 %vm2734_vm1, %v2733_v0  ;;  %v426_v36 = vpack.c.bf16 %v3095_v34, %v3090_v33 }
  0x2e   :  { %2338 = vmatmul.mubr.msk.bf16.gmra.mrb[20].mxu0 %vm83_vm2, %v75_v40  ;;  %2364 = vmatmul.mubr.msk.bf16.vlgmr.msra.gmra.mrb[20].mxu1 %vm83_vm2, %v36_v41  ;;  %v46_v40 = vpack.c.bf16 %v35_v37, %v35_v37  ;;  %v427_v41 = vpack.c.bf16 %v3116_v39, %v3111_v38  ;;  %v2093_v37 = vld [vmem:[%s4046_s0 + $0x260] sm:$0xff] }
  0x2f   :  { %2367 = vmatprep.mubr.msk.bf16.mxu1 %vm2734_vm1, %v2733_v0  ;;  %2409 = vmatprep.mubr.msk.bf16.mxu0 %vm2734_vm1, %v2733_v0 }
  0x30   :  { %2454 = vmatpush3.bf16.msra.mxu1 %v677_v43  ;;  %v2050_v43 = vld [vmem:[%s4046_s0 + $0x160] sm:$0xff] }
  0x31   :  { %2545 = vmatprep.subr.bf16.mxu1 %v2733_v0  ;;  %v630_v46 = vpack.c.bf16 %v2051_v44, %v2050_v43  ;;  %v2064_v43 = vld [vmem:[%s4046_s0 + $0x1d0] sm:$0xff]  ;;  %v2065_v44 = vld [vmem:[%s4046_s0 + $0x1d8] sm:$0xff] }
  0x36   :  { %2368 = vmatmul.mubr.msk.bf16.gmra.mrb[24].mxu1 %vm83_vm2, %v37_v49  ;;  %2410 = vmatmul.mubr.msk.bf16.vlgmr.msra.gmra.mrb[24].mxu0 %vm83_vm2, %v418_v50  ;;  %v1100_v49 = vsel %vm117_vm0, %v2137_v48, 0  ;;  %v2052_v50 = vld [vmem:[%s4046_s0 + $0x170] sm:$0xff]  ;;  %v637_v48 = vpack.c.bf16 %v2065_v44, %v2064_v43 }
  0x37   :  { %2500 = vmatpush3.bf16.msra.mxu0 %v889_v51  ;;  %2371 = vmatprep.mubr.msk.bf16.mxu1 %vm2734_vm1, %v2733_v0  ;;  %v2053_v51 = vld [vmem:[%s4046_s0 + $0x178] sm:$0xff] }
  0x38   :  { %2413 = vmatprep.mubr.msk.bf16.mxu0 %vm2734_vm1, %v2733_v0  ;;  %2591 = vmatprep.subr.bf16.mxu0 %v2733_v0 }
  0x3e   :  { %2372 = vmatmul.mubr.msk.bf16.gmra.mrb[28].mxu1 %vm83_vm2, %v38_v56  ;;  %2414 = vmatmul.mubr.msk.bf16.gmra.mrb[28].mxu0 %vm83_vm2, %v419_v57  ;;  %v2149_v56 = vld [vmem:[%s4045_s1 + $0x18] sm:$0xf]  ;;  %v631_v57 = vpack.c.bf16 %v2053_v51, %v2052_v50  ;;  %v2066_v50 = vld [vmem:[%s4046_s0 + $0x1e0] sm:$0xff]  ;;  %v2067_v51 = vld [vmem:[%s4046_s0 + $0x1e8] sm:$0xff] }
  0x3f   :  { %2375 = vmatprep.mubr.msk.bf16.mxu1 %vm2734_vm1, %v2733_v0  ;;  %2417 = vmatprep.mubr.msk.bf16.mxu0 %vm2734_vm1, %v2733_v0  ;;  %v1311_v59 = vsel %vm117_vm0, %v2149_v56, 0  ;;  %v638_v56 = vpack.c.bf16 %v2067_v51, %v2066_v50 }
  0x46   :  { %2376 = vmatmul.mubr.msk.bf16.gmra.mrb[32].mxu1 %vm83_vm2, %v39_v62  ;;  %2418 = vmatmul.mubr.msk.bf16.gmra.mrb[32].mxu0 %vm83_vm2, %v420_v63  ;;  %v2054_v62 = vld [vmem:[%s4046_s0 + $0x180] sm:$0xff]  ;;  %v2055_v63 = vld [vmem:[%s4046_s0 + $0x188] sm:$0xff] }
  0x47   :  { %2379 = vmatprep.mubr.msk.bf16.mxu1 %vm2734_vm1, %v2733_v0  ;;  %2421 = vmatprep.mubr.msk.bf16.mxu0 %vm2734_vm1, %v2733_v0 }
  0x4e   :  { %2380 = vmatmul.mubr.msk.bf16.gmra.mrb[36].mxu1 %vm83_vm2, %v40_v5  ;;  %2422 = vmatmul.mubr.msk.bf16.gmra.mrb[36].mxu0 %vm83_vm2, %v421_v6  ;;  %v632_v5 = vpack.c.bf16 %v2055_v63, %v2054_v62  ;;  %v843_v6 = vpack.c.bf16 %v2086_v2, %v2085_v1  ;;  %v2099_v62 = vld [vmem:[%s4046_s0 + $0x290] sm:$0xff]  ;;  %v2100_v63 = vld [vmem:[%s4046_s0 + $0x298] sm:$0xff] }
  0x4f   :  { %2383 = vmatprep.mubr.msk.bf16.mxu1 %vm2734_vm1, %v2733_v0  ;;  %2425 = vmatprep.mubr.msk.bf16.mxu0 %vm2734_vm1, %v2733_v0  ;;  %v850_v2 = vpack.c.bf16 %v2100_v63, %v2099_v62 }
  0x56   :  { %2384 = vmatmul.mubr.msk.bf16.gmra.mrb[40].mxu1 %vm83_vm2, %v41_v11  ;;  %2426 = vmatmul.mubr.msk.bf16.gmra.mrb[40].mxu0 %vm83_vm2, %v422_v12  ;;  %v2087_v11 = vld [vmem:[%s4046_s0 + $0x230] sm:$0xff]  ;;  %v2088_v12 = vld [vmem:[%s4046_s0 + $0x238] sm:$0xff] }
  0x57   :  { %2387 = vmatprep.mubr.msk.bf16.mxu1 %vm2734_vm1, %v2733_v0  ;;  %2429 = vmatprep.mubr.msk.bf16.mxu0 %vm2734_vm1, %v2733_v0  ;;  %v844_v14 = vpack.c.bf16 %v2088_v12, %v2087_v11  ;;  %v2103_v12 = vld [vmem:[%s4046_s0 + $0x2b0] sm:$0x3] }
  0x5e   :  { %2388 = vmatmul.mubr.msk.bf16.gmra.mrb[44].mxu1 %vm83_vm2, %v42_v17  ;;  %2430 = vmatmul.mubr.msk.bf16.gmra.mrb[44].mxu0 %vm83_vm2, %v423_v18  ;;  %v2058_v17 = vld [vmem:[%s4046_s0 + $0x1a0] sm:$0xff]  ;;  %v2059_v18 = vld [vmem:[%s4046_s0 + $0x1a8] sm:$0xff] }
  0x5f   :  { %2391 = vmatprep.mubr.msk.bf16.mxu1 %vm2734_vm1, %v2733_v0  ;;  %2433 = vmatprep.mubr.msk.bf16.mxu0 %vm2734_vm1, %v2733_v0 }
  0x66   :  { %2392 = vmatmul.mubr.msk.bf16.gmra.mrb[48].mxu1 %vm83_vm2, %v43_v23  ;;  %2434 = vmatmul.mubr.msk.bf16.gmra.mrb[48].mxu0 %vm83_vm2, %v424_v24  ;;  %v634_v23 = vpack.c.bf16 %v2059_v18, %v2058_v17  ;;  %v845_v24 = vpack.c.bf16 %v2090_v20, %v2089_v19 }
  0x67   :  { %2395 = vmatprep.mubr.msk.bf16.mxu1 %vm2734_vm1, %v2733_v0  ;;  %2437 = vmatprep.mubr.msk.bf16.mxu0 %vm2734_vm1, %v2733_v0 }
  0x6e   :  { %2396 = vmatmul.mubr.msk.bf16.gmra.mrb[52].mxu1 %vm83_vm2, %v44_v29  ;;  %2438 = vmatmul.mubr.msk.bf16.gmra.mrb[52].mxu0 %vm83_vm2, %v425_v30  ;;  %v2091_v29 = vld [vmem:[%s4046_s0 + $0x250] sm:$0xff]  ;;  %v2092_v30 = vld [vmem:[%s4046_s0 + $0x258] sm:$0xff] }
  0x6f   :  { %2399 = vmatprep.mubr.msk.bf16.mxu1 %vm2734_vm1, %v2733_v0  ;;  %2441 = vmatprep.mubr.msk.bf16.mxu0 %vm2734_vm1, %v2733_v0  ;;  %v846_v32 = vpack.c.bf16 %v2092_v30, %v2091_v29 }
  0x76   :  { %2400 = vmatmul.mubr.msk.bf16.gmra.mrb[56].mxu1 %vm83_vm2, %v45_v35  ;;  %2442 = vmatmul.mubr.msk.bf16.gmra.mrb[56].mxu0 %vm83_vm2, %v426_v36  ;;  %v2062_v35 = vld [vmem:[%s4046_s0 + $0x1c0] sm:$0xff]  ;;  %v2063_v36 = vld [vmem:[%s4046_s0 + $0x1c8] sm:$0xff] }
  0x77   :  { %2403 = vmatprep.mubr.msk.bf16.mxu1 %vm2734_vm1, %v2733_v0  ;;  %2445 = vmatprep.mubr.msk.bf16.mxu0 %vm2734_vm1, %v2733_v0 }
  0x7e   :  { %2404 = vmatmul.mubr.msk.bf16.gmra.mrb[60].mxu1 %vm83_vm2, %v46_v40  ;;  %2446 = vmatmul.mubr.msk.bf16.gmra.mrb[60].mxu0 %vm83_vm2, %v427_v41  ;;  %v2094_v40 = vld [vmem:[%s4046_s0 + $0x268] sm:$0xff]  ;;  %v636_v41 = vpack.c.bf16 %v2063_v36, %v2062_v35  ;;  %v2118_v35 = vld [vmem:[%s4046_s0 + $0x171] sm:$0xff]  ;;  %v2119_v36 = vld [vmem:[%s4046_s0 + $0x179] sm:$0xff] }
  0x7f   :  { %2449 = vmatprep.mubr.msk.bf16.mxu0 %vm2734_vm1, %v2733_v0  ;;  %2455 = vmatprep.mubr.msk.bf16.mxu1 %vm2734_vm1, %v2733_v0  ;;  %v847_v42 = vpack.c.bf16 %v2094_v40, %v2093_v37  ;;  %v1054_v44 = vpack.c.bf16 %v2119_v36, %v2118_v35 }
  0x86   :  { %2450 = vmatmul.mubr.msk.bf16.gmra.mrb[64].mxu0 %vm83_vm2, %v428_v45  ;;  %2456 = vmatmul.mubr.msk.bf16.vlgmr.msra.gmra.mrb[64].mxu1 %vm83_vm2, %v630_v46  ;;  %v2095_v45 = vld [vmem:[%s4046_s0 + $0x270] sm:$0xff]  ;;  %v2096_v46 = vld [vmem:[%s4046_s0 + $0x278] sm:$0xff] }
  0x87   :  { %2459 = vmatprep.mubr.msk.bf16.mxu1 %vm2734_vm1, %v2733_v0  ;;  %2501 = vmatprep.mubr.msk.bf16.mxu0 %vm2734_vm1, %v2733_v0 }
  0x88   :  { %2546 = vmatpush3.bf16.msra.mxu1 %v1100_v49  ;;  %v848_v49 = vpack.c.bf16 %v2096_v46, %v2095_v45  ;;  %v1264_v45 = vpack.c.bf16 %v2919_v54, %v2898_v47  ;;  %v2120_v47 = vld [vmem:[%s4046_s0 + $0x181] sm:$0xff]  ;;  %v2121_v54 = vld [vmem:[%s4046_s0 + $0x189] sm:$0xff] }
  0x89   :  { %2637 = vmatprep.subr.bf16.mxu1 %v2733_v0 }
  0x8e   :  { %2460 = vmatmul.mubr.msk.bf16.gmra.mrb[68].mxu1 %vm83_vm2, %v631_v57  ;;  %2502 = vmatmul.mubr.msk.bf16.vlgmr.msra.gmra.mrb[68].mxu0 %vm83_vm2, %v842_v58  ;;  %v849_v57 = vpack.c.bf16 %v2098_v53, %v2097_v52  ;;  %v2068_v58 = vld [vmem:[%s4046_s0 + $0x1f0] sm:$0xff] }
  0x8f   :  { %2592 = vmatpush3.bf16.msra.mxu0 %v1311_v59  ;;  %2463 = vmatprep.mubr.msk.bf16.mxu1 %vm2734_vm1, %v2733_v0  ;;  %v2069_v59 = vld [vmem:[%s4046_s0 + $0x1f8] sm:$0xff] }
  0x90   :  { %2505 = vmatprep.mubr.msk.bf16.mxu0 %vm2734_vm1, %v2733_v0  ;;  %2683 = vmatprep.subr.bf16.mxu0 %v2733_v0  ;;  %v639_v1 = vpack.c.bf16 %v2069_v59, %v2068_v58  ;;  %v1055_v58 = vpack.c.bf16 %v2121_v54, %v2120_v47  ;;  %v1265_v59 = vpack.c.bf16 %v2946_v60, %v2924_v55  ;;  %v2122_v55 = vld [vmem:[%s4046_s0 + $0x191] sm:$0xff]  ;;  %v2123_v60 = vld [vmem:[%s4046_s0 + $0x199] sm:$0xff] }
  0x91   :  { %v1268_v47 = vpack.c.bf16 %v3018_v15, %v2999_v10  ;;  %v2128_v10 = vld [vmem:[%s4046_s0 + $0x1c1] sm:$0xff]  ;;  %v2129_v15 = vld [vmem:[%s4046_s0 + $0x1c9] sm:$0xff] }
  0x96   :  { %2464 = vmatmul.mubr.msk.bf16.gmra.mrb[72].mxu1 %vm83_vm2, %v632_v5  ;;  %2506 = vmatmul.mubr.msk.bf16.gmra.mrb[72].mxu0 %vm83_vm2, %v843_v6  ;;  %v2070_v5 = vld [vmem:[%s4046_s0 + $0x200] sm:$0x3] }
  0x97   :  { %2467 = vmatprep.mubr.msk.bf16.mxu1 %vm2734_vm1, %v2733_v0  ;;  %2509 = vmatprep.mubr.msk.bf16.mxu0 %vm2734_vm1, %v2733_v0  ;;  %v2101_v6 = vld [vmem:[%s4046_s0 + $0x2a0] sm:$0xff]  ;;  %v640_v8 = vpack.c.bf16 %v2070_v5, %v2070_v5 }
  0x98   :  { %v851_v11 = vpack.c.bf16 %v2102_v7, %v2101_v6 }
  0x9e   :  { %2468 = vmatmul.mubr.msk.bf16.gmra.mrb[76].mxu1 %vm83_vm2, %v633_v13  ;;  %2510 = vmatmul.mubr.msk.bf16.gmra.mrb[76].mxu0 %vm83_vm2, %v844_v14  ;;  %v2116_v13 = vld [vmem:[%s4046_s0 + $0x161] sm:$0xff]  ;;  %v2117_v14 = vld [vmem:[%s4046_s0 + $0x169] sm:$0xff] }
  0x9f   :  { %2471 = vmatprep.mubr.msk.bf16.mxu1 %vm2734_vm1, %v2733_v0  ;;  %2513 = vmatprep.mubr.msk.bf16.mxu0 %vm2734_vm1, %v2733_v0 }
  0xa6   :  { %2472 = vmatmul.mubr.msk.bf16.gmra.mrb[80].mxu1 %vm83_vm2, %v634_v23  ;;  %2514 = vmatmul.mubr.msk.bf16.gmra.mrb[80].mxu0 %vm83_vm2, %v845_v24  ;;  %v852_v23 = vpack.c.bf16 %v2103_v12, %v2103_v12  ;;  %v1053_v24 = vpack.c.bf16 %v2117_v14, %v2116_v13  ;;  %v1266_v12 = vpack.c.bf16 %v2970_v3, %v2951_v61  ;;  %v2124_v61 = vld [vmem:[%s4046_s0 + $0x1a1] sm:$0xff]  ;;  %v2125_v3 = vld [vmem:[%s4046_s0 + $0x1a9] sm:$0xff] }
  0xa7   :  { %2475 = vmatprep.mubr.msk.bf16.mxu1 %vm2734_vm1, %v2733_v0  ;;  %2517 = vmatprep.mubr.msk.bf16.mxu0 %vm2734_vm1, %v2733_v0 }
  0xae   :  { %2476 = vmatmul.mubr.msk.bf16.gmra.mrb[84].mxu1 %vm83_vm2, %v635_v31  ;;  %2518 = vmatmul.mubr.msk.bf16.gmra.mrb[84].mxu0 %vm83_vm2, %v846_v32  ;;  %v1522_v32 = vsel %vm117_vm0, %v2182_v25, 0 }
  0xaf   :  { %2479 = vmatprep.mubr.msk.bf16.mxu1 %vm2734_vm1, %v2733_v0  ;;  %2521 = vmatprep.mubr.msk.bf16.mxu0 %vm2734_vm1, %v2733_v0 }
  0xb6   :  { %2480 = vmatmul.mubr.msk.bf16.gmra.mrb[88].mxu1 %vm83_vm2, %v636_v41  ;;  %2522 = vmatmul.mubr.msk.bf16.gmra.mrb[88].mxu0 %vm83_vm2, %v847_v42  ;;  %v2194_v41 = vld [vmem:[%s4045_s1 + $0x20] sm:$0xf] }
  0xb7   :  { %2483 = vmatprep.mubr.msk.bf16.mxu1 %vm2734_vm1, %v2733_v0  ;;  %2525 = vmatprep.mubr.msk.bf16.mxu0 %vm2734_vm1, %v2733_v0  ;;  %v1733_v50 = vsel %vm117_vm0, %v2194_v41, 0 }
  0xbe   :  { %2484 = vmatmul.mubr.msk.bf16.gmra.mrb[92].mxu1 %vm83_vm2, %v637_v48  ;;  %2526 = vmatmul.mubr.msk.bf16.gmra.mrb[92].mxu0 %vm83_vm2, %v848_v49 }
  0xbf   :  { %2487 = vmatprep.mubr.msk.bf16.mxu1 %vm2734_vm1, %v2733_v0  ;;  %2529 = vmatprep.mubr.msk.bf16.mxu0 %vm2734_vm1, %v2733_v0 }
  0xc6   :  { %2488 = vmatmul.mubr.msk.bf16.gmra.mrb[96].mxu1 %vm83_vm2, %v638_v56  ;;  %2530 = vmatmul.mubr.msk.bf16.gmra.mrb[96].mxu0 %vm83_vm2, %v849_v57 }
  0xc7   :  { %2491 = vmatprep.mubr.msk.bf16.mxu1 %vm2734_vm1, %v2733_v0  ;;  %2533 = vmatprep.mubr.msk.bf16.mxu0 %vm2734_vm1, %v2733_v0 }
  0xce   :  { %2492 = vmatmul.mubr.msk.bf16.gmra.mrb[100].mxu1 %vm83_vm2, %v639_v1  ;;  %2534 = vmatmul.mubr.msk.bf16.gmra.mrb[100].mxu0 %vm83_vm2, %v850_v2 }
  0xcf   :  { %2495 = vmatprep.mubr.msk.bf16.mxu1 %vm2734_vm1, %v2733_v0  ;;  %2537 = vmatprep.mubr.msk.bf16.mxu0 %vm2734_vm1, %v2733_v0 }
  0xd6   :  { %2496 = vmatmul.mubr.msk.bf16.gmra.mrb[104].mxu1 %vm83_vm2, %v640_v8  ;;  %2538 = vmatmul.mubr.msk.bf16.gmra.mrb[104].mxu0 %vm83_vm2, %v851_v11  ;;  %v1056_v11 = vpack.c.bf16 %v2123_v60, %v2122_v55 }
  0xd7   :  { %2541 = vmatprep.mubr.msk.bf16.mxu0 %vm2734_vm1, %v2733_v0  ;;  %2547 = vmatprep.mubr.msk.bf16.mxu1 %vm2734_vm1, %v2733_v0 }
  0xd9   :  { %v3337_v17 = vpop.f32.mrb[0].mxu0  ;;  %v3339_v18 = vpop.f32.mrb[0].mxu1 }
  0xda   :  { %v2319_v19 = vpop.f32.mrb[1].mxu0  ;;  %v2343_v20 = vpop.f32.mrb[1].mxu1 }
  0xdb   :  { %v3344_v26 = vpop.f32.mrb[2].mxu0  ;;  %v3346_v29 = vpop.f32.mrb[2].mxu1 }
  0xdc   :  { %v2320_v30 = vpop.f32.mrb[3].mxu0  ;;  %v2344_v31 = vpop.f32.mrb[3].mxu1 }
  0xdd   :  { %v1057_v31 = vpack.c.bf16 %v2125_v3, %v2124_v61 }
  0xde   :  { %2542 = vmatmul.mubr.msk.bf16.gmra.mrb[108].mxu0 %vm83_vm2, %v852_v23  ;;  %2548 = vmatmul.mubr.msk.bf16.vlgmr.msra.gmra.mrb[108].mxu1 %vm83_vm2, %v1053_v24 }
  0xdf   :  { %2551 = vmatprep.mubr.msk.bf16.mxu1 %vm2734_vm1, %v2733_v0  ;;  %2593 = vmatprep.mubr.msk.bf16.mxu0 %vm2734_vm1, %v2733_v0 }
  0xe0   :  { %2638 = vmatpush3.bf16.msra.mxu1 %v1522_v32  ;;  %v1267_v32 = vpack.c.bf16 %v2994_v9, %v2975_v4  ;;  %v2127_v4 = vld [vmem:[%s4046_s0 + $0x1b9] sm:$0xff] }
  0xe1   :  { %v3361_v37 = vpop.f32.mrb[4].mxu0  ;;  %v3363_v40 = vpop.f32.mrb[4].mxu1 }
  0xe2   :  { %v2323_v42 = vpop.f32.mrb[5].mxu0  ;;  %v2347_v43 = vpop.f32.mrb[5].mxu1 }
  0xe3   :  { %v3370_v46 = vpop.f32.mrb[6].mxu0  ;;  %v3372_v48 = vpop.f32.mrb[6].mxu1  ;;  %v2126_v43 = vld [vmem:[%s4046_s0 + $0x1b1] sm:$0xff] }
  0xe4   :  { %v2324_v49 = vpop.f32.mrb[7].mxu0  ;;  %v2348_v51 = vpop.f32.mrb[7].mxu1 }
  0xe5   :  { %v1058_v51 = vpack.c.bf16 %v2127_v4, %v2126_v43 }
  0xe6   :  { %2552 = vmatmul.mubr.msk.bf16.gmra.mrb[112].mxu1 %vm83_vm2, %v1054_v44  ;;  %2594 = vmatmul.mubr.msk.bf16.vlgmr.msra.gmra.mrb[112].mxu0 %vm83_vm2, %v1264_v45 }
  0xe7   :  { %2684 = vmatpush3.bf16.msra.mxu0 %v1733_v50  ;;  %2555 = vmatprep.mubr.msk.bf16.mxu1 %vm2734_vm1, %v2733_v0 }
  0xe8   :  { %2597 = vmatprep.mubr.msk.bf16.mxu0 %vm2734_vm1, %v2733_v0 }
  0xe9   :  { %v3387_v52 = vpop.f32.mrb[8].mxu0  ;;  %v3389_v53 = vpop.f32.mrb[8].mxu1 }
  0xea   :  { %v2327_v56 = vpop.f32.mrb[9].mxu0  ;;  %v2351_v57 = vpop.f32.mrb[9].mxu1 }
  0xeb   :  { %v3393_v62 = vpop.f32.mrb[10].mxu0  ;;  %v3395_v63 = vpop.f32.mrb[10].mxu1 }
  0xec   :  { %v2328_v1 = vpop.f32.mrb[11].mxu0  ;;  %v2352_v2 = vpop.f32.mrb[11].mxu1 }
  0xee   :  { %2556 = vmatmul.mubr.msk.bf16.gmra.mrb[116].mxu1 %vm83_vm2, %v1055_v58  ;;  %2598 = vmatmul.mubr.msk.bf16.gmra.mrb[116].mxu0 %vm83_vm2, %v1265_v59 }
  0xef   :  { %2559 = vmatprep.mubr.msk.bf16.mxu1 %vm2734_vm1, %v2733_v0  ;;  %2601 = vmatprep.mubr.msk.bf16.mxu0 %vm2734_vm1, %v2733_v0 }
  0xf1   :  { %v3409_v5 = vpop.f32.mrb[12].mxu0  ;;  %v3411_v6 = vpop.f32.mrb[12].mxu1 }
  0xf2   :  { %v2331_v7 = vpop.f32.mrb[13].mxu0  ;;  %v2355_v8 = vpop.f32.mrb[13].mxu1 }
  0xf3   :  { %v3415_v13 = vpop.f32.mrb[14].mxu0  ;;  %v3417_v14 = vpop.f32.mrb[14].mxu1  ;;  %v1059_v7 = vpack.c.bf16 %v2129_v15, %v2128_v10  ;;  %v1269_v8 = vpack.c.bf16 %v3042_v21, %v3023_v16  ;;  %v2130_v16 = vld [vmem:[%s4046_s0 + $0x1d1] sm:$0xff]  ;;  %v2131_v21 = vld [vmem:[%s4046_s0 + $0x1d9] sm:$0xff] }
  0xf4   :  { %v2332_v19 = vpop.f32.mrb[15].mxu0  ;;  %v2356_v20 = vpop.f32.mrb[15].mxu1 }
  0xf6   :  { %2560 = vmatmul.mubr.msk.bf16.gmra.mrb[120].mxu1 %vm83_vm2, %v1056_v11  ;;  %2602 = vmatmul.mubr.msk.bf16.gmra.mrb[120].mxu0 %vm83_vm2, %v1266_v12 }
  0xf7   :  { %2563 = vmatprep.mubr.msk.bf16.mxu1 %vm2734_vm1, %v2733_v0  ;;  %2605 = vmatprep.mubr.msk.bf16.mxu0 %vm2734_vm1, %v2733_v0 }
  0xf9   :  { %v3431_v23 = vpop.f32.mrb[16].mxu0  ;;  %v3433_v24 = vpop.f32.mrb[16].mxu1 }
  0xfa   :  { %v2335_v25 = vpop.f32.mrb[17].mxu0  ;;  %v2359_v30 = vpop.f32.mrb[17].mxu1 }
  0xfb   :  { %v3437_v35 = vpop.f32.mrb[18].mxu0  ;;  %v238_v36 = vpop.f32.mrb[18].mxu1 }
  0xfc   :  { %v2336_v41 = vpop.f32.mrb[19].mxu0  ;;  %v2360_v42 = vpop.f32.mrb[19].mxu1  ;;  %v1060_v36 = vpack.c.bf16 %v2131_v21, %v2130_v16 }
  0xfd   :  { %v1270_v41 = vpack.c.bf16 %v3066_v27, %v3047_v22  ;;  %v2132_v22 = vld [vmem:[%s4046_s0 + $0x1e1] sm:$0xff]  ;;  %v2133_v27 = vld [vmem:[%s4046_s0 + $0x1e9] sm:$0xff] }
  0xfe   :  { %2564 = vmatmul.mubr.msk.bf16.gmra.mrb[124].mxu1 %vm83_vm2, %v1057_v31  ;;  %2606 = vmatmul.mubr.msk.bf16.gmra.mrb[124].mxu0 %vm83_vm2, %v1267_v32 }
  0xff   :  { %2567 = vmatprep.mubr.msk.bf16.mxu1 %vm2734_vm1, %v2733_v0  ;;  %2609 = vmatprep.mubr.msk.bf16.mxu0 %vm2734_vm1, %v2733_v0 }
 0x101   :  { %v3451_v9 = vpop.f32.mrb[20].mxu0  ;;  %v311_v44 = vpop.f32.mrb[20].mxu1 }
 0x102   :  { %v312_v45 = vadd.f32 %v311_v44, %v3337_v17  ;;  %v2339_v49 = vpop.f32.mrb[21].mxu0  ;;  %v2365_v50 = vpop.f32.mrb[21].mxu1 }
 0x103   :  { %v3456_v54 = vpop.f32.mrb[22].mxu0  ;;  %v314_v56 = vpop.f32.mrb[22].mxu1 }
 0x104   :  { %v315_v57 = vadd.f32 %v314_v56, %v3344_v26  ;;  %v2340_v58 = vpop.f32.mrb[23].mxu0  ;;  %v2366_v59 = vpop.f32.mrb[23].mxu1 }
 0x105   :  { %v1271_v58 = vpack.c.bf16 %v3090_v33, %v3071_v28  ;;  %v2134_v28 = vld [vmem:[%s4046_s0 + $0x1f1] sm:$0xff]  ;;  %v2135_v33 = vld [vmem:[%s4046_s0 + $0x1f9] sm:$0xff] }
 0x106   :  { %2568 = vmatmul.mubr.msk.bf16.gmra.mrb[128].mxu1 %vm83_vm2, %v1058_v51  ;;  %2610 = vmatmul.mubr.msk.bf16.gmra.mrb[128].mxu0 %vm83_vm2, %v1268_v47 }
 0x107   :  { %2571 = vmatprep.mubr.msk.bf16.mxu1 %vm2734_vm1, %v2733_v0  ;;  %2613 = vmatprep.mubr.msk.bf16.mxu0 %vm2734_vm1, %v2733_v0 }
 0x109   :  { %v319_v17 = vpop.f32.mrb[24].mxu1  ;;  %v501_v26 = vpop.f32.mrb[24].mxu0 }
 0x10a   :  { %v320_v1 = vadd.f32 %v319_v17, %v3361_v37  ;;  %v3472_v2 = vadd.f32 %v501_v26, %v312_v45  ;;  %v2369_v55 = vpop.f32.mrb[25].mxu1  ;;  %v2411_v60 = vpop.f32.mrb[25].mxu0 }
 0x10b   :  { %v322_v11 = vpop.f32.mrb[26].mxu1  ;;  %v504_v12 = vpop.f32.mrb[26].mxu0 }
 0x10c   :  { %v323_v19 = vadd.f32 %v322_v11, %v3370_v46  ;;  %v3477_v20 = vadd.f32 %v504_v12, %v315_v57  ;;  %v2412_v61 = vpop.f32.mrb[27].mxu0  ;;  %v2370_v3 = vpop.f32.mrb[27].mxu1  ;;  %v1061_v57 = vpack.c.bf16 %v2133_v27, %v2132_v22  ;;  %v1062_v11 = vpack.c.bf16 %v2135_v33, %v2134_v28  ;;  %v1665_v33 = vld [vmem:[%s4046_s0 + $0xa] sm:$0xff] }
 0x10d   :  { %v1272_v12 = vpack.c.bf16 %v3111_v38, %v3095_v34  ;;  %v2136_v34 = vld [vmem:[%s4046_s0 + $0x201] sm:$0x3] }
 0x10e   :  { %2572 = vmatmul.mubr.msk.bf16.gmra.mrb[132].mxu1 %vm83_vm2, %v1059_v7  ;;  %2614 = vmatmul.mubr.msk.bf16.gmra.mrb[132].mxu0 %vm83_vm2, %v1269_v8  ;;  %v1262_v38 = vld [vmem:[%s4046_s0 + $0xa1] sm:$0xff] }
 0x10f   :  { %2575 = vmatprep.mubr.msk.bf16.mxu1 %vm2734_vm1, %v2733_v0  ;;  %2617 = vmatprep.mubr.msk.bf16.mxu0 %vm2734_vm1, %v2733_v0 }
 0x111   :  { %v327_v37 = vpop.f32.mrb[28].mxu1  ;;  %v509_v46 = vpop.f32.mrb[28].mxu0 }
 0x112   :  { %v328_v25 = vadd.f32 %v327_v37, %v3387_v52  ;;  %v3492_v30 = vadd.f32 %v509_v46, %v320_v1  ;;  %v2373_v31 = vpop.f32.mrb[29].mxu1  ;;  %v2415_v32 = vpop.f32.mrb[29].mxu0 }
 0x113   :  { %v330_v42 = vpop.f32.mrb[30].mxu1  ;;  %v512_v43 = vpop.f32.mrb[30].mxu0 }
 0x114   :  { %v331_v4 = vadd.f32 %v330_v42, %v3393_v62  ;;  %v3497_v44 = vadd.f32 %v512_v43, %v323_v19  ;;  %v2416_v45 = vpop.f32.mrb[31].mxu0  ;;  %v2374_v49 = vpop.f32.mrb[31].mxu1 }
 0x116   :  { %2576 = vmatmul.mubr.msk.bf16.gmra.mrb[136].mxu1 %vm83_vm2, %v1060_v36  ;;  %2618 = vmatmul.mubr.msk.bf16.gmra.mrb[136].mxu0 %vm83_vm2, %v1270_v41  ;;  %v1063_v36 = vpack.c.bf16 %v2136_v34, %v2136_v34  ;;  %v1273_v41 = vpack.c.bf16 %v1262_v38, %v3116_v39  ;;  %v1263_v39 = vld [vmem:[%s4046_s0 + $0xa9] sm:$0x3] }
 0x117   :  { %2579 = vmatprep.mubr.msk.bf16.mxu1 %vm2734_vm1, %v2733_v0  ;;  %2621 = vmatprep.mubr.msk.bf16.mxu0 %vm2734_vm1, %v2733_v0 }
 0x119   :  { %v335_v52 = vpop.f32.mrb[32].mxu1  ;;  %v517_v62 = vpop.f32.mrb[32].mxu0 }
 0x11a   :  { %v336_v50 = vadd.f32 %v335_v52, %v3409_v5  ;;  %v3512_v51 = vadd.f32 %v517_v62, %v328_v25  ;;  %v2377_v47 = vpop.f32.mrb[33].mxu1  ;;  %v2419_v56 = vpop.f32.mrb[33].mxu0 }
 0x11b   :  { %v338_v59 = vpop.f32.mrb[34].mxu1  ;;  %v520_v10 = vpop.f32.mrb[34].mxu0 }
 0x11c   :  { %v339_v15 = vadd.f32 %v338_v59, %v3415_v13  ;;  %v3517_v17 = vadd.f32 %v520_v10, %v331_v4  ;;  %v2420_v26 = vpop.f32.mrb[35].mxu0  ;;  %v2378_v1 = vpop.f32.mrb[35].mxu1 }
 0x11e   :  { %2580 = vmatmul.mubr.msk.bf16.gmra.mrb[140].mxu1 %vm83_vm2, %v1061_v57  ;;  %2622 = vmatmul.mubr.msk.bf16.gmra.mrb[140].mxu0 %vm83_vm2, %v1271_v58  ;;  %v1274_v57 = vpack.c.bf16 %v1263_v39, %v1263_v39 }
 0x11f   :  { %2583 = vmatprep.mubr.msk.bf16.mxu1 %vm2734_vm1, %v2733_v0  ;;  %2625 = vmatprep.mubr.msk.bf16.mxu0 %vm2734_vm1, %v2733_v0 }
 0x121   :  { %v343_v5 = vpop.f32.mrb[36].mxu1  ;;  %v525_v13 = vpop.f32.mrb[36].mxu0 }
 0x122   :  { %v344_v55 = vadd.f32 %v343_v5, %v3431_v23  ;;  %v3532_v60 = vadd.f32 %v525_v13, %v336_v50  ;;  %v2381_v7 = vpop.f32.mrb[37].mxu1  ;;  %v2423_v8 = vpop.f32.mrb[37].mxu0  ;;  %v1666_v5 = vld [vmem:[%s4046_s0 + $0x12] sm:$0xff] }
 0x123   :  { %v346_v19 = vpop.f32.mrb[38].mxu1  ;;  %v528_v61 = vpop.f32.mrb[38].mxu0 }
 0x124   :  { %v347_v3 = vadd.f32 %v346_v19, %v3437_v35  ;;  %v3537_v16 = vadd.f32 %v528_v61, %v339_v15  ;;  %v2424_v21 = vpop.f32.mrb[39].mxu0  ;;  %v2382_v37 = vpop.f32.mrb[39].mxu1  ;;  %v1686_v61 = vpack.c.bf16 %v1666_v5, %v1665_v33 }
 0x126   :  { %2584 = vmatmul.mubr.msk.bf16.gmra.mrb[144].mxu1 %vm83_vm2, %v1062_v11  ;;  %2626 = vmatmul.mubr.msk.bf16.gmra.mrb[144].mxu0 %vm83_vm2, %v1272_v12 }
 0x127   :  { %2587 = vmatprep.mubr.msk.bf16.mxu1 %vm2734_vm1, %v2733_v0  ;;  %2629 = vmatprep.mubr.msk.bf16.mxu0 %vm2734_vm1, %v2733_v0 }
 0x129   :  { %v351_v23 = vpop.f32.mrb[40].mxu1  ;;  %v533_v35 = vpop.f32.mrb[40].mxu0 }
 0x12a   :  { %v352_v46 = vadd.f32 %v351_v23, %v3451_v9  ;;  %v3552_v25 = vadd.f32 %v533_v35, %v344_v55  ;;  %v2385_v31 = vpop.f32.mrb[41].mxu1  ;;  %v2427_v32 = vpop.f32.mrb[41].mxu0  ;;  %v2161_v9 = vld [vmem:[%s4046_s0 + $0xb9] sm:$0xff] }
 0x12b   :  { %v354_v42 = vpop.f32.mrb[42].mxu1  ;;  %v536_v43 = vpop.f32.mrb[42].mxu0  ;;  %v1667_v35 = vld [vmem:[%s4046_s0 + $0x1a] sm:$0xff] }
 0x12c   :  { %v355_v4 = vadd.f32 %v354_v42, %v3456_v54  ;;  %v3556_v45 = vadd.f32 %v536_v43, %v347_v3  ;;  %v2428_v49 = vpop.f32.mrb[43].mxu0  ;;  %v2386_v22 = vpop.f32.mrb[43].mxu1  ;;  %v2162_v54 = vld [vmem:[%s4046_s0 + $0xc1] sm:$0xff] }
 0x12d   :  { %v1475_v58 = vpack.c.bf16 %v2162_v54, %v2161_v9 }
 0x12e   :  { %2588 = vmatmul.mubr.msk.bf16.gmra.mrb[148].mxu1 %vm83_vm2, %v1063_v36  ;;  %2630 = vmatmul.mubr.msk.bf16.gmra.mrb[148].mxu0 %vm83_vm2, %v1273_v41 }
 0x12f   :  { %2633 = vmatprep.mubr.msk.bf16.mxu0 %vm2734_vm1, %v2733_v0  ;;  %2639 = vmatprep.mubr.msk.bf16.mxu1 %vm2734_vm1, %v2733_v0 }
 0x131   :  { %v359_v27 = vpop.f32.mrb[44].mxu1  ;;  %v541_v52 = vpop.f32.mrb[44].mxu0 }
 0x132   :  { %v360_v62 = vadd.f32 %v359_v27, %v3339_v18  ;;  %v3574_v50 = vadd.f32 %v541_v52, %v352_v46  ;;  %v2389_v47 = vpop.f32.mrb[45].mxu1  ;;  %v2431_v56 = vpop.f32.mrb[45].mxu0  ;;  %v2163_v18 = vld [vmem:[%s4046_s0 + $0xc9] sm:$0xff] }
 0x133   :  { %v362_v59 = vpop.f32.mrb[46].mxu1  ;;  %v544_v10 = vpop.f32.mrb[46].mxu0  ;;  %v1668_v46 = vld [vmem:[%s4046_s0 + $0x22] sm:$0xff]  ;;  %v1670_v47 = vld [vmem:[%s4046_s0 + $0x32] sm:$0xff] }
 0x134   :  { %v363_v15 = vadd.f32 %v362_v59, %v3346_v29  ;;  %v3577_v26 = vadd.f32 %v544_v10, %v355_v4  ;;  %v2432_v1 = vpop.f32.mrb[47].mxu0  ;;  %v2390_v28 = vpop.f32.mrb[47].mxu1  ;;  %v2164_v29 = vld [vmem:[%s4046_s0 + $0xd1] sm:$0xff]  ;;  %v1687_v49 = vpack.c.bf16 %v1668_v46, %v1667_v35 }
 0x135   :  { %v1476_v19 = vpack.c.bf16 %v2164_v29, %v2163_v18 }
 0x136   :  { %2634 = vmatmul.mubr.msk.bf16.gmra.mrb[152].mxu0 %vm83_vm2, %v1274_v57  ;;  %2640 = vmatmul.mubr.msk.bf16.vlgmr.msra.gmra.mrb[152].mxu1 %vm83_vm2, %v1475_v58 }
 0x137   :  { %2643 = vmatprep.mubr.msk.bf16.mxu1 %vm2734_vm1, %v2733_v0  ;;  %2685 = vmatprep.mubr.msk.bf16.mxu0 %vm2734_vm1, %v2733_v0 }
 0x139   :  { %v367_v13 = vpop.f32.mrb[48].mxu1  ;;  %v549_v55 = vpop.f32.mrb[48].mxu0 }
 0x13a   :  { %v368_v7 = vadd.f32 %v367_v13, %v3363_v40  ;;  %v3598_v8 = vadd.f32 %v549_v55, %v360_v62  ;;  %v2393_v11 = vpop.f32.mrb[49].mxu1  ;;  %v2435_v12 = vpop.f32.mrb[49].mxu0  ;;  %v2165_v40 = vld [vmem:[%s4046_s0 + $0xd9] sm:$0xff]  ;;  %v1669_v62 = vld [vmem:[%s4046_s0 + $0x2a] sm:$0xff] }
 0x13b   :  { %v370_v3 = vpop.f32.mrb[50].mxu1  ;;  %v552_v21 = vpop.f32.mrb[50].mxu0  ;;  %v1688_v28 = vpack.c.bf16 %v1670_v47, %v1669_v62  ;;  %v1672_v11 = vld [vmem:[%s4046_s0 + $0x42] sm:$0xff] }
 0x13c   :  { %v371_v37 = vadd.f32 %v370_v3, %v3372_v48  ;;  %v3601_v34 = vadd.f32 %v552_v21, %v363_v15  ;;  %v2436_v38 = vpop.f32.mrb[51].mxu0  ;;  %v2394_v23 = vpop.f32.mrb[51].mxu1  ;;  %v2166_v48 = vld [vmem:[%s4046_s0 + $0xe1] sm:$0xff] }
 0x13d   :  { %v1477_v4 = vpack.c.bf16 %v2166_v48, %v2165_v40 }
 0x13e   :  { %2644 = vmatmul.mubr.msk.bf16.gmra.mrb[156].mxu1 %vm83_vm2, %v1476_v19  ;;  %2686 = vmatmul.mubr.msk.bf16.vlgmr.msra.gmra.mrb[156].mxu0 %vm83_vm2, %v1686_v61 }
 0x13f   :  { %2647 = vmatprep.mubr.msk.bf16.mxu1 %vm2734_vm1, %v2733_v0  ;;  %2689 = vmatprep.mubr.msk.bf16.mxu0 %vm2734_vm1, %v2733_v0 }
 0x141   :  { %v375_v31 = vpop.f32.mrb[52].mxu1  ;;  %v557_v32 = vpop.f32.mrb[52].mxu0 }
 0x142   :  { %v376_v36 = vadd.f32 %v375_v31, %v3389_v53  ;;  %v3622_v41 = vadd.f32 %v557_v32, %v368_v7  ;;  %v2397_v42 = vpop.f32.mrb[53].mxu1  ;;  %v2439_v43 = vpop.f32.mrb[53].mxu0  ;;  %v2167_v53 = vld [vmem:[%s4046_s0 + $0xe9] sm:$0xff]  ;;  %v1671_v7 = vld [vmem:[%s4046_s0 + $0x3a] sm:$0xff]  ;;  %v2172_v32 = vld [vmem:[%s4046_s0 + $0x111] sm:$0xff] }
 0x143   :  { %v378_v22 = vpop.f32.mrb[54].mxu1  ;;  %v560_v39 = vpop.f32.mrb[54].mxu0  ;;  %v1689_v23 = vpack.c.bf16 %v1672_v11, %v1671_v7  ;;  %v1674_v42 = vld [vmem:[%s4046_s0 + $0x52] sm:$0xff] }
 0x144   :  { %v379_v9 = vadd.f32 %v378_v22, %v3395_v63  ;;  %v3625_v54 = vadd.f32 %v560_v39, %v371_v37  ;;  %v2440_v27 = vpop.f32.mrb[55].mxu0  ;;  %v2398_v52 = vpop.f32.mrb[55].mxu1  ;;  %v2168_v63 = vld [vmem:[%s4046_s0 + $0xf1] sm:$0xff] }
 0x145   :  { %v1478_v1 = vpack.c.bf16 %v2168_v63, %v2167_v53 }
 0x146   :  { %2648 = vmatmul.mubr.msk.bf16.gmra.mrb[160].mxu1 %vm83_vm2, %v1477_v4  ;;  %2690 = vmatmul.mubr.msk.bf16.gmra.mrb[160].mxu0 %vm83_vm2, %v1687_v49 }
 0x147   :  { %2651 = vmatprep.mubr.msk.bf16.mxu1 %vm2734_vm1, %v2733_v0  ;;  %2693 = vmatprep.mubr.msk.bf16.mxu0 %vm2734_vm1, %v2733_v0 }
 0x149   :  { %v383_v56 = vpop.f32.mrb[56].mxu1  ;;  %v565_v57 = vpop.f32.mrb[56].mxu0 }
 0x14a   :  { %v384_v58 = vadd.f32 %v383_v56, %v3411_v6  ;;  %v3646_v59 = vadd.f32 %v565_v57, %v376_v36  ;;  %v2401_v10 = vpop.f32.mrb[57].mxu1  ;;  %v2443_v15 = vpop.f32.mrb[57].mxu0  ;;  %v2169_v6 = vld [vmem:[%s4046_s0 + $0xf9] sm:$0xff]  ;;  %v1673_v36 = vld [vmem:[%s4046_s0 + $0x4a] sm:$0xff] }
 0x14b   :  { %v386_v18 = vpop.f32.mrb[58].mxu1  ;;  %v568_v29 = vpop.f32.mrb[58].mxu0  ;;  %v1690_v52 = vpack.c.bf16 %v1674_v42, %v1673_v36  ;;  %v2173_v57 = vld [vmem:[%s4046_s0 + $0x119] sm:$0xff] }
 0x14c   :  { %v387_v33 = vadd.f32 %v386_v18, %v3417_v14  ;;  %v3649_v5 = vadd.f32 %v568_v29, %v379_v9  ;;  %v2444_v13 = vpop.f32.mrb[59].mxu0  ;;  %v2402_v55 = vpop.f32.mrb[59].mxu1  ;;  %v2170_v14 = vld [vmem:[%s4046_s0 + $0x101] sm:$0xff] }
 0x14d   :  { %v1479_v38 = vpack.c.bf16 %v2170_v14, %v2169_v6 }
 0x14e   :  { %2652 = vmatmul.mubr.msk.bf16.gmra.mrb[164].mxu1 %vm83_vm2, %v1478_v1  ;;  %2694 = vmatmul.mubr.msk.bf16.gmra.mrb[164].mxu0 %vm83_vm2, %v1688_v28 }
 0x14f   :  { %2655 = vmatprep.mubr.msk.bf16.mxu1 %vm2734_vm1, %v2733_v0  ;;  %2697 = vmatprep.mubr.msk.bf16.mxu0 %vm2734_vm1, %v2733_v0 }
 0x151   :  { %v391_v12 = vpop.f32.mrb[60].mxu1  ;;  %v573_v19 = vpop.f32.mrb[60].mxu0 }
 0x152   :  { %v392_v61 = vadd.f32 %v391_v12, %v3433_v24  ;;  %v3670_v3 = vadd.f32 %v573_v19, %v384_v58  ;;  %v2447_v21 = vpop.f32.mrb[61].mxu0  ;;  %v2405_v37 = vpop.f32.mrb[61].mxu1  ;;  %v2171_v24 = vld [vmem:[%s4046_s0 + $0x109] sm:$0xff] }
 0x153   :  { %v576_v40 = vpop.f32.mrb[62].mxu0  ;;  %v394_v48 = vpop.f32.mrb[62].mxu1  ;;  %v1480_v27 = vpack.c.bf16 %v2172_v32, %v2171_v24  ;;  %v1676_v58 = vld [vmem:[%s4046_s0 + $0x62] sm:$0xff]  ;;  %v1677_v19 = vld [vmem:[%s4046_s0 + $0x6a] sm:$0xff] }
 0x154   :  { %v3672_v35 = vadd.f32 %v576_v40, %v387_v33  ;;  %v2448_v46 = vpop.f32.mrb[63].mxu0  ;;  %v2406_v31 = vpop.f32.mrb[63].mxu1 }
 0x156   :  { %2656 = vmatmul.mubr.msk.bf16.gmra.mrb[168].mxu1 %vm83_vm2, %v1479_v38  ;;  %2698 = vmatmul.mubr.msk.bf16.gmra.mrb[168].mxu0 %vm83_vm2, %v1689_v23 }
 0x157   :  { %2659 = vmatprep.mubr.msk.bf16.mxu1 %vm2734_vm1, %v2733_v0  ;;  %2701 = vmatprep.mubr.msk.bf16.mxu0 %vm2734_vm1, %v2733_v0 }
 0x159   :  { %v581_v43 = vpop.f32.mrb[64].mxu0  ;;  %v713_v4 = vpop.f32.mrb[64].mxu1 }
 0x15a   :  { %v3692_v49 = vadd.f32 %v581_v43, %v392_v61  ;;  %v799_v22 = vadd.f32 %v713_v4, %v3472_v2  ;;  %v2451_v39 = vpop.f32.mrb[65].mxu0  ;;  %v2457_v9 = vpop.f32.mrb[65].mxu1  ;;  %v2174_v2 = vld [vmem:[%s4046_s0 + $0x121] sm:$0xff]  ;;  %v1678_v61 = vld [vmem:[%s4046_s0 + $0x72] sm:$0xff] }
 0x15b   :  { %v584_v53 = vpop.f32.mrb[66].mxu0  ;;  %v716_v63 = vpop.f32.mrb[66].mxu1  ;;  %v1481_v33 = vpack.c.bf16 %v2174_v2, %v2173_v57  ;;  %v1692_v31 = vpack.c.bf16 %v1678_v61, %v1677_v19  ;;  %v1680_v39 = vld [vmem:[%s4046_s0 + $0x82] sm:$0xff] }
 0x15c   :  { %v800_v62 = vadd.f32 %v716_v63, %v3477_v20  ;;  %v2452_v47 = vpop.f32.mrb[67].mxu0  ;;  %v2458_v56 = vpop.f32.mrb[67].mxu1  ;;  %v1675_v20 = vld [vmem:[%s4046_s0 + $0x5a] sm:$0xff] }
 0x15d   :  { %v1691_v13 = vpack.c.bf16 %v1676_v58, %v1675_v20 }
 0x15e   :  { %2660 = vmatmul.mubr.msk.bf16.gmra.mrb[172].mxu1 %vm83_vm2, %v1480_v27  ;;  %2702 = vmatmul.mubr.msk.bf16.gmra.mrb[172].mxu0 %vm83_vm2, %v1690_v52 }
 0x15f   :  { %2663 = vmatprep.mubr.msk.bf16.mxu1 %vm2734_vm1, %v2733_v0  ;;  %2705 = vmatprep.mubr.msk.bf16.mxu0 %vm2734_vm1, %v2733_v0 }
 0x161   :  { %v721_v10 = vpop.f32.mrb[68].mxu1  ;;  %v925_v15 = vpop.f32.mrb[68].mxu0 }
 0x162   :  { %v801_v1 = vadd.f32 %v721_v10, %v3492_v30  ;;  %v3715_v28 = vadd.f32 %v925_v15, %v799_v22  ;;  %v2461_v18 = vpop.f32.mrb[69].mxu1  ;;  %v2503_v29 = vpop.f32.mrb[69].mxu0  ;;  %v2175_v30 = vld [vmem:[%s4046_s0 + $0x129] sm:$0xff]  ;;  %v1679_v22 = vld [vmem:[%s4046_s0 + $0x7a] sm:$0xff] }
 0x163   :  { %v724_v55 = vpop.f32.mrb[70].mxu1  ;;  %v928_v6 = vpop.f32.mrb[70].mxu0  ;;  %v1693_v56 = vpack.c.bf16 %v1680_v39, %v1679_v22  ;;  %v1682_v18 = vld [vmem:[%s4046_s0 + $0x92] sm:$0xff] }
 0x164   :  { %v802_v14 = vadd.f32 %v724_v55, %v3497_v44  ;;  %v3718_v7 = vadd.f32 %v928_v6, %v800_v62  ;;  %v2504_v11 = vpop.f32.mrb[71].mxu0  ;;  %v2462_v12 = vpop.f32.mrb[71].mxu1  ;;  %v2176_v44 = vld [vmem:[%s4046_s0 + $0x131] sm:$0xff] }
 0x165   :  { %v1482_v46 = vpack.c.bf16 %v2176_v44, %v2175_v30 }
 0x166   :  { %2664 = vmatmul.mubr.msk.bf16.gmra.mrb[176].mxu1 %vm83_vm2, %v1481_v33  ;;  %2706 = vmatmul.mubr.msk.bf16.gmra.mrb[176].mxu0 %vm83_vm2, %v1691_v13 }
 0x167   :  { %2667 = vmatprep.mubr.msk.bf16.mxu1 %vm2734_vm1, %v2733_v0  ;;  %2709 = vmatprep.mubr.msk.bf16.mxu0 %vm2734_vm1, %v2733_v0 }
 0x169   :  { %v729_v21 = vpop.f32.mrb[72].mxu1  ;;  %v933_v37 = vpop.f32.mrb[72].mxu0 }
 0x16a   :  { %v803_v38 = vadd.f32 %v729_v21, %v3512_v51  ;;  %v3739_v23 = vadd.f32 %v933_v37, %v801_v1  ;;  %v2465_v40 = vpop.f32.mrb[73].mxu1  ;;  %v2507_v48 = vpop.f32.mrb[73].mxu0  ;;  %v2177_v51 = vld [vmem:[%s4046_s0 + $0x139] sm:$0xff]  ;;  %v1681_v1 = vld [vmem:[%s4046_s0 + $0x8a] sm:$0xff] }
 0x16b   :  { %v732_v24 = vpop.f32.mrb[74].mxu1  ;;  %v936_v32 = vpop.f32.mrb[74].mxu0  ;;  %v1694_v12 = vpack.c.bf16 %v1682_v18, %v1681_v1 }
 0x16c   :  { %v804_v36 = vadd.f32 %v732_v24, %v3517_v17  ;;  %v3742_v42 = vadd.f32 %v936_v32, %v802_v14  ;;  %v2508_v43 = vpop.f32.mrb[75].mxu0  ;;  %v2466_v4 = vpop.f32.mrb[75].mxu1  ;;  %v2178_v17 = vld [vmem:[%s4046_s0 + $0x141] sm:$0xff] }
 0x16d   :  { %v1483_v47 = vpack.c.bf16 %v2178_v17, %v2177_v51 }
 0x16e   :  { %2668 = vmatmul.mubr.msk.bf16.gmra.mrb[180].mxu1 %vm83_vm2, %v1482_v46  ;;  %2710 = vmatmul.mubr.msk.bf16.gmra.mrb[180].mxu0 %vm83_vm2, %v1692_v31 }
 0x16f   :  { %2671 = vmatprep.mubr.msk.bf16.mxu1 %vm2734_vm1, %v2733_v0  ;;  %2713 = vmatprep.mubr.msk.bf16.mxu0 %vm2734_vm1, %v2733_v0 }
 0x171   :  { %v737_v9 = vpop.f32.mrb[76].mxu1  ;;  %v941_v27 = vpop.f32.mrb[76].mxu0 }
 0x172   :  { %v805_v52 = vadd.f32 %v737_v9, %v3532_v60  ;;  %v3763_v53 = vadd.f32 %v941_v27, %v803_v38  ;;  %v2469_v63 = vpop.f32.mrb[77].mxu1  ;;  %v2511_v62 = vpop.f32.mrb[77].mxu0  ;;  %v2179_v60 = vld [vmem:[%s4046_s0 + $0x149] sm:$0xff] }
 0x173   :  { %v740_v57 = vpop.f32.mrb[78].mxu1  ;;  %v944_v2 = vpop.f32.mrb[78].mxu0  ;;  %v1684_v38 = vld [vmem:[%s4046_s0 + $0xa2] sm:$0xff] }
 0x174   :  { %v806_v20 = vadd.f32 %v740_v57, %v3537_v16  ;;  %v3766_v58 = vadd.f32 %v944_v2, %v804_v36  ;;  %v2512_v10 = vpop.f32.mrb[79].mxu0  ;;  %v2470_v15 = vpop.f32.mrb[79].mxu1  ;;  %v2180_v16 = vld [vmem:[%s4046_s0 + $0x151] sm:$0xff] }
 0x175   :  { %v1484_v11 = vpack.c.bf16 %v2180_v16, %v2179_v60 }
 0x176   :  { %2672 = vmatmul.mubr.msk.bf16.gmra.mrb[184].mxu1 %vm83_vm2, %v1483_v47  ;;  %2714 = vmatmul.mubr.msk.bf16.gmra.mrb[184].mxu0 %vm83_vm2, %v1693_v56 }
 0x177   :  { %2675 = vmatprep.mubr.msk.bf16.mxu1 %vm2734_vm1, %v2733_v0  ;;  %2717 = vmatprep.mubr.msk.bf16.mxu0 %vm2734_vm1, %v2733_v0 }
 0x179   :  { %v745_v29 = vpop.f32.mrb[80].mxu1  ;;  %v949_v33 = vpop.f32.mrb[80].mxu0 }
 0x17a   :  { %v807_v13 = vadd.f32 %v745_v29, %v3552_v25  ;;  %v3787_v55 = vadd.f32 %v949_v33, %v805_v52  ;;  %v2473_v6 = vpop.f32.mrb[81].mxu1  ;;  %v2515_v14 = vpop.f32.mrb[81].mxu0  ;;  %v2181_v25 = vld [vmem:[%s4046_s0 + $0x159] sm:$0x3] }
 0x17b   :  { %v748_v30 = vpop.f32.mrb[82].mxu1  ;;  %v952_v44 = vpop.f32.mrb[82].mxu0  ;;  %v1485_v36 = vpack.c.bf16 %v2181_v25, %v2181_v25 }
 0x17c   :  { %v808_v19 = vadd.f32 %v748_v30, %v3556_v45  ;;  %v3790_v61 = vadd.f32 %v952_v44, %v806_v20  ;;  %v2516_v21 = vpop.f32.mrb[83].mxu0  ;;  %v2474_v37 = vpop.f32.mrb[83].mxu1  ;;  %v1683_v45 = vld [vmem:[%s4046_s0 + $0x9a] sm:$0xff] }
 0x17d   :  { %v1695_v43 = vpack.c.bf16 %v1684_v38, %v1683_v45 }
 0x17e   :  { %2676 = vmatmul.mubr.msk.bf16.gmra.mrb[188].mxu1 %vm83_vm2, %v1484_v11  ;;  %2718 = vmatmul.mubr.msk.bf16.gmra.mrb[188].mxu0 %vm83_vm2, %v1694_v12 }
 0x17f   :  { %2679 = vmatprep.mubr.msk.bf16.mxu1 %vm2734_vm1, %v2733_v0  ;;  %2721 = vmatprep.mubr.msk.bf16.mxu0 %vm2734_vm1, %v2733_v0 }
 0x181   :  { %v753_v40 = vpop.f32.mrb[84].mxu1  ;;  %v957_v48 = vpop.f32.mrb[84].mxu0 }
 0x182   :  { %v809_v46 = vadd.f32 %v753_v40, %v3574_v50  ;;  %v3808_v31 = vadd.f32 %v957_v48, %v807_v13  ;;  %v2477_v24 = vpop.f32.mrb[85].mxu1  ;;  %v2519_v32 = vpop.f32.mrb[85].mxu0  ;;  %v1685_v50 = vld [vmem:[%s4046_s0 + $0xaa] sm:$0x3] }
 0x183   :  { %v756_v4 = vpop.f32.mrb[86].mxu1  ;;  %v960_v51 = vpop.f32.mrb[86].mxu0  ;;  %v1696_v56 = vpack.c.bf16 %v1685_v50, %v1685_v50 }
 0x184   :  { %v810_v17 = vadd.f32 %v756_v4, %v3577_v26  ;;  %v3811_v22 = vadd.f32 %v960_v51, %v808_v19  ;;  %v2520_v39 = vpop.f32.mrb[87].mxu0  ;;  %v2478_v9 = vpop.f32.mrb[87].mxu1 }
 0x186   :  { %2680 = vmatmul.mubr.msk.bf16.gmra.mrb[192].mxu1 %vm83_vm2, %v1485_v36  ;;  %2722 = vmatmul.mubr.msk.bf16.gmra.mrb[192].mxu0 %vm83_vm2, %v1695_v43 }
 0x187   :  { %2725 = vmatprep.mubr.msk.bf16.mxu0 %vm2734_vm1, %v2733_v0 }
 0x189   :  { %v761_v27 = vpop.f32.mrb[88].mxu1  ;;  %v965_v52 = vpop.f32.mrb[88].mxu0 }
 0x18a   :  { %v811_v63 = vadd.f32 %v761_v27, %v3598_v8  ;;  %v3821_v26 = vadd.f32 %v965_v52, %v809_v46  ;;  %v2481_v62 = vpop.f32.mrb[89].mxu1  ;;  %v2523_v47 = vpop.f32.mrb[89].mxu0 }
 0x18b   :  { %v764_v57 = vpop.f32.mrb[90].mxu1  ;;  %v968_v2 = vpop.f32.mrb[90].mxu0 }
 0x18c   :  { %v812_v20 = vadd.f32 %v764_v57, %v3601_v34  ;;  %v3824_v10 = vadd.f32 %v968_v2, %v810_v17  ;;  %v2524_v0 = vpop.f32.mrb[91].mxu0  ;;  %v2482_v15 = vpop.f32.mrb[91].mxu1 }
 0x18e   :  { %2726 = vmatmul.mubr.msk.bf16.gmra.mrb[196].mxu0 %vm83_vm2, %v1696_v56 }
 0x191   :  { %v769_v60 = vpop.f32.mrb[92].mxu1  ;;  %v973_v16 = vpop.f32.mrb[92].mxu0 }
 0x192   :  { %v813_v1 = vadd.f32 %v769_v60, %v3622_v41  ;;  %v3828_v8 = vadd.f32 %v973_v16, %v811_v63  ;;  %v2485_v18 = vpop.f32.mrb[93].mxu1  ;;  %v2527_v29 = vpop.f32.mrb[93].mxu0 }
 0x193   :  { %v772_v33 = vpop.f32.mrb[94].mxu1  ;;  %v976_v13 = vpop.f32.mrb[94].mxu0 }
 0x194   :  { %v814_v6 = vadd.f32 %v772_v33, %v3625_v54  ;;  %v3831_v14 = vadd.f32 %v976_v13, %v812_v20  ;;  %v2528_v34 = vpop.f32.mrb[95].mxu0  ;;  %v2486_v11 = vpop.f32.mrb[95].mxu1 }
 0x199   :  { %v777_v12 = vpop.f32.mrb[96].mxu1  ;;  %v981_v30 = vpop.f32.mrb[96].mxu0 }
 0x19a   :  { %v815_v44 = vadd.f32 %v777_v12, %v3646_v59  ;;  %v3834_v19 = vadd.f32 %v981_v30, %v813_v1  ;;  %v2489_v21 = vpop.f32.mrb[97].mxu1  ;;  %v2531_v41 = vpop.f32.mrb[97].mxu0 }
 0x19b   :  { %v780_v37 = vpop.f32.mrb[98].mxu1  ;;  %v984_v25 = vpop.f32.mrb[98].mxu0 }
 0x19c   :  { %v816_v45 = vadd.f32 %v780_v37, %v3649_v5  ;;  %v3837_v38 = vadd.f32 %v984_v25, %v814_v6  ;;  %v2532_v40 = vpop.f32.mrb[99].mxu0  ;;  %v2490_v54 = vpop.f32.mrb[99].mxu1 }
 0x1a1   :  { %v785_v48 = vpop.f32.mrb[100].mxu1  ;;  %v989_v46 = vpop.f32.mrb[100].mxu0 }
 0x1a2   :  { %v817_v24 = vadd.f32 %v785_v48, %v3670_v3  ;;  %v3840_v32 = vadd.f32 %v989_v46, %v815_v44  ;;  %v2493_v36 = vpop.f32.mrb[101].mxu1  ;;  %v2535_v59 = vpop.f32.mrb[101].mxu0 }
 0x1a3   :  { %v788_v43 = vpop.f32.mrb[102].mxu1  ;;  %v992_v4 = vpop.f32.mrb[102].mxu0 }
 0x1a4   :  { %v818_v51 = vadd.f32 %v788_v43, %v3672_v35  ;;  %v3843_v17 = vadd.f32 %v992_v4, %v816_v45  ;;  %v2536_v39 = vpop.f32.mrb[103].mxu0  ;;  %v2494_v5 = vpop.f32.mrb[103].mxu1 }
 0x1a9   :  { %v793_v9 = vpop.f32.mrb[104].mxu1  ;;  %v997_v50 = vpop.f32.mrb[104].mxu0 }
 0x1aa   :  { %v819_v27 = vadd.f32 %v793_v9, %v3692_v49  ;;  %v3846_v52 = vadd.f32 %v997_v50, %v817_v24  ;;  %v2539_v63 = vpop.f32.mrb[105].mxu0  ;;  %v2497_v3 = vpop.f32.mrb[105].mxu1 }
 0x1ab   :  { %v1000_v62 = vpop.f32.mrb[106].mxu0  ;;  %v796_v47 = vpop.f32.mrb[106].mxu1 }
 0x1ac   :  { %v3848_v56 = vadd.f32 %v1000_v62, %v818_v51  ;;  %v2540_v57 = vpop.f32.mrb[107].mxu0  ;;  %v2498_v2 = vpop.f32.mrb[107].mxu1 }
 0x1b1   :  { %v1005_v20 = vpop.f32.mrb[108].mxu0  ;;  %v1136_v35 = vpop.f32.mrb[108].mxu1 }
 0x1b2   :  { %v3850_v0 = vadd.f32 %v1005_v20, %v819_v27  ;;  %v1222_v15 = vadd.f32 %v1136_v35, %v3715_v28  ;;  %v2543_v60 = vpop.f32.mrb[109].mxu0  ;;  %v2549_v16 = vpop.f32.mrb[109].mxu1 }
 0x1b3   :  { %v1008_v1 = vpop.f32.mrb[110].mxu0  ;;  %v1139_v49 = vpop.f32.mrb[110].mxu1 }
 0x1b4   :  { %v1223_v18 = vadd.f32 %v1139_v49, %v3718_v7  ;;  %v2544_v29 = vpop.f32.mrb[111].mxu0  ;;  %v2550_v33 = vpop.f32.mrb[111].mxu1 }
 0x1b9   :  { %v1144_v13 = vpop.f32.mrb[112].mxu1  ;;  %v1347_v6 = vpop.f32.mrb[112].mxu0 }
 0x1ba   :  { %v1224_v34 = vadd.f32 %v1144_v13, %v3739_v23  ;;  %v3855_v11 = vadd.f32 %v1347_v6, %v1222_v15  ;;  %v2553_v12 = vpop.f32.mrb[113].mxu1  ;;  %v2595_v30 = vpop.f32.mrb[113].mxu0 }
 0x1bb   :  { %v1147_v44 = vpop.f32.mrb[114].mxu1  ;;  %v1350_v21 = vpop.f32.mrb[114].mxu0 }
 0x1bc   :  { %v1225_v28 = vadd.f32 %v1147_v44, %v3742_v42  ;;  %v3858_v41 = vadd.f32 %v1350_v21, %v1223_v18  ;;  %v2596_v37 = vpop.f32.mrb[115].mxu0  ;;  %v2554_v25 = vpop.f32.mrb[115].mxu1 }
 0x1c1   :  { %v1152_v45 = vpop.f32.mrb[116].mxu1  ;;  %v1355_v7 = vpop.f32.mrb[116].mxu0 }
 0x1c2   :  { %v1226_v40 = vadd.f32 %v1152_v45, %v3763_v53  ;;  %v3861_v54 = vadd.f32 %v1355_v7, %v1224_v34  ;;  %v2557_v48 = vpop.f32.mrb[117].mxu1  ;;  %v2599_v23 = vpop.f32.mrb[117].mxu0 }
 0x1c3   :  { %v1155_v46 = vpop.f32.mrb[118].mxu1  ;;  %v1358_v24 = vpop.f32.mrb[118].mxu0 }
 0x1c4   :  { %v1227_v36 = vadd.f32 %v1155_v46, %v3766_v58  ;;  %v3864_v59 = vadd.f32 %v1358_v24, %v1225_v28  ;;  %v2600_v43 = vpop.f32.mrb[119].mxu0  ;;  %v2558_v42 = vpop.f32.mrb[119].mxu1 }
 0x1c9   :  { %v1160_v4 = vpop.f32.mrb[120].mxu1  ;;  %v1363_v51 = vpop.f32.mrb[120].mxu0 }
 0x1ca   :  { %v1228_v39 = vadd.f32 %v1160_v4, %v3787_v55  ;;  %v3867_v5 = vadd.f32 %v1363_v51, %v1226_v40  ;;  %v2561_v9 = vpop.f32.mrb[121].mxu1  ;;  %v2603_v53 = vpop.f32.mrb[121].mxu0 }
 0x1cb   :  { %v1163_v50 = vpop.f32.mrb[122].mxu1  ;;  %v1366_v27 = vpop.f32.mrb[122].mxu0 }
 0x1cc   :  { %v1229_v63 = vadd.f32 %v1163_v50, %v3790_v61  ;;  %v3870_v3 = vadd.f32 %v1366_v27, %v1227_v36  ;;  %v2604_v62 = vpop.f32.mrb[123].mxu0  ;;  %v2562_v58 = vpop.f32.mrb[123].mxu1 }
 0x1d1   :  { %v1168_v47 = vpop.f32.mrb[124].mxu1  ;;  %v1371_v57 = vpop.f32.mrb[124].mxu0 }
 0x1d2   :  { %v1230_v2 = vadd.f32 %v1168_v47, %v3808_v31  ;;  %v3873_v20 = vadd.f32 %v1371_v57, %v1228_v39  ;;  %v2565_v35 = vpop.f32.mrb[125].mxu1  ;;  %v2607_v55 = vpop.f32.mrb[125].mxu0 }
 0x1d3   :  { %v1171_v15 = vpop.f32.mrb[126].mxu1  ;;  %v1374_v60 = vpop.f32.mrb[126].mxu0 }
 0x1d4   :  { %v1231_v16 = vadd.f32 %v1171_v15, %v3811_v22  ;;  %v3876_v1 = vadd.f32 %v1374_v60, %v1229_v63  ;;  %v2608_v49 = vpop.f32.mrb[127].mxu0  ;;  %v2566_v61 = vpop.f32.mrb[127].mxu1 }
 0x1d9   :  { %v1176_v18 = vpop.f32.mrb[128].mxu1  ;;  %v1379_v29 = vpop.f32.mrb[128].mxu0 }
 0x1da   :  { %v1232_v33 = vadd.f32 %v1176_v18, %v3821_v26  ;;  %v3879_v13 = vadd.f32 %v1379_v29, %v1230_v2  ;;  %v2569_v6 = vpop.f32.mrb[129].mxu1  ;;  %v2611_v31 = vpop.f32.mrb[129].mxu0 }
 0x1db   :  { %v1179_v34 = vpop.f32.mrb[130].mxu1  ;;  %v1382_v12 = vpop.f32.mrb[130].mxu0 }
 0x1dc   :  { %v1233_v30 = vadd.f32 %v1179_v34, %v3824_v10  ;;  %v3882_v44 = vadd.f32 %v1382_v12, %v1231_v16  ;;  %v2612_v21 = vpop.f32.mrb[131].mxu0  ;;  %v2570_v22 = vpop.f32.mrb[131].mxu1 }
 0x1e1   :  { %v1184_v28 = vpop.f32.mrb[132].mxu1  ;;  %v1387_v37 = vpop.f32.mrb[132].mxu0 }
 0x1e2   :  { %v1234_v25 = vadd.f32 %v1184_v28, %v3828_v8  ;;  %v3885_v45 = vadd.f32 %v1387_v37, %v1232_v33  ;;  %v2573_v7 = vpop.f32.mrb[133].mxu1  ;;  %v2615_v26 = vpop.f32.mrb[133].mxu0 }
 0x1e3   :  { %v1187_v40 = vpop.f32.mrb[134].mxu1  ;;  %v1390_v48 = vpop.f32.mrb[134].mxu0 }
 0x1e4   :  { %v1235_v23 = vadd.f32 %v1187_v40, %v3831_v14  ;;  %v3888_v46 = vadd.f32 %v1390_v48, %v1233_v30  ;;  %v2616_v24 = vpop.f32.mrb[135].mxu0  ;;  %v2574_v10 = vpop.f32.mrb[135].mxu1 }
 0x1e9   :  { %v1192_v36 = vpop.f32.mrb[136].mxu1  ;;  %v1395_v43 = vpop.f32.mrb[136].mxu0 }
 0x1ea   :  { %v1236_v42 = vadd.f32 %v1192_v36, %v3834_v19  ;;  %v3891_v4 = vadd.f32 %v1395_v43, %v1234_v25  ;;  %v2577_v51 = vpop.f32.mrb[137].mxu1  ;;  %v2619_v8 = vpop.f32.mrb[137].mxu0 }
 0x1eb   :  { %v1195_v39 = vpop.f32.mrb[138].mxu1  ;;  %v1398_v9 = vpop.f32.mrb[138].mxu0 }
 0x1ec   :  { %v1237_v53 = vadd.f32 %v1195_v39, %v3837_v38  ;;  %v3894_v50 = vadd.f32 %v1398_v9, %v1235_v23  ;;  %v2620_v27 = vpop.f32.mrb[139].mxu0  ;;  %v2578_v14 = vpop.f32.mrb[139].mxu1 }
 0x1ed   :  { %v3920_v27 = vld [vmem:[%s4047_s2] ss:$0 sm:$0xff] }
 0x1f1   :  { %v1200_v63 = vpop.f32.mrb[140].mxu1  ;;  %v1403_v62 = vpop.f32.mrb[140].mxu0 }
 0x1f2   :  { %v1238_v58 = vadd.f32 %v1200_v63, %v3840_v32  ;;  %v3897_v47 = vadd.f32 %v1403_v62, %v1236_v42  ;;  %v2581_v57 = vpop.f32.mrb[141].mxu1  ;;  %v2623_v19 = vpop.f32.mrb[141].mxu0 }
 0x1f3   :  { %v1203_v2 = vpop.f32.mrb[142].mxu1  ;;  %v1406_v35 = vpop.f32.mrb[142].mxu0 }
 0x1f4   :  { %v1239_v55 = vadd.f32 %v1203_v2, %v3843_v17  ;;  %v3900_v15 = vadd.f32 %v1406_v35, %v1237_v53  ;;  %v2624_v60 = vpop.f32.mrb[143].mxu0  ;;  %v2582_v38 = vpop.f32.mrb[143].mxu1 }
 0x1f9   :  { %v1208_v16 = vpop.f32.mrb[144].mxu1  ;;  %v1411_v49 = vpop.f32.mrb[144].mxu0 }
 0x1fa   :  { %v1240_v61 = vadd.f32 %v1208_v16, %v3846_v52  ;;  %v3903_v18 = vadd.f32 %v1411_v49, %v1238_v58  ;;  %v2585_v29 = vpop.f32.mrb[145].mxu1  ;;  %v2627_v32 = vpop.f32.mrb[145].mxu0 }
 0x1fb   :  { %v1211_v33 = vpop.f32.mrb[146].mxu1  ;;  %v1414_v6 = vpop.f32.mrb[146].mxu0 }
 0x1fc   :  { %v1241_v31 = vadd.f32 %v1211_v33, %v3848_v56  ;;  %v3906_v34 = vadd.f32 %v1414_v6, %v1239_v55  ;;  %v2628_v12 = vpop.f32.mrb[147].mxu0  ;;  %v2586_v17 = vpop.f32.mrb[147].mxu1 }
 0x201   :  { %v1216_v30 = vpop.f32.mrb[148].mxu1  ;;  %v1419_v21 = vpop.f32.mrb[148].mxu0 }
 0x202   :  { %v1242_v22 = vadd.f32 %v1216_v30, %v3850_v0  ;;  %v3909_v28 = vadd.f32 %v1419_v21, %v1240_v61  ;;  %v2631_v37 = vpop.f32.mrb[149].mxu0  ;;  %v2589_v52 = vpop.f32.mrb[149].mxu1 }
 0x203   :  { %v1422_v25 = vpop.f32.mrb[150].mxu0  ;;  %v1219_v7 = vpop.f32.mrb[150].mxu1 }
 0x204   :  { %v3911_v26 = vadd.f32 %v1422_v25, %v1241_v31  ;;  %v2632_v40 = vpop.f32.mrb[151].mxu0  ;;  %v2590_v48 = vpop.f32.mrb[151].mxu1 }
 0x209   :  { %v1427_v23 = vpop.f32.mrb[152].mxu0  ;;  %v1558_v56 = vpop.f32.mrb[152].mxu1 }
 0x20a   :  { %v3913_v24 = vadd.f32 %v1427_v23, %v1242_v22  ;;  %v1644_v10 = vadd.f32 %v1558_v56, %v3855_v11  ;;  %v2635_v36 = vpop.f32.mrb[153].mxu0  ;;  %v2641_v43 = vpop.f32.mrb[153].mxu1 }
 0x20b   :  { %v1430_v42 = vpop.f32.mrb[154].mxu0  ;;  %v1561_v0 = vpop.f32.mrb[154].mxu1 }
 0x20c   :  { %v1645_v51 = vadd.f32 %v1561_v0, %v3858_v41  ;;  %v2636_v8 = vpop.f32.mrb[155].mxu0  ;;  %v2642_v39 = vpop.f32.mrb[155].mxu1 }
 0x211   :  { %v1566_v9 = vpop.f32.mrb[156].mxu1  ;;  %v1769_v53 = vpop.f32.mrb[156].mxu0 }
 0x212   :  { %v1646_v14 = vadd.f32 %v1566_v9, %v3861_v54  ;;  %v1855_v63 = vadd.f32 %v1769_v53, %v1644_v10  ;;  %v2645_v62 = vpop.f32.mrb[157].mxu1  ;;  %v2687_v11 = vpop.f32.mrb[157].mxu0 }
 0x213   :  { %v1569_v58 = vpop.f32.mrb[158].mxu1  ;;  %v1772_v57 = vpop.f32.mrb[158].mxu0 }
 0x214   :  { %v1883_v19 = vadd.f32 %v3920_v27, %v1855_v63  ;;  %v1647_v41 = vadd.f32 %v1569_v58, %v3864_v59  ;;  %v1856_v2 = vadd.f32 %v1772_v57, %v1645_v51  ;;  %v2688_v35 = vpop.f32.mrb[159].mxu0  ;;  %v2646_v55 = vpop.f32.mrb[159].mxu1 }
 0x216   :  { %vm1904_vm3 = vcmp.ge.f32.partialorder %v1883_v19, 0.0  ;;  %v1925_v60 = vmul.f32 0.2, %v1883_v19  ;;  %v1884_v38 = vadd.f32 %v3920_v27, %v1856_v2 }
 0x218   :  { %v1946_v16 = vsel %vm1904_vm3, %v1883_v19, %v1925_v60  ;;  %vm1905_vm5 = vcmp.ge.f32.partialorder %v1884_v38, 0.0  ;;  %v1926_v54 = vmul.f32 0.2, %v1884_v38 }
 0x219   :  { %1968 = vst.msk [vmem:[%s4048_s3] sm:$0xff] %vm1967_vm4, %v1946_v16  ;;  %v1574_v49 = vpop.f32.mrb[160].mxu1  ;;  %v1777_v61 = vpop.f32.mrb[160].mxu0 }
 0x21a   :  { %v1947_v29 = vsel %vm1905_vm5, %v1884_v38, %v1926_v54  ;;  %v1648_v59 = vadd.f32 %v1574_v49, %v3867_v5  ;;  %v1857_v32 = vadd.f32 %v1777_v61, %v1646_v14  ;;  %v2649_v33 = vpop.f32.mrb[161].mxu1  ;;  %v2691_v6 = vpop.f32.mrb[161].mxu0 }
 0x21b   :  { %1969 = vst.msk [vmem:[%s4048_s3 + $0x8] sm:$0xff] %vm1967_vm4, %v1947_v29  ;;  %v1577_v31 = vpop.f32.mrb[162].mxu1  ;;  %v1780_v12 = vpop.f32.mrb[162].mxu0 }
 0x21c   :  { %v1885_v17 = vadd.f32 %v3920_v27, %v1857_v32  ;;  %v1649_v30 = vadd.f32 %v1577_v31, %v3870_v3  ;;  %v1858_v21 = vadd.f32 %v1780_v12, %v1647_v41  ;;  %v2692_v22 = vpop.f32.mrb[163].mxu0  ;;  %v2650_v37 = vpop.f32.mrb[163].mxu1 }
 0x21e   :  { %vm1906_vm6 = vcmp.ge.f32.partialorder %v1885_v17, 0.0  ;;  %v1927_v52 = vmul.f32 0.2, %v1885_v17  ;;  %v1886_v5 = vadd.f32 %v3920_v27, %v1858_v21 }
 0x220   :  { %v1948_v25 = vsel %vm1906_vm6, %v1885_v17, %v1927_v52  ;;  %vm1907_vm7 = vcmp.ge.f32.partialorder %v1886_v5, 0.0  ;;  %v1928_v7 = vmul.f32 0.2, %v1886_v5 }
 0x221   :  { %1970 = vst.msk [vmem:[%s4048_s3 + $0x10] sm:$0xff] %vm1967_vm4, %v1948_v25  ;;  %v1582_v40 = vpop.f32.mrb[164].mxu1  ;;  %v1785_v48 = vpop.f32.mrb[164].mxu0 }
 0x222   :  { %v1949_v23 = vsel %vm1907_vm7, %v1886_v5, %v1928_v7  ;;  %v1650_v3 = vadd.f32 %v1582_v40, %v3873_v20  ;;  %v1859_v56 = vadd.f32 %v1785_v48, %v1648_v59  ;;  %v2653_v10 = vpop.f32.mrb[165].mxu1  ;;  %v2695_v36 = vpop.f32.mrb[165].mxu0 }
 0x223   :  { %1971 = vst.msk [vmem:[%s4048_s3 + $0x18] sm:$0xff] %vm1967_vm4, %v1949_v23  ;;  %v1585_v43 = vpop.f32.mrb[166].mxu1  ;;  %v1788_v42 = vpop.f32.mrb[166].mxu0 }
 0x224   :  { %v1887_v0 = vadd.f32 %v3920_v27, %v1859_v56  ;;  %v1651_v51 = vadd.f32 %v1585_v43, %v3876_v1  ;;  %v1860_v8 = vadd.f32 %v1788_v42, %v1649_v30  ;;  %v2696_v39 = vpop.f32.mrb[167].mxu0  ;;  %v2654_v9 = vpop.f32.mrb[167].mxu1 }
 0x226   :  { %vm1908_vm8 = vcmp.ge.f32.partialorder %v1887_v0, 0.0  ;;  %v1929_v53 = vmul.f32 0.2, %v1887_v0  ;;  %v1888_v20 = vadd.f32 %v3920_v27, %v1860_v8 }
 0x228   :  { %v1950_v14 = vsel %vm1908_vm8, %v1887_v0, %v1929_v53  ;;  %vm1909_vm9 = vcmp.ge.f32.partialorder %v1888_v20, 0.0  ;;  %v1930_v63 = vmul.f32 0.2, %v1888_v20 }
 0x229   :  { %1972 = vst.msk [vmem:[%s4048_s3 + $0x20] sm:$0xff] %vm1967_vm4, %v1950_v14  ;;  %v1590_v62 = vpop.f32.mrb[168].mxu1  ;;  %v1793_v11 = vpop.f32.mrb[168].mxu0 }
 0x22a   :  { %v1951_v58 = vsel %vm1909_vm9, %v1888_v20, %v1930_v63  ;;  %v1652_v1 = vadd.f32 %v1590_v62, %v3879_v13  ;;  %v1861_v57 = vadd.f32 %v1793_v11, %v1650_v3  ;;  %v2657_v19 = vpop.f32.mrb[169].mxu1  ;;  %v2699_v41 = vpop.f32.mrb[169].mxu0 }
 0x22b   :  { %1973 = vst.msk [vmem:[%s4048_s3 + $0x28] sm:$0xff] %vm1967_vm4, %v1951_v58  ;;  %v1593_v2 = vpop.f32.mrb[170].mxu1  ;;  %v1796_v35 = vpop.f32.mrb[170].mxu0 }
 0x22c   :  { %v1889_v55 = vadd.f32 %v3920_v27, %v1861_v57  ;;  %v1653_v60 = vadd.f32 %v1593_v2, %v3882_v44  ;;  %v1862_v38 = vadd.f32 %v1796_v35, %v1651_v51  ;;  %v2700_v16 = vpop.f32.mrb[171].mxu0  ;;  %v2658_v54 = vpop.f32.mrb[171].mxu1 }
 0x22e   :  { %vm1910_vm10 = vcmp.ge.f32.partialorder %v1889_v55, 0.0  ;;  %v1931_v49 = vmul.f32 0.2, %v1889_v55  ;;  %v1890_v13 = vadd.f32 %v3920_v27, %v1862_v38 }
 0x230   :  { %v1952_v61 = vsel %vm1910_vm10, %v1889_v55, %v1931_v49  ;;  %vm1911_vm11 = vcmp.ge.f32.partialorder %v1890_v13, 0.0  ;;  %v1932_v29 = vmul.f32 0.2, %v1890_v13  ;;  %vm1988_vm10 = vcmask 123904  }
 0x231   :  { %1974 = vst.msk [vmem:[%s4048_s3 + $0x30] sm:$0xff] %vm1967_vm4, %v1952_v61  ;;  %v1598_v59 = vpop.f32.mrb[172].mxu1  ;;  %v1801_v32 = vpop.f32.mrb[172].mxu0 }
 0x232   :  { %v1953_v33 = vsel %vm1911_vm11, %v1890_v13, %v1932_v29  ;;  %v1654_v44 = vadd.f32 %v1598_v59, %v3885_v45  ;;  %v1863_v6 = vadd.f32 %v1801_v32, %v1652_v1  ;;  %v2661_v31 = vpop.f32.mrb[173].mxu1  ;;  %v2703_v12 = vpop.f32.mrb[173].mxu0 }
 0x233   :  { %1975 = vst.msk [vmem:[%s4048_s3 + $0x38] sm:$0xff] %vm1967_vm4, %v1953_v33  ;;  %v1601_v17 = vpop.f32.mrb[174].mxu1  ;;  %v1804_v30 = vpop.f32.mrb[174].mxu0 }
 0x234   :  { %v1891_v21 = vadd.f32 %v3920_v27, %v1863_v6  ;;  %v1655_v22 = vadd.f32 %v1601_v17, %v3888_v46  ;;  %v1864_v37 = vadd.f32 %v1804_v30, %v1653_v60  ;;  %v2704_v52 = vpop.f32.mrb[175].mxu0  ;;  %v2662_v5 = vpop.f32.mrb[175].mxu1 }
 0x236   :  { %vm1912_vm12 = vcmp.ge.f32.partialorder %v1891_v21, 0.0  ;;  %v1933_v25 = vmul.f32 0.2, %v1891_v21  ;;  %v1892_v45 = vadd.f32 %v3920_v27, %v1864_v37 }
 0x238   :  { %v1954_v7 = vsel %vm1912_vm12, %v1891_v21, %v1933_v25  ;;  %vm1913_vm13 = vcmp.ge.f32.partialorder %v1892_v45, 0.0  ;;  %v1934_v40 = vmul.f32 0.2, %v1892_v45 }
 0x239   :  { %1976 = vst.msk [vmem:[%s4048_s3 + $0x40] sm:$0xff] %vm1967_vm4, %v1954_v7  ;;  %v1606_v48 = vpop.f32.mrb[176].mxu1  ;;  %v1809_v23 = vpop.f32.mrb[176].mxu0 }
 0x23a   :  { %v1955_v3 = vsel %vm1913_vm13, %v1892_v45, %v1934_v40  ;;  %v1656_v46 = vadd.f32 %v1606_v48, %v3891_v4  ;;  %v1865_v56 = vadd.f32 %v1809_v23, %v1654_v44  ;;  %v2665_v10 = vpop.f32.mrb[177].mxu1  ;;  %v2707_v36 = vpop.f32.mrb[177].mxu0 }
 0x23b   :  { %1977 = vst.msk [vmem:[%s4048_s3 + $0x48] sm:$0xff] %vm1967_vm4, %v1955_v3  ;;  %v1609_v43 = vpop.f32.mrb[178].mxu1  ;;  %v1812_v42 = vpop.f32.mrb[178].mxu0 }
 0x23c   :  { %v1893_v0 = vadd.f32 %v3920_v27, %v1865_v56  ;;  %v1657_v51 = vadd.f32 %v1609_v43, %v3894_v50  ;;  %v1866_v8 = vadd.f32 %v1812_v42, %v1655_v22  ;;  %v2708_v39 = vpop.f32.mrb[179].mxu0  ;;  %v2666_v9 = vpop.f32.mrb[179].mxu1 }
 0x23e   :  { %vm1914_vm14 = vcmp.ge.f32.partialorder %v1893_v0, 0.0  ;;  %v1935_v53 = vmul.f32 0.2, %v1893_v0  ;;  %v1894_v4 = vadd.f32 %v3920_v27, %v1866_v8 }
 0x240   :  { %v1956_v20 = vsel %vm1914_vm14, %v1893_v0, %v1935_v53  ;;  %vm1915_vm15 = vcmp.ge.f32.partialorder %v1894_v4, 0.0  ;;  %v1936_v14 = vmul.f32 0.2, %v1894_v4 }
 0x241   :  { %1978 = vst.msk [vmem:[%s4048_s3 + $0x50] sm:$0xff] %vm1967_vm4, %v1956_v20  ;;  %v1614_v63 = vpop.f32.mrb[180].mxu1  ;;  %v1817_v62 = vpop.f32.mrb[180].mxu0 }
 0x242   :  { %v1957_v11 = vsel %vm1915_vm15, %v1894_v4, %v1936_v14  ;;  %v1658_v50 = vadd.f32 %v1614_v63, %v3897_v47  ;;  %v1867_v58 = vadd.f32 %v1817_v62, %v1656_v46  ;;  %v2669_v1 = vpop.f32.mrb[181].mxu1  ;;  %v2711_v57 = vpop.f32.mrb[181].mxu0 }
 0x243   :  { %1979 = vst.msk [vmem:[%s4048_s3 + $0x58] sm:$0xff] %vm1967_vm4, %v1957_v11  ;;  %v1617_v19 = vpop.f32.mrb[182].mxu1  ;;  %v1820_v41 = vpop.f32.mrb[182].mxu0 }
 0x244   :  { %v1895_v2 = vadd.f32 %v3920_v27, %v1867_v58  ;;  %v1659_v35 = vadd.f32 %v1617_v19, %v3900_v15  ;;  %v1868_v55 = vadd.f32 %v1820_v41, %v1657_v51  ;;  %v2712_v60 = vpop.f32.mrb[183].mxu0  ;;  %v2670_v38 = vpop.f32.mrb[183].mxu1 }
 0x246   :  { %vm1916_vm0 = vcmp.ge.f32.partialorder %v1895_v2, 0.0  ;;  %v1937_v16 = vmul.f32 0.2, %v1895_v2  ;;  %v1896_v47 = vadd.f32 %v3920_v27, %v1868_v55 }
 0x248   :  { %v1958_v54 = vsel %vm1916_vm0, %v1895_v2, %v1937_v16  ;;  %vm1917_vm1 = vcmp.ge.f32.partialorder %v1896_v47, 0.0  ;;  %v1938_v49 = vmul.f32 0.2, %v1896_v47 }
 0x249   :  { %1980 = vst.msk [vmem:[%s4048_s3 + $0x60] sm:$0xff] %vm1967_vm4, %v1958_v54  ;;  %v1622_v13 = vpop.f32.mrb[184].mxu1  ;;  %v1825_v61 = vpop.f32.mrb[184].mxu0 }
 0x24a   :  { %v1959_v29 = vsel %vm1917_vm1, %v1896_v47, %v1938_v49  ;;  %v1660_v15 = vadd.f32 %v1622_v13, %v3903_v18  ;;  %v1869_v59 = vadd.f32 %v1825_v61, %v1658_v50  ;;  %v2673_v32 = vpop.f32.mrb[185].mxu1  ;;  %v2715_v33 = vpop.f32.mrb[185].mxu0 }
 0x24b   :  { %1981 = vst.msk [vmem:[%s4048_s3 + $0x68] sm:$0xff] %vm1967_vm4, %v1959_v29  ;;  %v1625_v44 = vpop.f32.mrb[186].mxu1  ;;  %v1828_v6 = vpop.f32.mrb[186].mxu0 }
 0x24c   :  { %v1897_v31 = vadd.f32 %v3920_v27, %v1869_v59  ;;  %v1661_v12 = vadd.f32 %v1625_v44, %v3906_v34  ;;  %v1870_v17 = vadd.f32 %v1828_v6, %v1659_v35  ;;  %v2716_v30 = vpop.f32.mrb[187].mxu0  ;;  %v2674_v21 = vpop.f32.mrb[187].mxu1 }
 0x24e   :  { %vm1918_vm2 = vcmp.ge.f32.partialorder %v1897_v31, 0.0  ;;  %v1939_v22 = vmul.f32 0.2, %v1897_v31  ;;  %v1898_v18 = vadd.f32 %v3920_v27, %v1870_v17 }
 0x250   :  { %v1960_v37 = vsel %vm1918_vm2, %v1897_v31, %v1939_v22  ;;  %vm1919_vm3 = vcmp.ge.f32.partialorder %v1898_v18, 0.0  ;;  %v1940_v52 = vmul.f32 0.2, %v1898_v18 }
 0x251   :  { %1982 = vst.msk [vmem:[%s4048_s3 + $0x70] sm:$0xff] %vm1967_vm4, %v1960_v37  ;;  %v1630_v5 = vpop.f32.mrb[188].mxu1  ;;  %v1833_v25 = vpop.f32.mrb[188].mxu0 }
 0x252   :  { %v1961_v45 = vsel %vm1919_vm3, %v1898_v18, %v1940_v52  ;;  %v1662_v34 = vadd.f32 %v1630_v5, %v3909_v28  ;;  %v1871_v7 = vadd.f32 %v1833_v25, %v1660_v15  ;;  %v2677_v40 = vpop.f32.mrb[189].mxu1  ;;  %v2719_v48 = vpop.f32.mrb[189].mxu0 }
 0x253   :  { %1983 = vst.msk [vmem:[%s4048_s3 + $0x78] sm:$0xff] %vm1967_vm4, %v1961_v45  ;;  %v1633_v23 = vpop.f32.mrb[190].mxu1  ;;  %v1836_v3 = vpop.f32.mrb[190].mxu0 }
 0x254   :  { %v1899_v46 = vadd.f32 %v3920_v27, %v1871_v7  ;;  %v1663_v56 = vadd.f32 %v1633_v23, %v3911_v26  ;;  %v1872_v10 = vadd.f32 %v1836_v3, %v1661_v12  ;;  %v2720_v36 = vpop.f32.mrb[191].mxu0  ;;  %v2678_v43 = vpop.f32.mrb[191].mxu1 }
 0x256   :  { %vm1920_vm5 = vcmp.ge.f32.partialorder %v1899_v46, 0.0  ;;  %v1941_v42 = vmul.f32 0.2, %v1899_v46  ;;  %v1900_v28 = vadd.f32 %v3920_v27, %v1872_v10 }
 0x258   :  { %v1962_v0 = vsel %vm1920_vm5, %v1899_v46, %v1941_v42  ;;  %vm1921_vm6 = vcmp.ge.f32.partialorder %v1900_v28, 0.0  ;;  %v1942_v51 = vmul.f32 0.2, %v1900_v28 }
 0x259   :  { %1984 = vst.msk [vmem:[%s4048_s3 + $0x80] sm:$0xff] %vm1967_vm4, %v1962_v0  ;;  %v1638_v8 = vpop.f32.mrb[192].mxu1  ;;  %v1841_v39 = vpop.f32.mrb[192].mxu0 }
 0x25a   :  { %v1963_v9 = vsel %vm1921_vm6, %v1900_v28, %v1942_v51  ;;  %v1664_v26 = vadd.f32 %v1638_v8, %v3913_v24  ;;  %v1873_v53 = vadd.f32 %v1841_v39, %v1662_v34  ;;  %v2723_v4 = vpop.f32.mrb[193].mxu0  ;;  %v2681_v20 = vpop.f32.mrb[193].mxu1 }
 0x25b   :  { %1985 = vst.msk [vmem:[%s4048_s3 + $0x88] sm:$0xff] %vm1967_vm4, %v1963_v9  ;;  %v1844_v14 = vpop.f32.mrb[194].mxu0  ;;  %v1641_v63 = vpop.f32.mrb[194].mxu1 }
 0x25c   :  { %v1901_v62 = vadd.f32 %v3920_v27, %v1873_v53  ;;  %v1874_v11 = vadd.f32 %v1844_v14, %v1663_v56  ;;  %v2724_v50 = vpop.f32.mrb[195].mxu0  ;;  %v2682_v58 = vpop.f32.mrb[195].mxu1 }
 0x25e   :  { %vm1922_vm7 = vcmp.ge.f32.partialorder %v1901_v62, 0.0  ;;  %v1943_v1 = vmul.f32 0.2, %v1901_v62  ;;  %v1902_v57 = vadd.f32 %v3920_v27, %v1874_v11 }
 0x260   :  { %v1964_v24 = vsel %vm1922_vm7, %v1901_v62, %v1943_v1  ;;  %vm1923_vm8 = vcmp.ge.f32.partialorder %v1902_v57, 0.0  ;;  %v1944_v19 = vmul.f32 0.2, %v1902_v57 }
 0x261   :  { %1986 = vst.msk [vmem:[%s4048_s3 + $0x90] sm:$0xff] %vm1967_vm4, %v1964_v24  ;;  %v1849_v41 = vpop.f32.mrb[196].mxu0 }
 0x262   :  { %v1965_v2 = vsel %vm1923_vm8, %v1902_v57, %v1944_v19  ;;  %v1875_v35 = vadd.f32 %v1849_v41, %v1664_v26  ;;  %v2727_v55 = vpop.f32.mrb[197].mxu0 }
 0x263   :  { %1987 = vst.msk [vmem:[%s4048_s3 + $0x98] sm:$0xff] %vm1967_vm4, %v1965_v2  ;;  %v1852_v60 = vpop.f32.mrb[198].mxu0 }
 0x264   :  { %v1903_v38 = vadd.f32 %v3920_v27, %v1875_v35  ;;  %v2728_v16 = vpop.f32.mrb[199].mxu0 }
 0x266   :  { %vm1924_vm9 = vcmp.ge.f32.partialorder %v1903_v38, 0.0  ;;  %v1945_v47 = vmul.f32 0.2, %v1903_v38 }
 0x268   :  { %v1966_v54 = vsel %vm1924_vm9, %v1903_v38, %v1945_v47 }
 0x269   :  { %1989 = vst.msk [vmem:[%s4048_s3 + $0xa0] sm:$0x3] %vm1988_vm10, %v1966_v54 }

// kernel: shape_cam_tex_net_forward.5
= control target key start
LH: loop header
LB: loop body
LE: loop exit
PB: predicated region body
PF: predicated region fallthrough
CT: control target
= control target key end

     0   :  { %vm351_vm0 = vcmask 1040384   ;;  %vm352_vm1 = vcmask 1041408   ;;  %v12597_v0 = vmov 0.0   ;;  %v8303_v2 = vmov 65535   ;;  %s12593_s1 = inlined_call_operand.vmem [shape: bf16[9,3,8], index: 1, kind: input, shape index: {}]   ;;  %s12594_s0 = inlined_call_operand.vmem [shape: f32[2,2,596,3], index: 0, kind: input, shape index: {}]   ;;  %s12595_s2 = inlined_call_operand.vmem [shape: f32[1,8], index: 2, kind: input, shape index: {}]   ;;  %s12596_s3 = inlined_call_operand.vmem [shape: f32[578,8], index: 3, kind: output, shape index: {}]  }
   0x1   :  { %6946 = vmatprep.subr.bf16.mxu0 %v12597_v0  ;;  %8296 = vmatprep.subr.bf16.mxu1 %v12597_v0  ;;  %v5970_v1 = vld [vmem:[%s12593_s1 + $0x2] sm:$0x3]  ;;  %v353_v3 = vsel %vm351_vm0, 4294967295, %v8303_v2  ;;  %v5897_v4 = vld [vmem:[%s12594_s0 + $0x258] sm:$0xff]  ;;  %vm8304_vm2 = vmmov 0   ;;  %v5935_v7 = vld [vmem:[%s12594_s0 + $0x388] sm:$0xff] }
   0x2   :  { %v5898_v5 = vld [vmem:[%s12594_s0 + $0x260] sm:$0xff]  ;;  %v8336_v6 = vsel %vm352_vm1, %v353_v3, 0  ;;  %6948 = vmatprep.mubr.msk.bf16.mxu0 %vm8304_vm2, %v12597_v0  ;;  %7024 = vmatprep.mubr.msk.bf16.mxu1 %vm8304_vm2, %v12597_v0  ;;  %v5936_v8 = vld [vmem:[%s12594_s0 + $0x390] sm:$0xff]  ;;  %vm239_vm3 = vcmask 23552   ;;  %v5899_v16 = vld [vmem:[%s12594_s0 + $0x268] sm:$0xff]  ;;  %vm5818_vm5 = vcmask 64512  }
   0x3   :  { %v6045_v9 = vld [vmem:[%s12593_s1 + $0x4] sm:$0x3]  ;;  %v356_v10 = vand.u32 %v5970_v1, %v8336_v6  ;;  %v125_v11 = vld [vmem:[%s12593_s1] sm:$0x3]  ;;  %v200_v12 = vpack.c.bf16 %v5898_v5, %v5897_v4  ;;  %v219_v13 = vpack.c.bf16 %v5936_v8, %v5935_v7  ;;  %v5900_v17 = vld [vmem:[%s12594_s0 + $0x270] sm:$0xff] }
   0x4   :  { %v1352_v14 = vand.u32 %v6045_v9, %v8336_v6  ;;  %v798_v15 = vand.u32 %v8336_v6, %v125_v11  ;;  %v5937_v18 = vld [vmem:[%s12594_s0 + $0x398] sm:$0xff]  ;;  %v5938_v19 = vld [vmem:[%s12594_s0 + $0x3a0] sm:$0xff]  ;;  %v201_v20 = vpack.c.bf16 %v5900_v17, %v5899_v16  ;;  %v5939_v24 = vld [vmem:[%s12594_s0 + $0x3a8] sm:$0xff] }
   0x5   :  { %6947 = vmatpush3.bf16.msra.mxu0 %v356_v10  ;;  %8297 = vmatpush3.bf16.msra.mxu1 %v356_v10  ;;  %v220_v21 = vpack.c.bf16 %v5938_v19, %v5937_v18  ;;  %v5901_v22 = vld [vmem:[%s12594_s0 + $0x278] sm:$0xff]  ;;  %v5902_v23 = vld [vmem:[%s12594_s0 + $0x280] sm:$0xff]  ;;  %v5940_v25 = vld [vmem:[%s12594_s0 + $0x3b0] sm:$0xff] }
   0x6   :  { %7246 = vmatprep.subr.bf16.mxu0 %v12597_v0  ;;  %7096 = vmatprep.subr.bf16.mxu1 %v12597_v0  ;;  %v202_v26 = vpack.c.bf16 %v5902_v23, %v5901_v22  ;;  %v221_v27 = vpack.c.bf16 %v5940_v25, %v5939_v24  ;;  %v5903_v28 = vld [vmem:[%s12594_s0 + $0x288] sm:$0xff]  ;;  %v5904_v29 = vld [vmem:[%s12594_s0 + $0x290] sm:$0xff]  ;;  %v5941_v30 = vld [vmem:[%s12594_s0 + $0x3b8] sm:$0xff] }
   0x7   :  { %v5942_v31 = vld [vmem:[%s12594_s0 + $0x3c0] sm:$0xff]  ;;  %v203_v32 = vpack.c.bf16 %v5904_v29, %v5903_v28  ;;  %v5905_v34 = vld [vmem:[%s12594_s0 + $0x298] sm:$0xff]  ;;  %v5943_v36 = vld [vmem:[%s12594_s0 + $0x3c8] sm:$0xff] }
   0x8   :  { %6949 = vmatmul.mubr.msk.bf16.vlgmr.msra.gmra.mrb[0].mxu0 %vm239_vm3, %v200_v12  ;;  %7025 = vmatmul.mubr.msk.bf16.vlgmr.msra.gmra.mrb[0].mxu1 %vm239_vm3, %v219_v13  ;;  %v222_v33 = vpack.c.bf16 %v5942_v31, %v5941_v30  ;;  %v5906_v35 = vld [vmem:[%s12594_s0 + $0x2a0] sm:$0xff]  ;;  %v5944_v37 = vld [vmem:[%s12594_s0 + $0x3d0] sm:$0xff]  ;;  %v5907_v40 = vld [vmem:[%s12594_s0 + $0x2a8] sm:$0xff] }
   0x9   :  { %7247 = vmatpush3.bf16.msra.mxu0 %v1352_v14  ;;  %6952 = vmatprep.mubr.msk.bf16.mxu0 %vm8304_vm2, %v12597_v0  ;;  %v204_v38 = vpack.c.bf16 %v5906_v35, %v5905_v34  ;;  %v223_v39 = vpack.c.bf16 %v5944_v37, %v5943_v36  ;;  %v5908_v41 = vld [vmem:[%s12594_s0 + $0x2b0] sm:$0xff]  ;;  %v5945_v42 = vld [vmem:[%s12594_s0 + $0x3d8] sm:$0xff]  ;;  %v5946_v43 = vld [vmem:[%s12594_s0 + $0x3e0] sm:$0xff] }
   0xa   :  { %7028 = vmatprep.mubr.msk.bf16.mxu1 %vm8304_vm2, %v12597_v0  ;;  %7097 = vmatpush3.bf16.msra.mxu1 %v798_v15  ;;  %v205_v44 = vpack.c.bf16 %v5908_v41, %v5907_v40  ;;  %v224_v45 = vpack.c.bf16 %v5946_v43, %v5945_v42  ;;  %v5909_v46 = vld [vmem:[%s12594_s0 + $0x2b8] sm:$0xff]  ;;  %v5910_v47 = vld [vmem:[%s12594_s0 + $0x2c0] sm:$0xff]  ;;  %v5947_v48 = vld [vmem:[%s12594_s0 + $0x3e8] sm:$0xff] }
   0xb   :  { %7396 = vmatprep.subr.bf16.mxu1 %v12597_v0  ;;  %7546 = vmatprep.subr.bf16.mxu0 %v12597_v0  ;;  %v5948_v49 = vld [vmem:[%s12594_s0 + $0x3f0] sm:$0xff]  ;;  %v206_v50 = vpack.c.bf16 %v5910_v47, %v5909_v46  ;;  %v5911_v52 = vld [vmem:[%s12594_s0 + $0x2c8] sm:$0xff]  ;;  %v5949_v54 = vld [vmem:[%s12594_s0 + $0x3f8] sm:$0xff] }
   0xc   :  { %v225_v51 = vpack.c.bf16 %v5948_v49, %v5947_v48  ;;  %v5912_v53 = vld [vmem:[%s12594_s0 + $0x2d0] sm:$0xff]  ;;  %v5950_v55 = vld [vmem:[%s12594_s0 + $0x400] sm:$0xff]  ;;  %v5913_v58 = vld [vmem:[%s12594_s0 + $0x2d8] sm:$0xff] }
   0xd   :  { %v207_v56 = vpack.c.bf16 %v5912_v53, %v5911_v52  ;;  %v226_v57 = vpack.c.bf16 %v5950_v55, %v5949_v54  ;;  %v5914_v59 = vld [vmem:[%s12594_s0 + $0x2e0] sm:$0xff]  ;;  %v5951_v60 = vld [vmem:[%s12594_s0 + $0x408] sm:$0xff]  ;;  %v5952_v61 = vld [vmem:[%s12594_s0 + $0x410] sm:$0xff] }
   0xe   :  { %v208_v62 = vpack.c.bf16 %v5914_v59, %v5913_v58  ;;  %v227_v63 = vpack.c.bf16 %v5952_v61, %v5951_v60  ;;  %v5915_v1 = vld [vmem:[%s12594_s0 + $0x2e8] sm:$0xff]  ;;  %v5916_v2 = vld [vmem:[%s12594_s0 + $0x2f0] sm:$0xff]  ;;  %v5953_v3 = vld [vmem:[%s12594_s0 + $0x418] sm:$0xff] }
   0xf   :  { %v5954_v4 = vld [vmem:[%s12594_s0 + $0x420] sm:$0xff]  ;;  %v209_v5 = vpack.c.bf16 %v5916_v2, %v5915_v1  ;;  %v5917_v8 = vld [vmem:[%s12594_s0 + $0x2f8] sm:$0xff]  ;;  %v5955_v10 = vld [vmem:[%s12594_s0 + $0x428] sm:$0xff] }
  0x10   :  { %6953 = vmatmul.mubr.msk.bf16.gmra.mrb[4].mxu0 %vm239_vm3, %v201_v20  ;;  %7029 = vmatmul.mubr.msk.bf16.gmra.mrb[4].mxu1 %vm239_vm3, %v220_v21  ;;  %v228_v7 = vpack.c.bf16 %v5954_v4, %v5953_v3  ;;  %v5918_v9 = vld [vmem:[%s12594_s0 + $0x300] sm:$0xff]  ;;  %v5956_v11 = vld [vmem:[%s12594_s0 + $0x430] sm:$0xff]  ;;  %v5919_v14 = vld [vmem:[%s12594_s0 + $0x308] sm:$0xff] }
  0x11   :  { %6956 = vmatprep.mubr.msk.bf16.mxu0 %vm8304_vm2, %v12597_v0  ;;  %7032 = vmatprep.mubr.msk.bf16.mxu1 %vm8304_vm2, %v12597_v0  ;;  %v210_v12 = vpack.c.bf16 %v5918_v9, %v5917_v8  ;;  %v229_v13 = vpack.c.bf16 %v5956_v11, %v5955_v10  ;;  %v5920_v15 = vld [vmem:[%s12594_s0 + $0x310] sm:$0xff]  ;;  %v5957_v16 = vld [vmem:[%s12594_s0 + $0x438] sm:$0xff]  ;;  %v5958_v17 = vld [vmem:[%s12594_s0 + $0x440] sm:$0xff] }
  0x12   :  { %v211_v18 = vpack.c.bf16 %v5920_v15, %v5919_v14  ;;  %v230_v19 = vpack.c.bf16 %v5958_v17, %v5957_v16  ;;  %v5921_v20 = vld [vmem:[%s12594_s0 + $0x318] sm:$0xff]  ;;  %v5922_v21 = vld [vmem:[%s12594_s0 + $0x320] sm:$0xff]  ;;  %v5959_v22 = vld [vmem:[%s12594_s0 + $0x448] sm:$0xff] }
  0x13   :  { %v5960_v23 = vld [vmem:[%s12594_s0 + $0x450] sm:$0xff]  ;;  %v212_v24 = vpack.c.bf16 %v5922_v21, %v5921_v20  ;;  %v5961_v28 = vld [vmem:[%s12594_s0 + $0x458] sm:$0xff]  ;;  %v5962_v29 = vld [vmem:[%s12594_s0 + $0x460] sm:$0xff] }
  0x14   :  { %v231_v25 = vpack.c.bf16 %v5960_v23, %v5959_v22  ;;  %v232_v31 = vpack.c.bf16 %v5962_v29, %v5961_v28  ;;  %v5963_v34 = vld [vmem:[%s12594_s0 + $0x468] sm:$0xff]  ;;  %v5964_v35 = vld [vmem:[%s12594_s0 + $0x470] sm:$0xff]  ;;  %v5965_v40 = vld [vmem:[%s12594_s0 + $0x478] sm:$0xff] }
  0x15   :  { %v233_v37 = vpack.c.bf16 %v5964_v35, %v5963_v34  ;;  %v5966_v41 = vld [vmem:[%s12594_s0 + $0x480] sm:$0xff]  ;;  %v5967_v46 = vld [vmem:[%s12594_s0 + $0x488] sm:$0xff]  ;;  %v5968_v47 = vld [vmem:[%s12594_s0 + $0x490] sm:$0xff] }
  0x16   :  { %v234_v43 = vpack.c.bf16 %v5966_v41, %v5965_v40  ;;  %v235_v49 = vpack.c.bf16 %v5968_v47, %v5967_v46  ;;  %v5969_v52 = vld [vmem:[%s12594_s0 + $0x498] sm:$0x3]  ;;  %v16_v58 = vld [vmem:[%s12594_s0 + $0x8] sm:$0xff]  ;;  %v6156_v59 = vld [vmem:[%s12593_s1 + $0x6] sm:$0x3] }
  0x17   :  { %v236_v54 = vpack.c.bf16 %v5969_v52, %v5969_v52  ;;  %v5933_v55 = vld [vmem:[%s12594_s0 + $0x378] sm:$0xff]  ;;  %v1128_v2 = vld [vmem:[%s12594_s0 + $0x1] sm:$0xff]  ;;  %v1129_v3 = vld [vmem:[%s12594_s0 + $0x9] sm:$0xff] }
  0x18   :  { %6957 = vmatmul.mubr.msk.bf16.gmra.mrb[8].mxu0 %vm239_vm3, %v202_v26  ;;  %7033 = vmatmul.mubr.msk.bf16.gmra.mrb[8].mxu1 %vm239_vm3, %v221_v27  ;;  %v5923_v26 = vld [vmem:[%s12594_s0 + $0x328] sm:$0xff]  ;;  %v5924_v27 = vld [vmem:[%s12594_s0 + $0x330] sm:$0xff]  ;;  %v18_v1 = vld [vmem:[%s12594_s0 + $0x18] sm:$0xff] }
  0x19   :  { %6960 = vmatprep.mubr.msk.bf16.mxu0 %vm8304_vm2, %v12597_v0  ;;  %7036 = vmatprep.mubr.msk.bf16.mxu1 %vm8304_vm2, %v12597_v0  ;;  %v213_v30 = vpack.c.bf16 %v5924_v27, %v5923_v26  ;;  %v6267_v4 = vld [vmem:[%s12593_s1 + $0x8] sm:$0x3]  ;;  %v19_v9 = vld [vmem:[%s12594_s0 + $0x20] sm:$0xff]  ;;  %v1130_v11 = vld [vmem:[%s12594_s0 + $0x11] sm:$0xff] }
  0x1a   :  { %v2608_v8 = vand.u32 %v6267_v4, %v8336_v6  ;;  %v20_v10 = vld [vmem:[%s12594_s0 + $0x28] sm:$0xff]  ;;  %v21_v15 = vld [vmem:[%s12594_s0 + $0x30] sm:$0xff]  ;;  %v22_v16 = vld [vmem:[%s12594_s0 + $0x38] sm:$0xff] }
  0x1b   :  { %v1132_v17 = vld [vmem:[%s12594_s0 + $0x21] sm:$0xff]  ;;  %v1134_v23 = vld [vmem:[%s12594_s0 + $0x31] sm:$0xff] }
  0x1c   :  { %v23_v21 = vld [vmem:[%s12594_s0 + $0x40] sm:$0xff]  ;;  %v24_v22 = vld [vmem:[%s12594_s0 + $0x48] sm:$0xff]  ;;  %v25_v27 = vld [vmem:[%s12594_s0 + $0x50] sm:$0xff] }
  0x1d   :  { %v26_v28 = vld [vmem:[%s12594_s0 + $0x58] sm:$0xff]  ;;  %v1136_v29 = vld [vmem:[%s12594_s0 + $0x41] sm:$0xff] }
  0x1e   :  { %v28_v34 = vld [vmem:[%s12594_s0 + $0x68] sm:$0xff]  ;;  %v1138_v35 = vld [vmem:[%s12594_s0 + $0x51] sm:$0xff] }
  0x1f   :  { %v30_v40 = vld [vmem:[%s12594_s0 + $0x78] sm:$0xff]  ;;  %v1140_v41 = vld [vmem:[%s12594_s0 + $0x61] sm:$0xff] }
  0x20   :  { %6961 = vmatmul.mubr.msk.bf16.gmra.mrb[12].mxu0 %vm239_vm3, %v203_v32  ;;  %7037 = vmatmul.mubr.msk.bf16.gmra.mrb[12].mxu1 %vm239_vm3, %v222_v33  ;;  %v5925_v32 = vld [vmem:[%s12594_s0 + $0x338] sm:$0xff]  ;;  %v5926_v33 = vld [vmem:[%s12594_s0 + $0x340] sm:$0xff]  ;;  %v32_v46 = vld [vmem:[%s12594_s0 + $0x88] sm:$0xff] }
  0x21   :  { %6964 = vmatprep.mubr.msk.bf16.mxu0 %vm8304_vm2, %v12597_v0  ;;  %7040 = vmatprep.mubr.msk.bf16.mxu1 %vm8304_vm2, %v12597_v0  ;;  %v214_v36 = vpack.c.bf16 %v5926_v33, %v5925_v32  ;;  %v27_v33 = vld [vmem:[%s12594_s0 + $0x60] sm:$0xff]  ;;  %v1142_v47 = vld [vmem:[%s12594_s0 + $0x71] sm:$0xff] }
  0x22   :  { %v34_v52 = vld [vmem:[%s12594_s0 + $0x98] sm:$0xff] }
  0x23   :  { %v1146_v4 = vld [vmem:[%s12594_s0 + $0x91] sm:$0xff] }
  0x28   :  { %6965 = vmatmul.mubr.msk.bf16.gmra.mrb[16].mxu0 %vm239_vm3, %v204_v38  ;;  %7041 = vmatmul.mubr.msk.bf16.gmra.mrb[16].mxu1 %vm239_vm3, %v223_v39  ;;  %v5927_v38 = vld [vmem:[%s12594_s0 + $0x348] sm:$0xff]  ;;  %v5928_v39 = vld [vmem:[%s12594_s0 + $0x350] sm:$0xff] }
  0x29   :  { %6968 = vmatprep.mubr.msk.bf16.mxu0 %vm8304_vm2, %v12597_v0  ;;  %7044 = vmatprep.mubr.msk.bf16.mxu1 %vm8304_vm2, %v12597_v0  ;;  %v215_v42 = vpack.c.bf16 %v5928_v39, %v5927_v38  ;;  %v29_v39 = vld [vmem:[%s12594_s0 + $0x70] sm:$0xff] }
  0x30   :  { %6969 = vmatmul.mubr.msk.bf16.gmra.mrb[20].mxu0 %vm239_vm3, %v205_v44  ;;  %7045 = vmatmul.mubr.msk.bf16.gmra.mrb[20].mxu1 %vm239_vm3, %v224_v45  ;;  %v5929_v44 = vld [vmem:[%s12594_s0 + $0x358] sm:$0xff]  ;;  %v5930_v45 = vld [vmem:[%s12594_s0 + $0x360] sm:$0xff] }
  0x31   :  { %6972 = vmatprep.mubr.msk.bf16.mxu0 %vm8304_vm2, %v12597_v0  ;;  %7048 = vmatprep.mubr.msk.bf16.mxu1 %vm8304_vm2, %v12597_v0  ;;  %v216_v48 = vpack.c.bf16 %v5930_v45, %v5929_v44  ;;  %v31_v45 = vld [vmem:[%s12594_s0 + $0x80] sm:$0xff] }
  0x38   :  { %6973 = vmatmul.mubr.msk.bf16.gmra.mrb[24].mxu0 %vm239_vm3, %v206_v50  ;;  %7049 = vmatmul.mubr.msk.bf16.gmra.mrb[24].mxu1 %vm239_vm3, %v225_v51  ;;  %v5931_v50 = vld [vmem:[%s12594_s0 + $0x368] sm:$0xff]  ;;  %v5932_v51 = vld [vmem:[%s12594_s0 + $0x370] sm:$0xff] }
  0x39   :  { %6976 = vmatprep.mubr.msk.bf16.mxu0 %vm8304_vm2, %v12597_v0  ;;  %7052 = vmatprep.mubr.msk.bf16.mxu1 %vm8304_vm2, %v12597_v0  ;;  %v217_v53 = vpack.c.bf16 %v5932_v51, %v5931_v50  ;;  %v33_v51 = vld [vmem:[%s12594_s0 + $0x90] sm:$0xff] }
  0x40   :  { %6977 = vmatmul.mubr.msk.bf16.gmra.mrb[28].mxu0 %vm239_vm3, %v207_v56  ;;  %7053 = vmatmul.mubr.msk.bf16.gmra.mrb[28].mxu1 %vm239_vm3, %v226_v57  ;;  %v5934_v56 = vld [vmem:[%s12594_s0 + $0x380] sm:$0xff] }
  0x41   :  { %6980 = vmatprep.mubr.msk.bf16.mxu0 %vm8304_vm2, %v12597_v0  ;;  %7056 = vmatprep.mubr.msk.bf16.mxu1 %vm8304_vm2, %v12597_v0  ;;  %v15_v57 = vld [vmem:[%s12594_s0] sm:$0xff]  ;;  %v218_v60 = vpack.c.bf16 %v5934_v56, %v5933_v55 }
  0x42   :  { %v88_v61 = vpack.c.bf16 %v16_v58, %v15_v57 }
  0x48   :  { %6981 = vmatmul.mubr.msk.bf16.gmra.mrb[32].mxu0 %vm239_vm3, %v208_v62  ;;  %7057 = vmatmul.mubr.msk.bf16.gmra.mrb[32].mxu1 %vm239_vm3, %v227_v63  ;;  %v1980_v62 = vand.u32 %v6156_v59, %v8336_v6  ;;  %v17_v63 = vld [vmem:[%s12594_s0 + $0x10] sm:$0xff]  ;;  %v97_v59 = vpack.c.bf16 %v34_v52, %v33_v51 }
  0x49   :  { %6984 = vmatprep.mubr.msk.bf16.mxu0 %vm8304_vm2, %v12597_v0  ;;  %7060 = vmatprep.mubr.msk.bf16.mxu1 %vm8304_vm2, %v12597_v0 }
  0x50   :  { %6985 = vmatmul.mubr.msk.bf16.gmra.mrb[36].mxu0 %vm239_vm3, %v209_v5  ;;  %7061 = vmatmul.mubr.msk.bf16.gmra.mrb[36].mxu1 %vm239_vm3, %v228_v7  ;;  %v89_v5 = vpack.c.bf16 %v18_v1, %v17_v63  ;;  %v1201_v7 = vpack.c.bf16 %v1129_v3, %v1128_v2  ;;  %v35_v2 = vld [vmem:[%s12594_s0 + $0xa0] sm:$0xff]  ;;  %v36_v3 = vld [vmem:[%s12594_s0 + $0xa8] sm:$0xff] }
  0x51   :  { %6988 = vmatprep.mubr.msk.bf16.mxu0 %vm8304_vm2, %v12597_v0  ;;  %7064 = vmatprep.mubr.msk.bf16.mxu1 %vm8304_vm2, %v12597_v0 }
  0x58   :  { %6989 = vmatmul.mubr.msk.bf16.gmra.mrb[40].mxu0 %vm239_vm3, %v210_v12  ;;  %7065 = vmatmul.mubr.msk.bf16.gmra.mrb[40].mxu1 %vm239_vm3, %v229_v13  ;;  %v1131_v12 = vld [vmem:[%s12594_s0 + $0x19] sm:$0xff]  ;;  %v90_v13 = vpack.c.bf16 %v20_v10, %v19_v9 }
  0x59   :  { %6992 = vmatprep.mubr.msk.bf16.mxu0 %vm8304_vm2, %v12597_v0  ;;  %7068 = vmatprep.mubr.msk.bf16.mxu1 %vm8304_vm2, %v12597_v0  ;;  %v1202_v14 = vpack.c.bf16 %v1131_v12, %v1130_v11  ;;  %v98_v11 = vpack.c.bf16 %v36_v3, %v35_v2  ;;  %v1154_v2 = vld [vmem:[%s12594_s0 + $0xd1] sm:$0xff]  ;;  %v1155_v3 = vld [vmem:[%s12594_s0 + $0xd9] sm:$0xff] }
  0x60   :  { %6993 = vmatmul.mubr.msk.bf16.gmra.mrb[44].mxu0 %vm239_vm3, %v211_v18  ;;  %7069 = vmatmul.mubr.msk.bf16.gmra.mrb[44].mxu1 %vm239_vm3, %v230_v19  ;;  %v1133_v18 = vld [vmem:[%s12594_s0 + $0x29] sm:$0xff]  ;;  %v91_v19 = vpack.c.bf16 %v22_v16, %v21_v15 }
  0x61   :  { %6996 = vmatprep.mubr.msk.bf16.mxu0 %vm8304_vm2, %v12597_v0  ;;  %7072 = vmatprep.mubr.msk.bf16.mxu1 %vm8304_vm2, %v12597_v0  ;;  %v1203_v20 = vpack.c.bf16 %v1133_v18, %v1132_v17  ;;  %v37_v17 = vld [vmem:[%s12594_s0 + $0xb0] sm:$0xff]  ;;  %v38_v18 = vld [vmem:[%s12594_s0 + $0xb8] sm:$0xff] }
  0x68   :  { %6997 = vmatmul.mubr.msk.bf16.gmra.mrb[48].mxu0 %vm239_vm3, %v212_v24  ;;  %7073 = vmatmul.mubr.msk.bf16.gmra.mrb[48].mxu1 %vm239_vm3, %v231_v25  ;;  %v1135_v24 = vld [vmem:[%s12594_s0 + $0x39] sm:$0xff]  ;;  %v92_v25 = vpack.c.bf16 %v24_v22, %v23_v21 }
  0x69   :  { %7000 = vmatprep.mubr.msk.bf16.mxu0 %vm8304_vm2, %v12597_v0  ;;  %7076 = vmatprep.mubr.msk.bf16.mxu1 %vm8304_vm2, %v12597_v0  ;;  %v1204_v26 = vpack.c.bf16 %v1135_v24, %v1134_v23 }
  0x70   :  { %7001 = vmatmul.mubr.msk.bf16.gmra.mrb[52].mxu0 %vm239_vm3, %v213_v30  ;;  %7077 = vmatmul.mubr.msk.bf16.gmra.mrb[52].mxu1 %vm239_vm3, %v232_v31  ;;  %v1137_v30 = vld [vmem:[%s12594_s0 + $0x49] sm:$0xff]  ;;  %v93_v31 = vpack.c.bf16 %v26_v28, %v25_v27 }
  0x71   :  { %7004 = vmatprep.mubr.msk.bf16.mxu0 %vm8304_vm2, %v12597_v0  ;;  %7080 = vmatprep.mubr.msk.bf16.mxu1 %vm8304_vm2, %v12597_v0  ;;  %v1205_v32 = vpack.c.bf16 %v1137_v30, %v1136_v29 }
  0x78   :  { %7005 = vmatmul.mubr.msk.bf16.gmra.mrb[56].mxu0 %vm239_vm3, %v214_v36  ;;  %7081 = vmatmul.mubr.msk.bf16.gmra.mrb[56].mxu1 %vm239_vm3, %v233_v37  ;;  %v1139_v36 = vld [vmem:[%s12594_s0 + $0x59] sm:$0xff]  ;;  %v94_v37 = vpack.c.bf16 %v28_v34, %v27_v33  ;;  %v1150_v33 = vld [vmem:[%s12594_s0 + $0xb1] sm:$0xff] }
  0x79   :  { %7008 = vmatprep.mubr.msk.bf16.mxu0 %vm8304_vm2, %v12597_v0  ;;  %7084 = vmatprep.mubr.msk.bf16.mxu1 %vm8304_vm2, %v12597_v0  ;;  %v1206_v38 = vpack.c.bf16 %v1139_v36, %v1138_v35  ;;  %v1151_v34 = vld [vmem:[%s12594_s0 + $0xb9] sm:$0xff] }
  0x80   :  { %7009 = vmatmul.mubr.msk.bf16.gmra.mrb[60].mxu0 %vm239_vm3, %v215_v42  ;;  %7085 = vmatmul.mubr.msk.bf16.gmra.mrb[60].mxu1 %vm239_vm3, %v234_v43  ;;  %v1141_v42 = vld [vmem:[%s12594_s0 + $0x69] sm:$0xff]  ;;  %v95_v43 = vpack.c.bf16 %v30_v40, %v29_v39  ;;  %v1212_v40 = vpack.c.bf16 %v1151_v34, %v1150_v33 }
  0x81   :  { %7012 = vmatprep.mubr.msk.bf16.mxu0 %vm8304_vm2, %v12597_v0  ;;  %7088 = vmatprep.mubr.msk.bf16.mxu1 %vm8304_vm2, %v12597_v0  ;;  %v1207_v44 = vpack.c.bf16 %v1141_v42, %v1140_v41 }
  0x88   :  { %7013 = vmatmul.mubr.msk.bf16.gmra.mrb[64].mxu0 %vm239_vm3, %v216_v48  ;;  %7089 = vmatmul.mubr.msk.bf16.gmra.mrb[64].mxu1 %vm239_vm3, %v235_v49  ;;  %v1143_v48 = vld [vmem:[%s12594_s0 + $0x79] sm:$0xff]  ;;  %v96_v49 = vpack.c.bf16 %v32_v46, %v31_v45  ;;  %v41_v45 = vld [vmem:[%s12594_s0 + $0xd0] sm:$0xff] }
  0x89   :  { %7016 = vmatprep.mubr.msk.bf16.mxu0 %vm8304_vm2, %v12597_v0  ;;  %7092 = vmatprep.mubr.msk.bf16.mxu1 %vm8304_vm2, %v12597_v0  ;;  %v1208_v50 = vpack.c.bf16 %v1143_v48, %v1142_v47  ;;  %v42_v46 = vld [vmem:[%s12594_s0 + $0xd8] sm:$0xff]  ;;  %v1152_v47 = vld [vmem:[%s12594_s0 + $0xc1] sm:$0xff]  ;;  %v1153_v48 = vld [vmem:[%s12594_s0 + $0xc9] sm:$0xff] }
  0x90   :  { %7017 = vmatmul.mubr.msk.bf16.gmra.mrb[68].mxu0 %vm239_vm3, %v217_v53  ;;  %7093 = vmatmul.mubr.msk.bf16.gmra.mrb[68].mxu1 %vm239_vm3, %v236_v54  ;;  %v1144_v53 = vld [vmem:[%s12594_s0 + $0x81] sm:$0xff]  ;;  %v1145_v54 = vld [vmem:[%s12594_s0 + $0x89] sm:$0xff] }
  0x91   :  { %7020 = vmatprep.mubr.msk.bf16.mxu0 %vm8304_vm2, %v12597_v0  ;;  %7098 = vmatprep.mubr.msk.bf16.mxu1 %vm8304_vm2, %v12597_v0 }
  0x98   :  { %7021 = vmatmul.mubr.msk.bf16.gmra.mrb[72].mxu0 %vm239_vm3, %v218_v60  ;;  %7099 = vmatmul.mubr.msk.bf16.vlgmr.msra.gmra.mrb[72].mxu1 %vm239_vm3, %v88_v61  ;;  %v1209_v60 = vpack.c.bf16 %v1145_v54, %v1144_v53  ;;  %v101_v53 = vpack.c.bf16 %v42_v46, %v41_v45  ;;  %v1213_v54 = vpack.c.bf16 %v1153_v48, %v1152_v47 }
  0x99   :  { %7102 = vmatprep.mubr.msk.bf16.mxu1 %vm8304_vm2, %v12597_v0  ;;  %7248 = vmatprep.mubr.msk.bf16.mxu0 %vm8304_vm2, %v12597_v0 }
  0x9a   :  { %7397 = vmatpush3.bf16.msra.mxu1 %v1980_v62 }
  0x9b   :  { %7696 = vmatprep.subr.bf16.mxu1 %v12597_v0 }
  0xa0   :  { %7103 = vmatmul.mubr.msk.bf16.gmra.mrb[76].mxu1 %vm239_vm3, %v89_v5  ;;  %7249 = vmatmul.mubr.msk.bf16.vlgmr.msra.gmra.mrb[76].mxu0 %vm239_vm3, %v1201_v7  ;;  %v1147_v5 = vld [vmem:[%s12594_s0 + $0x99] sm:$0xff] }
  0xa1   :  { %7547 = vmatpush3.bf16.msra.mxu0 %v2608_v8  ;;  %7106 = vmatprep.mubr.msk.bf16.mxu1 %vm8304_vm2, %v12597_v0  ;;  %v1210_v12 = vpack.c.bf16 %v1147_v5, %v1146_v4 }
  0xa2   :  { %7252 = vmatprep.mubr.msk.bf16.mxu0 %vm8304_vm2, %v12597_v0  ;;  %7846 = vmatprep.subr.bf16.mxu0 %v12597_v0 }
  0xa8   :  { %7107 = vmatmul.mubr.msk.bf16.gmra.mrb[80].mxu1 %vm239_vm3, %v90_v13  ;;  %7253 = vmatmul.mubr.msk.bf16.gmra.mrb[80].mxu0 %vm239_vm3, %v1202_v14 }
  0xa9   :  { %7110 = vmatprep.mubr.msk.bf16.mxu1 %vm8304_vm2, %v12597_v0  ;;  %7256 = vmatprep.mubr.msk.bf16.mxu0 %vm8304_vm2, %v12597_v0 }
  0xb0   :  { %7111 = vmatmul.mubr.msk.bf16.gmra.mrb[84].mxu1 %vm239_vm3, %v91_v19  ;;  %7257 = vmatmul.mubr.msk.bf16.gmra.mrb[84].mxu0 %vm239_vm3, %v1203_v20  ;;  %v1148_v19 = vld [vmem:[%s12594_s0 + $0xa1] sm:$0xff]  ;;  %v1149_v20 = vld [vmem:[%s12594_s0 + $0xa9] sm:$0xff] }
  0xb1   :  { %7114 = vmatprep.mubr.msk.bf16.mxu1 %vm8304_vm2, %v12597_v0  ;;  %7260 = vmatprep.mubr.msk.bf16.mxu0 %vm8304_vm2, %v12597_v0 }
  0xb8   :  { %7115 = vmatmul.mubr.msk.bf16.gmra.mrb[88].mxu1 %vm239_vm3, %v92_v25  ;;  %7261 = vmatmul.mubr.msk.bf16.gmra.mrb[88].mxu0 %vm239_vm3, %v1204_v26  ;;  %v99_v25 = vpack.c.bf16 %v38_v18, %v37_v17  ;;  %v1211_v26 = vpack.c.bf16 %v1149_v20, %v1148_v19  ;;  %v45_v19 = vld [vmem:[%s12594_s0 + $0xf0] sm:$0xff]  ;;  %v46_v20 = vld [vmem:[%s12594_s0 + $0xf8] sm:$0xff] }
  0xb9   :  { %7118 = vmatprep.mubr.msk.bf16.mxu1 %vm8304_vm2, %v12597_v0  ;;  %7264 = vmatprep.mubr.msk.bf16.mxu0 %vm8304_vm2, %v12597_v0 }
  0xc0   :  { %7119 = vmatmul.mubr.msk.bf16.gmra.mrb[92].mxu1 %vm239_vm3, %v93_v31  ;;  %7265 = vmatmul.mubr.msk.bf16.gmra.mrb[92].mxu0 %vm239_vm3, %v1205_v32  ;;  %v39_v31 = vld [vmem:[%s12594_s0 + $0xc0] sm:$0xff]  ;;  %v40_v32 = vld [vmem:[%s12594_s0 + $0xc8] sm:$0xff] }
  0xc1   :  { %7122 = vmatprep.mubr.msk.bf16.mxu1 %vm8304_vm2, %v12597_v0  ;;  %7268 = vmatprep.mubr.msk.bf16.mxu0 %vm8304_vm2, %v12597_v0  ;;  %v100_v39 = vpack.c.bf16 %v40_v32, %v39_v31  ;;  %v103_v31 = vpack.c.bf16 %v46_v20, %v45_v19 }
  0xc8   :  { %7123 = vmatmul.mubr.msk.bf16.gmra.mrb[96].mxu1 %vm239_vm3, %v94_v37  ;;  %7269 = vmatmul.mubr.msk.bf16.gmra.mrb[96].mxu0 %vm239_vm3, %v1206_v38 }
  0xc9   :  { %7126 = vmatprep.mubr.msk.bf16.mxu1 %vm8304_vm2, %v12597_v0  ;;  %7272 = vmatprep.mubr.msk.bf16.mxu0 %vm8304_vm2, %v12597_v0 }
  0xd0   :  { %7127 = vmatmul.mubr.msk.bf16.gmra.mrb[100].mxu1 %vm239_vm3, %v95_v43  ;;  %7273 = vmatmul.mubr.msk.bf16.gmra.mrb[100].mxu0 %vm239_vm3, %v1207_v44 }
  0xd1   :  { %7130 = vmatprep.mubr.msk.bf16.mxu1 %vm8304_vm2, %v12597_v0  ;;  %7276 = vmatprep.mubr.msk.bf16.mxu0 %vm8304_vm2, %v12597_v0 }
  0xd8   :  { %7131 = vmatmul.mubr.msk.bf16.gmra.mrb[104].mxu1 %vm239_vm3, %v96_v49  ;;  %7277 = vmatmul.mubr.msk.bf16.gmra.mrb[104].mxu0 %vm239_vm3, %v1208_v50 }
  0xd9   :  { %7134 = vmatprep.mubr.msk.bf16.mxu1 %vm8304_vm2, %v12597_v0  ;;  %7280 = vmatprep.mubr.msk.bf16.mxu0 %vm8304_vm2, %v12597_v0 }
  0xdb   :  { %v8854_v55 = vpop.f32.mrb[0].mxu0  ;;  %v8856_v56 = vpop.f32.mrb[0].mxu1 }
  0xdc   :  { %v6950_v57 = vpop.f32.mrb[1].mxu0  ;;  %v7026_v58 = vpop.f32.mrb[1].mxu1 }
  0xdd   :  { %v8858_v61 = vpop.f32.mrb[2].mxu0  ;;  %v8860_v62 = vpop.f32.mrb[2].mxu1 }
  0xde   :  { %v6951_v63 = vpop.f32.mrb[3].mxu0  ;;  %v7027_v1 = vpop.f32.mrb[3].mxu1 }
  0xdf   :  { %v43_v63 = vld [vmem:[%s12594_s0 + $0xe0] sm:$0xff]  ;;  %v44_v1 = vld [vmem:[%s12594_s0 + $0xe8] sm:$0xff] }
  0xe0   :  { %7135 = vmatmul.mubr.msk.bf16.gmra.mrb[108].mxu1 %vm239_vm3, %v97_v59  ;;  %7281 = vmatmul.mubr.msk.bf16.gmra.mrb[108].mxu0 %vm239_vm3, %v1209_v60 }
  0xe1   :  { %7138 = vmatprep.mubr.msk.bf16.mxu1 %vm8304_vm2, %v12597_v0  ;;  %7284 = vmatprep.mubr.msk.bf16.mxu0 %vm8304_vm2, %v12597_v0 }
  0xe3   :  { %v8880_v7 = vpop.f32.mrb[4].mxu0  ;;  %v8882_v8 = vpop.f32.mrb[4].mxu1 }
  0xe4   :  { %v6954_v9 = vpop.f32.mrb[5].mxu0  ;;  %v7030_v10 = vpop.f32.mrb[5].mxu1 }
  0xe5   :  { %v8884_v13 = vpop.f32.mrb[6].mxu0  ;;  %v8886_v14 = vpop.f32.mrb[6].mxu1 }
  0xe6   :  { %v6955_v15 = vpop.f32.mrb[7].mxu0  ;;  %v7031_v16 = vpop.f32.mrb[7].mxu1 }
  0xe8   :  { %7139 = vmatmul.mubr.msk.bf16.gmra.mrb[112].mxu1 %vm239_vm3, %v98_v11  ;;  %7285 = vmatmul.mubr.msk.bf16.gmra.mrb[112].mxu0 %vm239_vm3, %v1210_v12  ;;  %v102_v11 = vpack.c.bf16 %v44_v1, %v43_v63  ;;  %v1214_v12 = vpack.c.bf16 %v1155_v3, %v1154_v2  ;;  %v49_v63 = vld [vmem:[%s12594_s0 + $0x110] sm:$0xff]  ;;  %v50_v1 = vld [vmem:[%s12594_s0 + $0x118] sm:$0xff]  ;;  %v1160_v2 = vld [vmem:[%s12594_s0 + $0x101] sm:$0xff] }
  0xe9   :  { %7142 = vmatprep.mubr.msk.bf16.mxu1 %vm8304_vm2, %v12597_v0  ;;  %7288 = vmatprep.mubr.msk.bf16.mxu0 %vm8304_vm2, %v12597_v0  ;;  %v1161_v3 = vld [vmem:[%s12594_s0 + $0x109] sm:$0xff] }
  0xeb   :  { %v8906_v21 = vpop.f32.mrb[8].mxu0  ;;  %v8908_v22 = vpop.f32.mrb[8].mxu1 }
  0xec   :  { %v6958_v23 = vpop.f32.mrb[9].mxu0  ;;  %v7034_v24 = vpop.f32.mrb[9].mxu1 }
  0xed   :  { %v8910_v27 = vpop.f32.mrb[10].mxu0  ;;  %v8912_v28 = vpop.f32.mrb[10].mxu1  ;;  %v1156_v23 = vld [vmem:[%s12594_s0 + $0xe1] sm:$0xff]  ;;  %v1157_v24 = vld [vmem:[%s12594_s0 + $0xe9] sm:$0xff] }
  0xee   :  { %v6959_v29 = vpop.f32.mrb[11].mxu0  ;;  %v7035_v30 = vpop.f32.mrb[11].mxu1  ;;  %v1215_v32 = vpack.c.bf16 %v1157_v24, %v1156_v23 }
  0xf0   :  { %7143 = vmatmul.mubr.msk.bf16.gmra.mrb[116].mxu1 %vm239_vm3, %v99_v25  ;;  %7289 = vmatmul.mubr.msk.bf16.gmra.mrb[116].mxu0 %vm239_vm3, %v1211_v26 }
  0xf1   :  { %7146 = vmatprep.mubr.msk.bf16.mxu1 %vm8304_vm2, %v12597_v0  ;;  %7292 = vmatprep.mubr.msk.bf16.mxu0 %vm8304_vm2, %v12597_v0 }
  0xf3   :  { %v8932_v35 = vpop.f32.mrb[12].mxu0  ;;  %v8934_v36 = vpop.f32.mrb[12].mxu1 }
  0xf4   :  { %12599 = vst [vmem:[#allocation2_spill] sm:$0xff] %v8934_v36  ;;  %v6962_v37 = vpop.f32.mrb[13].mxu0  ;;  %v7038_v38 = vpop.f32.mrb[13].mxu1 }
  0xf5   :  { %v8936_v41 = vpop.f32.mrb[14].mxu0  ;;  %v8938_v42 = vpop.f32.mrb[14].mxu1 }
  0xf6   :  { %12600 = vst [vmem:[#allocation3_spill] sm:$0xff] %v8938_v42  ;;  %v6963_v43 = vpop.f32.mrb[15].mxu0  ;;  %v7039_v44 = vpop.f32.mrb[15].mxu1 }
  0xf7   :  { %v1158_v43 = vld [vmem:[%s12594_s0 + $0xf1] sm:$0xff]  ;;  %v1159_v44 = vld [vmem:[%s12594_s0 + $0xf9] sm:$0xff] }
  0xf8   :  { %7147 = vmatmul.mubr.msk.bf16.gmra.mrb[120].mxu1 %vm239_vm3, %v100_v39  ;;  %7293 = vmatmul.mubr.msk.bf16.gmra.mrb[120].mxu0 %vm239_vm3, %v1212_v40  ;;  %v47_v39 = vld [vmem:[%s12594_s0 + $0x100] sm:$0xff]  ;;  %v48_v40 = vld [vmem:[%s12594_s0 + $0x108] sm:$0xff] }
  0xf9   :  { %7150 = vmatprep.mubr.msk.bf16.mxu1 %vm8304_vm2, %v12597_v0  ;;  %7296 = vmatprep.mubr.msk.bf16.mxu0 %vm8304_vm2, %v12597_v0 }
  0xfb   :  { %v8958_v49 = vpop.f32.mrb[16].mxu0  ;;  %v8960_v50 = vpop.f32.mrb[16].mxu1 }
  0xfc   :  { %12601 = vst [vmem:[#allocation4_spill] sm:$0xff] %v8960_v50  ;;  %v6966_v51 = vpop.f32.mrb[17].mxu0  ;;  %v7042_v52 = vpop.f32.mrb[17].mxu1 }
  0xfd   :  { %v8962_v57 = vpop.f32.mrb[18].mxu0  ;;  %v8964_v58 = vpop.f32.mrb[18].mxu1  ;;  %v104_v51 = vpack.c.bf16 %v48_v40, %v47_v39  ;;  %v1216_v52 = vpack.c.bf16 %v1159_v44, %v1158_v43 }
  0xfe   :  { %12602 = vst [vmem:[#allocation5_spill] sm:$0xff] %v8964_v58  ;;  %v6967_v59 = vpop.f32.mrb[19].mxu0  ;;  %v7043_v60 = vpop.f32.mrb[19].mxu1  ;;  %v71_v58 = vld [vmem:[%s12594_s0 + $0x1c0] sm:$0xff] }
 0x100   :  { %7151 = vmatmul.mubr.msk.bf16.gmra.mrb[124].mxu1 %vm239_vm3, %v101_v53  ;;  %7297 = vmatmul.mubr.msk.bf16.gmra.mrb[124].mxu0 %vm239_vm3, %v1213_v54 }
 0x101   :  { %7154 = vmatprep.mubr.msk.bf16.mxu1 %vm8304_vm2, %v12597_v0  ;;  %7300 = vmatprep.mubr.msk.bf16.mxu0 %vm8304_vm2, %v12597_v0 }
 0x103   :  { %v8984_v4 = vpop.f32.mrb[20].mxu0  ;;  %v8986_v5 = vpop.f32.mrb[20].mxu1 }
 0x104   :  { %12603 = vst [vmem:[#allocation6_spill] sm:$0xff] %v8986_v5  ;;  %v6970_v9 = vpop.f32.mrb[21].mxu0  ;;  %v7046_v10 = vpop.f32.mrb[21].mxu1 }
 0x105   :  { %v8988_v15 = vpop.f32.mrb[22].mxu0  ;;  %v8990_v16 = vpop.f32.mrb[22].mxu1 }
 0x106   :  { %12604 = vst [vmem:[#allocation7_spill] sm:$0xff] %v8990_v16  ;;  %v6971_v17 = vpop.f32.mrb[23].mxu0  ;;  %v7047_v18 = vpop.f32.mrb[23].mxu1 }
 0x107   :  { %v105_v17 = vpack.c.bf16 %v50_v1, %v49_v63  ;;  %v1217_v18 = vpack.c.bf16 %v1161_v3, %v1160_v2  ;;  %v1164_v63 = vld [vmem:[%s12594_s0 + $0x121] sm:$0xff]  ;;  %v1165_v1 = vld [vmem:[%s12594_s0 + $0x129] sm:$0xff] }
 0x108   :  { %7155 = vmatmul.mubr.msk.bf16.gmra.mrb[128].mxu1 %vm239_vm3, %v102_v11  ;;  %7301 = vmatmul.mubr.msk.bf16.gmra.mrb[128].mxu0 %vm239_vm3, %v1214_v12 }
 0x109   :  { %7158 = vmatprep.mubr.msk.bf16.mxu1 %vm8304_vm2, %v12597_v0  ;;  %7304 = vmatprep.mubr.msk.bf16.mxu0 %vm8304_vm2, %v12597_v0 }
 0x10b   :  { %v9010_v25 = vpop.f32.mrb[24].mxu0  ;;  %v9012_v26 = vpop.f32.mrb[24].mxu1 }
 0x10c   :  { %12605 = vst [vmem:[#allocation8_spill] sm:$0xff] %v9012_v26  ;;  %v6974_v29 = vpop.f32.mrb[25].mxu0  ;;  %v7050_v30 = vpop.f32.mrb[25].mxu1 }
 0x10d   :  { %v9014_v33 = vpop.f32.mrb[26].mxu0  ;;  %v9016_v34 = vpop.f32.mrb[26].mxu1  ;;  %v51_v29 = vld [vmem:[%s12594_s0 + $0x120] sm:$0xff]  ;;  %v52_v30 = vld [vmem:[%s12594_s0 + $0x128] sm:$0xff] }
 0x10e   :  { %12606 = vst [vmem:[#allocation9_spill] sm:$0xff] %v9016_v34  ;;  %v6975_v37 = vpop.f32.mrb[27].mxu0  ;;  %v7051_v38 = vpop.f32.mrb[27].mxu1  ;;  %v106_v43 = vpack.c.bf16 %v52_v30, %v51_v29  ;;  %v69_v34 = vld [vmem:[%s12594_s0 + $0x1b0] sm:$0xff] }
 0x110   :  { %7159 = vmatmul.mubr.msk.bf16.gmra.mrb[132].mxu1 %vm239_vm3, %v103_v31  ;;  %7305 = vmatmul.mubr.msk.bf16.gmra.mrb[132].mxu0 %vm239_vm3, %v1215_v32  ;;  %v1162_v31 = vld [vmem:[%s12594_s0 + $0x111] sm:$0xff]  ;;  %v1163_v32 = vld [vmem:[%s12594_s0 + $0x119] sm:$0xff] }
 0x111   :  { %7162 = vmatprep.mubr.msk.bf16.mxu1 %vm8304_vm2, %v12597_v0  ;;  %7308 = vmatprep.mubr.msk.bf16.mxu0 %vm8304_vm2, %v12597_v0  ;;  %v1218_v44 = vpack.c.bf16 %v1163_v32, %v1162_v31  ;;  %v55_v31 = vld [vmem:[%s12594_s0 + $0x140] sm:$0xff]  ;;  %v56_v32 = vld [vmem:[%s12594_s0 + $0x148] sm:$0xff] }
 0x113   :  { %v9036_v45 = vpop.f32.mrb[28].mxu0  ;;  %v9038_v46 = vpop.f32.mrb[28].mxu1 }
 0x114   :  { %12607 = vst [vmem:[#allocation10_spill] sm:$0xff] %v9038_v46  ;;  %v6978_v47 = vpop.f32.mrb[29].mxu0  ;;  %v7054_v48 = vpop.f32.mrb[29].mxu1 }
 0x115   :  { %v9040_v53 = vpop.f32.mrb[30].mxu0  ;;  %v9042_v54 = vpop.f32.mrb[30].mxu1 }
 0x116   :  { %12608 = vst [vmem:[#allocation11_spill] sm:$0xff] %v9042_v54  ;;  %v6979_v59 = vpop.f32.mrb[31].mxu0  ;;  %v7055_v60 = vpop.f32.mrb[31].mxu1  ;;  %v67_v54 = vld [vmem:[%s12594_s0 + $0x1a0] sm:$0xff] }
 0x117   :  { %v53_v59 = vld [vmem:[%s12594_s0 + $0x130] sm:$0xff]  ;;  %v54_v60 = vld [vmem:[%s12594_s0 + $0x138] sm:$0xff] }
 0x118   :  { %7163 = vmatmul.mubr.msk.bf16.gmra.mrb[136].mxu1 %vm239_vm3, %v104_v51  ;;  %7309 = vmatmul.mubr.msk.bf16.gmra.mrb[136].mxu0 %vm239_vm3, %v1216_v52 }
 0x119   :  { %7166 = vmatprep.mubr.msk.bf16.mxu1 %vm8304_vm2, %v12597_v0  ;;  %7312 = vmatprep.mubr.msk.bf16.mxu0 %vm8304_vm2, %v12597_v0 }
 0x11b   :  { %v9062_v9 = vpop.f32.mrb[32].mxu0  ;;  %v9064_v10 = vpop.f32.mrb[32].mxu1 }
 0x11c   :  { %12609 = vst [vmem:[#allocation12_spill] sm:$0xff] %v9064_v10  ;;  %v6982_v11 = vpop.f32.mrb[33].mxu0  ;;  %v7058_v12 = vpop.f32.mrb[33].mxu1 }
 0x11d   :  { %v9066_v19 = vpop.f32.mrb[34].mxu0  ;;  %v9068_v20 = vpop.f32.mrb[34].mxu1 }
 0x11e   :  { %12610 = vst [vmem:[#allocation13_spill] sm:$0xff] %v9068_v20  ;;  %v6983_v23 = vpop.f32.mrb[35].mxu0  ;;  %v7059_v24 = vpop.f32.mrb[35].mxu1  ;;  %v65_v20 = vld [vmem:[%s12594_s0 + $0x190] sm:$0xff] }
 0x120   :  { %7167 = vmatmul.mubr.msk.bf16.gmra.mrb[140].mxu1 %vm239_vm3, %v105_v17  ;;  %7313 = vmatmul.mubr.msk.bf16.gmra.mrb[140].mxu0 %vm239_vm3, %v1217_v18  ;;  %v107_v17 = vpack.c.bf16 %v54_v60, %v53_v59  ;;  %v1219_v18 = vpack.c.bf16 %v1165_v1, %v1164_v63  ;;  %v108_v59 = vpack.c.bf16 %v56_v32, %v55_v31 }
 0x121   :  { %7170 = vmatprep.mubr.msk.bf16.mxu1 %vm8304_vm2, %v12597_v0  ;;  %7316 = vmatprep.mubr.msk.bf16.mxu0 %vm8304_vm2, %v12597_v0 }
 0x123   :  { %v9088_v37 = vpop.f32.mrb[36].mxu0  ;;  %v9090_v38 = vpop.f32.mrb[36].mxu1 }
 0x124   :  { %12611 = vst [vmem:[#allocation14_spill] sm:$0xff] %v9090_v38  ;;  %v6986_v39 = vpop.f32.mrb[37].mxu0  ;;  %v7062_v40 = vpop.f32.mrb[37].mxu1 }
 0x125   :  { %v9092_v47 = vpop.f32.mrb[38].mxu0  ;;  %v9094_v48 = vpop.f32.mrb[38].mxu1  ;;  %v1166_v39 = vld [vmem:[%s12594_s0 + $0x131] sm:$0xff]  ;;  %v1167_v40 = vld [vmem:[%s12594_s0 + $0x139] sm:$0xff] }
 0x126   :  { %12612 = vst [vmem:[#allocation15_spill] sm:$0xff] %v9094_v48  ;;  %v6987_v51 = vpop.f32.mrb[39].mxu0  ;;  %v7063_v52 = vpop.f32.mrb[39].mxu1  ;;  %v1220_v60 = vpack.c.bf16 %v1167_v40, %v1166_v39  ;;  %v63_v48 = vld [vmem:[%s12594_s0 + $0x180] sm:$0xff] }
 0x128   :  { %7171 = vmatmul.mubr.msk.bf16.gmra.mrb[144].mxu1 %vm239_vm3, %v106_v43  ;;  %7317 = vmatmul.mubr.msk.bf16.gmra.mrb[144].mxu0 %vm239_vm3, %v1218_v44 }
 0x129   :  { %7174 = vmatprep.mubr.msk.bf16.mxu1 %vm8304_vm2, %v12597_v0  ;;  %7320 = vmatprep.mubr.msk.bf16.mxu0 %vm8304_vm2, %v12597_v0 }
 0x12b   :  { %v9114_v2 = vpop.f32.mrb[40].mxu0  ;;  %v9116_v3 = vpop.f32.mrb[40].mxu1 }
 0x12c   :  { %12613 = vst [vmem:[#allocation16_spill] sm:$0xff] %v9116_v3  ;;  %v6990_v11 = vpop.f32.mrb[41].mxu0  ;;  %v7066_v12 = vpop.f32.mrb[41].mxu1 }
 0x12d   :  { %v9118_v23 = vpop.f32.mrb[42].mxu0  ;;  %v9120_v24 = vpop.f32.mrb[42].mxu1 }
 0x12e   :  { %12614 = vst [vmem:[#allocation17_spill] sm:$0xff] %v9120_v24  ;;  %v6991_v29 = vpop.f32.mrb[43].mxu0  ;;  %v7067_v30 = vpop.f32.mrb[43].mxu1  ;;  %v61_v24 = vld [vmem:[%s12594_s0 + $0x170] sm:$0xff] }
 0x12f   :  { %v1168_v29 = vld [vmem:[%s12594_s0 + $0x141] sm:$0xff]  ;;  %v1169_v30 = vld [vmem:[%s12594_s0 + $0x149] sm:$0xff] }
 0x130   :  { %7175 = vmatmul.mubr.msk.bf16.gmra.mrb[148].mxu1 %vm239_vm3, %v107_v17  ;;  %7321 = vmatmul.mubr.msk.bf16.gmra.mrb[148].mxu0 %vm239_vm3, %v1219_v18  ;;  %v57_v17 = vld [vmem:[%s12594_s0 + $0x150] sm:$0xff]  ;;  %v58_v18 = vld [vmem:[%s12594_s0 + $0x158] sm:$0xff] }
 0x131   :  { %7178 = vmatprep.mubr.msk.bf16.mxu1 %vm8304_vm2, %v12597_v0  ;;  %7324 = vmatprep.mubr.msk.bf16.mxu0 %vm8304_vm2, %v12597_v0 }
 0x133   :  { %v9140_v43 = vpop.f32.mrb[44].mxu0  ;;  %v9142_v44 = vpop.f32.mrb[44].mxu1 }
 0x134   :  { %12615 = vst [vmem:[#allocation18_spill] sm:$0xff] %v9142_v44  ;;  %v6994_v51 = vpop.f32.mrb[45].mxu0  ;;  %v7070_v52 = vpop.f32.mrb[45].mxu1 }
 0x135   :  { %v9144_v63 = vpop.f32.mrb[46].mxu0  ;;  %v9146_v1 = vpop.f32.mrb[46].mxu1  ;;  %v109_v51 = vpack.c.bf16 %v58_v18, %v57_v17  ;;  %v1221_v52 = vpack.c.bf16 %v1169_v30, %v1168_v29  ;;  %v60_v17 = vld [vmem:[%s12594_s0 + $0x168] sm:$0xff]  ;;  %v1170_v18 = vld [vmem:[%s12594_s0 + $0x151] sm:$0xff]  ;;  %v1171_v29 = vld [vmem:[%s12594_s0 + $0x159] sm:$0xff] }
 0x136   :  { %12616 = vst [vmem:[#allocation19_spill] sm:$0xff] %v9146_v1  ;;  %v6995_v11 = vpop.f32.mrb[47].mxu0  ;;  %v7071_v12 = vpop.f32.mrb[47].mxu1  ;;  %v12619_v1 = vmov 0.0  }
 0x138   :  { %7179 = vmatmul.mubr.msk.bf16.gmra.mrb[152].mxu1 %vm239_vm3, %v108_v59  ;;  %7325 = vmatmul.mubr.msk.bf16.gmra.mrb[152].mxu0 %vm239_vm3, %v1220_v60 }
 0x139   :  { %7182 = vmatprep.mubr.msk.bf16.mxu1 %vm8304_vm2, %v12597_v0  ;;  %7328 = vmatprep.mubr.msk.bf16.mxu0 %vm8304_vm2, %v12597_v0  ;;  %v59_v0 = vld [vmem:[%s12594_s0 + $0x160] sm:$0xff] }
 0x13b   :  { %v9166_v31 = vpop.f32.mrb[48].mxu0  ;;  %v9168_v32 = vpop.f32.mrb[48].mxu1 }
 0x13c   :  { %12617 = vst [vmem:[#allocation20_spill] sm:$0xff] %v9168_v32  ;;  %v6998_v39 = vpop.f32.mrb[49].mxu0  ;;  %v7074_v40 = vpop.f32.mrb[49].mxu1 }
 0x13d   :  { %v9170_v59 = vpop.f32.mrb[50].mxu0  ;;  %v9172_v60 = vpop.f32.mrb[50].mxu1 }
 0x13e   :  { %12618 = vst [vmem:[#allocation21_spill] sm:$0xff] %v9172_v60  ;;  %v6999_v11 = vpop.f32.mrb[51].mxu0  ;;  %v7075_v12 = vpop.f32.mrb[51].mxu1 }
 0x13f   :  { %v1222_v11 = vpack.c.bf16 %v1171_v29, %v1170_v18 }
 0x140   :  { %7183 = vmatmul.mubr.msk.bf16.gmra.mrb[156].mxu1 %vm239_vm3, %v109_v51  ;;  %7329 = vmatmul.mubr.msk.bf16.gmra.mrb[156].mxu0 %vm239_vm3, %v1221_v52  ;;  %v110_v52 = vpack.c.bf16 %v60_v17, %v59_v0  ;;  %v62_v0 = vld [vmem:[%s12594_s0 + $0x178] sm:$0xff] }
 0x141   :  { %7186 = vmatprep.mubr.msk.bf16.mxu1 %vm8304_vm2, %v12619_v1  ;;  %7332 = vmatprep.mubr.msk.bf16.mxu0 %vm8304_vm2, %v12619_v1 }
 0x143   :  { %v9192_v30 = vpop.f32.mrb[52].mxu0  ;;  %v9194_v39 = vpop.f32.mrb[52].mxu1 }
 0x144   :  { %12620 = vst [vmem:[#allocation22_spill] sm:$0xff] %v9194_v39  ;;  %v7002_v40 = vpop.f32.mrb[53].mxu0  ;;  %v7078_v51 = vpop.f32.mrb[53].mxu1 }
 0x145   :  { %v9196_v12 = vpop.f32.mrb[54].mxu0  ;;  %v9198_v60 = vpop.f32.mrb[54].mxu1  ;;  %v111_v51 = vpack.c.bf16 %v62_v0, %v61_v24  ;;  %v64_v24 = vld [vmem:[%s12594_s0 + $0x188] sm:$0xff] }
 0x146   :  { %12621 = vst [vmem:[#allocation23_spill] sm:$0xff] %v9198_v60  ;;  %v7003_v32 = vpop.f32.mrb[55].mxu0  ;;  %v7079_v44 = vpop.f32.mrb[55].mxu1 }
 0x147   :  { %v1172_v44 = vld [vmem:[%s12594_s0 + $0x161] sm:$0xff]  ;;  %v1173_v32 = vld [vmem:[%s12594_s0 + $0x169] sm:$0xff] }
 0x148   :  { %7187 = vmatmul.mubr.msk.bf16.gmra.mrb[160].mxu1 %vm239_vm3, %v110_v52  ;;  %7333 = vmatmul.mubr.msk.bf16.gmra.mrb[160].mxu0 %vm239_vm3, %v1222_v11  ;;  %v1223_v52 = vpack.c.bf16 %v1173_v32, %v1172_v44 }
 0x149   :  { %7190 = vmatprep.mubr.msk.bf16.mxu1 %vm8304_vm2, %v12619_v1  ;;  %7336 = vmatprep.mubr.msk.bf16.mxu0 %vm8304_vm2, %v12619_v1 }
 0x14b   :  { %v9218_v17 = vpop.f32.mrb[56].mxu0  ;;  %v9220_v18 = vpop.f32.mrb[56].mxu1 }
 0x14c   :  { %12622 = vst [vmem:[#allocation24_spill] sm:$0xff] %v9220_v18  ;;  %v7006_v29 = vpop.f32.mrb[57].mxu0  ;;  %v7082_v40 = vpop.f32.mrb[57].mxu1 }
 0x14d   :  { %v9222_v11 = vpop.f32.mrb[58].mxu0  ;;  %v9224_v60 = vpop.f32.mrb[58].mxu1  ;;  %v112_v40 = vpack.c.bf16 %v64_v24, %v63_v48  ;;  %v66_v48 = vld [vmem:[%s12594_s0 + $0x198] sm:$0xff] }
 0x14e   :  { %12623 = vst [vmem:[#allocation25_spill] sm:$0xff] %v9224_v60  ;;  %v7007_v39 = vpop.f32.mrb[59].mxu0  ;;  %v7083_v3 = vpop.f32.mrb[59].mxu1 }
 0x14f   :  { %v1174_v3 = vld [vmem:[%s12594_s0 + $0x171] sm:$0xff]  ;;  %v1175_v39 = vld [vmem:[%s12594_s0 + $0x179] sm:$0xff] }
 0x150   :  { %7191 = vmatmul.mubr.msk.bf16.gmra.mrb[164].mxu1 %vm239_vm3, %v111_v51  ;;  %7337 = vmatmul.mubr.msk.bf16.gmra.mrb[164].mxu0 %vm239_vm3, %v1223_v52  ;;  %v1224_v51 = vpack.c.bf16 %v1175_v39, %v1174_v3 }
 0x151   :  { %7194 = vmatprep.mubr.msk.bf16.mxu1 %vm8304_vm2, %v12619_v1  ;;  %7340 = vmatprep.mubr.msk.bf16.mxu0 %vm8304_vm2, %v12619_v1 }
 0x153   :  { %v9244_v0 = vpop.f32.mrb[60].mxu0  ;;  %v9246_v44 = vpop.f32.mrb[60].mxu1 }
 0x154   :  { %12624 = vst [vmem:[#allocation26_spill] sm:$0xff] %v9246_v44  ;;  %v7010_v32 = vpop.f32.mrb[61].mxu0  ;;  %v7086_v29 = vpop.f32.mrb[61].mxu1 }
 0x155   :  { %v9248_v52 = vpop.f32.mrb[62].mxu0  ;;  %v9250_v60 = vpop.f32.mrb[62].mxu1  ;;  %v113_v29 = vpack.c.bf16 %v66_v48, %v65_v20  ;;  %v68_v20 = vld [vmem:[%s12594_s0 + $0x1a8] sm:$0xff] }
 0x156   :  { %12625 = vst [vmem:[#allocation27_spill] sm:$0xff] %v9250_v60  ;;  %v7011_v18 = vpop.f32.mrb[63].mxu0  ;;  %v7087_v38 = vpop.f32.mrb[63].mxu1 }
 0x157   :  { %v1176_v38 = vld [vmem:[%s12594_s0 + $0x181] sm:$0xff]  ;;  %v1177_v18 = vld [vmem:[%s12594_s0 + $0x189] sm:$0xff] }
 0x158   :  { %7195 = vmatmul.mubr.msk.bf16.gmra.mrb[168].mxu1 %vm239_vm3, %v112_v40  ;;  %7341 = vmatmul.mubr.msk.bf16.gmra.mrb[168].mxu0 %vm239_vm3, %v1224_v51  ;;  %v1225_v40 = vpack.c.bf16 %v1177_v18, %v1176_v38 }
 0x159   :  { %7198 = vmatprep.mubr.msk.bf16.mxu1 %vm8304_vm2, %v12619_v1  ;;  %7344 = vmatprep.mubr.msk.bf16.mxu0 %vm8304_vm2, %v12619_v1 }
 0x15b   :  { %v9270_v24 = vpop.f32.mrb[64].mxu0  ;;  %v9272_v3 = vpop.f32.mrb[64].mxu1 }
 0x15c   :  { %12626 = vst [vmem:[#allocation28_spill] sm:$0xff] %v9272_v3  ;;  %v7014_v39 = vpop.f32.mrb[65].mxu0  ;;  %v7090_v32 = vpop.f32.mrb[65].mxu1 }
 0x15d   :  { %v9274_v51 = vpop.f32.mrb[66].mxu0  ;;  %v9276_v60 = vpop.f32.mrb[66].mxu1  ;;  %v114_v32 = vpack.c.bf16 %v68_v20, %v67_v54  ;;  %v70_v54 = vld [vmem:[%s12594_s0 + $0x1b8] sm:$0xff] }
 0x15e   :  { %12627 = vst [vmem:[#allocation29_spill] sm:$0xff] %v9276_v60  ;;  %v7015_v44 = vpop.f32.mrb[67].mxu0  ;;  %v7091_v10 = vpop.f32.mrb[67].mxu1 }
 0x15f   :  { %v1178_v10 = vld [vmem:[%s12594_s0 + $0x191] sm:$0xff]  ;;  %v1179_v44 = vld [vmem:[%s12594_s0 + $0x199] sm:$0xff] }
 0x160   :  { %7199 = vmatmul.mubr.msk.bf16.gmra.mrb[172].mxu1 %vm239_vm3, %v113_v29  ;;  %7345 = vmatmul.mubr.msk.bf16.gmra.mrb[172].mxu0 %vm239_vm3, %v1225_v40  ;;  %v1226_v29 = vpack.c.bf16 %v1179_v44, %v1178_v10 }
 0x161   :  { %7202 = vmatprep.mubr.msk.bf16.mxu1 %vm8304_vm2, %v12619_v1  ;;  %7348 = vmatprep.mubr.msk.bf16.mxu0 %vm8304_vm2, %v12619_v1 }
 0x163   :  { %v9296_v48 = vpop.f32.mrb[68].mxu0  ;;  %v9298_v38 = vpop.f32.mrb[68].mxu1 }
 0x164   :  { %12628 = vst [vmem:[#allocation30_spill] sm:$0xff] %v9298_v38  ;;  %v7018_v18 = vpop.f32.mrb[69].mxu0  ;;  %v7094_v39 = vpop.f32.mrb[69].mxu1 }
 0x165   :  { %v9300_v40 = vpop.f32.mrb[70].mxu0  ;;  %v683_v60 = vpop.f32.mrb[70].mxu1  ;;  %v115_v39 = vpack.c.bf16 %v70_v54, %v69_v34 }
 0x166   :  { %v7019_v3 = vpop.f32.mrb[71].mxu0  ;;  %v7095_v46 = vpop.f32.mrb[71].mxu1  ;;  %v1181_v60 = vld [vmem:[%s12594_s0 + $0x1a9] sm:$0xff] }
 0x167   :  { %v1180_v46 = vld [vmem:[%s12594_s0 + $0x1a1] sm:$0xff] }
 0x168   :  { %7203 = vmatmul.mubr.msk.bf16.gmra.mrb[176].mxu1 %vm239_vm3, %v114_v32  ;;  %7349 = vmatmul.mubr.msk.bf16.gmra.mrb[176].mxu0 %vm239_vm3, %v1226_v29  ;;  %v1227_v32 = vpack.c.bf16 %v1181_v60, %v1180_v46 }
 0x169   :  { %7206 = vmatprep.mubr.msk.bf16.mxu1 %vm8304_vm2, %v12619_v1  ;;  %7352 = vmatprep.mubr.msk.bf16.mxu0 %vm8304_vm2, %v12619_v1 }
 0x16b   :  { %v9320_v3 = vpop.f32.mrb[72].mxu0  ;;  %v834_v20 = vpop.f32.mrb[72].mxu1 }
 0x16c   :  { %v835_v10 = vadd.f32 %v834_v20, %v8854_v55  ;;  %v7022_v44 = vpop.f32.mrb[73].mxu0  ;;  %v7100_v18 = vpop.f32.mrb[73].mxu1  ;;  %v72_v55 = vld [vmem:[%s12594_s0 + $0x1c8] sm:$0xff] }
 0x16d   :  { %v9323_v29 = vpop.f32.mrb[74].mxu0  ;;  %v837_v38 = vpop.f32.mrb[74].mxu1  ;;  %v116_v20 = vpack.c.bf16 %v72_v55, %v71_v58 }
 0x16e   :  { %v838_v26 = vadd.f32 %v837_v38, %v8858_v61  ;;  %v7023_v16 = vpop.f32.mrb[75].mxu0  ;;  %v7101_v5 = vpop.f32.mrb[75].mxu1  ;;  %v1182_v61 = vld [vmem:[%s12594_s0 + $0x1b1] sm:$0xff] }
 0x16f   :  { %v1183_v5 = vld [vmem:[%s12594_s0 + $0x1b9] sm:$0xff] }
 0x170   :  { %7207 = vmatmul.mubr.msk.bf16.gmra.mrb[180].mxu1 %vm239_vm3, %v115_v39  ;;  %7353 = vmatmul.mubr.msk.bf16.gmra.mrb[180].mxu0 %vm239_vm3, %v1227_v32  ;;  %v1228_v44 = vpack.c.bf16 %v1183_v5, %v1182_v61 }
 0x171   :  { %7210 = vmatprep.mubr.msk.bf16.mxu1 %vm8304_vm2, %v12619_v1  ;;  %7356 = vmatprep.mubr.msk.bf16.mxu0 %vm8304_vm2, %v12619_v1 }
 0x173   :  { %v842_v16 = vpop.f32.mrb[76].mxu1  ;;  %v1388_v34 = vpop.f32.mrb[76].mxu0 }
 0x174   :  { %v843_v38 = vadd.f32 %v842_v16, %v8880_v7  ;;  %v9345_v54 = vadd.f32 %v1388_v34, %v835_v10  ;;  %v7104_v46 = vpop.f32.mrb[77].mxu1  ;;  %v7250_v60 = vpop.f32.mrb[77].mxu0  ;;  %v73_v7 = vld [vmem:[%s12594_s0 + $0x1d0] sm:$0xff] }
 0x175   :  { %v845_v18 = vpop.f32.mrb[78].mxu1  ;;  %v1391_v39 = vpop.f32.mrb[78].mxu0 }
 0x176   :  { %v846_v32 = vadd.f32 %v845_v18, %v8884_v13  ;;  %v9348_v50 = vadd.f32 %v1391_v39, %v838_v26  ;;  %v7251_v42 = vpop.f32.mrb[79].mxu0  ;;  %v7105_v36 = vpop.f32.mrb[79].mxu1  ;;  %v74_v13 = vld [vmem:[%s12594_s0 + $0x1d8] sm:$0xff] }
 0x177   :  { %v1184_v36 = vld [vmem:[%s12594_s0 + $0x1c1] sm:$0xff]  ;;  %v1185_v42 = vld [vmem:[%s12594_s0 + $0x1c9] sm:$0xff]  ;;  %v117_v16 = vpack.c.bf16 %v74_v13, %v73_v7 }
 0x178   :  { %7211 = vmatmul.mubr.msk.bf16.gmra.mrb[184].mxu1 %vm239_vm3, %v116_v20  ;;  %7357 = vmatmul.mubr.msk.bf16.gmra.mrb[184].mxu0 %vm239_vm3, %v1228_v44  ;;  %v1229_v34 = vpack.c.bf16 %v1185_v42, %v1184_v36 }
 0x179   :  { %7214 = vmatprep.mubr.msk.bf16.mxu1 %vm8304_vm2, %v12619_v1  ;;  %7360 = vmatprep.mubr.msk.bf16.mxu0 %vm8304_vm2, %v12619_v1 }
 0x17b   :  { %v850_v58 = vpop.f32.mrb[80].mxu1  ;;  %v1396_v26 = vpop.f32.mrb[80].mxu0 }
 0x17c   :  { %v851_v10 = vadd.f32 %v850_v58, %v8906_v21  ;;  %v9369_v55 = vadd.f32 %v1396_v26, %v843_v38  ;;  %v7108_v61 = vpop.f32.mrb[81].mxu1  ;;  %v7254_v5 = vpop.f32.mrb[81].mxu0  ;;  %v75_v21 = vld [vmem:[%s12594_s0 + $0x1e0] sm:$0xff]  ;;  %v1186_v38 = vld [vmem:[%s12594_s0 + $0x1d1] sm:$0xff] }
 0x17d   :  { %v853_v46 = vpop.f32.mrb[82].mxu1  ;;  %v1399_v60 = vpop.f32.mrb[82].mxu0 }
 0x17e   :  { %v854_v20 = vadd.f32 %v853_v46, %v8910_v27  ;;  %v9372_v44 = vadd.f32 %v1399_v60, %v846_v32  ;;  %v7255_v18 = vpop.f32.mrb[83].mxu0  ;;  %v7109_v39 = vpop.f32.mrb[83].mxu1  ;;  %v76_v27 = vld [vmem:[%s12594_s0 + $0x1e8] sm:$0xff]  ;;  %v1187_v32 = vld [vmem:[%s12594_s0 + $0x1d9] sm:$0xff] }
 0x17f   :  { %v118_v61 = vpack.c.bf16 %v76_v27, %v75_v21  ;;  %v1230_v5 = vpack.c.bf16 %v1187_v32, %v1186_v38 }
 0x180   :  { %7215 = vmatmul.mubr.msk.bf16.gmra.mrb[188].mxu1 %vm239_vm3, %v117_v16  ;;  %7361 = vmatmul.mubr.msk.bf16.gmra.mrb[188].mxu0 %vm239_vm3, %v1229_v34 }
 0x181   :  { %7218 = vmatprep.mubr.msk.bf16.mxu1 %vm8304_vm2, %v12619_v1  ;;  %7364 = vmatprep.mubr.msk.bf16.mxu0 %vm8304_vm2, %v12619_v1 }
 0x183   :  { %v858_v7 = vpop.f32.mrb[84].mxu1  ;;  %v1404_v13 = vpop.f32.mrb[84].mxu0 }
 0x184   :  { %v859_v36 = vadd.f32 %v858_v7, %v8932_v35  ;;  %v9393_v42 = vadd.f32 %v1404_v13, %v851_v10  ;;  %v7112_v58 = vpop.f32.mrb[85].mxu1  ;;  %v7258_v26 = vpop.f32.mrb[85].mxu0  ;;  %v77_v35 = vld [vmem:[%s12594_s0 + $0x1f0] sm:$0xff]  ;;  %v1188_v10 = vld [vmem:[%s12594_s0 + $0x1e1] sm:$0xff] }
 0x185   :  { %v861_v16 = vpop.f32.mrb[86].mxu1  ;;  %v1407_v34 = vpop.f32.mrb[86].mxu0 }
 0x186   :  { %v862_v46 = vadd.f32 %v861_v16, %v8936_v41  ;;  %v9396_v60 = vadd.f32 %v1407_v34, %v854_v20  ;;  %v7259_v18 = vpop.f32.mrb[87].mxu0  ;;  %v7113_v39 = vpop.f32.mrb[87].mxu1  ;;  %v78_v41 = vld [vmem:[%s12594_s0 + $0x1f8] sm:$0xff]  ;;  %v1189_v20 = vld [vmem:[%s12594_s0 + $0x1e9] sm:$0xff] }
 0x187   :  { %v119_v58 = vpack.c.bf16 %v78_v41, %v77_v35  ;;  %v1231_v26 = vpack.c.bf16 %v1189_v20, %v1188_v10 }
 0x188   :  { %7219 = vmatmul.mubr.msk.bf16.gmra.mrb[192].mxu1 %vm239_vm3, %v118_v61  ;;  %7365 = vmatmul.mubr.msk.bf16.gmra.mrb[192].mxu0 %vm239_vm3, %v1230_v5 }
 0x189   :  { %7222 = vmatprep.mubr.msk.bf16.mxu1 %vm8304_vm2, %v12619_v1  ;;  %7368 = vmatprep.mubr.msk.bf16.mxu0 %vm8304_vm2, %v12619_v1 }
 0x18b   :  { %v866_v21 = vpop.f32.mrb[88].mxu1  ;;  %v1412_v27 = vpop.f32.mrb[88].mxu0 }
 0x18c   :  { %v867_v38 = vadd.f32 %v866_v21, %v8958_v49  ;;  %v9417_v32 = vadd.f32 %v1412_v27, %v859_v36  ;;  %v7116_v7 = vpop.f32.mrb[89].mxu1  ;;  %v7262_v13 = vpop.f32.mrb[89].mxu0  ;;  %v79_v49 = vld [vmem:[%s12594_s0 + $0x200] sm:$0xff]  ;;  %v1190_v36 = vld [vmem:[%s12594_s0 + $0x1f1] sm:$0xff] }
 0x18d   :  { %v869_v61 = vpop.f32.mrb[90].mxu1  ;;  %v1415_v5 = vpop.f32.mrb[90].mxu0 }
 0x18e   :  { %v870_v16 = vadd.f32 %v869_v61, %v8962_v57  ;;  %v9420_v34 = vadd.f32 %v1415_v5, %v862_v46  ;;  %v7263_v18 = vpop.f32.mrb[91].mxu0  ;;  %v7117_v39 = vpop.f32.mrb[91].mxu1  ;;  %v80_v57 = vld [vmem:[%s12594_s0 + $0x208] sm:$0xff]  ;;  %v1191_v46 = vld [vmem:[%s12594_s0 + $0x1f9] sm:$0xff] }
 0x18f   :  { %v120_v7 = vpack.c.bf16 %v80_v57, %v79_v49  ;;  %v1232_v13 = vpack.c.bf16 %v1191_v46, %v1190_v36 }
 0x190   :  { %7223 = vmatmul.mubr.msk.bf16.gmra.mrb[196].mxu1 %vm239_vm3, %v119_v58  ;;  %7369 = vmatmul.mubr.msk.bf16.gmra.mrb[196].mxu0 %vm239_vm3, %v1231_v26 }
 0x191   :  { %7226 = vmatprep.mubr.msk.bf16.mxu1 %vm8304_vm2, %v12619_v1  ;;  %7372 = vmatprep.mubr.msk.bf16.mxu0 %vm8304_vm2, %v12619_v1 }
 0x193   :  { %v874_v35 = vpop.f32.mrb[92].mxu1  ;;  %v1420_v41 = vpop.f32.mrb[92].mxu0 }
 0x194   :  { %v875_v10 = vadd.f32 %v874_v35, %v8984_v4  ;;  %v9441_v20 = vadd.f32 %v1420_v41, %v867_v38  ;;  %v7120_v21 = vpop.f32.mrb[93].mxu1  ;;  %v7266_v27 = vpop.f32.mrb[93].mxu0  ;;  %v81_v4 = vld [vmem:[%s12594_s0 + $0x210] sm:$0xff]  ;;  %v1192_v38 = vld [vmem:[%s12594_s0 + $0x201] sm:$0xff] }
 0x195   :  { %v877_v58 = vpop.f32.mrb[94].mxu1  ;;  %v1423_v26 = vpop.f32.mrb[94].mxu0 }
 0x196   :  { %v878_v61 = vadd.f32 %v877_v58, %v8988_v15  ;;  %v9444_v5 = vadd.f32 %v1423_v26, %v870_v16  ;;  %v7267_v18 = vpop.f32.mrb[95].mxu0  ;;  %v7121_v39 = vpop.f32.mrb[95].mxu1  ;;  %v82_v15 = vld [vmem:[%s12594_s0 + $0x218] sm:$0xff]  ;;  %v1193_v16 = vld [vmem:[%s12594_s0 + $0x209] sm:$0xff] }
 0x197   :  { %v121_v21 = vpack.c.bf16 %v82_v15, %v81_v4  ;;  %v1233_v27 = vpack.c.bf16 %v1193_v16, %v1192_v38 }
 0x198   :  { %7227 = vmatmul.mubr.msk.bf16.gmra.mrb[200].mxu1 %vm239_vm3, %v120_v7  ;;  %7373 = vmatmul.mubr.msk.bf16.gmra.mrb[200].mxu0 %vm239_vm3, %v1232_v13 }
 0x199   :  { %7230 = vmatprep.mubr.msk.bf16.mxu1 %vm8304_vm2, %v12619_v1  ;;  %7376 = vmatprep.mubr.msk.bf16.mxu0 %vm8304_vm2, %v12619_v1 }
 0x19b   :  { %v882_v49 = vpop.f32.mrb[96].mxu1  ;;  %v1428_v57 = vpop.f32.mrb[96].mxu0 }
 0x19c   :  { %v883_v36 = vadd.f32 %v882_v49, %v9010_v25  ;;  %v9465_v46 = vadd.f32 %v1428_v57, %v875_v10  ;;  %v7124_v35 = vpop.f32.mrb[97].mxu1  ;;  %v7270_v41 = vpop.f32.mrb[97].mxu0  ;;  %v83_v25 = vld [vmem:[%s12594_s0 + $0x220] sm:$0xff]  ;;  %v1194_v10 = vld [vmem:[%s12594_s0 + $0x211] sm:$0xff] }
 0x19d   :  { %v885_v7 = vpop.f32.mrb[98].mxu1  ;;  %v1431_v13 = vpop.f32.mrb[98].mxu0 }
 0x19e   :  { %v886_v58 = vadd.f32 %v885_v7, %v9014_v33  ;;  %v9468_v26 = vadd.f32 %v1431_v13, %v878_v61  ;;  %v7271_v18 = vpop.f32.mrb[99].mxu0  ;;  %v7125_v39 = vpop.f32.mrb[99].mxu1  ;;  %v84_v33 = vld [vmem:[%s12594_s0 + $0x228] sm:$0xff]  ;;  %v1195_v61 = vld [vmem:[%s12594_s0 + $0x219] sm:$0xff] }
 0x19f   :  { %v122_v35 = vpack.c.bf16 %v84_v33, %v83_v25  ;;  %v1234_v41 = vpack.c.bf16 %v1195_v61, %v1194_v10 }
 0x1a0   :  { %7231 = vmatmul.mubr.msk.bf16.gmra.mrb[204].mxu1 %vm239_vm3, %v121_v21  ;;  %7377 = vmatmul.mubr.msk.bf16.gmra.mrb[204].mxu0 %vm239_vm3, %v1233_v27 }
 0x1a1   :  { %7234 = vmatprep.mubr.msk.bf16.mxu1 %vm8304_vm2, %v12619_v1  ;;  %7380 = vmatprep.mubr.msk.bf16.mxu0 %vm8304_vm2, %v12619_v1 }
 0x1a3   :  { %v890_v4 = vpop.f32.mrb[100].mxu1  ;;  %v1436_v15 = vpop.f32.mrb[100].mxu0 }
 0x1a4   :  { %v891_v38 = vadd.f32 %v890_v4, %v9036_v45  ;;  %v9489_v16 = vadd.f32 %v1436_v15, %v883_v36  ;;  %v7128_v49 = vpop.f32.mrb[101].mxu1  ;;  %v7274_v57 = vpop.f32.mrb[101].mxu0  ;;  %v85_v45 = vld [vmem:[%s12594_s0 + $0x230] sm:$0xff]  ;;  %v1196_v36 = vld [vmem:[%s12594_s0 + $0x221] sm:$0xff] }
 0x1a5   :  { %v893_v21 = vpop.f32.mrb[102].mxu1  ;;  %v1439_v27 = vpop.f32.mrb[102].mxu0 }
 0x1a6   :  { %v894_v7 = vadd.f32 %v893_v21, %v9040_v53  ;;  %v9492_v13 = vadd.f32 %v1439_v27, %v886_v58  ;;  %v7275_v18 = vpop.f32.mrb[103].mxu0  ;;  %v7129_v39 = vpop.f32.mrb[103].mxu1  ;;  %v86_v53 = vld [vmem:[%s12594_s0 + $0x238] sm:$0xff]  ;;  %v1197_v58 = vld [vmem:[%s12594_s0 + $0x229] sm:$0xff] }
 0x1a7   :  { %v123_v49 = vpack.c.bf16 %v86_v53, %v85_v45  ;;  %v1235_v57 = vpack.c.bf16 %v1197_v58, %v1196_v36 }
 0x1a8   :  { %7235 = vmatmul.mubr.msk.bf16.gmra.mrb[208].mxu1 %vm239_vm3, %v122_v35  ;;  %7381 = vmatmul.mubr.msk.bf16.gmra.mrb[208].mxu0 %vm239_vm3, %v1234_v41 }
 0x1a9   :  { %7238 = vmatprep.mubr.msk.bf16.mxu1 %vm8304_vm2, %v12619_v1  ;;  %7384 = vmatprep.mubr.msk.bf16.mxu0 %vm8304_vm2, %v12619_v1 }
 0x1ab   :  { %v898_v25 = vpop.f32.mrb[104].mxu1  ;;  %v1444_v33 = vpop.f32.mrb[104].mxu0 }
 0x1ac   :  { %v899_v10 = vadd.f32 %v898_v25, %v9062_v9  ;;  %v9513_v61 = vadd.f32 %v1444_v33, %v891_v38  ;;  %v7132_v4 = vpop.f32.mrb[105].mxu1  ;;  %v7278_v15 = vpop.f32.mrb[105].mxu0  ;;  %v87_v9 = vld [vmem:[%s12594_s0 + $0x240] sm:$0x3] }
 0x1ad   :  { %v901_v35 = vpop.f32.mrb[106].mxu1  ;;  %v1447_v41 = vpop.f32.mrb[106].mxu0  ;;  %v1199_v38 = vld [vmem:[%s12594_s0 + $0x239] sm:$0xff]  ;;  %v124_v33 = vpack.c.bf16 %v87_v9, %v87_v9  ;;  %v6378_v9 = vld [vmem:[%s12593_s1 + $0xa] sm:$0x3] }
 0x1ae   :  { %v902_v21 = vadd.f32 %v901_v35, %v9066_v19  ;;  %v9516_v27 = vadd.f32 %v1447_v41, %v894_v7  ;;  %v7279_v18 = vpop.f32.mrb[107].mxu0  ;;  %v7133_v39 = vpop.f32.mrb[107].mxu1  ;;  %v1198_v19 = vld [vmem:[%s12594_s0 + $0x231] sm:$0xff] }
 0x1af   :  { %v1236_v4 = vpack.c.bf16 %v1199_v38, %v1198_v19 }
 0x1b0   :  { %7239 = vmatmul.mubr.msk.bf16.gmra.mrb[212].mxu1 %vm239_vm3, %v123_v49  ;;  %7385 = vmatmul.mubr.msk.bf16.gmra.mrb[212].mxu0 %vm239_vm3, %v1235_v57 }
 0x1b1   :  { %7242 = vmatprep.mubr.msk.bf16.mxu1 %vm8304_vm2, %v12619_v1  ;;  %7388 = vmatprep.mubr.msk.bf16.mxu0 %vm8304_vm2, %v12619_v1 }
 0x1b3   :  { %v906_v7 = vpop.f32.mrb[108].mxu1  ;;  %v1452_v45 = vpop.f32.mrb[108].mxu0 }
 0x1b4   :  { %v907_v53 = vadd.f32 %v906_v7, %v9088_v37  ;;  %v9534_v36 = vadd.f32 %v1452_v45, %v899_v10  ;;  %v7136_v58 = vpop.f32.mrb[109].mxu1  ;;  %v7282_v25 = vpop.f32.mrb[109].mxu0  ;;  %v1200_v37 = vld [vmem:[%s12594_s0 + $0x241] sm:$0x3]  ;;  %v6084_v10 = vld [vmem:[%s12594_s0 + $0x4b8] sm:$0xff] }
 0x1b5   :  { %v909_v15 = vpop.f32.mrb[110].mxu1  ;;  %v1455_v49 = vpop.f32.mrb[110].mxu0  ;;  %v1237_v58 = vpack.c.bf16 %v1200_v37, %v1200_v37  ;;  %v6416_v37 = vld [vmem:[%s12593_s1 + $0xc] sm:$0x3] }
 0x1b6   :  { %v910_v57 = vadd.f32 %v909_v15, %v9092_v47  ;;  %v9537_v35 = vadd.f32 %v1455_v49, %v902_v21  ;;  %v7283_v41 = vpop.f32.mrb[111].mxu0  ;;  %v7137_v18 = vpop.f32.mrb[111].mxu1  ;;  %v6083_v47 = vld [vmem:[%s12594_s0 + $0x4b0] sm:$0xff] }
 0x1b7   :  { %v1829_v25 = vpack.c.bf16 %v6084_v10, %v6083_v47 }
 0x1b8   :  { %12629 = vst [vmem:[#allocation31_spill] sm:$0xff] %v9537_v35  ;;  %7243 = vmatmul.mubr.msk.bf16.gmra.mrb[216].mxu1 %vm239_vm3, %v124_v33  ;;  %7389 = vmatmul.mubr.msk.bf16.gmra.mrb[216].mxu0 %vm239_vm3, %v1236_v4  ;;  %v3235_v35 = vand.u32 %v6378_v9, %v8336_v6 }
 0x1b9   :  { %7392 = vmatprep.mubr.msk.bf16.mxu0 %vm8304_vm2, %v12619_v1  ;;  %7398 = vmatprep.mubr.msk.bf16.mxu1 %vm8304_vm2, %v12619_v1 }
 0x1bb   :  { %v914_v21 = vpop.f32.mrb[112].mxu1  ;;  %v1460_v39 = vpop.f32.mrb[112].mxu0 }
 0x1bc   :  { %v915_v19 = vadd.f32 %v914_v21, %v9114_v2  ;;  %v9558_v38 = vadd.f32 %v1460_v39, %v907_v53  ;;  %v7140_v7 = vpop.f32.mrb[113].mxu1  ;;  %v7286_v45 = vpop.f32.mrb[113].mxu0  ;;  %v6085_v2 = vld [vmem:[%s12594_s0 + $0x4c0] sm:$0xff]  ;;  %v6194_v53 = vld [vmem:[%s12594_s0 + $0x708] sm:$0xff] }
 0x1bd   :  { %v917_v33 = vpop.f32.mrb[114].mxu1  ;;  %v1463_v4 = vpop.f32.mrb[114].mxu0 }
 0x1be   :  { %v918_v15 = vadd.f32 %v917_v33, %v9118_v23  ;;  %v9561_v49 = vadd.f32 %v1463_v4, %v910_v57  ;;  %v7287_v41 = vpop.f32.mrb[115].mxu0  ;;  %v7141_v18 = vpop.f32.mrb[115].mxu1  ;;  %v6086_v23 = vld [vmem:[%s12594_s0 + $0x4c8] sm:$0xff]  ;;  %v6195_v57 = vld [vmem:[%s12594_s0 + $0x710] sm:$0xff] }
 0x1bf   :  { %v1830_v45 = vpack.c.bf16 %v6086_v23, %v6085_v2 }
 0x1c0   :  { %12630 = vst [vmem:[#allocation32_spill] sm:$0xff] %v9561_v49  ;;  %7393 = vmatmul.mubr.msk.bf16.gmra.mrb[220].mxu0 %vm239_vm3, %v1237_v58  ;;  %7399 = vmatmul.mubr.msk.bf16.vlgmr.msra.gmra.mrb[220].mxu1 %vm239_vm3, %v1829_v25  ;;  %v2457_v58 = vpack.c.bf16 %v6195_v57, %v6194_v53 }
 0x1c1   :  { %7402 = vmatprep.mubr.msk.bf16.mxu1 %vm8304_vm2, %v12619_v1  ;;  %7548 = vmatprep.mubr.msk.bf16.mxu0 %vm8304_vm2, %v12619_v1 }
 0x1c2   :  { %7697 = vmatpush3.bf16.msra.mxu1 %v3235_v35  ;;  %v3862_v35 = vand.u32 %v6416_v37, %v8336_v6 }
 0x1c3   :  { %v922_v47 = vpop.f32.mrb[116].mxu1  ;;  %v1468_v10 = vpop.f32.mrb[116].mxu0  ;;  %7996 = vmatprep.subr.bf16.mxu1 %v12619_v1 }
 0x1c4   :  { %v923_v21 = vadd.f32 %v922_v47, %v9140_v43  ;;  %v9587_v39 = vadd.f32 %v1468_v10, %v915_v19  ;;  %v7144_v9 = vpop.f32.mrb[117].mxu1  ;;  %v7290_v7 = vpop.f32.mrb[117].mxu0  ;;  %v6087_v43 = vld [vmem:[%s12594_s0 + $0x4d0] sm:$0xff]  ;;  %v6196_v19 = vld [vmem:[%s12594_s0 + $0x718] sm:$0xff] }
 0x1c5   :  { %v925_v25 = vpop.f32.mrb[118].mxu1  ;;  %v1471_v33 = vpop.f32.mrb[118].mxu0 }
 0x1c6   :  { %v926_v4 = vadd.f32 %v925_v25, %v9144_v63  ;;  %v9591_v41 = vadd.f32 %v1471_v33, %v918_v15  ;;  %v7291_v18 = vpop.f32.mrb[119].mxu0  ;;  %v7145_v49 = vpop.f32.mrb[119].mxu1  ;;  %v6088_v63 = vld [vmem:[%s12594_s0 + $0x4d8] sm:$0xff]  ;;  %v6197_v15 = vld [vmem:[%s12594_s0 + $0x720] sm:$0xff] }
 0x1c7   :  { %v1831_v47 = vpack.c.bf16 %v6088_v63, %v6087_v43  ;;  %v2458_v10 = vpack.c.bf16 %v6197_v15, %v6196_v19 }
 0x1c8   :  { %7403 = vmatmul.mubr.msk.bf16.gmra.mrb[224].mxu1 %vm239_vm3, %v1830_v45  ;;  %7549 = vmatmul.mubr.msk.bf16.vlgmr.msra.gmra.mrb[224].mxu0 %vm239_vm3, %v2457_v58 }
 0x1c9   :  { %7847 = vmatpush3.bf16.msra.mxu0 %v3862_v35  ;;  %7406 = vmatprep.mubr.msk.bf16.mxu1 %vm8304_vm2, %v12619_v1  ;;  %v6199_v35 = vld [vmem:[%s12594_s0 + $0x730] sm:$0xff] }
 0x1ca   :  { %7552 = vmatprep.mubr.msk.bf16.mxu0 %vm8304_vm2, %v12619_v1  ;;  %8146 = vmatprep.subr.bf16.mxu0 %v12619_v1 }
 0x1cb   :  { %v930_v49 = vpop.f32.mrb[120].mxu1  ;;  %v1476_v2 = vpop.f32.mrb[120].mxu0 }
 0x1cc   :  { %v931_v23 = vadd.f32 %v930_v49, %v9166_v31  ;;  %v9613_v53 = vadd.f32 %v1476_v2, %v923_v21  ;;  %v7148_v57 = vpop.f32.mrb[121].mxu1  ;;  %v7294_v37 = vpop.f32.mrb[121].mxu0  ;;  %v6089_v31 = vld [vmem:[%s12594_s0 + $0x4e0] sm:$0xff]  ;;  %v6198_v21 = vld [vmem:[%s12594_s0 + $0x728] sm:$0xff] }
 0x1cd   :  { %v933_v9 = vpop.f32.mrb[122].mxu1  ;;  %v1479_v7 = vpop.f32.mrb[122].mxu0  ;;  %v2459_v2 = vpack.c.bf16 %v6199_v35, %v6198_v21 }
 0x1ce   :  { %v934_v45 = vadd.f32 %v933_v9, %v9170_v59  ;;  %v9616_v58 = vadd.f32 %v1479_v7, %v926_v4  ;;  %v7295_v25 = vpop.f32.mrb[123].mxu0  ;;  %v7149_v33 = vpop.f32.mrb[123].mxu1  ;;  %v6090_v59 = vld [vmem:[%s12594_s0 + $0x4e8] sm:$0xff] }
 0x1cf   :  { %v1832_v49 = vpack.c.bf16 %v6090_v59, %v6089_v31 }
 0x1d0   :  { %7407 = vmatmul.mubr.msk.bf16.gmra.mrb[228].mxu1 %vm239_vm3, %v1831_v47  ;;  %7553 = vmatmul.mubr.msk.bf16.gmra.mrb[228].mxu0 %vm239_vm3, %v2458_v10 }
 0x1d1   :  { %7410 = vmatprep.mubr.msk.bf16.mxu1 %vm8304_vm2, %v12619_v1  ;;  %7556 = vmatprep.mubr.msk.bf16.mxu0 %vm8304_vm2, %v12619_v1 }
 0x1d3   :  { %v938_v4 = vpop.f32.mrb[124].mxu1  ;;  %v1484_v18 = vpop.f32.mrb[124].mxu0 }
 0x1d4   :  { %v939_v43 = vadd.f32 %v938_v4, %v9192_v30  ;;  %v9637_v63 = vadd.f32 %v1484_v18, %v931_v23  ;;  %v7152_v19 = vpop.f32.mrb[125].mxu1  ;;  %v7298_v15 = vpop.f32.mrb[125].mxu0  ;;  %v6091_v30 = vld [vmem:[%s12594_s0 + $0x4f0] sm:$0xff]  ;;  %v6200_v23 = vld [vmem:[%s12594_s0 + $0x738] sm:$0xff] }
 0x1d5   :  { %v941_v57 = vpop.f32.mrb[126].mxu1  ;;  %v1487_v37 = vpop.f32.mrb[126].mxu0 }
 0x1d6   :  { %v942_v47 = vadd.f32 %v941_v57, %v9196_v12  ;;  %v9640_v10 = vadd.f32 %v1487_v37, %v934_v45  ;;  %v7299_v9 = vpop.f32.mrb[127].mxu0  ;;  %v7153_v7 = vpop.f32.mrb[127].mxu1  ;;  %v6092_v12 = vld [vmem:[%s12594_s0 + $0x4f8] sm:$0xff]  ;;  %v6201_v45 = vld [vmem:[%s12594_s0 + $0x740] sm:$0xff] }
 0x1d7   :  { %v1833_v4 = vpack.c.bf16 %v6092_v12, %v6091_v30  ;;  %v2460_v18 = vpack.c.bf16 %v6201_v45, %v6200_v23 }
 0x1d8   :  { %7411 = vmatmul.mubr.msk.bf16.gmra.mrb[232].mxu1 %vm239_vm3, %v1832_v49  ;;  %7557 = vmatmul.mubr.msk.bf16.gmra.mrb[232].mxu0 %vm239_vm3, %v2459_v2 }
 0x1d9   :  { %7414 = vmatprep.mubr.msk.bf16.mxu1 %vm8304_vm2, %v12619_v1  ;;  %7560 = vmatprep.mubr.msk.bf16.mxu0 %vm8304_vm2, %v12619_v1 }
 0x1db   :  { %v946_v25 = vpop.f32.mrb[128].mxu1  ;;  %v1492_v33 = vpop.f32.mrb[128].mxu0 }
 0x1dc   :  { %v947_v31 = vadd.f32 %v946_v25, %v9218_v17  ;;  %v9661_v59 = vadd.f32 %v1492_v33, %v939_v43  ;;  %v7156_v21 = vpop.f32.mrb[129].mxu1  ;;  %v7302_v35 = vpop.f32.mrb[129].mxu0  ;;  %v6093_v17 = vld [vmem:[%s12594_s0 + $0x500] sm:$0xff]  ;;  %v6202_v43 = vld [vmem:[%s12594_s0 + $0x748] sm:$0xff] }
 0x1dd   :  { %v949_v19 = vpop.f32.mrb[130].mxu1  ;;  %v1495_v15 = vpop.f32.mrb[130].mxu0 }
 0x1de   :  { %v950_v49 = vadd.f32 %v949_v19, %v9222_v11  ;;  %v9664_v2 = vadd.f32 %v1495_v15, %v942_v47  ;;  %v7303_v57 = vpop.f32.mrb[131].mxu0  ;;  %v7157_v37 = vpop.f32.mrb[131].mxu1  ;;  %v6094_v11 = vld [vmem:[%s12594_s0 + $0x508] sm:$0xff]  ;;  %v6203_v47 = vld [vmem:[%s12594_s0 + $0x750] sm:$0xff] }
 0x1df   :  { %v1834_v25 = vpack.c.bf16 %v6094_v11, %v6093_v17  ;;  %v2461_v33 = vpack.c.bf16 %v6203_v47, %v6202_v43 }
 0x1e0   :  { %7415 = vmatmul.mubr.msk.bf16.gmra.mrb[236].mxu1 %vm239_vm3, %v1833_v4  ;;  %7561 = vmatmul.mubr.msk.bf16.gmra.mrb[236].mxu0 %vm239_vm3, %v2460_v18 }
 0x1e1   :  { %7418 = vmatprep.mubr.msk.bf16.mxu1 %vm8304_vm2, %v12619_v1  ;;  %7564 = vmatprep.mubr.msk.bf16.mxu0 %vm8304_vm2, %v12619_v1 }
 0x1e3   :  { %v954_v9 = vpop.f32.mrb[132].mxu1  ;;  %v1500_v7 = vpop.f32.mrb[132].mxu0 }
 0x1e4   :  { %v955_v30 = vadd.f32 %v954_v9, %v9244_v0  ;;  %v9685_v12 = vadd.f32 %v1500_v7, %v947_v31  ;;  %v7160_v23 = vpop.f32.mrb[133].mxu1  ;;  %v7306_v45 = vpop.f32.mrb[133].mxu0  ;;  %v6095_v0 = vld [vmem:[%s12594_s0 + $0x510] sm:$0xff]  ;;  %v6204_v31 = vld [vmem:[%s12594_s0 + $0x758] sm:$0xff] }
 0x1e5   :  { %v957_v21 = vpop.f32.mrb[134].mxu1  ;;  %v1503_v35 = vpop.f32.mrb[134].mxu0 }
 0x1e6   :  { %v958_v4 = vadd.f32 %v957_v21, %v9248_v52  ;;  %v9688_v18 = vadd.f32 %v1503_v35, %v950_v49  ;;  %v7307_v19 = vpop.f32.mrb[135].mxu0  ;;  %v7161_v15 = vpop.f32.mrb[135].mxu1  ;;  %v6096_v52 = vld [vmem:[%s12594_s0 + $0x518] sm:$0xff]  ;;  %v6205_v49 = vld [vmem:[%s12594_s0 + $0x760] sm:$0xff] }
 0x1e7   :  { %v1835_v9 = vpack.c.bf16 %v6096_v52, %v6095_v0  ;;  %v2462_v7 = vpack.c.bf16 %v6205_v49, %v6204_v31 }
 0x1e8   :  { %7419 = vmatmul.mubr.msk.bf16.gmra.mrb[240].mxu1 %vm239_vm3, %v1834_v25  ;;  %7565 = vmatmul.mubr.msk.bf16.gmra.mrb[240].mxu0 %vm239_vm3, %v2461_v33 }
 0x1e9   :  { %7422 = vmatprep.mubr.msk.bf16.mxu1 %vm8304_vm2, %v12619_v1  ;;  %7568 = vmatprep.mubr.msk.bf16.mxu0 %vm8304_vm2, %v12619_v1 }
 0x1eb   :  { %v962_v57 = vpop.f32.mrb[136].mxu1  ;;  %v1508_v37 = vpop.f32.mrb[136].mxu0 }
 0x1ec   :  { %v963_v17 = vadd.f32 %v962_v57, %v9270_v24  ;;  %v9709_v11 = vadd.f32 %v1508_v37, %v955_v30  ;;  %v7164_v43 = vpop.f32.mrb[137].mxu1  ;;  %v7310_v47 = vpop.f32.mrb[137].mxu0  ;;  %v6097_v24 = vld [vmem:[%s12594_s0 + $0x520] sm:$0xff]  ;;  %v6206_v30 = vld [vmem:[%s12594_s0 + $0x768] sm:$0xff] }
 0x1ed   :  { %v965_v23 = vpop.f32.mrb[138].mxu1  ;;  %v1511_v45 = vpop.f32.mrb[138].mxu0 }
 0x1ee   :  { %v966_v25 = vadd.f32 %v965_v23, %v9274_v51  ;;  %v9712_v33 = vadd.f32 %v1511_v45, %v958_v4  ;;  %v7311_v21 = vpop.f32.mrb[139].mxu0  ;;  %v7165_v35 = vpop.f32.mrb[139].mxu1  ;;  %v6098_v51 = vld [vmem:[%s12594_s0 + $0x528] sm:$0xff]  ;;  %v6207_v4 = vld [vmem:[%s12594_s0 + $0x770] sm:$0xff] }
 0x1ef   :  { %v1836_v57 = vpack.c.bf16 %v6098_v51, %v6097_v24  ;;  %v2463_v37 = vpack.c.bf16 %v6207_v4, %v6206_v30 }
 0x1f0   :  { %7423 = vmatmul.mubr.msk.bf16.gmra.mrb[244].mxu1 %vm239_vm3, %v1835_v9  ;;  %7569 = vmatmul.mubr.msk.bf16.gmra.mrb[244].mxu0 %vm239_vm3, %v2462_v7 }
 0x1f1   :  { %7426 = vmatprep.mubr.msk.bf16.mxu1 %vm8304_vm2, %v12619_v1  ;;  %7572 = vmatprep.mubr.msk.bf16.mxu0 %vm8304_vm2, %v12619_v1 }
 0x1f3   :  { %v970_v19 = vpop.f32.mrb[140].mxu1  ;;  %v1516_v15 = vpop.f32.mrb[140].mxu0 }
 0x1f4   :  { %v971_v0 = vadd.f32 %v970_v19, %v9296_v48  ;;  %v9733_v52 = vadd.f32 %v1516_v15, %v963_v17  ;;  %v7168_v31 = vpop.f32.mrb[141].mxu1  ;;  %v7314_v49 = vpop.f32.mrb[141].mxu0  ;;  %v6099_v48 = vld [vmem:[%s12594_s0 + $0x530] sm:$0xff]  ;;  %v6208_v17 = vld [vmem:[%s12594_s0 + $0x778] sm:$0xff] }
 0x1f5   :  { %v973_v43 = vpop.f32.mrb[142].mxu1  ;;  %v1519_v47 = vpop.f32.mrb[142].mxu0 }
 0x1f6   :  { %v974_v9 = vadd.f32 %v973_v43, %v9300_v40  ;;  %v9736_v7 = vadd.f32 %v1519_v47, %v966_v25  ;;  %v7315_v23 = vpop.f32.mrb[143].mxu0  ;;  %v7169_v45 = vpop.f32.mrb[143].mxu1  ;;  %v6100_v40 = vld [vmem:[%s12594_s0 + $0x538] sm:$0xff]  ;;  %v6209_v25 = vld [vmem:[%s12594_s0 + $0x780] sm:$0xff] }
 0x1f7   :  { %v1837_v19 = vpack.c.bf16 %v6100_v40, %v6099_v48  ;;  %v2464_v15 = vpack.c.bf16 %v6209_v25, %v6208_v17 }
 0x1f8   :  { %7427 = vmatmul.mubr.msk.bf16.gmra.mrb[248].mxu1 %vm239_vm3, %v1836_v57  ;;  %7573 = vmatmul.mubr.msk.bf16.gmra.mrb[248].mxu0 %vm239_vm3, %v2463_v37 }
 0x1f9   :  { %7430 = vmatprep.mubr.msk.bf16.mxu1 %vm8304_vm2, %v12619_v1  ;;  %7576 = vmatprep.mubr.msk.bf16.mxu0 %vm8304_vm2, %v12619_v1 }
 0x1fb   :  { %v978_v21 = vpop.f32.mrb[144].mxu1  ;;  %v1524_v35 = vpop.f32.mrb[144].mxu0 }
 0x1fc   :  { %v979_v24 = vadd.f32 %v978_v21, %v9320_v3  ;;  %v9757_v51 = vadd.f32 %v1524_v35, %v971_v0  ;;  %v7172_v30 = vpop.f32.mrb[145].mxu1  ;;  %v7318_v4 = vpop.f32.mrb[145].mxu0  ;;  %v6101_v3 = vld [vmem:[%s12594_s0 + $0x540] sm:$0xff]  ;;  %v6210_v0 = vld [vmem:[%s12594_s0 + $0x788] sm:$0xff] }
 0x1fd   :  { %v981_v31 = vpop.f32.mrb[146].mxu1  ;;  %v1527_v49 = vpop.f32.mrb[146].mxu0 }
 0x1fe   :  { %v982_v57 = vadd.f32 %v981_v31, %v9323_v29  ;;  %v9760_v37 = vadd.f32 %v1527_v49, %v974_v9  ;;  %v7319_v43 = vpop.f32.mrb[147].mxu0  ;;  %v7173_v47 = vpop.f32.mrb[147].mxu1  ;;  %v6102_v29 = vld [vmem:[%s12594_s0 + $0x548] sm:$0xff]  ;;  %v6211_v9 = vld [vmem:[%s12594_s0 + $0x790] sm:$0xff] }
 0x1ff   :  { %v1838_v21 = vpack.c.bf16 %v6102_v29, %v6101_v3  ;;  %v2465_v35 = vpack.c.bf16 %v6211_v9, %v6210_v0 }
 0x200   :  { %7431 = vmatmul.mubr.msk.bf16.gmra.mrb[252].mxu1 %vm239_vm3, %v1837_v19  ;;  %7577 = vmatmul.mubr.msk.bf16.gmra.mrb[252].mxu0 %vm239_vm3, %v2464_v15 }
 0x201   :  { %7434 = vmatprep.mubr.msk.bf16.mxu1 %vm8304_vm2, %v12619_v1  ;;  %7580 = vmatprep.mubr.msk.bf16.mxu0 %vm8304_vm2, %v12619_v1 }
 0x203   :  { %v986_v23 = vpop.f32.mrb[148].mxu1  ;;  %v1532_v45 = vpop.f32.mrb[148].mxu0 }
 0x204   :  { %v987_v48 = vadd.f32 %v986_v23, %v8856_v56  ;;  %v9781_v40 = vadd.f32 %v1532_v45, %v979_v24  ;;  %v7176_v17 = vpop.f32.mrb[149].mxu1  ;;  %v7322_v25 = vpop.f32.mrb[149].mxu0  ;;  %v6103_v56 = vld [vmem:[%s12594_s0 + $0x550] sm:$0xff]  ;;  %v6212_v24 = vld [vmem:[%s12594_s0 + $0x798] sm:$0xff] }
 0x205   :  { %v989_v30 = vpop.f32.mrb[150].mxu1  ;;  %v1535_v4 = vpop.f32.mrb[150].mxu0 }
 0x206   :  { %v990_v19 = vadd.f32 %v989_v30, %v8860_v62  ;;  %v9784_v15 = vadd.f32 %v1535_v4, %v982_v57  ;;  %v7323_v31 = vpop.f32.mrb[151].mxu0  ;;  %v7177_v49 = vpop.f32.mrb[151].mxu1  ;;  %v6104_v62 = vld [vmem:[%s12594_s0 + $0x558] sm:$0xff]  ;;  %v6213_v57 = vld [vmem:[%s12594_s0 + $0x7a0] sm:$0xff] }
 0x207   :  { %v1839_v23 = vpack.c.bf16 %v6104_v62, %v6103_v56  ;;  %v2466_v45 = vpack.c.bf16 %v6213_v57, %v6212_v24 }
 0x208   :  { %7435 = vmatmul.mubr.msk.bf16.gmra.mrb[0].mxu1 %vm239_vm3, %v1838_v21  ;;  %7581 = vmatmul.mubr.msk.bf16.gmra.mrb[0].mxu0 %vm239_vm3, %v2465_v35 }
 0x209   :  { %7438 = vmatprep.mubr.msk.bf16.mxu1 %vm8304_vm2, %v12619_v1  ;;  %7584 = vmatprep.mubr.msk.bf16.mxu0 %vm8304_vm2, %v12619_v1 }
 0x20b   :  { %v994_v43 = vpop.f32.mrb[152].mxu1  ;;  %v1540_v47 = vpop.f32.mrb[152].mxu0 }
 0x20c   :  { %v995_v3 = vadd.f32 %v994_v43, %v8882_v8  ;;  %v9805_v29 = vadd.f32 %v1540_v47, %v987_v48  ;;  %v7180_v0 = vpop.f32.mrb[153].mxu1  ;;  %v7326_v9 = vpop.f32.mrb[153].mxu0  ;;  %v6105_v8 = vld [vmem:[%s12594_s0 + $0x560] sm:$0xff]  ;;  %v6214_v48 = vld [vmem:[%s12594_s0 + $0x7a8] sm:$0xff] }
 0x20d   :  { %v997_v17 = vpop.f32.mrb[154].mxu1  ;;  %v1543_v25 = vpop.f32.mrb[154].mxu0 }
 0x20e   :  { %v998_v21 = vadd.f32 %v997_v17, %v8886_v14  ;;  %v9808_v35 = vadd.f32 %v1543_v25, %v990_v19  ;;  %v7327_v30 = vpop.f32.mrb[155].mxu0  ;;  %v7181_v4 = vpop.f32.mrb[155].mxu1  ;;  %v6106_v14 = vld [vmem:[%s12594_s0 + $0x568] sm:$0xff]  ;;  %v6215_v19 = vld [vmem:[%s12594_s0 + $0x7b0] sm:$0xff] }
 0x20f   :  { %v1840_v43 = vpack.c.bf16 %v6106_v14, %v6105_v8  ;;  %v2467_v47 = vpack.c.bf16 %v6215_v19, %v6214_v48  ;;  %v12631_v8 = vld [vmem:[#allocation2_spill] sm:$0xff] }
 0x210   :  { %7439 = vmatmul.mubr.msk.bf16.gmra.mrb[4].mxu1 %vm239_vm3, %v1839_v23  ;;  %7585 = vmatmul.mubr.msk.bf16.gmra.mrb[4].mxu0 %vm239_vm3, %v2466_v45 }
 0x211   :  { %7442 = vmatprep.mubr.msk.bf16.mxu1 %vm8304_vm2, %v12619_v1  ;;  %7588 = vmatprep.mubr.msk.bf16.mxu0 %vm8304_vm2, %v12619_v1 }
 0x213   :  { %v1002_v31 = vpop.f32.mrb[156].mxu1  ;;  %v1548_v49 = vpop.f32.mrb[156].mxu0 }
 0x214   :  { %v1003_v56 = vadd.f32 %v1002_v31, %v8908_v22  ;;  %v9829_v62 = vadd.f32 %v1548_v49, %v995_v3  ;;  %v7184_v24 = vpop.f32.mrb[157].mxu1  ;;  %v7330_v57 = vpop.f32.mrb[157].mxu0  ;;  %v6107_v22 = vld [vmem:[%s12594_s0 + $0x570] sm:$0xff]  ;;  %v6216_v3 = vld [vmem:[%s12594_s0 + $0x7b8] sm:$0xff] }
 0x215   :  { %v1005_v0 = vpop.f32.mrb[158].mxu1  ;;  %v1551_v9 = vpop.f32.mrb[158].mxu0 }
 0x216   :  { %v1006_v23 = vadd.f32 %v1005_v0, %v8912_v28  ;;  %v9832_v45 = vadd.f32 %v1551_v9, %v998_v21  ;;  %v7331_v17 = vpop.f32.mrb[159].mxu0  ;;  %v7185_v25 = vpop.f32.mrb[159].mxu1  ;;  %v6108_v28 = vld [vmem:[%s12594_s0 + $0x578] sm:$0xff]  ;;  %v6217_v21 = vld [vmem:[%s12594_s0 + $0x7c0] sm:$0xff] }
 0x217   :  { %v1841_v49 = vpack.c.bf16 %v6108_v28, %v6107_v22  ;;  %v2468_v24 = vpack.c.bf16 %v6217_v21, %v6216_v3  ;;  %v6218_v22 = vld [vmem:[%s12594_s0 + $0x7c8] sm:$0xff]  ;;  %v6219_v28 = vld [vmem:[%s12594_s0 + $0x7d0] sm:$0xff] }
 0x218   :  { %7443 = vmatmul.mubr.msk.bf16.gmra.mrb[8].mxu1 %vm239_vm3, %v1840_v43  ;;  %7589 = vmatmul.mubr.msk.bf16.gmra.mrb[8].mxu0 %vm239_vm3, %v2467_v47  ;;  %v12633_v47 = vld [vmem:[#allocation3_spill] sm:$0xff] }
 0x219   :  { %7446 = vmatprep.mubr.msk.bf16.mxu1 %vm8304_vm2, %v12619_v1  ;;  %7592 = vmatprep.mubr.msk.bf16.mxu0 %vm8304_vm2, %v12619_v1 }
 0x21b   :  { %v1010_v30 = vpop.f32.mrb[160].mxu1  ;;  %v1556_v4 = vpop.f32.mrb[160].mxu0 }
 0x21c   :  { %v1011_v14 = vadd.f32 %v1010_v30, %v12631_v8  ;;  %v9853_v48 = vadd.f32 %v1556_v4, %v1003_v56  ;;  %v7188_v19 = vpop.f32.mrb[161].mxu1  ;;  %v7334_v31 = vpop.f32.mrb[161].mxu0  ;;  %v6109_v56 = vld [vmem:[%s12594_s0 + $0x580] sm:$0xff]  ;;  %v12635_v30 = vld [vmem:[#allocation4_spill] sm:$0xff] }
 0x21d   :  { %v1013_v57 = vpop.f32.mrb[162].mxu1  ;;  %v1559_v43 = vpop.f32.mrb[162].mxu0 }
 0x21e   :  { %12632 = vst [vmem:[#allocation2_spill] sm:$0xff] %v9853_v48  ;;  %v1014_v0 = vadd.f32 %v1013_v57, %v12633_v47  ;;  %v9856_v9 = vadd.f32 %v1559_v43, %v1006_v23  ;;  %v7335_v17 = vpop.f32.mrb[163].mxu0  ;;  %v7189_v25 = vpop.f32.mrb[163].mxu1  ;;  %v6110_v23 = vld [vmem:[%s12594_s0 + $0x588] sm:$0xff]  ;;  %v12637_v47 = vld [vmem:[#allocation5_spill] sm:$0xff] }
 0x220   :  { %12634 = vst [vmem:[#allocation3_spill] sm:$0xff] %v9856_v9  ;;  %7447 = vmatmul.mubr.msk.bf16.gmra.mrb[12].mxu1 %vm239_vm3, %v1841_v49  ;;  %7593 = vmatmul.mubr.msk.bf16.gmra.mrb[12].mxu0 %vm239_vm3, %v2468_v24  ;;  %v1842_v49 = vpack.c.bf16 %v6110_v23, %v6109_v56  ;;  %v2469_v24 = vpack.c.bf16 %v6219_v28, %v6218_v22  ;;  %v12639_v22 = vld [vmem:[#allocation6_spill] sm:$0xff] }
 0x221   :  { %7450 = vmatprep.mubr.msk.bf16.mxu1 %vm8304_vm2, %v12619_v1  ;;  %7596 = vmatprep.mubr.msk.bf16.mxu0 %vm8304_vm2, %v12619_v1 }
 0x223   :  { %v1018_v3 = vpop.f32.mrb[164].mxu1  ;;  %v1564_v21 = vpop.f32.mrb[164].mxu0 }
 0x224   :  { %v1019_v4 = vadd.f32 %v1018_v3, %v12635_v30  ;;  %v9877_v8 = vadd.f32 %v1564_v21, %v1011_v14  ;;  %v7192_v19 = vpop.f32.mrb[165].mxu1  ;;  %v7338_v31 = vpop.f32.mrb[165].mxu0  ;;  %v6111_v14 = vld [vmem:[%s12594_s0 + $0x590] sm:$0xff] }
 0x225   :  { %v1021_v57 = vpop.f32.mrb[166].mxu1  ;;  %v1567_v43 = vpop.f32.mrb[166].mxu0 }
 0x226   :  { %12636 = vst [vmem:[#allocation4_spill] sm:$0xff] %v9877_v8  ;;  %v1022_v17 = vadd.f32 %v1021_v57, %v12637_v47  ;;  %v9880_v25 = vadd.f32 %v1567_v43, %v1014_v0  ;;  %v7339_v9 = vpop.f32.mrb[167].mxu0  ;;  %v7193_v48 = vpop.f32.mrb[167].mxu1  ;;  %v6112_v0 = vld [vmem:[%s12594_s0 + $0x598] sm:$0xff]  ;;  %v12641_v57 = vld [vmem:[#allocation7_spill] sm:$0xff] }
 0x227   :  { %v6220_v48 = vld [vmem:[%s12594_s0 + $0x7d8] sm:$0xff]  ;;  %v6221_v9 = vld [vmem:[%s12594_s0 + $0x7e0] sm:$0xff]  ;;  %v1843_v19 = vpack.c.bf16 %v6112_v0, %v6111_v14 }
 0x228   :  { %12638 = vst [vmem:[#allocation5_spill] sm:$0xff] %v9880_v25  ;;  %7451 = vmatmul.mubr.msk.bf16.gmra.mrb[16].mxu1 %vm239_vm3, %v1842_v49  ;;  %7597 = vmatmul.mubr.msk.bf16.gmra.mrb[16].mxu0 %vm239_vm3, %v2469_v24  ;;  %v2470_v31 = vpack.c.bf16 %v6221_v9, %v6220_v48  ;;  %v12643_v48 = vld [vmem:[#allocation8_spill] sm:$0xff] }
 0x229   :  { %7454 = vmatprep.mubr.msk.bf16.mxu1 %vm8304_vm2, %v12619_v1  ;;  %7600 = vmatprep.mubr.msk.bf16.mxu0 %vm8304_vm2, %v12619_v1 }
 0x22b   :  { %v1026_v56 = vpop.f32.mrb[168].mxu1  ;;  %v1572_v23 = vpop.f32.mrb[168].mxu0 }
 0x22c   :  { %v1027_v28 = vadd.f32 %v1026_v56, %v12639_v22  ;;  %v9901_v3 = vadd.f32 %v1572_v23, %v1019_v4  ;;  %v7196_v21 = vpop.f32.mrb[169].mxu1  ;;  %v7342_v30 = vpop.f32.mrb[169].mxu0  ;;  %v6113_v4 = vld [vmem:[%s12594_s0 + $0x5a0] sm:$0xff] }
 0x22d   :  { %v1029_v49 = vpop.f32.mrb[170].mxu1  ;;  %v1575_v24 = vpop.f32.mrb[170].mxu0 }
 0x22e   :  { %12640 = vst [vmem:[#allocation6_spill] sm:$0xff] %v9901_v3  ;;  %v1030_v43 = vadd.f32 %v1029_v49, %v12641_v57  ;;  %v9904_v47 = vadd.f32 %v1575_v24, %v1022_v17  ;;  %v7343_v25 = vpop.f32.mrb[171].mxu0  ;;  %v7197_v8 = vpop.f32.mrb[171].mxu1  ;;  %v6114_v17 = vld [vmem:[%s12594_s0 + $0x5a8] sm:$0xff]  ;;  %v12645_v49 = vld [vmem:[#allocation9_spill] sm:$0xff] }
 0x22f   :  { %v6222_v8 = vld [vmem:[%s12594_s0 + $0x7e8] sm:$0xff]  ;;  %v6223_v25 = vld [vmem:[%s12594_s0 + $0x7f0] sm:$0xff]  ;;  %v1844_v21 = vpack.c.bf16 %v6114_v17, %v6113_v4 }
 0x230   :  { %12642 = vst [vmem:[#allocation7_spill] sm:$0xff] %v9904_v47  ;;  %7455 = vmatmul.mubr.msk.bf16.gmra.mrb[20].mxu1 %vm239_vm3, %v1843_v19  ;;  %7601 = vmatmul.mubr.msk.bf16.gmra.mrb[20].mxu0 %vm239_vm3, %v2470_v31  ;;  %v2471_v30 = vpack.c.bf16 %v6223_v25, %v6222_v8  ;;  %v12647_v8 = vld [vmem:[#allocation10_spill] sm:$0xff] }
 0x231   :  { %7458 = vmatprep.mubr.msk.bf16.mxu1 %vm8304_vm2, %v12619_v1  ;;  %7604 = vmatprep.mubr.msk.bf16.mxu0 %vm8304_vm2, %v12619_v1 }
 0x233   :  { %v1034_v14 = vpop.f32.mrb[172].mxu1  ;;  %v1580_v0 = vpop.f32.mrb[172].mxu0 }
 0x234   :  { %v1035_v9 = vadd.f32 %v1034_v14, %v12643_v48  ;;  %v9925_v56 = vadd.f32 %v1580_v0, %v1027_v28  ;;  %v7200_v23 = vpop.f32.mrb[173].mxu1  ;;  %v7346_v22 = vpop.f32.mrb[173].mxu0  ;;  %v6115_v28 = vld [vmem:[%s12594_s0 + $0x5b0] sm:$0xff] }
 0x235   :  { %v1037_v19 = vpop.f32.mrb[174].mxu1  ;;  %v1583_v31 = vpop.f32.mrb[174].mxu0 }
 0x236   :  { %12644 = vst [vmem:[#allocation8_spill] sm:$0xff] %v9925_v56  ;;  %v1038_v24 = vadd.f32 %v1037_v19, %v12645_v49  ;;  %v9928_v57 = vadd.f32 %v1583_v31, %v1030_v43  ;;  %v7347_v47 = vpop.f32.mrb[175].mxu0  ;;  %v7201_v3 = vpop.f32.mrb[175].mxu1  ;;  %v6116_v43 = vld [vmem:[%s12594_s0 + $0x5b8] sm:$0xff]  ;;  %v12649_v19 = vld [vmem:[#allocation11_spill] sm:$0xff] }
 0x237   :  { %v6224_v3 = vld [vmem:[%s12594_s0 + $0x7f8] sm:$0xff]  ;;  %v6225_v47 = vld [vmem:[%s12594_s0 + $0x800] sm:$0xff]  ;;  %v1845_v23 = vpack.c.bf16 %v6116_v43, %v6115_v28 }
 0x238   :  { %12646 = vst [vmem:[#allocation9_spill] sm:$0xff] %v9928_v57  ;;  %7459 = vmatmul.mubr.msk.bf16.gmra.mrb[24].mxu1 %vm239_vm3, %v1844_v21  ;;  %7605 = vmatmul.mubr.msk.bf16.gmra.mrb[24].mxu0 %vm239_vm3, %v2471_v30  ;;  %v2472_v22 = vpack.c.bf16 %v6225_v47, %v6224_v3  ;;  %v12651_v3 = vld [vmem:[#allocation12_spill] sm:$0xff] }
 0x239   :  { %7462 = vmatprep.mubr.msk.bf16.mxu1 %vm8304_vm2, %v12619_v1  ;;  %7608 = vmatprep.mubr.msk.bf16.mxu0 %vm8304_vm2, %v12619_v1 }
 0x23b   :  { %v1042_v4 = vpop.f32.mrb[176].mxu1  ;;  %v1588_v17 = vpop.f32.mrb[176].mxu0 }
 0x23c   :  { %v1043_v25 = vadd.f32 %v1042_v4, %v12647_v8  ;;  %v9949_v14 = vadd.f32 %v1588_v17, %v1035_v9  ;;  %v7204_v0 = vpop.f32.mrb[177].mxu1  ;;  %v7350_v48 = vpop.f32.mrb[177].mxu0  ;;  %v6117_v9 = vld [vmem:[%s12594_s0 + $0x5c0] sm:$0xff] }
 0x23d   :  { %v1045_v21 = vpop.f32.mrb[178].mxu1  ;;  %v1591_v30 = vpop.f32.mrb[178].mxu0 }
 0x23e   :  { %12648 = vst [vmem:[#allocation10_spill] sm:$0xff] %v9949_v14  ;;  %v1046_v31 = vadd.f32 %v1045_v21, %v12649_v19  ;;  %v9952_v49 = vadd.f32 %v1591_v30, %v1038_v24  ;;  %v7351_v57 = vpop.f32.mrb[179].mxu0  ;;  %v7205_v56 = vpop.f32.mrb[179].mxu1  ;;  %v6118_v24 = vld [vmem:[%s12594_s0 + $0x5c8] sm:$0xff]  ;;  %v12653_v21 = vld [vmem:[#allocation13_spill] sm:$0xff] }
 0x23f   :  { %v6226_v56 = vld [vmem:[%s12594_s0 + $0x808] sm:$0xff]  ;;  %v6227_v57 = vld [vmem:[%s12594_s0 + $0x810] sm:$0xff]  ;;  %v1846_v0 = vpack.c.bf16 %v6118_v24, %v6117_v9 }
 0x240   :  { %12650 = vst [vmem:[#allocation11_spill] sm:$0xff] %v9952_v49  ;;  %7463 = vmatmul.mubr.msk.bf16.gmra.mrb[28].mxu1 %vm239_vm3, %v1845_v23  ;;  %7609 = vmatmul.mubr.msk.bf16.gmra.mrb[28].mxu0 %vm239_vm3, %v2472_v22  ;;  %v2473_v48 = vpack.c.bf16 %v6227_v57, %v6226_v56  ;;  %v12655_v56 = vld [vmem:[#allocation14_spill] sm:$0xff] }
 0x241   :  { %7466 = vmatprep.mubr.msk.bf16.mxu1 %vm8304_vm2, %v12619_v1  ;;  %7612 = vmatprep.mubr.msk.bf16.mxu0 %vm8304_vm2, %v12619_v1 }
 0x243   :  { %v1050_v28 = vpop.f32.mrb[180].mxu1  ;;  %v1596_v43 = vpop.f32.mrb[180].mxu0 }
 0x244   :  { %v1051_v47 = vadd.f32 %v1050_v28, %v12651_v3  ;;  %v9973_v4 = vadd.f32 %v1596_v43, %v1043_v25  ;;  %v7208_v17 = vpop.f32.mrb[181].mxu1  ;;  %v7354_v8 = vpop.f32.mrb[181].mxu0  ;;  %v6119_v25 = vld [vmem:[%s12594_s0 + $0x5d0] sm:$0xff] }
 0x245   :  { %v1053_v23 = vpop.f32.mrb[182].mxu1  ;;  %v1599_v22 = vpop.f32.mrb[182].mxu0 }
 0x246   :  { %12652 = vst [vmem:[#allocation12_spill] sm:$0xff] %v9973_v4  ;;  %v1054_v30 = vadd.f32 %v1053_v23, %v12653_v21  ;;  %v9976_v19 = vadd.f32 %v1599_v22, %v1046_v31  ;;  %v7355_v49 = vpop.f32.mrb[183].mxu0  ;;  %v7209_v14 = vpop.f32.mrb[183].mxu1  ;;  %v6120_v31 = vld [vmem:[%s12594_s0 + $0x5d8] sm:$0xff]  ;;  %v12657_v23 = vld [vmem:[#allocation15_spill] sm:$0xff] }
 0x247   :  { %v6228_v14 = vld [vmem:[%s12594_s0 + $0x818] sm:$0xff]  ;;  %v6229_v49 = vld [vmem:[%s12594_s0 + $0x820] sm:$0xff]  ;;  %v1847_v17 = vpack.c.bf16 %v6120_v31, %v6119_v25 }
 0x248   :  { %12654 = vst [vmem:[#allocation13_spill] sm:$0xff] %v9976_v19  ;;  %7467 = vmatmul.mubr.msk.bf16.gmra.mrb[32].mxu1 %vm239_vm3, %v1846_v0  ;;  %7613 = vmatmul.mubr.msk.bf16.gmra.mrb[32].mxu0 %vm239_vm3, %v2473_v48  ;;  %v2474_v8 = vpack.c.bf16 %v6229_v49, %v6228_v14  ;;  %v12659_v14 = vld [vmem:[#allocation16_spill] sm:$0xff] }
 0x249   :  { %7470 = vmatprep.mubr.msk.bf16.mxu1 %vm8304_vm2, %v12619_v1  ;;  %7616 = vmatprep.mubr.msk.bf16.mxu0 %vm8304_vm2, %v12619_v1 }
 0x24b   :  { %v1058_v9 = vpop.f32.mrb[184].mxu1  ;;  %v1604_v24 = vpop.f32.mrb[184].mxu0 }
 0x24c   :  { %v1059_v57 = vadd.f32 %v1058_v9, %v12655_v56  ;;  %v9997_v28 = vadd.f32 %v1604_v24, %v1051_v47  ;;  %v7212_v43 = vpop.f32.mrb[185].mxu1  ;;  %v7358_v3 = vpop.f32.mrb[185].mxu0  ;;  %v6121_v47 = vld [vmem:[%s12594_s0 + $0x5e0] sm:$0xff] }
 0x24d   :  { %v1061_v0 = vpop.f32.mrb[186].mxu1  ;;  %v1607_v48 = vpop.f32.mrb[186].mxu0 }
 0x24e   :  { %12656 = vst [vmem:[#allocation14_spill] sm:$0xff] %v9997_v28  ;;  %v1062_v22 = vadd.f32 %v1061_v0, %v12657_v23  ;;  %v10000_v21 = vadd.f32 %v1607_v48, %v1054_v30  ;;  %v7359_v19 = vpop.f32.mrb[187].mxu0  ;;  %v7213_v4 = vpop.f32.mrb[187].mxu1  ;;  %v6122_v30 = vld [vmem:[%s12594_s0 + $0x5e8] sm:$0xff]  ;;  %v12661_v0 = vld [vmem:[#allocation17_spill] sm:$0xff] }
 0x24f   :  { %v6230_v4 = vld [vmem:[%s12594_s0 + $0x828] sm:$0xff]  ;;  %v6231_v19 = vld [vmem:[%s12594_s0 + $0x830] sm:$0xff]  ;;  %v1848_v43 = vpack.c.bf16 %v6122_v30, %v6121_v47 }
 0x250   :  { %12658 = vst [vmem:[#allocation15_spill] sm:$0xff] %v10000_v21  ;;  %7471 = vmatmul.mubr.msk.bf16.gmra.mrb[36].mxu1 %vm239_vm3, %v1847_v17  ;;  %7617 = vmatmul.mubr.msk.bf16.gmra.mrb[36].mxu0 %vm239_vm3, %v2474_v8  ;;  %v2475_v3 = vpack.c.bf16 %v6231_v19, %v6230_v4  ;;  %v12663_v4 = vld [vmem:[#allocation18_spill] sm:$0xff] }
 0x251   :  { %7474 = vmatprep.mubr.msk.bf16.mxu1 %vm8304_vm2, %v12619_v1  ;;  %7620 = vmatprep.mubr.msk.bf16.mxu0 %vm8304_vm2, %v12619_v1 }
 0x253   :  { %v1066_v25 = vpop.f32.mrb[188].mxu1  ;;  %v1612_v31 = vpop.f32.mrb[188].mxu0 }
 0x254   :  { %v1067_v49 = vadd.f32 %v1066_v25, %v12659_v14  ;;  %v10021_v9 = vadd.f32 %v1612_v31, %v1059_v57  ;;  %v7216_v24 = vpop.f32.mrb[189].mxu1  ;;  %v7362_v56 = vpop.f32.mrb[189].mxu0  ;;  %v6123_v57 = vld [vmem:[%s12594_s0 + $0x5f0] sm:$0xff] }
 0x255   :  { %v1069_v17 = vpop.f32.mrb[190].mxu1  ;;  %v1615_v8 = vpop.f32.mrb[190].mxu0 }
 0x256   :  { %12660 = vst [vmem:[#allocation16_spill] sm:$0xff] %v10021_v9  ;;  %v1070_v48 = vadd.f32 %v1069_v17, %v12661_v0  ;;  %v10024_v23 = vadd.f32 %v1615_v8, %v1062_v22  ;;  %v7363_v21 = vpop.f32.mrb[191].mxu0  ;;  %v7217_v28 = vpop.f32.mrb[191].mxu1  ;;  %v6124_v22 = vld [vmem:[%s12594_s0 + $0x5f8] sm:$0xff]  ;;  %v12665_v17 = vld [vmem:[#allocation19_spill] sm:$0xff] }
 0x257   :  { %v6232_v28 = vld [vmem:[%s12594_s0 + $0x838] sm:$0xff]  ;;  %v6233_v21 = vld [vmem:[%s12594_s0 + $0x840] sm:$0xff]  ;;  %v1849_v24 = vpack.c.bf16 %v6124_v22, %v6123_v57 }
 0x258   :  { %12662 = vst [vmem:[#allocation17_spill] sm:$0xff] %v10024_v23  ;;  %7475 = vmatmul.mubr.msk.bf16.gmra.mrb[40].mxu1 %vm239_vm3, %v1848_v43  ;;  %7621 = vmatmul.mubr.msk.bf16.gmra.mrb[40].mxu0 %vm239_vm3, %v2475_v3  ;;  %v2476_v56 = vpack.c.bf16 %v6233_v21, %v6232_v28  ;;  %v12667_v28 = vld [vmem:[#allocation20_spill] sm:$0xff] }
 0x259   :  { %7478 = vmatprep.mubr.msk.bf16.mxu1 %vm8304_vm2, %v12619_v1  ;;  %7624 = vmatprep.mubr.msk.bf16.mxu0 %vm8304_vm2, %v12619_v1 }
 0x25b   :  { %v1074_v47 = vpop.f32.mrb[192].mxu1  ;;  %v1620_v30 = vpop.f32.mrb[192].mxu0 }
 0x25c   :  { %v1075_v19 = vadd.f32 %v1074_v47, %v12663_v4  ;;  %v10045_v25 = vadd.f32 %v1620_v30, %v1067_v49  ;;  %v7220_v31 = vpop.f32.mrb[193].mxu1  ;;  %v7366_v14 = vpop.f32.mrb[193].mxu0  ;;  %v6125_v49 = vld [vmem:[%s12594_s0 + $0x600] sm:$0xff] }
 0x25d   :  { %v1077_v43 = vpop.f32.mrb[194].mxu1  ;;  %v1623_v3 = vpop.f32.mrb[194].mxu0 }
 0x25e   :  { %12664 = vst [vmem:[#allocation18_spill] sm:$0xff] %v10045_v25  ;;  %v1078_v8 = vadd.f32 %v1077_v43, %v12665_v17  ;;  %v10048_v0 = vadd.f32 %v1623_v3, %v1070_v48  ;;  %v7367_v23 = vpop.f32.mrb[195].mxu0  ;;  %v7221_v9 = vpop.f32.mrb[195].mxu1  ;;  %v6126_v48 = vld [vmem:[%s12594_s0 + $0x608] sm:$0xff]  ;;  %v12669_v43 = vld [vmem:[#allocation21_spill] sm:$0xff] }
 0x25f   :  { %v6234_v9 = vld [vmem:[%s12594_s0 + $0x848] sm:$0xff]  ;;  %v6235_v23 = vld [vmem:[%s12594_s0 + $0x850] sm:$0xff]  ;;  %v1850_v31 = vpack.c.bf16 %v6126_v48, %v6125_v49 }
 0x260   :  { %12666 = vst [vmem:[#allocation19_spill] sm:$0xff] %v10048_v0  ;;  %7479 = vmatmul.mubr.msk.bf16.gmra.mrb[44].mxu1 %vm239_vm3, %v1849_v24  ;;  %7625 = vmatmul.mubr.msk.bf16.gmra.mrb[44].mxu0 %vm239_vm3, %v2476_v56  ;;  %v2477_v14 = vpack.c.bf16 %v6235_v23, %v6234_v9  ;;  %v12671_v9 = vld [vmem:[#allocation22_spill] sm:$0xff] }
 0x261   :  { %7482 = vmatprep.mubr.msk.bf16.mxu1 %vm8304_vm2, %v12619_v1  ;;  %7628 = vmatprep.mubr.msk.bf16.mxu0 %vm8304_vm2, %v12619_v1 }
 0x263   :  { %v1082_v57 = vpop.f32.mrb[196].mxu1  ;;  %v1628_v22 = vpop.f32.mrb[196].mxu0 }
 0x264   :  { %v1083_v21 = vadd.f32 %v1082_v57, %v12667_v28  ;;  %v10069_v47 = vadd.f32 %v1628_v22, %v1075_v19  ;;  %v7224_v30 = vpop.f32.mrb[197].mxu1  ;;  %v7370_v4 = vpop.f32.mrb[197].mxu0  ;;  %v6127_v19 = vld [vmem:[%s12594_s0 + $0x610] sm:$0xff] }
 0x265   :  { %v1085_v24 = vpop.f32.mrb[198].mxu1  ;;  %v1631_v56 = vpop.f32.mrb[198].mxu0 }
 0x266   :  { %12668 = vst [vmem:[#allocation20_spill] sm:$0xff] %v10069_v47  ;;  %v1086_v3 = vadd.f32 %v1085_v24, %v12669_v43  ;;  %v10072_v17 = vadd.f32 %v1631_v56, %v1078_v8  ;;  %v7371_v0 = vpop.f32.mrb[199].mxu0  ;;  %v7225_v25 = vpop.f32.mrb[199].mxu1  ;;  %v6128_v8 = vld [vmem:[%s12594_s0 + $0x618] sm:$0xff]  ;;  %v12673_v24 = vld [vmem:[#allocation23_spill] sm:$0xff] }
 0x267   :  { %v6236_v25 = vld [vmem:[%s12594_s0 + $0x858] sm:$0xff]  ;;  %v6237_v0 = vld [vmem:[%s12594_s0 + $0x860] sm:$0xff]  ;;  %v1851_v30 = vpack.c.bf16 %v6128_v8, %v6127_v19 }
 0x268   :  { %12670 = vst [vmem:[#allocation21_spill] sm:$0xff] %v10072_v17  ;;  %7483 = vmatmul.mubr.msk.bf16.gmra.mrb[48].mxu1 %vm239_vm3, %v1850_v31  ;;  %7629 = vmatmul.mubr.msk.bf16.gmra.mrb[48].mxu0 %vm239_vm3, %v2477_v14  ;;  %v2478_v4 = vpack.c.bf16 %v6237_v0, %v6236_v25  ;;  %v12675_v25 = vld [vmem:[#allocation24_spill] sm:$0xff] }
 0x269   :  { %7486 = vmatprep.mubr.msk.bf16.mxu1 %vm8304_vm2, %v12619_v1  ;;  %7632 = vmatprep.mubr.msk.bf16.mxu0 %vm8304_vm2, %v12619_v1 }
 0x26b   :  { %v1090_v49 = vpop.f32.mrb[200].mxu1  ;;  %v1636_v48 = vpop.f32.mrb[200].mxu0 }
 0x26c   :  { %v1091_v23 = vadd.f32 %v1090_v49, %v12671_v9  ;;  %v10093_v57 = vadd.f32 %v1636_v48, %v1083_v21  ;;  %v7228_v22 = vpop.f32.mrb[201].mxu1  ;;  %v7374_v28 = vpop.f32.mrb[201].mxu0  ;;  %v6129_v21 = vld [vmem:[%s12594_s0 + $0x620] sm:$0xff] }
 0x26d   :  { %v1093_v31 = vpop.f32.mrb[202].mxu1  ;;  %v1639_v14 = vpop.f32.mrb[202].mxu0 }
 0x26e   :  { %12672 = vst [vmem:[#allocation22_spill] sm:$0xff] %v10093_v57  ;;  %v1094_v56 = vadd.f32 %v1093_v31, %v12673_v24  ;;  %v10096_v43 = vadd.f32 %v1639_v14, %v1086_v3  ;;  %v7375_v17 = vpop.f32.mrb[203].mxu0  ;;  %v7229_v47 = vpop.f32.mrb[203].mxu1  ;;  %v6130_v3 = vld [vmem:[%s12594_s0 + $0x628] sm:$0xff]  ;;  %v12677_v31 = vld [vmem:[#allocation25_spill] sm:$0xff] }
 0x26f   :  { %v6238_v47 = vld [vmem:[%s12594_s0 + $0x868] sm:$0xff]  ;;  %v6239_v17 = vld [vmem:[%s12594_s0 + $0x870] sm:$0xff]  ;;  %v1852_v22 = vpack.c.bf16 %v6130_v3, %v6129_v21 }
 0x270   :  { %12674 = vst [vmem:[#allocation23_spill] sm:$0xff] %v10096_v43  ;;  %7487 = vmatmul.mubr.msk.bf16.gmra.mrb[52].mxu1 %vm239_vm3, %v1851_v30  ;;  %7633 = vmatmul.mubr.msk.bf16.gmra.mrb[52].mxu0 %vm239_vm3, %v2478_v4  ;;  %v2479_v28 = vpack.c.bf16 %v6239_v17, %v6238_v47  ;;  %v12679_v47 = vld [vmem:[#allocation26_spill] sm:$0xff] }
 0x271   :  { %7490 = vmatprep.mubr.msk.bf16.mxu1 %vm8304_vm2, %v12619_v1  ;;  %7636 = vmatprep.mubr.msk.bf16.mxu0 %vm8304_vm2, %v12619_v1 }
 0x273   :  { %v1098_v19 = vpop.f32.mrb[204].mxu1  ;;  %v1644_v8 = vpop.f32.mrb[204].mxu0 }
 0x274   :  { %v1099_v0 = vadd.f32 %v1098_v19, %v12675_v25  ;;  %v10117_v49 = vadd.f32 %v1644_v8, %v1091_v23  ;;  %v7232_v48 = vpop.f32.mrb[205].mxu1  ;;  %v7378_v9 = vpop.f32.mrb[205].mxu0  ;;  %v6131_v23 = vld [vmem:[%s12594_s0 + $0x630] sm:$0xff] }
 0x275   :  { %v1101_v30 = vpop.f32.mrb[206].mxu1  ;;  %v1647_v4 = vpop.f32.mrb[206].mxu0 }
 0x276   :  { %12676 = vst [vmem:[#allocation24_spill] sm:$0xff] %v10117_v49  ;;  %v1102_v14 = vadd.f32 %v1101_v30, %v12677_v31  ;;  %v10120_v24 = vadd.f32 %v1647_v4, %v1094_v56  ;;  %v7379_v43 = vpop.f32.mrb[207].mxu0  ;;  %v7233_v57 = vpop.f32.mrb[207].mxu1  ;;  %v6132_v56 = vld [vmem:[%s12594_s0 + $0x638] sm:$0xff]  ;;  %v12681_v30 = vld [vmem:[#allocation27_spill] sm:$0xff] }
 0x277   :  { %v6240_v57 = vld [vmem:[%s12594_s0 + $0x878] sm:$0xff]  ;;  %v6241_v43 = vld [vmem:[%s12594_s0 + $0x880] sm:$0xff]  ;;  %v1853_v48 = vpack.c.bf16 %v6132_v56, %v6131_v23 }
 0x278   :  { %12678 = vst [vmem:[#allocation25_spill] sm:$0xff] %v10120_v24  ;;  %7491 = vmatmul.mubr.msk.bf16.gmra.mrb[56].mxu1 %vm239_vm3, %v1852_v22  ;;  %7637 = vmatmul.mubr.msk.bf16.gmra.mrb[56].mxu0 %vm239_vm3, %v2479_v28  ;;  %v2480_v9 = vpack.c.bf16 %v6241_v43, %v6240_v57  ;;  %v12683_v57 = vld [vmem:[#allocation28_spill] sm:$0xff] }
 0x279   :  { %7494 = vmatprep.mubr.msk.bf16.mxu1 %vm8304_vm2, %v12619_v1  ;;  %7640 = vmatprep.mubr.msk.bf16.mxu0 %vm8304_vm2, %v12619_v1 }
 0x27b   :  { %v1106_v21 = vpop.f32.mrb[208].mxu1  ;;  %v1652_v3 = vpop.f32.mrb[208].mxu0 }
 0x27c   :  { %v1107_v17 = vadd.f32 %v1106_v21, %v12679_v47  ;;  %v10141_v19 = vadd.f32 %v1652_v3, %v1099_v0  ;;  %v7236_v8 = vpop.f32.mrb[209].mxu1  ;;  %v7382_v25 = vpop.f32.mrb[209].mxu0  ;;  %v6133_v0 = vld [vmem:[%s12594_s0 + $0x640] sm:$0xff] }
 0x27d   :  { %v1109_v22 = vpop.f32.mrb[210].mxu1  ;;  %v1655_v28 = vpop.f32.mrb[210].mxu0 }
 0x27e   :  { %12680 = vst [vmem:[#allocation26_spill] sm:$0xff] %v10141_v19  ;;  %v1110_v4 = vadd.f32 %v1109_v22, %v12681_v30  ;;  %v10144_v31 = vadd.f32 %v1655_v28, %v1102_v14  ;;  %v7383_v24 = vpop.f32.mrb[211].mxu0  ;;  %v7237_v49 = vpop.f32.mrb[211].mxu1  ;;  %v6134_v14 = vld [vmem:[%s12594_s0 + $0x648] sm:$0xff]  ;;  %v12684_v22 = vld [vmem:[#allocation29_spill] sm:$0xff] }
 0x27f   :  { %v6242_v49 = vld [vmem:[%s12594_s0 + $0x888] sm:$0xff]  ;;  %v6243_v24 = vld [vmem:[%s12594_s0 + $0x890] sm:$0xff]  ;;  %v1854_v8 = vpack.c.bf16 %v6134_v14, %v6133_v0 }
 0x280   :  { %12682 = vst [vmem:[#allocation27_spill] sm:$0xff] %v10144_v31  ;;  %7495 = vmatmul.mubr.msk.bf16.gmra.mrb[60].mxu1 %vm239_vm3, %v1853_v48  ;;  %7641 = vmatmul.mubr.msk.bf16.gmra.mrb[60].mxu0 %vm239_vm3, %v2480_v9  ;;  %v2481_v25 = vpack.c.bf16 %v6243_v24, %v6242_v49  ;;  %v12685_v49 = vld [vmem:[#allocation30_spill] sm:$0xff] }
 0x281   :  { %7498 = vmatprep.mubr.msk.bf16.mxu1 %vm8304_vm2, %v12619_v1  ;;  %7644 = vmatprep.mubr.msk.bf16.mxu0 %vm8304_vm2, %v12619_v1 }
 0x283   :  { %v1114_v23 = vpop.f32.mrb[212].mxu1  ;;  %v1660_v56 = vpop.f32.mrb[212].mxu0 }
 0x284   :  { %v1115_v43 = vadd.f32 %v1114_v23, %v12683_v57  ;;  %v10165_v21 = vadd.f32 %v1660_v56, %v1107_v17  ;;  %v7240_v3 = vpop.f32.mrb[213].mxu1  ;;  %v7386_v47 = vpop.f32.mrb[213].mxu0  ;;  %v6135_v17 = vld [vmem:[%s12594_s0 + $0x650] sm:$0xff] }
 0x285   :  { %v1117_v48 = vpop.f32.mrb[214].mxu1  ;;  %v1663_v9 = vpop.f32.mrb[214].mxu0 }
 0x286   :  { %v1118_v28 = vadd.f32 %v1117_v48, %v12684_v22  ;;  %v10168_v30 = vadd.f32 %v1663_v9, %v1110_v4  ;;  %v7387_v31 = vpop.f32.mrb[215].mxu0  ;;  %v7241_v19 = vpop.f32.mrb[215].mxu1  ;;  %v6136_v4 = vld [vmem:[%s12594_s0 + $0x658] sm:$0xff] }
 0x287   :  { %v6244_v19 = vld [vmem:[%s12594_s0 + $0x898] sm:$0xff]  ;;  %v6245_v31 = vld [vmem:[%s12594_s0 + $0x8a0] sm:$0xff]  ;;  %v1855_v3 = vpack.c.bf16 %v6136_v4, %v6135_v17  ;;  %v6247_v17 = vld [vmem:[%s12594_s0 + $0x8b0] sm:$0xff] }
 0x288   :  { %7499 = vmatmul.mubr.msk.bf16.gmra.mrb[64].mxu1 %vm239_vm3, %v1854_v8  ;;  %7645 = vmatmul.mubr.msk.bf16.gmra.mrb[64].mxu0 %vm239_vm3, %v2481_v25  ;;  %v2482_v47 = vpack.c.bf16 %v6245_v31, %v6244_v19 }
 0x289   :  { %7502 = vmatprep.mubr.msk.bf16.mxu1 %vm8304_vm2, %v12619_v1  ;;  %7648 = vmatprep.mubr.msk.bf16.mxu0 %vm8304_vm2, %v12619_v1 }
 0x28b   :  { %v1122_v0 = vpop.f32.mrb[216].mxu1  ;;  %v1668_v14 = vpop.f32.mrb[216].mxu0 }
 0x28c   :  { %v1123_v24 = vadd.f32 %v1122_v0, %v12685_v49  ;;  %v10189_v23 = vadd.f32 %v1668_v14, %v1115_v43  ;;  %v7390_v56 = vpop.f32.mrb[217].mxu0  ;;  %v7244_v57 = vpop.f32.mrb[217].mxu1  ;;  %v6137_v0 = vld [vmem:[%s12594_s0 + $0x660] sm:$0xff]  ;;  %v6138_v43 = vld [vmem:[%s12594_s0 + $0x668] sm:$0xff] }
 0x28d   :  { %v1671_v8 = vpop.f32.mrb[218].mxu0  ;;  %v1125_v25 = vpop.f32.mrb[218].mxu1  ;;  %v1856_v57 = vpack.c.bf16 %v6138_v43, %v6137_v0  ;;  %v6249_v0 = vld [vmem:[%s12594_s0 + $0x8c0] sm:$0xff] }
 0x28e   :  { %v10191_v48 = vadd.f32 %v1671_v8, %v1118_v28  ;;  %v7391_v9 = vpop.f32.mrb[219].mxu0  ;;  %v7245_v22 = vpop.f32.mrb[219].mxu1  ;;  %v6246_v28 = vld [vmem:[%s12594_s0 + $0x8a8] sm:$0xff] }
 0x290   :  { %7503 = vmatmul.mubr.msk.bf16.gmra.mrb[68].mxu1 %vm239_vm3, %v1855_v3  ;;  %7649 = vmatmul.mubr.msk.bf16.gmra.mrb[68].mxu0 %vm239_vm3, %v2482_v47  ;;  %v2483_v3 = vpack.c.bf16 %v6247_v17, %v6246_v28 }
 0x291   :  { %7506 = vmatprep.mubr.msk.bf16.mxu1 %vm8304_vm2, %v12619_v1  ;;  %7652 = vmatprep.mubr.msk.bf16.mxu0 %vm8304_vm2, %v12619_v1 }
 0x293   :  { %v1676_v4 = vpop.f32.mrb[220].mxu0  ;;  %v2016_v19 = vpop.f32.mrb[220].mxu1 }
 0x294   :  { %v10211_v31 = vadd.f32 %v1676_v4, %v1123_v24  ;;  %v2310_v14 = vadd.f32 %v2016_v19, %v9345_v54  ;;  %v7394_v49 = vpop.f32.mrb[221].mxu0  ;;  %v7400_v56 = vpop.f32.mrb[221].mxu1  ;;  %v6139_v24 = vld [vmem:[%s12594_s0 + $0x670] sm:$0xff]  ;;  %v6248_v54 = vld [vmem:[%s12594_s0 + $0x8b8] sm:$0xff] }
 0x295   :  { %v1679_v47 = vpop.f32.mrb[222].mxu0  ;;  %v2019_v8 = vpop.f32.mrb[222].mxu1 }
 0x296   :  { %12686 = vst [vmem:[#allocation28_spill] sm:$0xff] %v10211_v31  ;;  %v2311_v25 = vadd.f32 %v2019_v8, %v9348_v50  ;;  %v7395_v9 = vpop.f32.mrb[223].mxu0  ;;  %v7401_v22 = vpop.f32.mrb[223].mxu1  ;;  %v6140_v50 = vld [vmem:[%s12594_s0 + $0x678] sm:$0xff] }
 0x297   :  { %v1857_v56 = vpack.c.bf16 %v6140_v50, %v6139_v24 }
 0x298   :  { %7507 = vmatmul.mubr.msk.bf16.gmra.mrb[72].mxu1 %vm239_vm3, %v1856_v57  ;;  %7653 = vmatmul.mubr.msk.bf16.gmra.mrb[72].mxu0 %vm239_vm3, %v2483_v3  ;;  %v2484_v57 = vpack.c.bf16 %v6249_v0, %v6248_v54 }
 0x299   :  { %7510 = vmatprep.mubr.msk.bf16.mxu1 %vm8304_vm2, %v12619_v1  ;;  %7656 = vmatprep.mubr.msk.bf16.mxu0 %vm8304_vm2, %v12619_v1 }
 0x29b   :  { %v2024_v43 = vpop.f32.mrb[224].mxu1  ;;  %v2644_v28 = vpop.f32.mrb[224].mxu0 }
 0x29c   :  { %v2312_v17 = vadd.f32 %v2024_v43, %v9369_v55  ;;  %v10234_v4 = vadd.f32 %v2644_v28, %v2310_v14  ;;  %v7404_v19 = vpop.f32.mrb[225].mxu1  ;;  %v7550_v49 = vpop.f32.mrb[225].mxu0  ;;  %v6141_v55 = vld [vmem:[%s12594_s0 + $0x680] sm:$0xff]  ;;  %v6251_v14 = vld [vmem:[%s12594_s0 + $0x8d0] sm:$0xff] }
 0x29d   :  { %v2027_v3 = vpop.f32.mrb[226].mxu1  ;;  %v2647_v47 = vpop.f32.mrb[226].mxu0 }
 0x29e   :  { %v2313_v8 = vadd.f32 %v2027_v3, %v9372_v44  ;;  %v10237_v9 = vadd.f32 %v2647_v47, %v2311_v25  ;;  %v7551_v22 = vpop.f32.mrb[227].mxu0  ;;  %v7405_v31 = vpop.f32.mrb[227].mxu1  ;;  %v6142_v44 = vld [vmem:[%s12594_s0 + $0x688] sm:$0xff] }
 0x29f   :  { %v6250_v31 = vld [vmem:[%s12594_s0 + $0x8c8] sm:$0xff]  ;;  %v1858_v28 = vpack.c.bf16 %v6142_v44, %v6141_v55 }
 0x2a0   :  { %7511 = vmatmul.mubr.msk.bf16.gmra.mrb[76].mxu1 %vm239_vm3, %v1857_v56  ;;  %7657 = vmatmul.mubr.msk.bf16.gmra.mrb[76].mxu0 %vm239_vm3, %v2484_v57  ;;  %v2485_v19 = vpack.c.bf16 %v6251_v14, %v6250_v31 }
 0x2a1   :  { %7514 = vmatprep.mubr.msk.bf16.mxu1 %vm8304_vm2, %v12619_v1  ;;  %7660 = vmatprep.mubr.msk.bf16.mxu0 %vm8304_vm2, %v12619_v1 }
 0x2a3   :  { %v2032_v25 = vpop.f32.mrb[228].mxu1  ;;  %v2652_v24 = vpop.f32.mrb[228].mxu0 }
 0x2a4   :  { %v2314_v50 = vadd.f32 %v2032_v25, %v9393_v42  ;;  %v10258_v54 = vadd.f32 %v2652_v24, %v2312_v17  ;;  %v7408_v0 = vpop.f32.mrb[229].mxu1  ;;  %v7554_v43 = vpop.f32.mrb[229].mxu0  ;;  %v6143_v42 = vld [vmem:[%s12594_s0 + $0x690] sm:$0xff]  ;;  %v6252_v17 = vld [vmem:[%s12594_s0 + $0x8d8] sm:$0xff] }
 0x2a5   :  { %v2035_v49 = vpop.f32.mrb[230].mxu1  ;;  %v2655_v56 = vpop.f32.mrb[230].mxu0 }
 0x2a6   :  { %v2315_v57 = vadd.f32 %v2035_v49, %v9396_v60  ;;  %v10261_v3 = vadd.f32 %v2655_v56, %v2313_v8  ;;  %v7555_v47 = vpop.f32.mrb[231].mxu0  ;;  %v7409_v22 = vpop.f32.mrb[231].mxu1  ;;  %v6144_v60 = vld [vmem:[%s12594_s0 + $0x698] sm:$0xff]  ;;  %v6253_v8 = vld [vmem:[%s12594_s0 + $0x8e0] sm:$0xff] }
 0x2a7   :  { %v1859_v0 = vpack.c.bf16 %v6144_v60, %v6143_v42  ;;  %v2486_v43 = vpack.c.bf16 %v6253_v8, %v6252_v17 }
 0x2a8   :  { %7515 = vmatmul.mubr.msk.bf16.gmra.mrb[80].mxu1 %vm239_vm3, %v1858_v28  ;;  %7661 = vmatmul.mubr.msk.bf16.gmra.mrb[80].mxu0 %vm239_vm3, %v2485_v19 }
 0x2a9   :  { %7518 = vmatprep.mubr.msk.bf16.mxu1 %vm8304_vm2, %v12619_v1  ;;  %7664 = vmatprep.mubr.msk.bf16.mxu0 %vm8304_vm2, %v12619_v1 }
 0x2ab   :  { %v2040_v55 = vpop.f32.mrb[232].mxu1  ;;  %v2660_v44 = vpop.f32.mrb[232].mxu0 }
 0x2ac   :  { %v2316_v31 = vadd.f32 %v2040_v55, %v9417_v32  ;;  %v10282_v14 = vadd.f32 %v2660_v44, %v2314_v50  ;;  %v7412_v25 = vpop.f32.mrb[233].mxu1  ;;  %v7558_v24 = vpop.f32.mrb[233].mxu0  ;;  %v6145_v32 = vld [vmem:[%s12594_s0 + $0x6a0] sm:$0xff]  ;;  %v6254_v50 = vld [vmem:[%s12594_s0 + $0x8e8] sm:$0xff] }
 0x2ad   :  { %v2043_v28 = vpop.f32.mrb[234].mxu1  ;;  %v2663_v19 = vpop.f32.mrb[234].mxu0 }
 0x2ae   :  { %v2317_v49 = vadd.f32 %v2043_v28, %v9420_v34  ;;  %v10285_v56 = vadd.f32 %v2663_v19, %v2315_v57  ;;  %v7559_v47 = vpop.f32.mrb[235].mxu0  ;;  %v7413_v22 = vpop.f32.mrb[235].mxu1  ;;  %v6146_v34 = vld [vmem:[%s12594_s0 + $0x6a8] sm:$0xff]  ;;  %v6255_v57 = vld [vmem:[%s12594_s0 + $0x8f0] sm:$0xff] }
 0x2af   :  { %v1860_v25 = vpack.c.bf16 %v6146_v34, %v6145_v32  ;;  %v2487_v24 = vpack.c.bf16 %v6255_v57, %v6254_v50 }
 0x2b0   :  { %7519 = vmatmul.mubr.msk.bf16.gmra.mrb[84].mxu1 %vm239_vm3, %v1859_v0  ;;  %7665 = vmatmul.mubr.msk.bf16.gmra.mrb[84].mxu0 %vm239_vm3, %v2486_v43 }
 0x2b1   :  { %7522 = vmatprep.mubr.msk.bf16.mxu1 %vm8304_vm2, %v12619_v1  ;;  %7668 = vmatprep.mubr.msk.bf16.mxu0 %vm8304_vm2, %v12619_v1 }
 0x2b3   :  { %v2048_v42 = vpop.f32.mrb[236].mxu1  ;;  %v2668_v60 = vpop.f32.mrb[236].mxu0 }
 0x2b4   :  { %v2318_v17 = vadd.f32 %v2048_v42, %v9441_v20  ;;  %v10306_v8 = vadd.f32 %v2668_v60, %v2316_v31  ;;  %v7416_v55 = vpop.f32.mrb[237].mxu1  ;;  %v7562_v44 = vpop.f32.mrb[237].mxu0  ;;  %v6147_v20 = vld [vmem:[%s12594_s0 + $0x6b0] sm:$0xff]  ;;  %v6256_v31 = vld [vmem:[%s12594_s0 + $0x8f8] sm:$0xff] }
 0x2b5   :  { %v2051_v0 = vpop.f32.mrb[238].mxu1  ;;  %v2671_v43 = vpop.f32.mrb[238].mxu0 }
 0x2b6   :  { %v2319_v28 = vadd.f32 %v2051_v0, %v9444_v5  ;;  %v10309_v19 = vadd.f32 %v2671_v43, %v2317_v49  ;;  %v7563_v47 = vpop.f32.mrb[239].mxu0  ;;  %v7417_v22 = vpop.f32.mrb[239].mxu1  ;;  %v6148_v5 = vld [vmem:[%s12594_s0 + $0x6b8] sm:$0xff]  ;;  %v6257_v49 = vld [vmem:[%s12594_s0 + $0x900] sm:$0xff] }
 0x2b7   :  { %v1861_v55 = vpack.c.bf16 %v6148_v5, %v6147_v20  ;;  %v2488_v44 = vpack.c.bf16 %v6257_v49, %v6256_v31 }
 0x2b8   :  { %7523 = vmatmul.mubr.msk.bf16.gmra.mrb[88].mxu1 %vm239_vm3, %v1860_v25  ;;  %7669 = vmatmul.mubr.msk.bf16.gmra.mrb[88].mxu0 %vm239_vm3, %v2487_v24 }
 0x2b9   :  { %7526 = vmatprep.mubr.msk.bf16.mxu1 %vm8304_vm2, %v12619_v1  ;;  %7672 = vmatprep.mubr.msk.bf16.mxu0 %vm8304_vm2, %v12619_v1 }
 0x2bb   :  { %v2056_v32 = vpop.f32.mrb[240].mxu1  ;;  %v2676_v34 = vpop.f32.mrb[240].mxu0 }
 0x2bc   :  { %v2320_v50 = vadd.f32 %v2056_v32, %v9465_v46  ;;  %v10330_v57 = vadd.f32 %v2676_v34, %v2318_v17  ;;  %v7420_v42 = vpop.f32.mrb[241].mxu1  ;;  %v7566_v60 = vpop.f32.mrb[241].mxu0  ;;  %v6149_v46 = vld [vmem:[%s12594_s0 + $0x6c0] sm:$0xff]  ;;  %v6258_v17 = vld [vmem:[%s12594_s0 + $0x908] sm:$0xff] }
 0x2bd   :  { %v2059_v25 = vpop.f32.mrb[242].mxu1  ;;  %v2679_v24 = vpop.f32.mrb[242].mxu0 }
 0x2be   :  { %v2321_v0 = vadd.f32 %v2059_v25, %v9468_v26  ;;  %v10333_v43 = vadd.f32 %v2679_v24, %v2319_v28  ;;  %v7567_v47 = vpop.f32.mrb[243].mxu0  ;;  %v7421_v22 = vpop.f32.mrb[243].mxu1  ;;  %v6150_v26 = vld [vmem:[%s12594_s0 + $0x6c8] sm:$0xff]  ;;  %v6259_v28 = vld [vmem:[%s12594_s0 + $0x910] sm:$0xff] }
 0x2bf   :  { %v1862_v42 = vpack.c.bf16 %v6150_v26, %v6149_v46  ;;  %v2489_v60 = vpack.c.bf16 %v6259_v28, %v6258_v17 }
 0x2c0   :  { %7527 = vmatmul.mubr.msk.bf16.gmra.mrb[92].mxu1 %vm239_vm3, %v1861_v55  ;;  %7673 = vmatmul.mubr.msk.bf16.gmra.mrb[92].mxu0 %vm239_vm3, %v2488_v44 }
 0x2c1   :  { %7530 = vmatprep.mubr.msk.bf16.mxu1 %vm8304_vm2, %v12619_v1  ;;  %7676 = vmatprep.mubr.msk.bf16.mxu0 %vm8304_vm2, %v12619_v1 }
 0x2c3   :  { %v2064_v20 = vpop.f32.mrb[244].mxu1  ;;  %v2684_v5 = vpop.f32.mrb[244].mxu0 }
 0x2c4   :  { %v2322_v31 = vadd.f32 %v2064_v20, %v9489_v16  ;;  %v10354_v49 = vadd.f32 %v2684_v5, %v2320_v50  ;;  %v7424_v32 = vpop.f32.mrb[245].mxu1  ;;  %v7570_v34 = vpop.f32.mrb[245].mxu0  ;;  %v6151_v16 = vld [vmem:[%s12594_s0 + $0x6d0] sm:$0xff]  ;;  %v6260_v50 = vld [vmem:[%s12594_s0 + $0x918] sm:$0xff] }
 0x2c5   :  { %v2067_v55 = vpop.f32.mrb[246].mxu1  ;;  %v2687_v44 = vpop.f32.mrb[246].mxu0 }
 0x2c6   :  { %v2323_v25 = vadd.f32 %v2067_v55, %v9492_v13  ;;  %v10357_v24 = vadd.f32 %v2687_v44, %v2321_v0  ;;  %v7571_v47 = vpop.f32.mrb[247].mxu0  ;;  %v7425_v22 = vpop.f32.mrb[247].mxu1  ;;  %v6152_v13 = vld [vmem:[%s12594_s0 + $0x6d8] sm:$0xff]  ;;  %v6261_v0 = vld [vmem:[%s12594_s0 + $0x920] sm:$0xff] }
 0x2c7   :  { %v1863_v32 = vpack.c.bf16 %v6152_v13, %v6151_v16  ;;  %v2490_v34 = vpack.c.bf16 %v6261_v0, %v6260_v50 }
 0x2c8   :  { %7531 = vmatmul.mubr.msk.bf16.gmra.mrb[96].mxu1 %vm239_vm3, %v1862_v42  ;;  %7677 = vmatmul.mubr.msk.bf16.gmra.mrb[96].mxu0 %vm239_vm3, %v2489_v60 }
 0x2c9   :  { %7534 = vmatprep.mubr.msk.bf16.mxu1 %vm8304_vm2, %v12619_v1  ;;  %7680 = vmatprep.mubr.msk.bf16.mxu0 %vm8304_vm2, %v12619_v1 }
 0x2cb   :  { %v2072_v46 = vpop.f32.mrb[248].mxu1  ;;  %v2692_v26 = vpop.f32.mrb[248].mxu0 }
 0x2cc   :  { %v2324_v17 = vadd.f32 %v2072_v46, %v9513_v61  ;;  %v10378_v28 = vadd.f32 %v2692_v26, %v2322_v31  ;;  %v7428_v20 = vpop.f32.mrb[249].mxu1  ;;  %v7574_v5 = vpop.f32.mrb[249].mxu0  ;;  %v6153_v61 = vld [vmem:[%s12594_s0 + $0x6e0] sm:$0xff]  ;;  %v6262_v31 = vld [vmem:[%s12594_s0 + $0x928] sm:$0xff] }
 0x2cd   :  { %v2075_v42 = vpop.f32.mrb[250].mxu1  ;;  %v2695_v60 = vpop.f32.mrb[250].mxu0 }
 0x2ce   :  { %v2325_v55 = vadd.f32 %v2075_v42, %v9516_v27  ;;  %v10381_v44 = vadd.f32 %v2695_v60, %v2323_v25  ;;  %v7575_v47 = vpop.f32.mrb[251].mxu0  ;;  %v7429_v22 = vpop.f32.mrb[251].mxu1  ;;  %v6154_v27 = vld [vmem:[%s12594_s0 + $0x6e8] sm:$0xff]  ;;  %v6263_v25 = vld [vmem:[%s12594_s0 + $0x930] sm:$0xff] }
 0x2cf   :  { %v1864_v20 = vpack.c.bf16 %v6154_v27, %v6153_v61  ;;  %v2491_v5 = vpack.c.bf16 %v6263_v25, %v6262_v31  ;;  %v12688_v42 = vld [vmem:[#allocation31_spill] sm:$0xff] }
 0x2d0   :  { %12687 = vst [vmem:[#allocation29_spill] sm:$0xff] %v10381_v44  ;;  %7535 = vmatmul.mubr.msk.bf16.gmra.mrb[100].mxu1 %vm239_vm3, %v1863_v32  ;;  %7681 = vmatmul.mubr.msk.bf16.gmra.mrb[100].mxu0 %vm239_vm3, %v2490_v34 }
 0x2d1   :  { %7538 = vmatprep.mubr.msk.bf16.mxu1 %vm8304_vm2, %v12619_v1  ;;  %7684 = vmatprep.mubr.msk.bf16.mxu0 %vm8304_vm2, %v12619_v1 }
 0x2d3   :  { %v2080_v16 = vpop.f32.mrb[252].mxu1  ;;  %v2700_v13 = vpop.f32.mrb[252].mxu0 }
 0x2d4   :  { %v2326_v50 = vadd.f32 %v2080_v16, %v9534_v36  ;;  %v10402_v0 = vadd.f32 %v2700_v13, %v2324_v17  ;;  %v7432_v46 = vpop.f32.mrb[253].mxu1  ;;  %v7578_v26 = vpop.f32.mrb[253].mxu0  ;;  %v6155_v36 = vld [vmem:[%s12594_s0 + $0x6f0] sm:$0x3]  ;;  %v6264_v17 = vld [vmem:[%s12594_s0 + $0x938] sm:$0xff] }
 0x2d5   :  { %v2083_v32 = vpop.f32.mrb[254].mxu1  ;;  %v2703_v34 = vpop.f32.mrb[254].mxu0  ;;  %v1865_v13 = vpack.c.bf16 %v6155_v36, %v6155_v36 }
 0x2d6   :  { %v2327_v60 = vadd.f32 %v2083_v32, %v12688_v42  ;;  %v10405_v47 = vadd.f32 %v2703_v34, %v2325_v55  ;;  %v7579_v22 = vpop.f32.mrb[255].mxu0  ;;  %v7433_v44 = vpop.f32.mrb[255].mxu1  ;;  %v6265_v55 = vld [vmem:[%s12594_s0 + $0x940] sm:$0xff] }
 0x2d7   :  { %v2492_v46 = vpack.c.bf16 %v6265_v55, %v6264_v17  ;;  %v6527_v55 = vld [vmem:[%s12593_s1 + $0xe] sm:$0x3] }
 0x2d8   :  { %7539 = vmatmul.mubr.msk.bf16.gmra.mrb[104].mxu1 %vm239_vm3, %v1864_v20  ;;  %7685 = vmatmul.mubr.msk.bf16.gmra.mrb[104].mxu0 %vm239_vm3, %v2491_v5  ;;  %v12690_v5 = vld [vmem:[#allocation32_spill] sm:$0xff] }
 0x2d9   :  { %7542 = vmatprep.mubr.msk.bf16.mxu1 %vm8304_vm2, %v12619_v1  ;;  %7688 = vmatprep.mubr.msk.bf16.mxu0 %vm8304_vm2, %v12619_v1 }
 0x2db   :  { %v2088_v44 = vpop.f32.mrb[0].mxu1  ;;  %v2708_v61 = vpop.f32.mrb[0].mxu0 }
 0x2dc   :  { %v2328_v27 = vadd.f32 %v2088_v44, %v9558_v38  ;;  %v10423_v31 = vadd.f32 %v2708_v61, %v2326_v50  ;;  %v7436_v25 = vpop.f32.mrb[1].mxu1  ;;  %v7582_v16 = vpop.f32.mrb[1].mxu0  ;;  %v6266_v38 = vld [vmem:[%s12594_s0 + $0x948] sm:$0x3]  ;;  %v6305_v50 = vld [vmem:[%s12594_s0 + $0x4b1] sm:$0xff] }
 0x2dd   :  { %v2091_v26 = vpop.f32.mrb[2].mxu1  ;;  %v2711_v20 = vpop.f32.mrb[2].mxu0 }
 0x2de   :  { %12689 = vst [vmem:[#allocation30_spill] sm:$0xff] %v10423_v31  ;;  %v2329_v32 = vadd.f32 %v2091_v26, %v12690_v5  ;;  %v10426_v34 = vadd.f32 %v2711_v20, %v2327_v60  ;;  %v7583_v42 = vpop.f32.mrb[3].mxu0  ;;  %v7437_v22 = vpop.f32.mrb[3].mxu1  ;;  %v6306_v60 = vld [vmem:[%s12594_s0 + $0x4b9] sm:$0xff]  ;;  %v4489_v31 = vand.u32 %v6527_v55, %v8336_v6 }
 0x2e0   :  { %12691 = vst [vmem:[#allocation31_spill] sm:$0xff] %v10426_v34  ;;  %7543 = vmatmul.mubr.msk.bf16.gmra.mrb[108].mxu1 %vm239_vm3, %v1865_v13  ;;  %7689 = vmatmul.mubr.msk.bf16.gmra.mrb[108].mxu0 %vm239_vm3, %v2492_v46  ;;  %v2493_v13 = vpack.c.bf16 %v6266_v38, %v6266_v38  ;;  %v3084_v46 = vpack.c.bf16 %v6306_v60, %v6305_v50 }
 0x2e1   :  { %7692 = vmatprep.mubr.msk.bf16.mxu0 %vm8304_vm2, %v12619_v1  ;;  %7698 = vmatprep.mubr.msk.bf16.mxu1 %vm8304_vm2, %v12619_v1 }
 0x2e3   :  { %v2096_v36 = vpop.f32.mrb[4].mxu1  ;;  %v2716_v17 = vpop.f32.mrb[4].mxu0 }
 0x2e4   :  { %v2330_v44 = vadd.f32 %v2096_v36, %v9587_v39  ;;  %v10447_v61 = vadd.f32 %v2716_v17, %v2328_v27  ;;  %v7440_v25 = vpop.f32.mrb[5].mxu1  ;;  %v7586_v16 = vpop.f32.mrb[5].mxu0  ;;  %v6307_v39 = vld [vmem:[%s12594_s0 + $0x4c1] sm:$0xff]  ;;  %v3638_v27 = vld [vmem:[%s12594_s0 + $0x11] sm:$0xff] }
 0x2e5   :  { %v2099_v26 = vpop.f32.mrb[6].mxu1  ;;  %v2719_v20 = vpop.f32.mrb[6].mxu0 }
 0x2e6   :  { %v2331_v5 = vadd.f32 %v2099_v26, %v9591_v41  ;;  %v10450_v42 = vadd.f32 %v2719_v20, %v2329_v32  ;;  %v7587_v22 = vpop.f32.mrb[7].mxu0  ;;  %v7441_v34 = vpop.f32.mrb[7].mxu1  ;;  %v6308_v41 = vld [vmem:[%s12594_s0 + $0x4c9] sm:$0xff]  ;;  %v3639_v32 = vld [vmem:[%s12594_s0 + $0x19] sm:$0xff] }
 0x2e7   :  { %v6565_v34 = vld [vmem:[%s12593_s1 + $0x10] sm:$0x3]  ;;  %v3085_v55 = vpack.c.bf16 %v6308_v41, %v6307_v39  ;;  %v3711_v25 = vpack.c.bf16 %v3639_v32, %v3638_v27 }
 0x2e8   :  { %12692 = vst [vmem:[#allocation32_spill] sm:$0xff] %v10450_v42  ;;  %7693 = vmatmul.mubr.msk.bf16.gmra.mrb[112].mxu0 %vm239_vm3, %v2493_v13  ;;  %7699 = vmatmul.mubr.msk.bf16.vlgmr.msra.gmra.mrb[112].mxu1 %vm239_vm3, %v3084_v46  ;;  %v5116_v26 = vand.u32 %v6565_v34, %v8336_v6  ;;  %v6310_v6 = vld [vmem:[%s12594_s0 + $0x4d9] sm:$0xff] }
 0x2e9   :  { %7702 = vmatprep.mubr.msk.bf16.mxu1 %vm8304_vm2, %v12619_v1  ;;  %7848 = vmatprep.mubr.msk.bf16.mxu0 %vm8304_vm2, %v12619_v1 }
 0x2ea   :  { %7997 = vmatpush3.bf16.msra.mxu1 %v4489_v31 }
 0x2eb   :  { %v2104_v38 = vpop.f32.mrb[8].mxu1  ;;  %v2724_v50 = vpop.f32.mrb[8].mxu0 }
 0x2ec   :  { %v2332_v60 = vadd.f32 %v2104_v38, %v9613_v53  ;;  %v7444_v36 = vpop.f32.mrb[9].mxu1  ;;  %v7590_v17 = vpop.f32.mrb[9].mxu0  ;;  %v10475_v16 = vadd.f32 %v2724_v50, %v2330_v44  ;;  %v6309_v53 = vld [vmem:[%s12594_s0 + $0x4d1] sm:$0xff]  ;;  %v3641_v44 = vld [vmem:[%s12594_s0 + $0x29] sm:$0xff] }
 0x2ed   :  { %v2107_v13 = vpop.f32.mrb[10].mxu1  ;;  %v2727_v46 = vpop.f32.mrb[10].mxu0  ;;  %v3086_v34 = vpack.c.bf16 %v6310_v6, %v6309_v53 }
 0x2ee   :  { %v2333_v31 = vadd.f32 %v2107_v13, %v9616_v58  ;;  %v7591_v20 = vpop.f32.mrb[11].mxu0  ;;  %v7445_v22 = vpop.f32.mrb[11].mxu1  ;;  %v10479_v42 = vadd.f32 %v2727_v46, %v2331_v5  ;;  %v3640_v58 = vld [vmem:[%s12594_s0 + $0x21] sm:$0xff] }
 0x2ef   :  { %v3712_v38 = vpack.c.bf16 %v3641_v44, %v3640_v58 }
 0x2f0   :  { %7703 = vmatmul.mubr.msk.bf16.gmra.mrb[116].mxu1 %vm239_vm3, %v3085_v55  ;;  %7849 = vmatmul.mubr.msk.bf16.vlgmr.msra.gmra.mrb[116].mxu0 %vm239_vm3, %v3711_v25 }
 0x2f1   :  { %8147 = vmatpush3.bf16.msra.mxu0 %v5116_v26  ;;  %7706 = vmatprep.mubr.msk.bf16.mxu1 %vm8304_vm2, %v12619_v1  ;;  %v3643_v26 = vld [vmem:[%s12594_s0 + $0x39] sm:$0xff] }
 0x2f2   :  { %7852 = vmatprep.mubr.msk.bf16.mxu0 %vm8304_vm2, %v12619_v1 }
 0x2f3   :  { %v2112_v5 = vpop.f32.mrb[12].mxu1  ;;  %v2732_v39 = vpop.f32.mrb[12].mxu0 }
 0x2f4   :  { %v2334_v41 = vadd.f32 %v2112_v5, %v9637_v63  ;;  %v7448_v27 = vpop.f32.mrb[13].mxu1  ;;  %v7594_v32 = vpop.f32.mrb[13].mxu0  ;;  %v10500_v50 = vadd.f32 %v2732_v39, %v2332_v60  ;;  %v6311_v63 = vld [vmem:[%s12594_s0 + $0x4e1] sm:$0xff]  ;;  %v3642_v60 = vld [vmem:[%s12594_s0 + $0x31] sm:$0xff] }
 0x2f5   :  { %v2115_v36 = vpop.f32.mrb[14].mxu1  ;;  %v2735_v17 = vpop.f32.mrb[14].mxu0  ;;  %v3713_v44 = vpack.c.bf16 %v3643_v26, %v3642_v60 }
 0x2f6   :  { %v2335_v55 = vadd.f32 %v2115_v36, %v9640_v10  ;;  %v7595_v25 = vpop.f32.mrb[15].mxu0  ;;  %v7449_v13 = vpop.f32.mrb[15].mxu1  ;;  %v10503_v46 = vadd.f32 %v2735_v17, %v2333_v31  ;;  %v6312_v10 = vld [vmem:[%s12594_s0 + $0x4e9] sm:$0xff] }
 0x2f7   :  { %v3087_v58 = vpack.c.bf16 %v6312_v10, %v6311_v63  ;;  %v3645_v17 = vld [vmem:[%s12594_s0 + $0x49] sm:$0xff] }
 0x2f8   :  { %7707 = vmatmul.mubr.msk.bf16.gmra.mrb[120].mxu1 %vm239_vm3, %v3086_v34  ;;  %7853 = vmatmul.mubr.msk.bf16.gmra.mrb[120].mxu0 %vm239_vm3, %v3712_v38 }
 0x2f9   :  { %7710 = vmatprep.mubr.msk.bf16.mxu1 %vm8304_vm2, %v12619_v1  ;;  %7856 = vmatprep.mubr.msk.bf16.mxu0 %vm8304_vm2, %v12619_v1 }
 0x2fb   :  { %v2120_v31 = vpop.f32.mrb[16].mxu1  ;;  %v2740_v20 = vpop.f32.mrb[16].mxu0 }
 0x2fc   :  { %v2336_v22 = vadd.f32 %v2120_v31, %v9661_v59  ;;  %v7452_v53 = vpop.f32.mrb[17].mxu1  ;;  %v7598_v6 = vpop.f32.mrb[17].mxu0  ;;  %v10524_v5 = vadd.f32 %v2740_v20, %v2334_v41  ;;  %v6313_v59 = vld [vmem:[%s12594_s0 + $0x4f1] sm:$0xff]  ;;  %v3644_v41 = vld [vmem:[%s12594_s0 + $0x41] sm:$0xff] }
 0x2fd   :  { %v2123_v39 = vpop.f32.mrb[18].mxu1  ;;  %v2743_v27 = vpop.f32.mrb[18].mxu0  ;;  %v3714_v26 = vpack.c.bf16 %v3645_v17, %v3644_v41 }
 0x2fe   :  { %v2337_v32 = vadd.f32 %v2123_v39, %v9664_v2  ;;  %v7599_v34 = vpop.f32.mrb[19].mxu0  ;;  %v7453_v38 = vpop.f32.mrb[19].mxu1  ;;  %v10527_v36 = vadd.f32 %v2743_v27, %v2335_v55  ;;  %v6314_v2 = vld [vmem:[%s12594_s0 + $0x4f9] sm:$0xff] }
 0x2ff   :  { %v3088_v60 = vpack.c.bf16 %v6314_v2, %v6313_v59  ;;  %v3647_v27 = vld [vmem:[%s12594_s0 + $0x59] sm:$0xff] }
 0x300   :  { %7711 = vmatmul.mubr.msk.bf16.gmra.mrb[124].mxu1 %vm239_vm3, %v3087_v58  ;;  %7857 = vmatmul.mubr.msk.bf16.gmra.mrb[124].mxu0 %vm239_vm3, %v3713_v44 }
 0x301   :  { %7714 = vmatprep.mubr.msk.bf16.mxu1 %vm8304_vm2, %v12619_v1  ;;  %7860 = vmatprep.mubr.msk.bf16.mxu0 %vm8304_vm2, %v12619_v1 }
 0x303   :  { %v2128_v55 = vpop.f32.mrb[20].mxu1  ;;  %v2748_v25 = vpop.f32.mrb[20].mxu0 }
 0x304   :  { %v2338_v13 = vadd.f32 %v2128_v55, %v9685_v12  ;;  %v7456_v63 = vpop.f32.mrb[21].mxu1  ;;  %v7602_v10 = vpop.f32.mrb[21].mxu0  ;;  %v10548_v31 = vadd.f32 %v2748_v25, %v2336_v22  ;;  %v6315_v12 = vld [vmem:[%s12594_s0 + $0x501] sm:$0xff]  ;;  %v3646_v22 = vld [vmem:[%s12594_s0 + $0x51] sm:$0xff] }
 0x305   :  { %v2131_v20 = vpop.f32.mrb[22].mxu1  ;;  %v2751_v53 = vpop.f32.mrb[22].mxu0  ;;  %v3715_v17 = vpack.c.bf16 %v3647_v27, %v3646_v22 }
 0x306   :  { %v2339_v6 = vadd.f32 %v2131_v20, %v9688_v18  ;;  %v7603_v58 = vpop.f32.mrb[23].mxu0  ;;  %v7457_v44 = vpop.f32.mrb[23].mxu1  ;;  %v10551_v39 = vadd.f32 %v2751_v53, %v2337_v32  ;;  %v6316_v18 = vld [vmem:[%s12594_s0 + $0x509] sm:$0xff] }
 0x307   :  { %v3089_v41 = vpack.c.bf16 %v6316_v18, %v6315_v12  ;;  %v3649_v53 = vld [vmem:[%s12594_s0 + $0x69] sm:$0xff] }
 0x308   :  { %7715 = vmatmul.mubr.msk.bf16.gmra.mrb[128].mxu1 %vm239_vm3, %v3088_v60  ;;  %7861 = vmatmul.mubr.msk.bf16.gmra.mrb[128].mxu0 %vm239_vm3, %v3714_v26 }
 0x309   :  { %7718 = vmatprep.mubr.msk.bf16.mxu1 %vm8304_vm2, %v12619_v1  ;;  %7864 = vmatprep.mubr.msk.bf16.mxu0 %vm8304_vm2, %v12619_v1 }
 0x30b   :  { %v2136_v32 = vpop.f32.mrb[24].mxu1  ;;  %v2756_v34 = vpop.f32.mrb[24].mxu0 }
 0x30c   :  { %v2340_v38 = vadd.f32 %v2136_v32, %v9709_v11  ;;  %v7460_v59 = vpop.f32.mrb[25].mxu1  ;;  %v7606_v2 = vpop.f32.mrb[25].mxu0  ;;  %v10572_v55 = vadd.f32 %v2756_v34, %v2338_v13  ;;  %v6317_v11 = vld [vmem:[%s12594_s0 + $0x511] sm:$0xff]  ;;  %v3648_v13 = vld [vmem:[%s12594_s0 + $0x61] sm:$0xff] }
 0x30d   :  { %v2139_v25 = vpop.f32.mrb[26].mxu1  ;;  %v2759_v63 = vpop.f32.mrb[26].mxu0  ;;  %v3716_v27 = vpack.c.bf16 %v3649_v53, %v3648_v13 }
 0x30e   :  { %v2341_v10 = vadd.f32 %v2139_v25, %v9712_v33  ;;  %v7607_v60 = vpop.f32.mrb[27].mxu0  ;;  %v7461_v26 = vpop.f32.mrb[27].mxu1  ;;  %v10575_v20 = vadd.f32 %v2759_v63, %v2339_v6  ;;  %v6318_v33 = vld [vmem:[%s12594_s0 + $0x519] sm:$0xff] }
 0x30f   :  { %v3090_v22 = vpack.c.bf16 %v6318_v33, %v6317_v11  ;;  %v3651_v63 = vld [vmem:[%s12594_s0 + $0x79] sm:$0xff] }
 0x310   :  { %7719 = vmatmul.mubr.msk.bf16.gmra.mrb[132].mxu1 %vm239_vm3, %v3089_v41  ;;  %7865 = vmatmul.mubr.msk.bf16.gmra.mrb[132].mxu0 %vm239_vm3, %v3715_v17 }
 0x311   :  { %7722 = vmatprep.mubr.msk.bf16.mxu1 %vm8304_vm2, %v12619_v1  ;;  %7868 = vmatprep.mubr.msk.bf16.mxu0 %vm8304_vm2, %v12619_v1 }
 0x313   :  { %v2144_v6 = vpop.f32.mrb[28].mxu1  ;;  %v2764_v58 = vpop.f32.mrb[28].mxu0 }
 0x314   :  { %v2342_v44 = vadd.f32 %v2144_v6, %v9733_v52  ;;  %v7464_v12 = vpop.f32.mrb[29].mxu1  ;;  %v7610_v18 = vpop.f32.mrb[29].mxu0  ;;  %v10596_v32 = vadd.f32 %v2764_v58, %v2340_v38  ;;  %v6319_v52 = vld [vmem:[%s12594_s0 + $0x521] sm:$0xff]  ;;  %v3650_v38 = vld [vmem:[%s12594_s0 + $0x71] sm:$0xff] }
 0x315   :  { %v2147_v34 = vpop.f32.mrb[30].mxu1  ;;  %v2767_v59 = vpop.f32.mrb[30].mxu0  ;;  %v3717_v53 = vpack.c.bf16 %v3651_v63, %v3650_v38 }
 0x316   :  { %v2343_v2 = vadd.f32 %v2147_v34, %v9736_v7  ;;  %v7611_v41 = vpop.f32.mrb[31].mxu0  ;;  %v7465_v17 = vpop.f32.mrb[31].mxu1  ;;  %v10599_v25 = vadd.f32 %v2767_v59, %v2341_v10  ;;  %v6320_v7 = vld [vmem:[%s12594_s0 + $0x529] sm:$0xff] }
 0x317   :  { %v3091_v13 = vpack.c.bf16 %v6320_v7, %v6319_v52  ;;  %v3653_v59 = vld [vmem:[%s12594_s0 + $0x89] sm:$0xff] }
 0x318   :  { %7723 = vmatmul.mubr.msk.bf16.gmra.mrb[136].mxu1 %vm239_vm3, %v3090_v22  ;;  %7869 = vmatmul.mubr.msk.bf16.gmra.mrb[136].mxu0 %vm239_vm3, %v3716_v27 }
 0x319   :  { %7726 = vmatprep.mubr.msk.bf16.mxu1 %vm8304_vm2, %v12619_v1  ;;  %7872 = vmatprep.mubr.msk.bf16.mxu0 %vm8304_vm2, %v12619_v1 }
 0x31b   :  { %v2152_v10 = vpop.f32.mrb[32].mxu1  ;;  %v2772_v60 = vpop.f32.mrb[32].mxu0 }
 0x31c   :  { %v2344_v26 = vadd.f32 %v2152_v10, %v9757_v51  ;;  %v7468_v11 = vpop.f32.mrb[33].mxu1  ;;  %v7614_v33 = vpop.f32.mrb[33].mxu0  ;;  %v10620_v6 = vadd.f32 %v2772_v60, %v2342_v44  ;;  %v6321_v51 = vld [vmem:[%s12594_s0 + $0x531] sm:$0xff]  ;;  %v3652_v44 = vld [vmem:[%s12594_s0 + $0x81] sm:$0xff] }
 0x31d   :  { %v2155_v58 = vpop.f32.mrb[34].mxu1  ;;  %v2775_v12 = vpop.f32.mrb[34].mxu0  ;;  %v3718_v63 = vpack.c.bf16 %v3653_v59, %v3652_v44 }
 0x31e   :  { %v2345_v18 = vadd.f32 %v2155_v58, %v9760_v37  ;;  %v7615_v22 = vpop.f32.mrb[35].mxu0  ;;  %v7469_v27 = vpop.f32.mrb[35].mxu1  ;;  %v10623_v34 = vadd.f32 %v2775_v12, %v2343_v2  ;;  %v6322_v37 = vld [vmem:[%s12594_s0 + $0x539] sm:$0xff] }
 0x31f   :  { %v3092_v38 = vpack.c.bf16 %v6322_v37, %v6321_v51  ;;  %v3655_v12 = vld [vmem:[%s12594_s0 + $0x99] sm:$0xff] }
 0x320   :  { %7727 = vmatmul.mubr.msk.bf16.gmra.mrb[140].mxu1 %vm239_vm3, %v3091_v13  ;;  %7873 = vmatmul.mubr.msk.bf16.gmra.mrb[140].mxu0 %vm239_vm3, %v3717_v53 }
 0x321   :  { %7730 = vmatprep.mubr.msk.bf16.mxu1 %vm8304_vm2, %v12619_v1  ;;  %7876 = vmatprep.mubr.msk.bf16.mxu0 %vm8304_vm2, %v12619_v1 }
 0x323   :  { %v2160_v2 = vpop.f32.mrb[36].mxu1  ;;  %v2780_v41 = vpop.f32.mrb[36].mxu0 }
 0x324   :  { %v2346_v17 = vadd.f32 %v2160_v2, %v9781_v40  ;;  %v7472_v52 = vpop.f32.mrb[37].mxu1  ;;  %v7618_v7 = vpop.f32.mrb[37].mxu0  ;;  %v10644_v10 = vadd.f32 %v2780_v41, %v2344_v26  ;;  %v6323_v40 = vld [vmem:[%s12594_s0 + $0x541] sm:$0xff]  ;;  %v3654_v26 = vld [vmem:[%s12594_s0 + $0x91] sm:$0xff] }
 0x325   :  { %v2163_v60 = vpop.f32.mrb[38].mxu1  ;;  %v2783_v11 = vpop.f32.mrb[38].mxu0  ;;  %v3719_v59 = vpack.c.bf16 %v3655_v12, %v3654_v26 }
 0x326   :  { %v2347_v33 = vadd.f32 %v2163_v60, %v9784_v15  ;;  %v7619_v13 = vpop.f32.mrb[39].mxu0  ;;  %v7473_v53 = vpop.f32.mrb[39].mxu1  ;;  %v10647_v58 = vadd.f32 %v2783_v11, %v2345_v18  ;;  %v6324_v15 = vld [vmem:[%s12594_s0 + $0x549] sm:$0xff] }
 0x327   :  { %v3093_v44 = vpack.c.bf16 %v6324_v15, %v6323_v40  ;;  %v3657_v11 = vld [vmem:[%s12594_s0 + $0xa9] sm:$0xff] }
 0x328   :  { %7731 = vmatmul.mubr.msk.bf16.gmra.mrb[144].mxu1 %vm239_vm3, %v3092_v38  ;;  %7877 = vmatmul.mubr.msk.bf16.gmra.mrb[144].mxu0 %vm239_vm3, %v3718_v63 }
 0x329   :  { %7734 = vmatprep.mubr.msk.bf16.mxu1 %vm8304_vm2, %v12619_v1  ;;  %7880 = vmatprep.mubr.msk.bf16.mxu0 %vm8304_vm2, %v12619_v1 }
 0x32b   :  { %v2168_v18 = vpop.f32.mrb[40].mxu1  ;;  %v2788_v22 = vpop.f32.mrb[40].mxu0 }
 0x32c   :  { %v2348_v27 = vadd.f32 %v2168_v18, %v9805_v29  ;;  %v7476_v51 = vpop.f32.mrb[41].mxu1  ;;  %v7622_v37 = vpop.f32.mrb[41].mxu0  ;;  %v10668_v2 = vadd.f32 %v2788_v22, %v2346_v17  ;;  %v6325_v29 = vld [vmem:[%s12594_s0 + $0x551] sm:$0xff]  ;;  %v3656_v17 = vld [vmem:[%s12594_s0 + $0xa1] sm:$0xff] }
 0x32d   :  { %v2171_v41 = vpop.f32.mrb[42].mxu1  ;;  %v2791_v52 = vpop.f32.mrb[42].mxu0  ;;  %v3720_v12 = vpack.c.bf16 %v3657_v11, %v3656_v17 }
 0x32e   :  { %v2349_v7 = vadd.f32 %v2171_v41, %v9808_v35  ;;  %v7623_v38 = vpop.f32.mrb[43].mxu0  ;;  %v7477_v63 = vpop.f32.mrb[43].mxu1  ;;  %v10671_v60 = vadd.f32 %v2791_v52, %v2347_v33  ;;  %v6326_v35 = vld [vmem:[%s12594_s0 + $0x559] sm:$0xff] }
 0x32f   :  { %v3094_v26 = vpack.c.bf16 %v6326_v35, %v6325_v29  ;;  %v3659_v52 = vld [vmem:[%s12594_s0 + $0xb9] sm:$0xff] }
 0x330   :  { %7735 = vmatmul.mubr.msk.bf16.gmra.mrb[148].mxu1 %vm239_vm3, %v3093_v44  ;;  %7881 = vmatmul.mubr.msk.bf16.gmra.mrb[148].mxu0 %vm239_vm3, %v3719_v59  ;;  %v12693_v63 = vld [vmem:[#allocation2_spill] sm:$0xff] }
 0x331   :  { %7738 = vmatprep.mubr.msk.bf16.mxu1 %vm8304_vm2, %v12619_v1  ;;  %7884 = vmatprep.mubr.msk.bf16.mxu0 %vm8304_vm2, %v12619_v1 }
 0x333   :  { %v2176_v33 = vpop.f32.mrb[44].mxu1  ;;  %v2796_v13 = vpop.f32.mrb[44].mxu0 }
 0x334   :  { %v2350_v53 = vadd.f32 %v2176_v33, %v9829_v62  ;;  %v7480_v40 = vpop.f32.mrb[45].mxu1  ;;  %v7626_v15 = vpop.f32.mrb[45].mxu0  ;;  %v10692_v18 = vadd.f32 %v2796_v13, %v2348_v27  ;;  %v6327_v62 = vld [vmem:[%s12594_s0 + $0x561] sm:$0xff]  ;;  %v3658_v27 = vld [vmem:[%s12594_s0 + $0xb1] sm:$0xff] }
 0x335   :  { %v2179_v22 = vpop.f32.mrb[46].mxu1  ;;  %v2799_v51 = vpop.f32.mrb[46].mxu0  ;;  %v3721_v33 = vpack.c.bf16 %v3659_v52, %v3658_v27  ;;  %v12696_v52 = vld [vmem:[#allocation4_spill] sm:$0xff] }
 0x336   :  { %v2351_v37 = vadd.f32 %v2179_v22, %v9832_v45  ;;  %v7627_v44 = vpop.f32.mrb[47].mxu0  ;;  %v7481_v59 = vpop.f32.mrb[47].mxu1  ;;  %v10695_v41 = vadd.f32 %v2799_v51, %v2349_v7  ;;  %v6328_v45 = vld [vmem:[%s12594_s0 + $0x569] sm:$0xff] }
 0x337   :  { %v3095_v11 = vpack.c.bf16 %v6328_v45, %v6327_v62  ;;  %v6329_v59 = vld [vmem:[%s12594_s0 + $0x571] sm:$0xff]  ;;  %v3661_v62 = vld [vmem:[%s12594_s0 + $0xc9] sm:$0xff] }
 0x338   :  { %7739 = vmatmul.mubr.msk.bf16.gmra.mrb[152].mxu1 %vm239_vm3, %v3094_v26  ;;  %7885 = vmatmul.mubr.msk.bf16.gmra.mrb[152].mxu0 %vm239_vm3, %v3720_v12  ;;  %v12694_v26 = vld [vmem:[#allocation3_spill] sm:$0xff] }
 0x339   :  { %7742 = vmatprep.mubr.msk.bf16.mxu1 %vm8304_vm2, %v12619_v1  ;;  %7888 = vmatprep.mubr.msk.bf16.mxu0 %vm8304_vm2, %v12619_v1 }
 0x33b   :  { %v2184_v7 = vpop.f32.mrb[48].mxu1  ;;  %v2804_v38 = vpop.f32.mrb[48].mxu0 }
 0x33c   :  { %v2352_v29 = vadd.f32 %v2184_v7, %v12693_v63  ;;  %v7484_v35 = vpop.f32.mrb[49].mxu1  ;;  %v7630_v17 = vpop.f32.mrb[49].mxu0  ;;  %v10716_v13 = vadd.f32 %v2804_v38, %v2350_v53  ;;  %v6330_v53 = vld [vmem:[%s12594_s0 + $0x579] sm:$0xff] }
 0x33d   :  { %v2187_v40 = vpop.f32.mrb[50].mxu1  ;;  %v2807_v15 = vpop.f32.mrb[50].mxu0  ;;  %v3096_v35 = vpack.c.bf16 %v6330_v53, %v6329_v59  ;;  %v3663_v59 = vld [vmem:[%s12594_s0 + $0xd9] sm:$0xff] }
 0x33e   :  { %v2353_v12 = vadd.f32 %v2187_v40, %v12694_v26  ;;  %v7631_v22 = vpop.f32.mrb[51].mxu0  ;;  %v7485_v51 = vpop.f32.mrb[51].mxu1  ;;  %v10719_v44 = vadd.f32 %v2807_v15, %v2351_v37  ;;  %v3660_v37 = vld [vmem:[%s12594_s0 + $0xc1] sm:$0xff]  ;;  %v12698_v15 = vld [vmem:[#allocation5_spill] sm:$0xff] }
 0x33f   :  { %v3722_v17 = vpack.c.bf16 %v3661_v62, %v3660_v37  ;;  %v12700_v62 = vld [vmem:[#allocation6_spill] sm:$0xff] }
 0x340   :  { %12695 = vst [vmem:[#allocation2_spill] sm:$0xff] %v10719_v44  ;;  %7743 = vmatmul.mubr.msk.bf16.gmra.mrb[156].mxu1 %vm239_vm3, %v3095_v11  ;;  %7889 = vmatmul.mubr.msk.bf16.gmra.mrb[156].mxu0 %vm239_vm3, %v3721_v33 }
 0x341   :  { %7746 = vmatprep.mubr.msk.bf16.mxu1 %vm8304_vm2, %v12619_v1  ;;  %7892 = vmatprep.mubr.msk.bf16.mxu0 %vm8304_vm2, %v12619_v1 }
 0x343   :  { %v2192_v45 = vpop.f32.mrb[52].mxu1  ;;  %v2812_v27 = vpop.f32.mrb[52].mxu0 }
 0x344   :  { %v2354_v7 = vadd.f32 %v2192_v45, %v12696_v52  ;;  %v7488_v38 = vpop.f32.mrb[53].mxu1  ;;  %v7634_v63 = vpop.f32.mrb[53].mxu0  ;;  %v10740_v11 = vadd.f32 %v2812_v27, %v2352_v29  ;;  %v6331_v45 = vld [vmem:[%s12594_s0 + $0x581] sm:$0xff]  ;;  %v6332_v29 = vld [vmem:[%s12594_s0 + $0x589] sm:$0xff] }
 0x345   :  { %v2195_v33 = vpop.f32.mrb[54].mxu1  ;;  %v2815_v40 = vpop.f32.mrb[54].mxu0  ;;  %v3097_v63 = vpack.c.bf16 %v6332_v29, %v6331_v45 }
 0x346   :  { %12697 = vst [vmem:[#allocation3_spill] sm:$0xff] %v10740_v11  ;;  %v2355_v26 = vadd.f32 %v2195_v33, %v12698_v15  ;;  %v7635_v22 = vpop.f32.mrb[55].mxu0  ;;  %v7489_v51 = vpop.f32.mrb[55].mxu1  ;;  %v10743_v44 = vadd.f32 %v2815_v40, %v2353_v12  ;;  %v3662_v12 = vld [vmem:[%s12594_s0 + $0xd1] sm:$0xff]  ;;  %v12702_v15 = vld [vmem:[#allocation7_spill] sm:$0xff] }
 0x348   :  { %12699 = vst [vmem:[#allocation4_spill] sm:$0xff] %v10743_v44  ;;  %7747 = vmatmul.mubr.msk.bf16.gmra.mrb[160].mxu1 %vm239_vm3, %v3096_v35  ;;  %7893 = vmatmul.mubr.msk.bf16.gmra.mrb[160].mxu0 %vm239_vm3, %v3722_v17  ;;  %v3723_v35 = vpack.c.bf16 %v3663_v59, %v3662_v12  ;;  %v12704_v12 = vld [vmem:[#allocation8_spill] sm:$0xff] }
 0x349   :  { %7750 = vmatprep.mubr.msk.bf16.mxu1 %vm8304_vm2, %v12619_v1  ;;  %7896 = vmatprep.mubr.msk.bf16.mxu0 %vm8304_vm2, %v12619_v1 }
 0x34b   :  { %v2200_v53 = vpop.f32.mrb[56].mxu1  ;;  %v2820_v37 = vpop.f32.mrb[56].mxu0 }
 0x34c   :  { %v2356_v27 = vadd.f32 %v2200_v53, %v12700_v62  ;;  %v7492_v52 = vpop.f32.mrb[57].mxu1  ;;  %v7638_v38 = vpop.f32.mrb[57].mxu0  ;;  %v10764_v17 = vadd.f32 %v2820_v37, %v2354_v7  ;;  %v6333_v53 = vld [vmem:[%s12594_s0 + $0x591] sm:$0xff]  ;;  %v3664_v7 = vld [vmem:[%s12594_s0 + $0xe1] sm:$0xff] }
 0x34d   :  { %v2203_v33 = vpop.f32.mrb[58].mxu1  ;;  %v2823_v40 = vpop.f32.mrb[58].mxu0 }
 0x34e   :  { %12701 = vst [vmem:[#allocation5_spill] sm:$0xff] %v10764_v17  ;;  %v2357_v22 = vadd.f32 %v2203_v33, %v12702_v15  ;;  %v7639_v51 = vpop.f32.mrb[59].mxu0  ;;  %v7493_v44 = vpop.f32.mrb[59].mxu1  ;;  %v10767_v11 = vadd.f32 %v2823_v40, %v2355_v26  ;;  %v3665_v26 = vld [vmem:[%s12594_s0 + $0xe9] sm:$0xff]  ;;  %v12706_v40 = vld [vmem:[#allocation9_spill] sm:$0xff] }
 0x34f   :  { %v6334_v44 = vld [vmem:[%s12594_s0 + $0x599] sm:$0xff]  ;;  %v3724_v38 = vpack.c.bf16 %v3665_v26, %v3664_v7 }
 0x350   :  { %12703 = vst [vmem:[#allocation6_spill] sm:$0xff] %v10767_v11  ;;  %7751 = vmatmul.mubr.msk.bf16.gmra.mrb[164].mxu1 %vm239_vm3, %v3097_v63  ;;  %7897 = vmatmul.mubr.msk.bf16.gmra.mrb[164].mxu0 %vm239_vm3, %v3723_v35  ;;  %v3098_v52 = vpack.c.bf16 %v6334_v44, %v6333_v53  ;;  %v12708_v7 = vld [vmem:[#allocation10_spill] sm:$0xff] }
 0x351   :  { %7754 = vmatprep.mubr.msk.bf16.mxu1 %vm8304_vm2, %v12619_v1  ;;  %7900 = vmatprep.mubr.msk.bf16.mxu0 %vm8304_vm2, %v12619_v1 }
 0x353   :  { %v2208_v45 = vpop.f32.mrb[60].mxu1  ;;  %v2828_v29 = vpop.f32.mrb[60].mxu0 }
 0x354   :  { %v2358_v59 = vadd.f32 %v2208_v45, %v12704_v12  ;;  %v7496_v37 = vpop.f32.mrb[61].mxu1  ;;  %v7642_v62 = vpop.f32.mrb[61].mxu0  ;;  %v10788_v63 = vadd.f32 %v2828_v29, %v2356_v27  ;;  %v6335_v45 = vld [vmem:[%s12594_s0 + $0x5a1] sm:$0xff]  ;;  %v3666_v27 = vld [vmem:[%s12594_s0 + $0xf1] sm:$0xff] }
 0x355   :  { %v2211_v35 = vpop.f32.mrb[62].mxu1  ;;  %v2831_v33 = vpop.f32.mrb[62].mxu0 }
 0x356   :  { %12705 = vst [vmem:[#allocation7_spill] sm:$0xff] %v10788_v63  ;;  %v2359_v15 = vadd.f32 %v2211_v35, %v12706_v40  ;;  %v7643_v51 = vpop.f32.mrb[63].mxu0  ;;  %v7497_v11 = vpop.f32.mrb[63].mxu1  ;;  %v10791_v17 = vadd.f32 %v2831_v33, %v2357_v22  ;;  %v3667_v22 = vld [vmem:[%s12594_s0 + $0xf9] sm:$0xff]  ;;  %v12710_v33 = vld [vmem:[#allocation11_spill] sm:$0xff] }
 0x357   :  { %v6336_v11 = vld [vmem:[%s12594_s0 + $0x5a9] sm:$0xff]  ;;  %v3725_v62 = vpack.c.bf16 %v3667_v22, %v3666_v27 }
 0x358   :  { %12707 = vst [vmem:[#allocation8_spill] sm:$0xff] %v10791_v17  ;;  %7755 = vmatmul.mubr.msk.bf16.gmra.mrb[168].mxu1 %vm239_vm3, %v3098_v52  ;;  %7901 = vmatmul.mubr.msk.bf16.gmra.mrb[168].mxu0 %vm239_vm3, %v3724_v38  ;;  %v3099_v37 = vpack.c.bf16 %v6336_v11, %v6335_v45  ;;  %v12712_v27 = vld [vmem:[#allocation12_spill] sm:$0xff] }
 0x359   :  { %7758 = vmatprep.mubr.msk.bf16.mxu1 %vm8304_vm2, %v12619_v1  ;;  %7904 = vmatprep.mubr.msk.bf16.mxu0 %vm8304_vm2, %v12619_v1 }
 0x35b   :  { %v2216_v53 = vpop.f32.mrb[64].mxu1  ;;  %v2836_v44 = vpop.f32.mrb[64].mxu0 }
 0x35c   :  { %v2360_v26 = vadd.f32 %v2216_v53, %v12708_v7  ;;  %v7500_v29 = vpop.f32.mrb[65].mxu1  ;;  %v7646_v12 = vpop.f32.mrb[65].mxu0  ;;  %v10812_v52 = vadd.f32 %v2836_v44, %v2358_v59  ;;  %v6337_v53 = vld [vmem:[%s12594_s0 + $0x5b1] sm:$0xff]  ;;  %v3668_v59 = vld [vmem:[%s12594_s0 + $0x101] sm:$0xff] }
 0x35d   :  { %v2219_v38 = vpop.f32.mrb[66].mxu1  ;;  %v2839_v35 = vpop.f32.mrb[66].mxu0 }
 0x35e   :  { %12709 = vst [vmem:[#allocation9_spill] sm:$0xff] %v10812_v52  ;;  %v2361_v40 = vadd.f32 %v2219_v38, %v12710_v33  ;;  %v7647_v51 = vpop.f32.mrb[67].mxu0  ;;  %v7501_v17 = vpop.f32.mrb[67].mxu1  ;;  %v10815_v63 = vadd.f32 %v2839_v35, %v2359_v15  ;;  %v3669_v15 = vld [vmem:[%s12594_s0 + $0x109] sm:$0xff]  ;;  %v12714_v35 = vld [vmem:[#allocation13_spill] sm:$0xff] }
 0x35f   :  { %v6338_v17 = vld [vmem:[%s12594_s0 + $0x5b9] sm:$0xff]  ;;  %v3726_v12 = vpack.c.bf16 %v3669_v15, %v3668_v59 }
 0x360   :  { %12711 = vst [vmem:[#allocation10_spill] sm:$0xff] %v10815_v63  ;;  %7759 = vmatmul.mubr.msk.bf16.gmra.mrb[172].mxu1 %vm239_vm3, %v3099_v37  ;;  %7905 = vmatmul.mubr.msk.bf16.gmra.mrb[172].mxu0 %vm239_vm3, %v3725_v62  ;;  %v3100_v29 = vpack.c.bf16 %v6338_v17, %v6337_v53  ;;  %v12716_v59 = vld [vmem:[#allocation14_spill] sm:$0xff] }
 0x361   :  { %7762 = vmatprep.mubr.msk.bf16.mxu1 %vm8304_vm2, %v12619_v1  ;;  %7908 = vmatprep.mubr.msk.bf16.mxu0 %vm8304_vm2, %v12619_v1 }
 0x363   :  { %v2224_v45 = vpop.f32.mrb[68].mxu1  ;;  %v2844_v11 = vpop.f32.mrb[68].mxu0 }
 0x364   :  { %v2362_v22 = vadd.f32 %v2224_v45, %v12712_v27  ;;  %v7504_v44 = vpop.f32.mrb[69].mxu1  ;;  %v7650_v7 = vpop.f32.mrb[69].mxu0  ;;  %v10836_v37 = vadd.f32 %v2844_v11, %v2360_v26  ;;  %v6339_v45 = vld [vmem:[%s12594_s0 + $0x5c1] sm:$0xff]  ;;  %v3670_v26 = vld [vmem:[%s12594_s0 + $0x111] sm:$0xff] }
 0x365   :  { %v2227_v62 = vpop.f32.mrb[70].mxu1  ;;  %v2847_v38 = vpop.f32.mrb[70].mxu0 }
 0x366   :  { %12713 = vst [vmem:[#allocation11_spill] sm:$0xff] %v10836_v37  ;;  %v2363_v33 = vadd.f32 %v2227_v62, %v12714_v35  ;;  %v7651_v51 = vpop.f32.mrb[71].mxu0  ;;  %v7505_v63 = vpop.f32.mrb[71].mxu1  ;;  %v10839_v52 = vadd.f32 %v2847_v38, %v2361_v40  ;;  %v3671_v40 = vld [vmem:[%s12594_s0 + $0x119] sm:$0xff]  ;;  %v12718_v38 = vld [vmem:[#allocation15_spill] sm:$0xff] }
 0x367   :  { %v6340_v63 = vld [vmem:[%s12594_s0 + $0x5c9] sm:$0xff]  ;;  %v3727_v7 = vpack.c.bf16 %v3671_v40, %v3670_v26 }
 0x368   :  { %12715 = vst [vmem:[#allocation12_spill] sm:$0xff] %v10839_v52  ;;  %7763 = vmatmul.mubr.msk.bf16.gmra.mrb[176].mxu1 %vm239_vm3, %v3100_v29  ;;  %7909 = vmatmul.mubr.msk.bf16.gmra.mrb[176].mxu0 %vm239_vm3, %v3726_v12  ;;  %v3101_v44 = vpack.c.bf16 %v6340_v63, %v6339_v45  ;;  %v12720_v26 = vld [vmem:[#allocation16_spill] sm:$0xff] }
 0x369   :  { %7766 = vmatprep.mubr.msk.bf16.mxu1 %vm8304_vm2, %v12619_v1  ;;  %7912 = vmatprep.mubr.msk.bf16.mxu0 %vm8304_vm2, %v12619_v1 }
 0x36b   :  { %v2232_v53 = vpop.f32.mrb[72].mxu1  ;;  %v2852_v17 = vpop.f32.mrb[72].mxu0 }
 0x36c   :  { %v2364_v15 = vadd.f32 %v2232_v53, %v12716_v59  ;;  %v7508_v11 = vpop.f32.mrb[73].mxu1  ;;  %v7654_v27 = vpop.f32.mrb[73].mxu0  ;;  %v10860_v29 = vadd.f32 %v2852_v17, %v2362_v22  ;;  %v6341_v53 = vld [vmem:[%s12594_s0 + $0x5d1] sm:$0xff]  ;;  %v3672_v22 = vld [vmem:[%s12594_s0 + $0x121] sm:$0xff] }
 0x36d   :  { %v2235_v12 = vpop.f32.mrb[74].mxu1  ;;  %v2855_v62 = vpop.f32.mrb[74].mxu0 }
 0x36e   :  { %12717 = vst [vmem:[#allocation13_spill] sm:$0xff] %v10860_v29  ;;  %v2365_v35 = vadd.f32 %v2235_v12, %v12718_v38  ;;  %v7655_v51 = vpop.f32.mrb[75].mxu0  ;;  %v7509_v52 = vpop.f32.mrb[75].mxu1  ;;  %v10863_v37 = vadd.f32 %v2855_v62, %v2363_v33  ;;  %v3673_v33 = vld [vmem:[%s12594_s0 + $0x129] sm:$0xff]  ;;  %v12722_v62 = vld [vmem:[#allocation17_spill] sm:$0xff] }
 0x36f   :  { %v6342_v52 = vld [vmem:[%s12594_s0 + $0x5d9] sm:$0xff]  ;;  %v3728_v27 = vpack.c.bf16 %v3673_v33, %v3672_v22 }
 0x370   :  { %12719 = vst [vmem:[#allocation14_spill] sm:$0xff] %v10863_v37  ;;  %7767 = vmatmul.mubr.msk.bf16.gmra.mrb[180].mxu1 %vm239_vm3, %v3101_v44  ;;  %7913 = vmatmul.mubr.msk.bf16.gmra.mrb[180].mxu0 %vm239_vm3, %v3727_v7  ;;  %v3102_v11 = vpack.c.bf16 %v6342_v52, %v6341_v53  ;;  %v12724_v22 = vld [vmem:[#allocation18_spill] sm:$0xff] }
 0x371   :  { %7770 = vmatprep.mubr.msk.bf16.mxu1 %vm8304_vm2, %v12619_v1  ;;  %7916 = vmatprep.mubr.msk.bf16.mxu0 %vm8304_vm2, %v12619_v1 }
 0x373   :  { %v2240_v45 = vpop.f32.mrb[76].mxu1  ;;  %v2860_v63 = vpop.f32.mrb[76].mxu0 }
 0x374   :  { %v2366_v40 = vadd.f32 %v2240_v45, %v12720_v26  ;;  %v7512_v17 = vpop.f32.mrb[77].mxu1  ;;  %v7658_v59 = vpop.f32.mrb[77].mxu0  ;;  %v10884_v44 = vadd.f32 %v2860_v63, %v2364_v15  ;;  %v6343_v45 = vld [vmem:[%s12594_s0 + $0x5e1] sm:$0xff]  ;;  %v3674_v15 = vld [vmem:[%s12594_s0 + $0x131] sm:$0xff] }
 0x375   :  { %v2243_v7 = vpop.f32.mrb[78].mxu1  ;;  %v2863_v12 = vpop.f32.mrb[78].mxu0 }
 0x376   :  { %12721 = vst [vmem:[#allocation15_spill] sm:$0xff] %v10884_v44  ;;  %v2367_v38 = vadd.f32 %v2243_v7, %v12722_v62  ;;  %v7659_v51 = vpop.f32.mrb[79].mxu0  ;;  %v7513_v37 = vpop.f32.mrb[79].mxu1  ;;  %v10887_v29 = vadd.f32 %v2863_v12, %v2365_v35  ;;  %v3675_v35 = vld [vmem:[%s12594_s0 + $0x139] sm:$0xff]  ;;  %v12726_v12 = vld [vmem:[#allocation19_spill] sm:$0xff] }
 0x377   :  { %v6344_v37 = vld [vmem:[%s12594_s0 + $0x5e9] sm:$0xff]  ;;  %v3729_v59 = vpack.c.bf16 %v3675_v35, %v3674_v15 }
 0x378   :  { %12723 = vst [vmem:[#allocation16_spill] sm:$0xff] %v10887_v29  ;;  %7771 = vmatmul.mubr.msk.bf16.gmra.mrb[184].mxu1 %vm239_vm3, %v3102_v11  ;;  %7917 = vmatmul.mubr.msk.bf16.gmra.mrb[184].mxu0 %vm239_vm3, %v3728_v27  ;;  %v3103_v17 = vpack.c.bf16 %v6344_v37, %v6343_v45  ;;  %v12728_v15 = vld [vmem:[#allocation20_spill] sm:$0xff] }
 0x379   :  { %7774 = vmatprep.mubr.msk.bf16.mxu1 %vm8304_vm2, %v12619_v1  ;;  %7920 = vmatprep.mubr.msk.bf16.mxu0 %vm8304_vm2, %v12619_v1 }
 0x37b   :  { %v2248_v53 = vpop.f32.mrb[80].mxu1  ;;  %v2868_v52 = vpop.f32.mrb[80].mxu0 }
 0x37c   :  { %v2368_v33 = vadd.f32 %v2248_v53, %v12724_v22  ;;  %v7516_v63 = vpop.f32.mrb[81].mxu1  ;;  %v7662_v26 = vpop.f32.mrb[81].mxu0  ;;  %v10908_v11 = vadd.f32 %v2868_v52, %v2366_v40  ;;  %v6345_v53 = vld [vmem:[%s12594_s0 + $0x5f1] sm:$0xff]  ;;  %v3676_v40 = vld [vmem:[%s12594_s0 + $0x141] sm:$0xff] }
 0x37d   :  { %v2251_v27 = vpop.f32.mrb[82].mxu1  ;;  %v2871_v7 = vpop.f32.mrb[82].mxu0 }
 0x37e   :  { %12725 = vst [vmem:[#allocation17_spill] sm:$0xff] %v10908_v11  ;;  %v2369_v62 = vadd.f32 %v2251_v27, %v12726_v12  ;;  %v7663_v51 = vpop.f32.mrb[83].mxu0  ;;  %v7517_v29 = vpop.f32.mrb[83].mxu1  ;;  %v10911_v44 = vadd.f32 %v2871_v7, %v2367_v38  ;;  %v3677_v38 = vld [vmem:[%s12594_s0 + $0x149] sm:$0xff]  ;;  %v12730_v7 = vld [vmem:[#allocation21_spill] sm:$0xff] }
 0x37f   :  { %v6346_v29 = vld [vmem:[%s12594_s0 + $0x5f9] sm:$0xff]  ;;  %v3730_v26 = vpack.c.bf16 %v3677_v38, %v3676_v40 }
 0x380   :  { %12727 = vst [vmem:[#allocation18_spill] sm:$0xff] %v10911_v44  ;;  %7775 = vmatmul.mubr.msk.bf16.gmra.mrb[188].mxu1 %vm239_vm3, %v3103_v17  ;;  %7921 = vmatmul.mubr.msk.bf16.gmra.mrb[188].mxu0 %vm239_vm3, %v3729_v59  ;;  %v3104_v63 = vpack.c.bf16 %v6346_v29, %v6345_v53  ;;  %v12732_v40 = vld [vmem:[#allocation22_spill] sm:$0xff] }
 0x381   :  { %7778 = vmatprep.mubr.msk.bf16.mxu1 %vm8304_vm2, %v12619_v1  ;;  %7924 = vmatprep.mubr.msk.bf16.mxu0 %vm8304_vm2, %v12619_v1 }
 0x383   :  { %v2256_v45 = vpop.f32.mrb[84].mxu1  ;;  %v2876_v37 = vpop.f32.mrb[84].mxu0 }
 0x384   :  { %v2370_v35 = vadd.f32 %v2256_v45, %v12728_v15  ;;  %v7520_v52 = vpop.f32.mrb[85].mxu1  ;;  %v7666_v22 = vpop.f32.mrb[85].mxu0  ;;  %v10932_v17 = vadd.f32 %v2876_v37, %v2368_v33  ;;  %v6347_v45 = vld [vmem:[%s12594_s0 + $0x601] sm:$0xff]  ;;  %v3678_v33 = vld [vmem:[%s12594_s0 + $0x151] sm:$0xff] }
 0x385   :  { %v2259_v59 = vpop.f32.mrb[86].mxu1  ;;  %v2879_v27 = vpop.f32.mrb[86].mxu0 }
 0x386   :  { %12729 = vst [vmem:[#allocation19_spill] sm:$0xff] %v10932_v17  ;;  %v2371_v12 = vadd.f32 %v2259_v59, %v12730_v7  ;;  %v7667_v51 = vpop.f32.mrb[87].mxu0  ;;  %v7521_v44 = vpop.f32.mrb[87].mxu1  ;;  %v10935_v11 = vadd.f32 %v2879_v27, %v2369_v62  ;;  %v3679_v62 = vld [vmem:[%s12594_s0 + $0x159] sm:$0xff]  ;;  %v12734_v27 = vld [vmem:[#allocation23_spill] sm:$0xff] }
 0x387   :  { %v6348_v44 = vld [vmem:[%s12594_s0 + $0x609] sm:$0xff]  ;;  %v3731_v22 = vpack.c.bf16 %v3679_v62, %v3678_v33 }
 0x388   :  { %12731 = vst [vmem:[#allocation20_spill] sm:$0xff] %v10935_v11  ;;  %7779 = vmatmul.mubr.msk.bf16.gmra.mrb[192].mxu1 %vm239_vm3, %v3104_v63  ;;  %7925 = vmatmul.mubr.msk.bf16.gmra.mrb[192].mxu0 %vm239_vm3, %v3730_v26  ;;  %v3105_v52 = vpack.c.bf16 %v6348_v44, %v6347_v45  ;;  %v12736_v33 = vld [vmem:[#allocation24_spill] sm:$0xff] }
 0x389   :  { %7782 = vmatprep.mubr.msk.bf16.mxu1 %vm8304_vm2, %v12619_v1  ;;  %7928 = vmatprep.mubr.msk.bf16.mxu0 %vm8304_vm2, %v12619_v1 }
 0x38b   :  { %v2264_v53 = vpop.f32.mrb[88].mxu1  ;;  %v2884_v29 = vpop.f32.mrb[88].mxu0 }
 0x38c   :  { %v2372_v38 = vadd.f32 %v2264_v53, %v12732_v40  ;;  %v7524_v37 = vpop.f32.mrb[89].mxu1  ;;  %v7670_v15 = vpop.f32.mrb[89].mxu0  ;;  %v10956_v63 = vadd.f32 %v2884_v29, %v2370_v35  ;;  %v6349_v53 = vld [vmem:[%s12594_s0 + $0x611] sm:$0xff]  ;;  %v3680_v35 = vld [vmem:[%s12594_s0 + $0x161] sm:$0xff] }
 0x38d   :  { %v2267_v26 = vpop.f32.mrb[90].mxu1  ;;  %v2887_v59 = vpop.f32.mrb[90].mxu0 }
 0x38e   :  { %12733 = vst [vmem:[#allocation21_spill] sm:$0xff] %v10956_v63  ;;  %v2373_v7 = vadd.f32 %v2267_v26, %v12734_v27  ;;  %v7671_v51 = vpop.f32.mrb[91].mxu0  ;;  %v7525_v11 = vpop.f32.mrb[91].mxu1  ;;  %v10959_v17 = vadd.f32 %v2887_v59, %v2371_v12  ;;  %v3681_v12 = vld [vmem:[%s12594_s0 + $0x169] sm:$0xff]  ;;  %v12738_v59 = vld [vmem:[#allocation25_spill] sm:$0xff] }
 0x38f   :  { %v6350_v11 = vld [vmem:[%s12594_s0 + $0x619] sm:$0xff]  ;;  %v3732_v15 = vpack.c.bf16 %v3681_v12, %v3680_v35 }
 0x390   :  { %12735 = vst [vmem:[#allocation22_spill] sm:$0xff] %v10959_v17  ;;  %7783 = vmatmul.mubr.msk.bf16.gmra.mrb[196].mxu1 %vm239_vm3, %v3105_v52  ;;  %7929 = vmatmul.mubr.msk.bf16.gmra.mrb[196].mxu0 %vm239_vm3, %v3731_v22  ;;  %v3106_v37 = vpack.c.bf16 %v6350_v11, %v6349_v53  ;;  %v12740_v35 = vld [vmem:[#allocation26_spill] sm:$0xff] }
 0x391   :  { %7786 = vmatprep.mubr.msk.bf16.mxu1 %vm8304_vm2, %v12619_v1  ;;  %7932 = vmatprep.mubr.msk.bf16.mxu0 %vm8304_vm2, %v12619_v1 }
 0x393   :  { %v2272_v45 = vpop.f32.mrb[92].mxu1  ;;  %v2892_v44 = vpop.f32.mrb[92].mxu0 }
 0x394   :  { %v2374_v62 = vadd.f32 %v2272_v45, %v12736_v33  ;;  %v7528_v29 = vpop.f32.mrb[93].mxu1  ;;  %v7674_v40 = vpop.f32.mrb[93].mxu0  ;;  %v10980_v52 = vadd.f32 %v2892_v44, %v2372_v38  ;;  %v6351_v45 = vld [vmem:[%s12594_s0 + $0x621] sm:$0xff]  ;;  %v3682_v38 = vld [vmem:[%s12594_s0 + $0x171] sm:$0xff] }
 0x395   :  { %v2275_v22 = vpop.f32.mrb[94].mxu1  ;;  %v2895_v26 = vpop.f32.mrb[94].mxu0 }
 0x396   :  { %12737 = vst [vmem:[#allocation23_spill] sm:$0xff] %v10980_v52  ;;  %v2375_v27 = vadd.f32 %v2275_v22, %v12738_v59  ;;  %v7675_v51 = vpop.f32.mrb[95].mxu0  ;;  %v7529_v17 = vpop.f32.mrb[95].mxu1  ;;  %v10983_v63 = vadd.f32 %v2895_v26, %v2373_v7  ;;  %v3683_v7 = vld [vmem:[%s12594_s0 + $0x179] sm:$0xff]  ;;  %v12741_v26 = vld [vmem:[#allocation27_spill] sm:$0xff] }
 0x397   :  { %v6352_v17 = vld [vmem:[%s12594_s0 + $0x629] sm:$0xff]  ;;  %v3733_v40 = vpack.c.bf16 %v3683_v7, %v3682_v38 }
 0x398   :  { %12739 = vst [vmem:[#allocation24_spill] sm:$0xff] %v10983_v63  ;;  %7787 = vmatmul.mubr.msk.bf16.gmra.mrb[200].mxu1 %vm239_vm3, %v3106_v37  ;;  %7933 = vmatmul.mubr.msk.bf16.gmra.mrb[200].mxu0 %vm239_vm3, %v3732_v15  ;;  %v3107_v29 = vpack.c.bf16 %v6352_v17, %v6351_v45 }
 0x399   :  { %7790 = vmatprep.mubr.msk.bf16.mxu1 %vm8304_vm2, %v12619_v1  ;;  %7936 = vmatprep.mubr.msk.bf16.mxu0 %vm8304_vm2, %v12619_v1 }
 0x39b   :  { %v2280_v53 = vpop.f32.mrb[96].mxu1  ;;  %v2900_v11 = vpop.f32.mrb[96].mxu0 }
 0x39c   :  { %v2376_v12 = vadd.f32 %v2280_v53, %v12740_v35  ;;  %v7532_v44 = vpop.f32.mrb[97].mxu1  ;;  %v7678_v33 = vpop.f32.mrb[97].mxu0  ;;  %v11004_v37 = vadd.f32 %v2900_v11, %v2374_v62  ;;  %v6353_v53 = vld [vmem:[%s12594_s0 + $0x631] sm:$0xff]  ;;  %v3684_v62 = vld [vmem:[%s12594_s0 + $0x181] sm:$0xff] }
 0x39d   :  { %v2283_v15 = vpop.f32.mrb[98].mxu1  ;;  %v2903_v22 = vpop.f32.mrb[98].mxu0 }
 0x39e   :  { %v2377_v59 = vadd.f32 %v2283_v15, %v12741_v26  ;;  %v7679_v51 = vpop.f32.mrb[99].mxu0  ;;  %v7533_v63 = vpop.f32.mrb[99].mxu1  ;;  %v11007_v52 = vadd.f32 %v2903_v22, %v2375_v27  ;;  %v3685_v27 = vld [vmem:[%s12594_s0 + $0x189] sm:$0xff] }
 0x39f   :  { %v6354_v63 = vld [vmem:[%s12594_s0 + $0x639] sm:$0xff]  ;;  %v3734_v44 = vpack.c.bf16 %v3685_v27, %v3684_v62 }
 0x3a0   :  { %7791 = vmatmul.mubr.msk.bf16.gmra.mrb[204].mxu1 %vm239_vm3, %v3107_v29  ;;  %7937 = vmatmul.mubr.msk.bf16.gmra.mrb[204].mxu0 %vm239_vm3, %v3733_v40  ;;  %v3108_v35 = vpack.c.bf16 %v6354_v63, %v6353_v53 }
 0x3a1   :  { %7794 = vmatprep.mubr.msk.bf16.mxu1 %vm8304_vm2, %v12619_v1  ;;  %7940 = vmatprep.mubr.msk.bf16.mxu0 %vm8304_vm2, %v12619_v1 }
 0x3a3   :  { %v2288_v45 = vpop.f32.mrb[100].mxu1  ;;  %v2908_v17 = vpop.f32.mrb[100].mxu0 }
 0x3a4   :  { %v2378_v38 = vadd.f32 %v2288_v45, %v10165_v21  ;;  %v7536_v7 = vpop.f32.mrb[101].mxu1  ;;  %v7682_v11 = vpop.f32.mrb[101].mxu0  ;;  %v11028_v33 = vadd.f32 %v2908_v17, %v2376_v12  ;;  %v6355_v21 = vld [vmem:[%s12594_s0 + $0x641] sm:$0xff]  ;;  %v3686_v12 = vld [vmem:[%s12594_s0 + $0x191] sm:$0xff] }
 0x3a5   :  { %v2291_v29 = vpop.f32.mrb[102].mxu1  ;;  %v2911_v40 = vpop.f32.mrb[102].mxu0 }
 0x3a6   :  { %v2379_v15 = vadd.f32 %v2291_v29, %v10168_v30  ;;  %v7683_v22 = vpop.f32.mrb[103].mxu0  ;;  %v7537_v26 = vpop.f32.mrb[103].mxu1  ;;  %v11031_v51 = vadd.f32 %v2911_v40, %v2377_v59  ;;  %v6356_v30 = vld [vmem:[%s12594_s0 + $0x649] sm:$0xff]  ;;  %v3687_v59 = vld [vmem:[%s12594_s0 + $0x199] sm:$0xff] }
 0x3a7   :  { %v3109_v17 = vpack.c.bf16 %v6356_v30, %v6355_v21  ;;  %v3735_v7 = vpack.c.bf16 %v3687_v59, %v3686_v12  ;;  %v12742_v12 = vld [vmem:[#allocation28_spill] sm:$0xff] }
 0x3a8   :  { %7795 = vmatmul.mubr.msk.bf16.gmra.mrb[208].mxu1 %vm239_vm3, %v3108_v35  ;;  %7941 = vmatmul.mubr.msk.bf16.gmra.mrb[208].mxu0 %vm239_vm3, %v3734_v44 }
 0x3a9   :  { %7798 = vmatprep.mubr.msk.bf16.mxu1 %vm8304_vm2, %v12619_v1  ;;  %7944 = vmatprep.mubr.msk.bf16.mxu0 %vm8304_vm2, %v12619_v1 }
 0x3ab   :  { %v2296_v53 = vpop.f32.mrb[104].mxu1  ;;  %v2916_v63 = vpop.f32.mrb[104].mxu0 }
 0x3ac   :  { %v2380_v62 = vadd.f32 %v2296_v53, %v10189_v23  ;;  %v7540_v27 = vpop.f32.mrb[105].mxu1  ;;  %v7686_v45 = vpop.f32.mrb[105].mxu0  ;;  %v11052_v11 = vadd.f32 %v2916_v63, %v2378_v38  ;;  %v6357_v23 = vld [vmem:[%s12594_s0 + $0x651] sm:$0xff]  ;;  %v3688_v38 = vld [vmem:[%s12594_s0 + $0x1a1] sm:$0xff] }
 0x3ad   :  { %v2299_v35 = vpop.f32.mrb[106].mxu1  ;;  %v2919_v44 = vpop.f32.mrb[106].mxu0 }
 0x3ae   :  { %v2381_v29 = vadd.f32 %v2299_v35, %v10191_v48  ;;  %v7687_v40 = vpop.f32.mrb[107].mxu0  ;;  %v7541_v22 = vpop.f32.mrb[107].mxu1  ;;  %v11055_v26 = vadd.f32 %v2919_v44, %v2379_v15  ;;  %v6358_v48 = vld [vmem:[%s12594_s0 + $0x659] sm:$0xff]  ;;  %v3689_v15 = vld [vmem:[%s12594_s0 + $0x1a9] sm:$0xff] }
 0x3af   :  { %v3110_v27 = vpack.c.bf16 %v6358_v48, %v6357_v23  ;;  %v3736_v45 = vpack.c.bf16 %v3689_v15, %v3688_v38  ;;  %v3691_v23 = vld [vmem:[%s12594_s0 + $0x1b9] sm:$0xff] }
 0x3b0   :  { %7799 = vmatmul.mubr.msk.bf16.gmra.mrb[212].mxu1 %vm239_vm3, %v3109_v17  ;;  %7945 = vmatmul.mubr.msk.bf16.gmra.mrb[212].mxu0 %vm239_vm3, %v3735_v7 }
 0x3b1   :  { %7802 = vmatprep.mubr.msk.bf16.mxu1 %vm8304_vm2, %v12619_v1  ;;  %7948 = vmatprep.mubr.msk.bf16.mxu0 %vm8304_vm2, %v12619_v1 }
 0x3b3   :  { %v2304_v21 = vpop.f32.mrb[108].mxu1  ;;  %v2924_v30 = vpop.f32.mrb[108].mxu0 }
 0x3b4   :  { %v2382_v59 = vadd.f32 %v2304_v21, %v12742_v12  ;;  %v7690_v53 = vpop.f32.mrb[109].mxu0  ;;  %v7544_v63 = vpop.f32.mrb[109].mxu1  ;;  %v11076_v17 = vadd.f32 %v2924_v30, %v2380_v62  ;;  %v6359_v21 = vld [vmem:[%s12594_s0 + $0x661] sm:$0xff]  ;;  %v6360_v62 = vld [vmem:[%s12594_s0 + $0x669] sm:$0xff] }
 0x3b5   :  { %v2927_v7 = vpop.f32.mrb[110].mxu0  ;;  %v2307_v35 = vpop.f32.mrb[110].mxu1  ;;  %v3111_v53 = vpack.c.bf16 %v6360_v62, %v6359_v21  ;;  %v3693_v21 = vld [vmem:[%s12594_s0 + $0x1c9] sm:$0xff] }
 0x3b6   :  { %v7691_v44 = vpop.f32.mrb[111].mxu0  ;;  %v7545_v40 = vpop.f32.mrb[111].mxu1  ;;  %v11078_v22 = vadd.f32 %v2927_v7, %v2381_v29  ;;  %v3690_v29 = vld [vmem:[%s12594_s0 + $0x1b1] sm:$0xff] }
 0x3b7   :  { %v3737_v63 = vpack.c.bf16 %v3691_v23, %v3690_v29 }
 0x3b8   :  { %7803 = vmatmul.mubr.msk.bf16.gmra.mrb[216].mxu1 %vm239_vm3, %v3110_v27  ;;  %7949 = vmatmul.mubr.msk.bf16.gmra.mrb[216].mxu0 %vm239_vm3, %v3736_v45 }
 0x3b9   :  { %7806 = vmatprep.mubr.msk.bf16.mxu1 %vm8304_vm2, %v12619_v1  ;;  %7952 = vmatprep.mubr.msk.bf16.mxu0 %vm8304_vm2, %v12619_v1 }
 0x3bb   :  { %v2932_v48 = vpop.f32.mrb[112].mxu0  ;;  %v3271_v38 = vpop.f32.mrb[112].mxu1 }
 0x3bc   :  { %v3565_v15 = vadd.f32 %v3271_v38, %v10234_v4  ;;  %v7694_v30 = vpop.f32.mrb[113].mxu0  ;;  %v7700_v12 = vpop.f32.mrb[113].mxu1  ;;  %v11099_v27 = vadd.f32 %v2932_v48, %v2382_v59  ;;  %v6361_v4 = vld [vmem:[%s12594_s0 + $0x671] sm:$0xff]  ;;  %v3692_v59 = vld [vmem:[%s12594_s0 + $0x1c1] sm:$0xff] }
 0x3bd   :  { %v2935_v45 = vpop.f32.mrb[114].mxu0  ;;  %v3274_v7 = vpop.f32.mrb[114].mxu1  ;;  %v3738_v12 = vpack.c.bf16 %v3693_v21, %v3692_v59 }
 0x3be   :  { %12743 = vst [vmem:[#allocation25_spill] sm:$0xff] %v11099_v27  ;;  %v3566_v35 = vadd.f32 %v3274_v7, %v10237_v9  ;;  %v7695_v44 = vpop.f32.mrb[115].mxu0  ;;  %v7701_v40 = vpop.f32.mrb[115].mxu1  ;;  %v6362_v9 = vld [vmem:[%s12594_s0 + $0x679] sm:$0xff] }
 0x3bf   :  { %v3112_v30 = vpack.c.bf16 %v6362_v9, %v6361_v4 }
 0x3c0   :  { %7807 = vmatmul.mubr.msk.bf16.gmra.mrb[220].mxu1 %vm239_vm3, %v3111_v53  ;;  %7953 = vmatmul.mubr.msk.bf16.gmra.mrb[220].mxu0 %vm239_vm3, %v3737_v63 }
 0x3c1   :  { %7810 = vmatprep.mubr.msk.bf16.mxu1 %vm8304_vm2, %v12619_v1  ;;  %7956 = vmatprep.mubr.msk.bf16.mxu0 %vm8304_vm2, %v12619_v1 }
 0x3c3   :  { %v3279_v62 = vpop.f32.mrb[116].mxu1  ;;  %v3898_v29 = vpop.f32.mrb[116].mxu0 }
 0x3c4   :  { %v3567_v23 = vadd.f32 %v3279_v62, %v10258_v54  ;;  %v7704_v48 = vpop.f32.mrb[117].mxu1  ;;  %v7850_v38 = vpop.f32.mrb[117].mxu0  ;;  %v11121_v53 = vadd.f32 %v3898_v29, %v3565_v15  ;;  %v6363_v54 = vld [vmem:[%s12594_s0 + $0x681] sm:$0xff]  ;;  %v3694_v15 = vld [vmem:[%s12594_s0 + $0x1d1] sm:$0xff] }
 0x3c5   :  { %v3282_v63 = vpop.f32.mrb[118].mxu1  ;;  %v3901_v45 = vpop.f32.mrb[118].mxu0 }
 0x3c6   :  { %v3568_v7 = vadd.f32 %v3282_v63, %v10261_v3  ;;  %v7851_v44 = vpop.f32.mrb[119].mxu0  ;;  %v7705_v40 = vpop.f32.mrb[119].mxu1  ;;  %v11124_v27 = vadd.f32 %v3901_v45, %v3566_v35  ;;  %v6364_v3 = vld [vmem:[%s12594_s0 + $0x689] sm:$0xff]  ;;  %v3695_v35 = vld [vmem:[%s12594_s0 + $0x1d9] sm:$0xff] }
 0x3c7   :  { %v3113_v29 = vpack.c.bf16 %v6364_v3, %v6363_v54  ;;  %v3739_v48 = vpack.c.bf16 %v3695_v35, %v3694_v15 }
 0x3c8   :  { %7811 = vmatmul.mubr.msk.bf16.gmra.mrb[224].mxu1 %vm239_vm3, %v3112_v30  ;;  %7957 = vmatmul.mubr.msk.bf16.gmra.mrb[224].mxu0 %vm239_vm3, %v3738_v12 }
 0x3c9   :  { %7814 = vmatprep.mubr.msk.bf16.mxu1 %vm8304_vm2, %v12619_v1  ;;  %7960 = vmatprep.mubr.msk.bf16.mxu0 %vm8304_vm2, %v12619_v1 }
 0x3cb   :  { %v3287_v4 = vpop.f32.mrb[120].mxu1  ;;  %v3906_v9 = vpop.f32.mrb[120].mxu0 }
 0x3cc   :  { %v3569_v59 = vadd.f32 %v3287_v4, %v10282_v14  ;;  %v7708_v21 = vpop.f32.mrb[121].mxu1  ;;  %v7854_v62 = vpop.f32.mrb[121].mxu0  ;;  %v11145_v38 = vadd.f32 %v3906_v9, %v3567_v23  ;;  %v6365_v14 = vld [vmem:[%s12594_s0 + $0x691] sm:$0xff]  ;;  %v3696_v23 = vld [vmem:[%s12594_s0 + $0x1e1] sm:$0xff] }
 0x3cd   :  { %v3290_v30 = vpop.f32.mrb[122].mxu1  ;;  %v3909_v12 = vpop.f32.mrb[122].mxu0 }
 0x3ce   :  { %v3570_v63 = vadd.f32 %v3290_v30, %v10285_v56  ;;  %v7855_v45 = vpop.f32.mrb[123].mxu0  ;;  %v7709_v44 = vpop.f32.mrb[123].mxu1  ;;  %v11148_v40 = vadd.f32 %v3909_v12, %v3568_v7  ;;  %v6366_v56 = vld [vmem:[%s12594_s0 + $0x699] sm:$0xff]  ;;  %v3697_v7 = vld [vmem:[%s12594_s0 + $0x1e9] sm:$0xff] }
 0x3cf   :  { %v3114_v9 = vpack.c.bf16 %v6366_v56, %v6365_v14  ;;  %v3740_v21 = vpack.c.bf16 %v3697_v7, %v3696_v23 }
 0x3d0   :  { %7815 = vmatmul.mubr.msk.bf16.gmra.mrb[228].mxu1 %vm239_vm3, %v3113_v29  ;;  %7961 = vmatmul.mubr.msk.bf16.gmra.mrb[228].mxu0 %vm239_vm3, %v3739_v48 }
 0x3d1   :  { %7818 = vmatprep.mubr.msk.bf16.mxu1 %vm8304_vm2, %v12619_v1  ;;  %7964 = vmatprep.mubr.msk.bf16.mxu0 %vm8304_vm2, %v12619_v1 }
 0x3d3   :  { %v3295_v54 = vpop.f32.mrb[124].mxu1  ;;  %v3914_v3 = vpop.f32.mrb[124].mxu0 }
 0x3d4   :  { %v3571_v15 = vadd.f32 %v3295_v54, %v10306_v8  ;;  %v7712_v35 = vpop.f32.mrb[125].mxu1  ;;  %v7858_v4 = vpop.f32.mrb[125].mxu0  ;;  %v11169_v62 = vadd.f32 %v3914_v3, %v3569_v59  ;;  %v6367_v8 = vld [vmem:[%s12594_s0 + $0x6a1] sm:$0xff]  ;;  %v3698_v59 = vld [vmem:[%s12594_s0 + $0x1f1] sm:$0xff] }
 0x3d5   :  { %v3298_v29 = vpop.f32.mrb[126].mxu1  ;;  %v3917_v48 = vpop.f32.mrb[126].mxu0 }
 0x3d6   :  { %v3572_v30 = vadd.f32 %v3298_v29, %v10309_v19  ;;  %v7859_v12 = vpop.f32.mrb[127].mxu0  ;;  %v7713_v45 = vpop.f32.mrb[127].mxu1  ;;  %v11172_v44 = vadd.f32 %v3917_v48, %v3570_v63  ;;  %v6368_v19 = vld [vmem:[%s12594_s0 + $0x6a9] sm:$0xff]  ;;  %v3699_v63 = vld [vmem:[%s12594_s0 + $0x1f9] sm:$0xff] }
 0x3d7   :  { %v3115_v3 = vpack.c.bf16 %v6368_v19, %v6367_v8  ;;  %v3741_v35 = vpack.c.bf16 %v3699_v63, %v3698_v59 }
 0x3d8   :  { %7819 = vmatmul.mubr.msk.bf16.gmra.mrb[232].mxu1 %vm239_vm3, %v3114_v9  ;;  %7965 = vmatmul.mubr.msk.bf16.gmra.mrb[232].mxu0 %vm239_vm3, %v3740_v21 }
 0x3d9   :  { %7822 = vmatprep.mubr.msk.bf16.mxu1 %vm8304_vm2, %v12619_v1  ;;  %7968 = vmatprep.mubr.msk.bf16.mxu0 %vm8304_vm2, %v12619_v1 }
 0x3db   :  { %v3303_v14 = vpop.f32.mrb[128].mxu1  ;;  %v3922_v56 = vpop.f32.mrb[128].mxu0 }
 0x3dc   :  { %v3573_v23 = vadd.f32 %v3303_v14, %v10330_v57  ;;  %v7716_v7 = vpop.f32.mrb[129].mxu1  ;;  %v7862_v54 = vpop.f32.mrb[129].mxu0  ;;  %v11193_v4 = vadd.f32 %v3922_v56, %v3571_v15  ;;  %v6369_v57 = vld [vmem:[%s12594_s0 + $0x6b1] sm:$0xff]  ;;  %v3700_v15 = vld [vmem:[%s12594_s0 + $0x201] sm:$0xff] }
 0x3dd   :  { %v3306_v9 = vpop.f32.mrb[130].mxu1  ;;  %v3925_v21 = vpop.f32.mrb[130].mxu0 }
 0x3de   :  { %v3574_v29 = vadd.f32 %v3306_v9, %v10333_v43  ;;  %v7863_v48 = vpop.f32.mrb[131].mxu0  ;;  %v7717_v12 = vpop.f32.mrb[131].mxu1  ;;  %v11196_v45 = vadd.f32 %v3925_v21, %v3572_v30  ;;  %v6370_v43 = vld [vmem:[%s12594_s0 + $0x6b9] sm:$0xff]  ;;  %v3701_v30 = vld [vmem:[%s12594_s0 + $0x209] sm:$0xff] }
 0x3df   :  { %v3116_v56 = vpack.c.bf16 %v6370_v43, %v6369_v57  ;;  %v3742_v7 = vpack.c.bf16 %v3701_v30, %v3700_v15 }
 0x3e0   :  { %7823 = vmatmul.mubr.msk.bf16.gmra.mrb[236].mxu1 %vm239_vm3, %v3115_v3  ;;  %7969 = vmatmul.mubr.msk.bf16.gmra.mrb[236].mxu0 %vm239_vm3, %v3741_v35 }
 0x3e1   :  { %7826 = vmatprep.mubr.msk.bf16.mxu1 %vm8304_vm2, %v12619_v1  ;;  %7972 = vmatprep.mubr.msk.bf16.mxu0 %vm8304_vm2, %v12619_v1 }
 0x3e3   :  { %v3311_v8 = vpop.f32.mrb[132].mxu1  ;;  %v3930_v19 = vpop.f32.mrb[132].mxu0 }
 0x3e4   :  { %v3575_v59 = vadd.f32 %v3311_v8, %v10354_v49  ;;  %v7720_v63 = vpop.f32.mrb[133].mxu1  ;;  %v7866_v14 = vpop.f32.mrb[133].mxu0  ;;  %v11217_v54 = vadd.f32 %v3930_v19, %v3573_v23  ;;  %v6371_v49 = vld [vmem:[%s12594_s0 + $0x6c1] sm:$0xff]  ;;  %v3702_v23 = vld [vmem:[%s12594_s0 + $0x211] sm:$0xff] }
 0x3e5   :  { %v3314_v3 = vpop.f32.mrb[134].mxu1  ;;  %v3933_v35 = vpop.f32.mrb[134].mxu0 }
 0x3e6   :  { %v3576_v9 = vadd.f32 %v3314_v3, %v10357_v24  ;;  %v7867_v21 = vpop.f32.mrb[135].mxu0  ;;  %v7721_v48 = vpop.f32.mrb[135].mxu1  ;;  %v11220_v12 = vadd.f32 %v3933_v35, %v3574_v29  ;;  %v6372_v24 = vld [vmem:[%s12594_s0 + $0x6c9] sm:$0xff]  ;;  %v3703_v29 = vld [vmem:[%s12594_s0 + $0x219] sm:$0xff] }
 0x3e7   :  { %v3117_v19 = vpack.c.bf16 %v6372_v24, %v6371_v49  ;;  %v3743_v63 = vpack.c.bf16 %v3703_v29, %v3702_v23  ;;  %v12745_v3 = vld [vmem:[#allocation29_spill] sm:$0xff]  ;;  %v3705_v49 = vld [vmem:[%s12594_s0 + $0x229] sm:$0xff] }
 0x3e8   :  { %12744 = vst [vmem:[#allocation26_spill] sm:$0xff] %v11220_v12  ;;  %7827 = vmatmul.mubr.msk.bf16.gmra.mrb[240].mxu1 %vm239_vm3, %v3116_v56  ;;  %7973 = vmatmul.mubr.msk.bf16.gmra.mrb[240].mxu0 %vm239_vm3, %v3742_v7 }
 0x3e9   :  { %7830 = vmatprep.mubr.msk.bf16.mxu1 %vm8304_vm2, %v12619_v1  ;;  %7976 = vmatprep.mubr.msk.bf16.mxu0 %vm8304_vm2, %v12619_v1 }
 0x3eb   :  { %v3319_v57 = vpop.f32.mrb[136].mxu1  ;;  %v3938_v43 = vpop.f32.mrb[136].mxu0 }
 0x3ec   :  { %v3577_v15 = vadd.f32 %v3319_v57, %v10378_v28  ;;  %v7724_v30 = vpop.f32.mrb[137].mxu1  ;;  %v7870_v8 = vpop.f32.mrb[137].mxu0  ;;  %v11241_v14 = vadd.f32 %v3938_v43, %v3575_v59  ;;  %v6373_v28 = vld [vmem:[%s12594_s0 + $0x6d1] sm:$0xff]  ;;  %v6374_v59 = vld [vmem:[%s12594_s0 + $0x6d9] sm:$0xff] }
 0x3ed   :  { %v3322_v56 = vpop.f32.mrb[138].mxu1  ;;  %v3941_v7 = vpop.f32.mrb[138].mxu0  ;;  %v3118_v30 = vpack.c.bf16 %v6374_v59, %v6373_v28 }
 0x3ee   :  { %v3578_v35 = vadd.f32 %v3322_v56, %v12745_v3  ;;  %v7871_v21 = vpop.f32.mrb[139].mxu0  ;;  %v7725_v48 = vpop.f32.mrb[139].mxu1  ;;  %v11244_v12 = vadd.f32 %v3941_v7, %v3576_v9  ;;  %v3704_v9 = vld [vmem:[%s12594_s0 + $0x221] sm:$0xff] }
 0x3ef   :  { %v3744_v8 = vpack.c.bf16 %v3705_v49, %v3704_v9  ;;  %v12748_v9 = vld [vmem:[#allocation30_spill] sm:$0xff] }
 0x3f0   :  { %7831 = vmatmul.mubr.msk.bf16.gmra.mrb[244].mxu1 %vm239_vm3, %v3117_v19  ;;  %7977 = vmatmul.mubr.msk.bf16.gmra.mrb[244].mxu0 %vm239_vm3, %v3743_v63 }
 0x3f1   :  { %7834 = vmatprep.mubr.msk.bf16.mxu1 %vm8304_vm2, %v12619_v1  ;;  %7980 = vmatprep.mubr.msk.bf16.mxu0 %vm8304_vm2, %v12619_v1 }
 0x3f3   :  { %v3327_v24 = vpop.f32.mrb[140].mxu1  ;;  %v3946_v23 = vpop.f32.mrb[140].mxu0 }
 0x3f4   :  { %v3579_v29 = vadd.f32 %v3327_v24, %v10402_v0  ;;  %v7728_v57 = vpop.f32.mrb[141].mxu1  ;;  %v7874_v43 = vpop.f32.mrb[141].mxu0  ;;  %v11265_v19 = vadd.f32 %v3946_v23, %v3577_v15  ;;  %v6375_v0 = vld [vmem:[%s12594_s0 + $0x6e1] sm:$0xff]  ;;  %v3706_v15 = vld [vmem:[%s12594_s0 + $0x231] sm:$0xff] }
 0x3f5   :  { %v3330_v63 = vpop.f32.mrb[142].mxu1  ;;  %v3949_v56 = vpop.f32.mrb[142].mxu0 }
 0x3f6   :  { %12746 = vst [vmem:[#allocation27_spill] sm:$0xff] %v11265_v19  ;;  %v3580_v7 = vadd.f32 %v3330_v63, %v10405_v47  ;;  %v7875_v3 = vpop.f32.mrb[143].mxu0  ;;  %v7729_v21 = vpop.f32.mrb[143].mxu1  ;;  %v11268_v48 = vadd.f32 %v3949_v56, %v3578_v35  ;;  %v6376_v47 = vld [vmem:[%s12594_s0 + $0x6e9] sm:$0xff]  ;;  %v3707_v35 = vld [vmem:[%s12594_s0 + $0x239] sm:$0xff] }
 0x3f7   :  { %v3119_v57 = vpack.c.bf16 %v6376_v47, %v6375_v0  ;;  %v3745_v43 = vpack.c.bf16 %v3707_v35, %v3706_v15  ;;  %v12749_v56 = vld [vmem:[#allocation31_spill] sm:$0xff] }
 0x3f8   :  { %12747 = vst [vmem:[#allocation28_spill] sm:$0xff] %v11268_v48  ;;  %7835 = vmatmul.mubr.msk.bf16.gmra.mrb[248].mxu1 %vm239_vm3, %v3118_v30  ;;  %7981 = vmatmul.mubr.msk.bf16.gmra.mrb[248].mxu0 %vm239_vm3, %v3744_v8 }
 0x3f9   :  { %7838 = vmatprep.mubr.msk.bf16.mxu1 %vm8304_vm2, %v12619_v1  ;;  %7984 = vmatprep.mubr.msk.bf16.mxu0 %vm8304_vm2, %v12619_v1 }
 0x3fb   :  { %v3335_v28 = vpop.f32.mrb[144].mxu1  ;;  %v3954_v59 = vpop.f32.mrb[144].mxu0 }
 0x3fc   :  { %v3581_v49 = vadd.f32 %v3335_v28, %v12748_v9  ;;  %v7732_v24 = vpop.f32.mrb[145].mxu1  ;;  %v7878_v23 = vpop.f32.mrb[145].mxu0  ;;  %v11289_v30 = vadd.f32 %v3954_v59, %v3579_v29  ;;  %v6377_v29 = vld [vmem:[%s12594_s0 + $0x6f1] sm:$0x3] }
 0x3fd   :  { %v3338_v8 = vpop.f32.mrb[146].mxu1  ;;  %v3957_v63 = vpop.f32.mrb[146].mxu0  ;;  %v3120_v59 = vpack.c.bf16 %v6377_v29, %v6377_v29 }
 0x3fe   :  { %v3582_v3 = vadd.f32 %v3338_v8, %v12749_v56  ;;  %v7879_v21 = vpop.f32.mrb[147].mxu0  ;;  %v7733_v48 = vpop.f32.mrb[147].mxu1  ;;  %v11292_v19 = vadd.f32 %v3957_v63, %v3580_v7  ;;  %v3709_v7 = vld [vmem:[%s12594_s0 + $0x249] sm:$0xff] }
 0x3ff   :  { %v3708_v48 = vld [vmem:[%s12594_s0 + $0x241] sm:$0xff] }
 0x400   :  { %7839 = vmatmul.mubr.msk.bf16.gmra.mrb[252].mxu1 %vm239_vm3, %v3119_v57  ;;  %7985 = vmatmul.mubr.msk.bf16.gmra.mrb[252].mxu0 %vm239_vm3, %v3745_v43  ;;  %v3746_v9 = vpack.c.bf16 %v3709_v7, %v3708_v48  ;;  %v12750_v43 = vld [vmem:[#allocation32_spill] sm:$0xff] }
 0x401   :  { %7842 = vmatprep.mubr.msk.bf16.mxu1 %vm8304_vm2, %v12619_v1  ;;  %7988 = vmatprep.mubr.msk.bf16.mxu0 %vm8304_vm2, %v12619_v1 }
 0x403   :  { %v3343_v0 = vpop.f32.mrb[148].mxu1  ;;  %v3962_v47 = vpop.f32.mrb[148].mxu0 }
 0x404   :  { %v3583_v15 = vadd.f32 %v3343_v0, %v10447_v61  ;;  %v7736_v35 = vpop.f32.mrb[149].mxu1  ;;  %v7882_v28 = vpop.f32.mrb[149].mxu0  ;;  %v11310_v24 = vadd.f32 %v3962_v47, %v3581_v49  ;;  %v3710_v61 = vld [vmem:[%s12594_s0 + $0x251] sm:$0x3]  ;;  %v6454_v49 = vld [vmem:[%s12594_s0 + $0x269] sm:$0xff] }
 0x405   :  { %v3346_v23 = vpop.f32.mrb[150].mxu1  ;;  %v3965_v57 = vpop.f32.mrb[150].mxu0  ;;  %v3747_v35 = vpack.c.bf16 %v3710_v61, %v3710_v61 }
 0x406   :  { %v3584_v8 = vadd.f32 %v3346_v23, %v12750_v43  ;;  %v7883_v63 = vpop.f32.mrb[151].mxu0  ;;  %v7737_v56 = vpop.f32.mrb[151].mxu1  ;;  %v11313_v21 = vadd.f32 %v3965_v57, %v3582_v3  ;;  %v6455_v3 = vld [vmem:[%s12594_s0 + $0x271] sm:$0xff] }
 0x407   :  { %v4338_v28 = vpack.c.bf16 %v6455_v3, %v6454_v49 }
 0x408   :  { %7843 = vmatmul.mubr.msk.bf16.gmra.mrb[0].mxu1 %vm239_vm3, %v3120_v59  ;;  %7989 = vmatmul.mubr.msk.bf16.gmra.mrb[0].mxu0 %vm239_vm3, %v3746_v9 }
 0x409   :  { %7992 = vmatprep.mubr.msk.bf16.mxu0 %vm8304_vm2, %v12619_v1  ;;  %7998 = vmatprep.mubr.msk.bf16.mxu1 %vm8304_vm2, %v12619_v1 }
 0x40b   :  { %v3351_v29 = vpop.f32.mrb[152].mxu1  ;;  %v3970_v48 = vpop.f32.mrb[152].mxu0 }
 0x40c   :  { %v3585_v7 = vadd.f32 %v3351_v29, %v10475_v16  ;;  %v7740_v0 = vpop.f32.mrb[153].mxu1  ;;  %v7886_v47 = vpop.f32.mrb[153].mxu0  ;;  %v11331_v59 = vadd.f32 %v3970_v48, %v3583_v15  ;;  %v6456_v16 = vld [vmem:[%s12594_s0 + $0x279] sm:$0xff] }
 0x40d   :  { %v3354_v9 = vpop.f32.mrb[154].mxu1  ;;  %v3973_v23 = vpop.f32.mrb[154].mxu0  ;;  %v4892_v15 = vld [vmem:[%s12594_s0 + $0x12] sm:$0xff] }
 0x40e   :  { %v3586_v57 = vadd.f32 %v3354_v9, %v10479_v42  ;;  %v7887_v43 = vpop.f32.mrb[155].mxu0  ;;  %v7741_v63 = vpop.f32.mrb[155].mxu1  ;;  %v11334_v56 = vadd.f32 %v3973_v23, %v3584_v8  ;;  %v6457_v42 = vld [vmem:[%s12594_s0 + $0x281] sm:$0xff] }
 0x40f   :  { %v4893_v8 = vld [vmem:[%s12594_s0 + $0x1a] sm:$0xff]  ;;  %v4339_v47 = vpack.c.bf16 %v6457_v42, %v6456_v16 }
 0x410   :  { %12751 = vst [vmem:[#allocation29_spill] sm:$0xff] %v11334_v56  ;;  %7993 = vmatmul.mubr.msk.bf16.gmra.mrb[4].mxu0 %vm239_vm3, %v3747_v35  ;;  %7999 = vmatmul.mubr.msk.bf16.vlgmr.msra.gmra.mrb[4].mxu1 %vm239_vm3, %v4338_v28  ;;  %v4965_v35 = vpack.c.bf16 %v4893_v8, %v4892_v15 }
 0x411   :  { %8002 = vmatprep.mubr.msk.bf16.mxu1 %vm8304_vm2, %v12619_v1  ;;  %8148 = vmatprep.mubr.msk.bf16.mxu0 %vm8304_vm2, %v12619_v1 }
 0x413   :  { %v3359_v61 = vpop.f32.mrb[156].mxu1  ;;  %v3978_v49 = vpop.f32.mrb[156].mxu0 }
 0x414   :  { %v3587_v3 = vadd.f32 %v3359_v61, %v10500_v50  ;;  %v11355_v29 = vadd.f32 %v3978_v49, %v3585_v7  ;;  %v7744_v48 = vpop.f32.mrb[157].mxu1  ;;  %v7890_v0 = vpop.f32.mrb[157].mxu0  ;;  %v6458_v50 = vld [vmem:[%s12594_s0 + $0x289] sm:$0xff] }
 0x415   :  { %v3362_v28 = vpop.f32.mrb[158].mxu1  ;;  %v3981_v9 = vpop.f32.mrb[158].mxu0  ;;  %v4894_v7 = vld [vmem:[%s12594_s0 + $0x22] sm:$0xff] }
 0x416   :  { %v3588_v23 = vadd.f32 %v3362_v28, %v10503_v46  ;;  %v11358_v43 = vadd.f32 %v3981_v9, %v3586_v57  ;;  %v7891_v63 = vpop.f32.mrb[159].mxu0  ;;  %v7745_v56 = vpop.f32.mrb[159].mxu1  ;;  %v6459_v46 = vld [vmem:[%s12594_s0 + $0x291] sm:$0xff] }
 0x417   :  { %v4895_v57 = vld [vmem:[%s12594_s0 + $0x2a] sm:$0xff]  ;;  %v4340_v49 = vpack.c.bf16 %v6459_v46, %v6458_v50 }
 0x418   :  { %8003 = vmatmul.mubr.msk.bf16.gmra.mrb[8].mxu1 %vm239_vm3, %v4339_v47  ;;  %8149 = vmatmul.mubr.msk.bf16.vlgmr.msra.gmra.mrb[8].mxu0 %vm239_vm3, %v4965_v35  ;;  %v4966_v48 = vpack.c.bf16 %v4895_v57, %v4894_v7 }
 0x419   :  { %8006 = vmatprep.mubr.msk.bf16.mxu1 %vm8304_vm2, %v12619_v1  ;;  %8152 = vmatprep.mubr.msk.bf16.mxu0 %vm8304_vm2, %v12619_v1 }
 0x41b   :  { %v3367_v56 = vpop.f32.mrb[160].mxu1  ;;  %v3986_v16 = vpop.f32.mrb[160].mxu0 }
 0x41c   :  { %v3589_v42 = vadd.f32 %v3367_v56, %v10524_v5  ;;  %v11379_v15 = vadd.f32 %v3986_v16, %v3587_v3  ;;  %v7748_v8 = vpop.f32.mrb[161].mxu1  ;;  %v7894_v61 = vpop.f32.mrb[161].mxu0  ;;  %v6460_v5 = vld [vmem:[%s12594_s0 + $0x299] sm:$0xff] }
 0x41d   :  { %v3370_v0 = vpop.f32.mrb[162].mxu1  ;;  %v3989_v47 = vpop.f32.mrb[162].mxu0  ;;  %v4896_v3 = vld [vmem:[%s12594_s0 + $0x32] sm:$0xff] }
 0x41e   :  { %v3590_v35 = vadd.f32 %v3370_v0, %v10527_v36  ;;  %v11382_v28 = vadd.f32 %v3989_v47, %v3588_v23  ;;  %v7895_v9 = vpop.f32.mrb[163].mxu0  ;;  %v7749_v63 = vpop.f32.mrb[163].mxu1  ;;  %v6461_v36 = vld [vmem:[%s12594_s0 + $0x2a1] sm:$0xff] }
 0x41f   :  { %v4897_v23 = vld [vmem:[%s12594_s0 + $0x3a] sm:$0xff]  ;;  %v4341_v8 = vpack.c.bf16 %v6461_v36, %v6460_v5 }
 0x420   :  { %8007 = vmatmul.mubr.msk.bf16.gmra.mrb[12].mxu1 %vm239_vm3, %v4340_v49  ;;  %8153 = vmatmul.mubr.msk.bf16.gmra.mrb[12].mxu0 %vm239_vm3, %v4966_v48  ;;  %v4967_v61 = vpack.c.bf16 %v4897_v23, %v4896_v3 }
 0x421   :  { %8010 = vmatprep.mubr.msk.bf16.mxu1 %vm8304_vm2, %v12619_v1  ;;  %8156 = vmatprep.mubr.msk.bf16.mxu0 %vm8304_vm2, %v12619_v1 }
 0x423   :  { %v3375_v50 = vpop.f32.mrb[164].mxu1  ;;  %v3994_v46 = vpop.f32.mrb[164].mxu0 }
 0x424   :  { %v3591_v7 = vadd.f32 %v3375_v50, %v10548_v31  ;;  %v11403_v57 = vadd.f32 %v3994_v46, %v3589_v42  ;;  %v7752_v56 = vpop.f32.mrb[165].mxu1  ;;  %v7898_v16 = vpop.f32.mrb[165].mxu0  ;;  %v6462_v31 = vld [vmem:[%s12594_s0 + $0x2a9] sm:$0xff] }
 0x425   :  { %v3378_v49 = vpop.f32.mrb[166].mxu1  ;;  %v3997_v48 = vpop.f32.mrb[166].mxu0  ;;  %v4898_v42 = vld [vmem:[%s12594_s0 + $0x42] sm:$0xff] }
 0x426   :  { %v3592_v0 = vadd.f32 %v3378_v49, %v10551_v39  ;;  %v11406_v47 = vadd.f32 %v3997_v48, %v3590_v35  ;;  %v7899_v9 = vpop.f32.mrb[167].mxu0  ;;  %v7753_v63 = vpop.f32.mrb[167].mxu1  ;;  %v6463_v39 = vld [vmem:[%s12594_s0 + $0x2b1] sm:$0xff] }
 0x427   :  { %v4899_v35 = vld [vmem:[%s12594_s0 + $0x4a] sm:$0xff]  ;;  %v4342_v56 = vpack.c.bf16 %v6463_v39, %v6462_v31 }
 0x428   :  { %8011 = vmatmul.mubr.msk.bf16.gmra.mrb[16].mxu1 %vm239_vm3, %v4341_v8  ;;  %8157 = vmatmul.mubr.msk.bf16.gmra.mrb[16].mxu0 %vm239_vm3, %v4967_v61  ;;  %v4968_v16 = vpack.c.bf16 %v4899_v35, %v4898_v42 }
 0x429   :  { %8014 = vmatprep.mubr.msk.bf16.mxu1 %vm8304_vm2, %v12619_v1  ;;  %8160 = vmatprep.mubr.msk.bf16.mxu0 %vm8304_vm2, %v12619_v1 }
 0x42b   :  { %v3383_v5 = vpop.f32.mrb[168].mxu1  ;;  %v4002_v36 = vpop.f32.mrb[168].mxu0 }
 0x42c   :  { %v3593_v3 = vadd.f32 %v3383_v5, %v10572_v55  ;;  %v11427_v23 = vadd.f32 %v4002_v36, %v3591_v7  ;;  %v7756_v50 = vpop.f32.mrb[169].mxu1  ;;  %v7902_v46 = vpop.f32.mrb[169].mxu0  ;;  %v6464_v55 = vld [vmem:[%s12594_s0 + $0x2b9] sm:$0xff] }
 0x42d   :  { %v3386_v8 = vpop.f32.mrb[170].mxu1  ;;  %v4005_v61 = vpop.f32.mrb[170].mxu0  ;;  %v4900_v7 = vld [vmem:[%s12594_s0 + $0x52] sm:$0xff] }
 0x42e   :  { %v3594_v49 = vadd.f32 %v3386_v8, %v10575_v20  ;;  %v11430_v48 = vadd.f32 %v4005_v61, %v3592_v0  ;;  %v7903_v9 = vpop.f32.mrb[171].mxu0  ;;  %v7757_v63 = vpop.f32.mrb[171].mxu1  ;;  %v6465_v20 = vld [vmem:[%s12594_s0 + $0x2c1] sm:$0xff] }
 0x42f   :  { %v4901_v0 = vld [vmem:[%s12594_s0 + $0x5a] sm:$0xff]  ;;  %v4343_v50 = vpack.c.bf16 %v6465_v20, %v6464_v55 }
 0x430   :  { %8015 = vmatmul.mubr.msk.bf16.gmra.mrb[20].mxu1 %vm239_vm3, %v4342_v56  ;;  %8161 = vmatmul.mubr.msk.bf16.gmra.mrb[20].mxu0 %vm239_vm3, %v4968_v16  ;;  %v4969_v46 = vpack.c.bf16 %v4901_v0, %v4900_v7 }
 0x431   :  { %8018 = vmatprep.mubr.msk.bf16.mxu1 %vm8304_vm2, %v12619_v1  ;;  %8164 = vmatprep.mubr.msk.bf16.mxu0 %vm8304_vm2, %v12619_v1 }
 0x433   :  { %v3391_v31 = vpop.f32.mrb[172].mxu1  ;;  %v4010_v39 = vpop.f32.mrb[172].mxu0 }
 0x434   :  { %v3595_v42 = vadd.f32 %v3391_v31, %v10596_v32  ;;  %v11451_v35 = vadd.f32 %v4010_v39, %v3593_v3  ;;  %v7760_v5 = vpop.f32.mrb[173].mxu1  ;;  %v7906_v36 = vpop.f32.mrb[173].mxu0  ;;  %v6466_v32 = vld [vmem:[%s12594_s0 + $0x2c9] sm:$0xff] }
 0x435   :  { %v3394_v56 = vpop.f32.mrb[174].mxu1  ;;  %v4013_v16 = vpop.f32.mrb[174].mxu0  ;;  %v4902_v3 = vld [vmem:[%s12594_s0 + $0x62] sm:$0xff] }
 0x436   :  { %v3596_v8 = vadd.f32 %v3394_v56, %v10599_v25  ;;  %v11454_v61 = vadd.f32 %v4013_v16, %v3594_v49  ;;  %v7907_v9 = vpop.f32.mrb[175].mxu0  ;;  %v7761_v63 = vpop.f32.mrb[175].mxu1  ;;  %v6467_v25 = vld [vmem:[%s12594_s0 + $0x2d1] sm:$0xff] }
 0x437   :  { %v4903_v49 = vld [vmem:[%s12594_s0 + $0x6a] sm:$0xff]  ;;  %v4344_v5 = vpack.c.bf16 %v6467_v25, %v6466_v32 }
 0x438   :  { %8019 = vmatmul.mubr.msk.bf16.gmra.mrb[24].mxu1 %vm239_vm3, %v4343_v50  ;;  %8165 = vmatmul.mubr.msk.bf16.gmra.mrb[24].mxu0 %vm239_vm3, %v4969_v46  ;;  %v4970_v36 = vpack.c.bf16 %v4903_v49, %v4902_v3 }
 0x439   :  { %8022 = vmatprep.mubr.msk.bf16.mxu1 %vm8304_vm2, %v12619_v1  ;;  %8168 = vmatprep.mubr.msk.bf16.mxu0 %vm8304_vm2, %v12619_v1 }
 0x43b   :  { %v3399_v55 = vpop.f32.mrb[176].mxu1  ;;  %v4018_v20 = vpop.f32.mrb[176].mxu0 }
 0x43c   :  { %v3597_v7 = vadd.f32 %v3399_v55, %v10620_v6  ;;  %v11475_v0 = vadd.f32 %v4018_v20, %v3595_v42  ;;  %v7764_v31 = vpop.f32.mrb[177].mxu1  ;;  %v7910_v39 = vpop.f32.mrb[177].mxu0  ;;  %v6468_v6 = vld [vmem:[%s12594_s0 + $0x2d9] sm:$0xff] }
 0x43d   :  { %v3402_v50 = vpop.f32.mrb[178].mxu1  ;;  %v4021_v46 = vpop.f32.mrb[178].mxu0  ;;  %v4904_v42 = vld [vmem:[%s12594_s0 + $0x72] sm:$0xff] }
 0x43e   :  { %v3598_v56 = vadd.f32 %v3402_v50, %v10623_v34  ;;  %v11478_v16 = vadd.f32 %v4021_v46, %v3596_v8  ;;  %v7911_v9 = vpop.f32.mrb[179].mxu0  ;;  %v7765_v63 = vpop.f32.mrb[179].mxu1  ;;  %v6469_v34 = vld [vmem:[%s12594_s0 + $0x2e1] sm:$0xff] }
 0x43f   :  { %v4905_v8 = vld [vmem:[%s12594_s0 + $0x7a] sm:$0xff]  ;;  %v4345_v31 = vpack.c.bf16 %v6469_v34, %v6468_v6 }
 0x440   :  { %8023 = vmatmul.mubr.msk.bf16.gmra.mrb[28].mxu1 %vm239_vm3, %v4344_v5  ;;  %8169 = vmatmul.mubr.msk.bf16.gmra.mrb[28].mxu0 %vm239_vm3, %v4970_v36  ;;  %v4971_v39 = vpack.c.bf16 %v4905_v8, %v4904_v42 }
 0x441   :  { %8026 = vmatprep.mubr.msk.bf16.mxu1 %vm8304_vm2, %v12619_v1  ;;  %8172 = vmatprep.mubr.msk.bf16.mxu0 %vm8304_vm2, %v12619_v1 }
 0x443   :  { %v3407_v32 = vpop.f32.mrb[180].mxu1  ;;  %v4026_v25 = vpop.f32.mrb[180].mxu0 }
 0x444   :  { %v3599_v3 = vadd.f32 %v3407_v32, %v10644_v10  ;;  %v11499_v49 = vadd.f32 %v4026_v25, %v3597_v7  ;;  %v7768_v55 = vpop.f32.mrb[181].mxu1  ;;  %v7914_v20 = vpop.f32.mrb[181].mxu0  ;;  %v6470_v10 = vld [vmem:[%s12594_s0 + $0x2e9] sm:$0xff] }
 0x445   :  { %v3410_v5 = vpop.f32.mrb[182].mxu1  ;;  %v4029_v36 = vpop.f32.mrb[182].mxu0  ;;  %v4906_v7 = vld [vmem:[%s12594_s0 + $0x82] sm:$0xff] }
 0x446   :  { %v3600_v50 = vadd.f32 %v3410_v5, %v10647_v58  ;;  %v11502_v46 = vadd.f32 %v4029_v36, %v3598_v56  ;;  %v7915_v9 = vpop.f32.mrb[183].mxu0  ;;  %v7769_v63 = vpop.f32.mrb[183].mxu1  ;;  %v6471_v58 = vld [vmem:[%s12594_s0 + $0x2f1] sm:$0xff] }
 0x447   :  { %v4907_v56 = vld [vmem:[%s12594_s0 + $0x8a] sm:$0xff]  ;;  %v4346_v55 = vpack.c.bf16 %v6471_v58, %v6470_v10 }
 0x448   :  { %8027 = vmatmul.mubr.msk.bf16.gmra.mrb[32].mxu1 %vm239_vm3, %v4345_v31  ;;  %8173 = vmatmul.mubr.msk.bf16.gmra.mrb[32].mxu0 %vm239_vm3, %v4971_v39  ;;  %v4972_v20 = vpack.c.bf16 %v4907_v56, %v4906_v7 }
 0x449   :  { %8030 = vmatprep.mubr.msk.bf16.mxu1 %vm8304_vm2, %v12619_v1  ;;  %8176 = vmatprep.mubr.msk.bf16.mxu0 %vm8304_vm2, %v12619_v1 }
 0x44b   :  { %v3415_v6 = vpop.f32.mrb[184].mxu1  ;;  %v4034_v34 = vpop.f32.mrb[184].mxu0 }
 0x44c   :  { %v3601_v42 = vadd.f32 %v3415_v6, %v10668_v2  ;;  %v11523_v8 = vadd.f32 %v4034_v34, %v3599_v3  ;;  %v7772_v32 = vpop.f32.mrb[185].mxu1  ;;  %v7918_v25 = vpop.f32.mrb[185].mxu0  ;;  %v6472_v2 = vld [vmem:[%s12594_s0 + $0x2f9] sm:$0xff] }
 0x44d   :  { %v3418_v31 = vpop.f32.mrb[186].mxu1  ;;  %v4037_v39 = vpop.f32.mrb[186].mxu0  ;;  %v4908_v3 = vld [vmem:[%s12594_s0 + $0x92] sm:$0xff] }
 0x44e   :  { %v3602_v5 = vadd.f32 %v3418_v31, %v10671_v60  ;;  %v11526_v36 = vadd.f32 %v4037_v39, %v3600_v50  ;;  %v7919_v9 = vpop.f32.mrb[187].mxu0  ;;  %v7773_v63 = vpop.f32.mrb[187].mxu1  ;;  %v6473_v60 = vld [vmem:[%s12594_s0 + $0x301] sm:$0xff] }
 0x44f   :  { %v4909_v50 = vld [vmem:[%s12594_s0 + $0x9a] sm:$0xff]  ;;  %v4347_v32 = vpack.c.bf16 %v6473_v60, %v6472_v2 }
 0x450   :  { %8031 = vmatmul.mubr.msk.bf16.gmra.mrb[36].mxu1 %vm239_vm3, %v4346_v55  ;;  %8177 = vmatmul.mubr.msk.bf16.gmra.mrb[36].mxu0 %vm239_vm3, %v4972_v20  ;;  %v4973_v25 = vpack.c.bf16 %v4909_v50, %v4908_v3 }
 0x451   :  { %8034 = vmatprep.mubr.msk.bf16.mxu1 %vm8304_vm2, %v12619_v1  ;;  %8180 = vmatprep.mubr.msk.bf16.mxu0 %vm8304_vm2, %v12619_v1 }
 0x453   :  { %v3423_v10 = vpop.f32.mrb[188].mxu1  ;;  %v4042_v58 = vpop.f32.mrb[188].mxu0 }
 0x454   :  { %v3603_v7 = vadd.f32 %v3423_v10, %v10692_v18  ;;  %v11547_v56 = vadd.f32 %v4042_v58, %v3601_v42  ;;  %v7776_v6 = vpop.f32.mrb[189].mxu1  ;;  %v7922_v34 = vpop.f32.mrb[189].mxu0  ;;  %v6474_v18 = vld [vmem:[%s12594_s0 + $0x309] sm:$0xff] }
 0x455   :  { %v3426_v55 = vpop.f32.mrb[190].mxu1  ;;  %v4045_v20 = vpop.f32.mrb[190].mxu0  ;;  %v4910_v42 = vld [vmem:[%s12594_s0 + $0xa2] sm:$0xff] }
 0x456   :  { %v3604_v31 = vadd.f32 %v3426_v55, %v10695_v41  ;;  %v11550_v39 = vadd.f32 %v4045_v20, %v3602_v5  ;;  %v7923_v9 = vpop.f32.mrb[191].mxu0  ;;  %v7777_v63 = vpop.f32.mrb[191].mxu1  ;;  %v6475_v41 = vld [vmem:[%s12594_s0 + $0x311] sm:$0xff]  ;;  %v12754_v55 = vld [vmem:[#allocation2_spill] sm:$0xff] }
 0x457   :  { %v4911_v5 = vld [vmem:[%s12594_s0 + $0xaa] sm:$0xff]  ;;  %v4348_v6 = vpack.c.bf16 %v6475_v41, %v6474_v18 }
 0x458   :  { %12752 = vst [vmem:[#allocation30_spill] sm:$0xff] %v11550_v39  ;;  %8035 = vmatmul.mubr.msk.bf16.gmra.mrb[40].mxu1 %vm239_vm3, %v4347_v32  ;;  %8181 = vmatmul.mubr.msk.bf16.gmra.mrb[40].mxu0 %vm239_vm3, %v4973_v25  ;;  %v4974_v34 = vpack.c.bf16 %v4911_v5, %v4910_v42  ;;  %v12756_v42 = vld [vmem:[#allocation3_spill] sm:$0xff] }
 0x459   :  { %8038 = vmatprep.mubr.msk.bf16.mxu1 %vm8304_vm2, %v12619_v1  ;;  %8184 = vmatprep.mubr.msk.bf16.mxu0 %vm8304_vm2, %v12619_v1 }
 0x45b   :  { %v3431_v2 = vpop.f32.mrb[192].mxu1  ;;  %v4050_v60 = vpop.f32.mrb[192].mxu0 }
 0x45c   :  { %v3605_v3 = vadd.f32 %v3431_v2, %v10716_v13  ;;  %v11571_v50 = vadd.f32 %v4050_v60, %v3603_v7  ;;  %v7780_v10 = vpop.f32.mrb[193].mxu1  ;;  %v7926_v58 = vpop.f32.mrb[193].mxu0  ;;  %v6476_v13 = vld [vmem:[%s12594_s0 + $0x319] sm:$0xff]  ;;  %v6477_v7 = vld [vmem:[%s12594_s0 + $0x321] sm:$0xff] }
 0x45d   :  { %v3434_v32 = vpop.f32.mrb[194].mxu1  ;;  %v4053_v25 = vpop.f32.mrb[194].mxu0  ;;  %v4349_v58 = vpack.c.bf16 %v6477_v7, %v6476_v13 }
 0x45e   :  { %12753 = vst [vmem:[#allocation31_spill] sm:$0xff] %v11571_v50  ;;  %v3606_v20 = vadd.f32 %v3434_v32, %v12754_v55  ;;  %v11574_v9 = vadd.f32 %v4053_v25, %v3604_v31  ;;  %v7927_v63 = vpop.f32.mrb[195].mxu0  ;;  %v7781_v39 = vpop.f32.mrb[195].mxu1  ;;  %v4912_v31 = vld [vmem:[%s12594_s0 + $0xb2] sm:$0xff] }
 0x45f   :  { %v4913_v39 = vld [vmem:[%s12594_s0 + $0xba] sm:$0xff]  ;;  %v12758_v25 = vld [vmem:[#allocation4_spill] sm:$0xff] }
 0x460   :  { %12755 = vst [vmem:[#allocation32_spill] sm:$0xff] %v11574_v9  ;;  %8039 = vmatmul.mubr.msk.bf16.gmra.mrb[44].mxu1 %vm239_vm3, %v4348_v6  ;;  %8185 = vmatmul.mubr.msk.bf16.gmra.mrb[44].mxu0 %vm239_vm3, %v4974_v34  ;;  %v4975_v6 = vpack.c.bf16 %v4913_v39, %v4912_v31  ;;  %v12760_v31 = vld [vmem:[#allocation5_spill] sm:$0xff] }
 0x461   :  { %8042 = vmatprep.mubr.msk.bf16.mxu1 %vm8304_vm2, %v12619_v1  ;;  %8188 = vmatprep.mubr.msk.bf16.mxu0 %vm8304_vm2, %v12619_v1 }
 0x463   :  { %v3439_v18 = vpop.f32.mrb[196].mxu1  ;;  %v4058_v41 = vpop.f32.mrb[196].mxu0 }
 0x464   :  { %v3607_v5 = vadd.f32 %v3439_v18, %v12756_v42  ;;  %v11595_v2 = vadd.f32 %v4058_v41, %v3605_v3  ;;  %v7784_v60 = vpop.f32.mrb[197].mxu1  ;;  %v7930_v10 = vpop.f32.mrb[197].mxu0  ;;  %v6478_v3 = vld [vmem:[%s12594_s0 + $0x329] sm:$0xff] }
 0x465   :  { %v3442_v34 = vpop.f32.mrb[198].mxu1  ;;  %v4061_v32 = vpop.f32.mrb[198].mxu0 }
 0x466   :  { %12757 = vst [vmem:[#allocation2_spill] sm:$0xff] %v11595_v2  ;;  %v3608_v55 = vadd.f32 %v3442_v34, %v12758_v25  ;;  %v11598_v63 = vadd.f32 %v4061_v32, %v3606_v20  ;;  %v7931_v9 = vpop.f32.mrb[199].mxu0  ;;  %v7785_v50 = vpop.f32.mrb[199].mxu1  ;;  %v6479_v20 = vld [vmem:[%s12594_s0 + $0x331] sm:$0xff]  ;;  %v12762_v34 = vld [vmem:[#allocation6_spill] sm:$0xff] }
 0x467   :  { %v4914_v50 = vld [vmem:[%s12594_s0 + $0xc2] sm:$0xff]  ;;  %v4915_v9 = vld [vmem:[%s12594_s0 + $0xca] sm:$0xff]  ;;  %v4350_v60 = vpack.c.bf16 %v6479_v20, %v6478_v3 }
 0x468   :  { %12759 = vst [vmem:[#allocation3_spill] sm:$0xff] %v11598_v63  ;;  %8043 = vmatmul.mubr.msk.bf16.gmra.mrb[48].mxu1 %vm239_vm3, %v4349_v58  ;;  %8189 = vmatmul.mubr.msk.bf16.gmra.mrb[48].mxu0 %vm239_vm3, %v4975_v6  ;;  %v4976_v10 = vpack.c.bf16 %v4915_v9, %v4914_v50  ;;  %v12764_v50 = vld [vmem:[#allocation7_spill] sm:$0xff] }
 0x469   :  { %8046 = vmatprep.mubr.msk.bf16.mxu1 %vm8304_vm2, %v12619_v1  ;;  %8192 = vmatprep.mubr.msk.bf16.mxu0 %vm8304_vm2, %v12619_v1 }
 0x46b   :  { %v3447_v13 = vpop.f32.mrb[200].mxu1  ;;  %v4066_v7 = vpop.f32.mrb[200].mxu0 }
 0x46c   :  { %v3609_v39 = vadd.f32 %v3447_v13, %v12760_v31  ;;  %v11619_v18 = vadd.f32 %v4066_v7, %v3607_v5  ;;  %v7788_v41 = vpop.f32.mrb[201].mxu1  ;;  %v7934_v42 = vpop.f32.mrb[201].mxu0  ;;  %v6480_v5 = vld [vmem:[%s12594_s0 + $0x339] sm:$0xff] }
 0x46d   :  { %v3450_v58 = vpop.f32.mrb[202].mxu1  ;;  %v4069_v6 = vpop.f32.mrb[202].mxu0 }
 0x46e   :  { %12761 = vst [vmem:[#allocation4_spill] sm:$0xff] %v11619_v18  ;;  %v3610_v32 = vadd.f32 %v3450_v58, %v12762_v34  ;;  %v11622_v25 = vadd.f32 %v4069_v6, %v3608_v55  ;;  %v7935_v63 = vpop.f32.mrb[203].mxu0  ;;  %v7789_v2 = vpop.f32.mrb[203].mxu1  ;;  %v6481_v55 = vld [vmem:[%s12594_s0 + $0x341] sm:$0xff]  ;;  %v12766_v58 = vld [vmem:[#allocation8_spill] sm:$0xff] }
 0x46f   :  { %v4916_v2 = vld [vmem:[%s12594_s0 + $0xd2] sm:$0xff]  ;;  %v4917_v63 = vld [vmem:[%s12594_s0 + $0xda] sm:$0xff]  ;;  %v4351_v41 = vpack.c.bf16 %v6481_v55, %v6480_v5 }
 0x470   :  { %12763 = vst [vmem:[#allocation5_spill] sm:$0xff] %v11622_v25  ;;  %8047 = vmatmul.mubr.msk.bf16.gmra.mrb[52].mxu1 %vm239_vm3, %v4350_v60  ;;  %8193 = vmatmul.mubr.msk.bf16.gmra.mrb[52].mxu0 %vm239_vm3, %v4976_v10  ;;  %v4977_v42 = vpack.c.bf16 %v4917_v63, %v4916_v2  ;;  %v12768_v2 = vld [vmem:[#allocation9_spill] sm:$0xff] }
 0x471   :  { %8050 = vmatprep.mubr.msk.bf16.mxu1 %vm8304_vm2, %v12619_v1  ;;  %8196 = vmatprep.mubr.msk.bf16.mxu0 %vm8304_vm2, %v12619_v1 }
 0x473   :  { %v3455_v3 = vpop.f32.mrb[204].mxu1  ;;  %v4074_v20 = vpop.f32.mrb[204].mxu0 }
 0x474   :  { %v3611_v9 = vadd.f32 %v3455_v3, %v12764_v50  ;;  %v11643_v13 = vadd.f32 %v4074_v20, %v3609_v39  ;;  %v7792_v7 = vpop.f32.mrb[205].mxu1  ;;  %v7938_v31 = vpop.f32.mrb[205].mxu0  ;;  %v6482_v39 = vld [vmem:[%s12594_s0 + $0x349] sm:$0xff] }
 0x475   :  { %v3458_v60 = vpop.f32.mrb[206].mxu1  ;;  %v4077_v10 = vpop.f32.mrb[206].mxu0 }
 0x476   :  { %12765 = vst [vmem:[#allocation6_spill] sm:$0xff] %v11643_v13  ;;  %v3612_v6 = vadd.f32 %v3458_v60, %v12766_v58  ;;  %v11646_v34 = vadd.f32 %v4077_v10, %v3610_v32  ;;  %v7939_v25 = vpop.f32.mrb[207].mxu0  ;;  %v7793_v18 = vpop.f32.mrb[207].mxu1  ;;  %v6483_v32 = vld [vmem:[%s12594_s0 + $0x351] sm:$0xff]  ;;  %v12770_v60 = vld [vmem:[#allocation10_spill] sm:$0xff] }
 0x477   :  { %v4918_v18 = vld [vmem:[%s12594_s0 + $0xe2] sm:$0xff]  ;;  %v4919_v25 = vld [vmem:[%s12594_s0 + $0xea] sm:$0xff]  ;;  %v4352_v7 = vpack.c.bf16 %v6483_v32, %v6482_v39 }
 0x478   :  { %12767 = vst [vmem:[#allocation7_spill] sm:$0xff] %v11646_v34  ;;  %8051 = vmatmul.mubr.msk.bf16.gmra.mrb[56].mxu1 %vm239_vm3, %v4351_v41  ;;  %8197 = vmatmul.mubr.msk.bf16.gmra.mrb[56].mxu0 %vm239_vm3, %v4977_v42  ;;  %v4978_v31 = vpack.c.bf16 %v4919_v25, %v4918_v18  ;;  %v12772_v18 = vld [vmem:[#allocation11_spill] sm:$0xff] }
 0x479   :  { %8054 = vmatprep.mubr.msk.bf16.mxu1 %vm8304_vm2, %v12619_v1  ;;  %8200 = vmatprep.mubr.msk.bf16.mxu0 %vm8304_vm2, %v12619_v1 }
 0x47b   :  { %v3463_v5 = vpop.f32.mrb[208].mxu1  ;;  %v4082_v55 = vpop.f32.mrb[208].mxu0 }
 0x47c   :  { %v3613_v63 = vadd.f32 %v3463_v5, %v12768_v2  ;;  %v11667_v3 = vadd.f32 %v4082_v55, %v3611_v9  ;;  %v7796_v20 = vpop.f32.mrb[209].mxu1  ;;  %v7942_v50 = vpop.f32.mrb[209].mxu0  ;;  %v6484_v9 = vld [vmem:[%s12594_s0 + $0x359] sm:$0xff] }
 0x47d   :  { %v3466_v41 = vpop.f32.mrb[210].mxu1  ;;  %v4085_v42 = vpop.f32.mrb[210].mxu0 }
 0x47e   :  { %12769 = vst [vmem:[#allocation8_spill] sm:$0xff] %v11667_v3  ;;  %v3614_v10 = vadd.f32 %v3466_v41, %v12770_v60  ;;  %v11670_v58 = vadd.f32 %v4085_v42, %v3612_v6  ;;  %v7943_v34 = vpop.f32.mrb[211].mxu0  ;;  %v7797_v13 = vpop.f32.mrb[211].mxu1  ;;  %v6485_v6 = vld [vmem:[%s12594_s0 + $0x361] sm:$0xff]  ;;  %v12774_v41 = vld [vmem:[#allocation12_spill] sm:$0xff] }
 0x47f   :  { %v4920_v13 = vld [vmem:[%s12594_s0 + $0xf2] sm:$0xff]  ;;  %v4921_v34 = vld [vmem:[%s12594_s0 + $0xfa] sm:$0xff]  ;;  %v4353_v20 = vpack.c.bf16 %v6485_v6, %v6484_v9 }
 0x480   :  { %12771 = vst [vmem:[#allocation9_spill] sm:$0xff] %v11670_v58  ;;  %8055 = vmatmul.mubr.msk.bf16.gmra.mrb[60].mxu1 %vm239_vm3, %v4352_v7  ;;  %8201 = vmatmul.mubr.msk.bf16.gmra.mrb[60].mxu0 %vm239_vm3, %v4978_v31  ;;  %v4979_v50 = vpack.c.bf16 %v4921_v34, %v4920_v13  ;;  %v12776_v13 = vld [vmem:[#allocation13_spill] sm:$0xff] }
 0x481   :  { %8058 = vmatprep.mubr.msk.bf16.mxu1 %vm8304_vm2, %v12619_v1  ;;  %8204 = vmatprep.mubr.msk.bf16.mxu0 %vm8304_vm2, %v12619_v1 }
 0x483   :  { %v3471_v39 = vpop.f32.mrb[212].mxu1  ;;  %v4090_v32 = vpop.f32.mrb[212].mxu0 }
 0x484   :  { %v3615_v25 = vadd.f32 %v3471_v39, %v12772_v18  ;;  %v11691_v5 = vadd.f32 %v4090_v32, %v3613_v63  ;;  %v7800_v55 = vpop.f32.mrb[213].mxu1  ;;  %v7946_v2 = vpop.f32.mrb[213].mxu0  ;;  %v6486_v63 = vld [vmem:[%s12594_s0 + $0x369] sm:$0xff] }
 0x485   :  { %v3474_v7 = vpop.f32.mrb[214].mxu1  ;;  %v4093_v31 = vpop.f32.mrb[214].mxu0 }
 0x486   :  { %12773 = vst [vmem:[#allocation10_spill] sm:$0xff] %v11691_v5  ;;  %v3616_v42 = vadd.f32 %v3474_v7, %v12774_v41  ;;  %v11694_v60 = vadd.f32 %v4093_v31, %v3614_v10  ;;  %v7947_v58 = vpop.f32.mrb[215].mxu0  ;;  %v7801_v3 = vpop.f32.mrb[215].mxu1  ;;  %v6487_v10 = vld [vmem:[%s12594_s0 + $0x371] sm:$0xff]  ;;  %v12778_v7 = vld [vmem:[#allocation14_spill] sm:$0xff] }
 0x487   :  { %v4922_v3 = vld [vmem:[%s12594_s0 + $0x102] sm:$0xff]  ;;  %v4923_v58 = vld [vmem:[%s12594_s0 + $0x10a] sm:$0xff]  ;;  %v4354_v55 = vpack.c.bf16 %v6487_v10, %v6486_v63 }
 0x488   :  { %12775 = vst [vmem:[#allocation11_spill] sm:$0xff] %v11694_v60  ;;  %8059 = vmatmul.mubr.msk.bf16.gmra.mrb[64].mxu1 %vm239_vm3, %v4353_v20  ;;  %8205 = vmatmul.mubr.msk.bf16.gmra.mrb[64].mxu0 %vm239_vm3, %v4979_v50  ;;  %v4980_v2 = vpack.c.bf16 %v4923_v58, %v4922_v3  ;;  %v12780_v3 = vld [vmem:[#allocation15_spill] sm:$0xff] }
 0x489   :  { %8062 = vmatprep.mubr.msk.bf16.mxu1 %vm8304_vm2, %v12619_v1  ;;  %8208 = vmatprep.mubr.msk.bf16.mxu0 %vm8304_vm2, %v12619_v1 }
 0x48b   :  { %v3479_v9 = vpop.f32.mrb[216].mxu1  ;;  %v4098_v6 = vpop.f32.mrb[216].mxu0 }
 0x48c   :  { %v3617_v34 = vadd.f32 %v3479_v9, %v12776_v13  ;;  %v11715_v39 = vadd.f32 %v4098_v6, %v3615_v25  ;;  %v7804_v32 = vpop.f32.mrb[217].mxu1  ;;  %v7950_v18 = vpop.f32.mrb[217].mxu0  ;;  %v6488_v25 = vld [vmem:[%s12594_s0 + $0x379] sm:$0xff] }
 0x48d   :  { %v3482_v20 = vpop.f32.mrb[218].mxu1  ;;  %v4101_v50 = vpop.f32.mrb[218].mxu0 }
 0x48e   :  { %12777 = vst [vmem:[#allocation12_spill] sm:$0xff] %v11715_v39  ;;  %v3618_v31 = vadd.f32 %v3482_v20, %v12778_v7  ;;  %v11718_v41 = vadd.f32 %v4101_v50, %v3616_v42  ;;  %v7951_v60 = vpop.f32.mrb[219].mxu0  ;;  %v7805_v5 = vpop.f32.mrb[219].mxu1  ;;  %v6489_v42 = vld [vmem:[%s12594_s0 + $0x381] sm:$0xff]  ;;  %v12782_v20 = vld [vmem:[#allocation16_spill] sm:$0xff] }
 0x48f   :  { %v4924_v5 = vld [vmem:[%s12594_s0 + $0x112] sm:$0xff]  ;;  %v4925_v60 = vld [vmem:[%s12594_s0 + $0x11a] sm:$0xff]  ;;  %v4355_v32 = vpack.c.bf16 %v6489_v42, %v6488_v25 }
 0x490   :  { %12779 = vst [vmem:[#allocation13_spill] sm:$0xff] %v11718_v41  ;;  %8063 = vmatmul.mubr.msk.bf16.gmra.mrb[68].mxu1 %vm239_vm3, %v4354_v55  ;;  %8209 = vmatmul.mubr.msk.bf16.gmra.mrb[68].mxu0 %vm239_vm3, %v4980_v2  ;;  %v4981_v18 = vpack.c.bf16 %v4925_v60, %v4924_v5  ;;  %v12784_v5 = vld [vmem:[#allocation17_spill] sm:$0xff] }
 0x491   :  { %8066 = vmatprep.mubr.msk.bf16.mxu1 %vm8304_vm2, %v12619_v1  ;;  %8212 = vmatprep.mubr.msk.bf16.mxu0 %vm8304_vm2, %v12619_v1 }
 0x493   :  { %v3487_v63 = vpop.f32.mrb[220].mxu1  ;;  %v4106_v10 = vpop.f32.mrb[220].mxu0 }
 0x494   :  { %v3619_v58 = vadd.f32 %v3487_v63, %v12780_v3  ;;  %v11739_v9 = vadd.f32 %v4106_v10, %v3617_v34  ;;  %v7808_v6 = vpop.f32.mrb[221].mxu1  ;;  %v7954_v13 = vpop.f32.mrb[221].mxu0  ;;  %v6490_v34 = vld [vmem:[%s12594_s0 + $0x389] sm:$0xff] }
 0x495   :  { %v3490_v55 = vpop.f32.mrb[222].mxu1  ;;  %v4109_v2 = vpop.f32.mrb[222].mxu0 }
 0x496   :  { %12781 = vst [vmem:[#allocation14_spill] sm:$0xff] %v11739_v9  ;;  %v3620_v50 = vadd.f32 %v3490_v55, %v12782_v20  ;;  %v11742_v7 = vadd.f32 %v4109_v2, %v3618_v31  ;;  %v7955_v41 = vpop.f32.mrb[223].mxu0  ;;  %v7809_v39 = vpop.f32.mrb[223].mxu1  ;;  %v6491_v31 = vld [vmem:[%s12594_s0 + $0x391] sm:$0xff]  ;;  %v12786_v55 = vld [vmem:[#allocation18_spill] sm:$0xff] }
 0x497   :  { %v4926_v39 = vld [vmem:[%s12594_s0 + $0x122] sm:$0xff]  ;;  %v4927_v41 = vld [vmem:[%s12594_s0 + $0x12a] sm:$0xff]  ;;  %v4356_v6 = vpack.c.bf16 %v6491_v31, %v6490_v34 }
 0x498   :  { %12783 = vst [vmem:[#allocation15_spill] sm:$0xff] %v11742_v7  ;;  %8067 = vmatmul.mubr.msk.bf16.gmra.mrb[72].mxu1 %vm239_vm3, %v4355_v32  ;;  %8213 = vmatmul.mubr.msk.bf16.gmra.mrb[72].mxu0 %vm239_vm3, %v4981_v18  ;;  %v4982_v13 = vpack.c.bf16 %v4927_v41, %v4926_v39  ;;  %v12788_v39 = vld [vmem:[#allocation19_spill] sm:$0xff] }
 0x499   :  { %8070 = vmatprep.mubr.msk.bf16.mxu1 %vm8304_vm2, %v12619_v1  ;;  %8216 = vmatprep.mubr.msk.bf16.mxu0 %vm8304_vm2, %v12619_v1 }
 0x49b   :  { %v3495_v25 = vpop.f32.mrb[224].mxu1  ;;  %v4114_v42 = vpop.f32.mrb[224].mxu0 }
 0x49c   :  { %v3621_v60 = vadd.f32 %v3495_v25, %v12784_v5  ;;  %v11763_v63 = vadd.f32 %v4114_v42, %v3619_v58  ;;  %v7812_v10 = vpop.f32.mrb[225].mxu1  ;;  %v7958_v3 = vpop.f32.mrb[225].mxu0  ;;  %v6492_v58 = vld [vmem:[%s12594_s0 + $0x399] sm:$0xff] }
 0x49d   :  { %v3498_v32 = vpop.f32.mrb[226].mxu1  ;;  %v4117_v18 = vpop.f32.mrb[226].mxu0 }
 0x49e   :  { %12785 = vst [vmem:[#allocation16_spill] sm:$0xff] %v11763_v63  ;;  %v3622_v2 = vadd.f32 %v3498_v32, %v12786_v55  ;;  %v11766_v20 = vadd.f32 %v4117_v18, %v3620_v50  ;;  %v7959_v7 = vpop.f32.mrb[227].mxu0  ;;  %v7813_v9 = vpop.f32.mrb[227].mxu1  ;;  %v6493_v50 = vld [vmem:[%s12594_s0 + $0x3a1] sm:$0xff]  ;;  %v12790_v32 = vld [vmem:[#allocation20_spill] sm:$0xff] }
 0x49f   :  { %v4928_v9 = vld [vmem:[%s12594_s0 + $0x132] sm:$0xff]  ;;  %v4929_v7 = vld [vmem:[%s12594_s0 + $0x13a] sm:$0xff]  ;;  %v4357_v10 = vpack.c.bf16 %v6493_v50, %v6492_v58 }
 0x4a0   :  { %12787 = vst [vmem:[#allocation17_spill] sm:$0xff] %v11766_v20  ;;  %8071 = vmatmul.mubr.msk.bf16.gmra.mrb[76].mxu1 %vm239_vm3, %v4356_v6  ;;  %8217 = vmatmul.mubr.msk.bf16.gmra.mrb[76].mxu0 %vm239_vm3, %v4982_v13  ;;  %v4983_v3 = vpack.c.bf16 %v4929_v7, %v4928_v9  ;;  %v12792_v9 = vld [vmem:[#allocation21_spill] sm:$0xff] }
 0x4a1   :  { %8074 = vmatprep.mubr.msk.bf16.mxu1 %vm8304_vm2, %v12619_v1  ;;  %8220 = vmatprep.mubr.msk.bf16.mxu0 %vm8304_vm2, %v12619_v1 }
 0x4a3   :  { %v3503_v34 = vpop.f32.mrb[228].mxu1  ;;  %v4122_v31 = vpop.f32.mrb[228].mxu0 }
 0x4a4   :  { %v3623_v41 = vadd.f32 %v3503_v34, %v12788_v39  ;;  %v11787_v25 = vadd.f32 %v4122_v31, %v3621_v60  ;;  %v7816_v42 = vpop.f32.mrb[229].mxu1  ;;  %v7962_v5 = vpop.f32.mrb[229].mxu0  ;;  %v6494_v60 = vld [vmem:[%s12594_s0 + $0x3a9] sm:$0xff] }
 0x4a5   :  { %v3506_v6 = vpop.f32.mrb[230].mxu1  ;;  %v4125_v13 = vpop.f32.mrb[230].mxu0 }
 0x4a6   :  { %12789 = vst [vmem:[#allocation18_spill] sm:$0xff] %v11787_v25  ;;  %v3624_v18 = vadd.f32 %v3506_v6, %v12790_v32  ;;  %v11790_v55 = vadd.f32 %v4125_v13, %v3622_v2  ;;  %v7963_v20 = vpop.f32.mrb[231].mxu0  ;;  %v7817_v63 = vpop.f32.mrb[231].mxu1  ;;  %v6495_v2 = vld [vmem:[%s12594_s0 + $0x3b1] sm:$0xff]  ;;  %v12794_v6 = vld [vmem:[#allocation22_spill] sm:$0xff] }
 0x4a7   :  { %v4930_v63 = vld [vmem:[%s12594_s0 + $0x142] sm:$0xff]  ;;  %v4931_v20 = vld [vmem:[%s12594_s0 + $0x14a] sm:$0xff]  ;;  %v4358_v42 = vpack.c.bf16 %v6495_v2, %v6494_v60 }
 0x4a8   :  { %12791 = vst [vmem:[#allocation19_spill] sm:$0xff] %v11790_v55  ;;  %8075 = vmatmul.mubr.msk.bf16.gmra.mrb[80].mxu1 %vm239_vm3, %v4357_v10  ;;  %8221 = vmatmul.mubr.msk.bf16.gmra.mrb[80].mxu0 %vm239_vm3, %v4983_v3  ;;  %v4984_v5 = vpack.c.bf16 %v4931_v20, %v4930_v63  ;;  %v12796_v63 = vld [vmem:[#allocation23_spill] sm:$0xff] }
 0x4a9   :  { %8078 = vmatprep.mubr.msk.bf16.mxu1 %vm8304_vm2, %v12619_v1  ;;  %8224 = vmatprep.mubr.msk.bf16.mxu0 %vm8304_vm2, %v12619_v1 }
 0x4ab   :  { %v3511_v58 = vpop.f32.mrb[232].mxu1  ;;  %v4130_v50 = vpop.f32.mrb[232].mxu0 }
 0x4ac   :  { %v3625_v7 = vadd.f32 %v3511_v58, %v12792_v9  ;;  %v11811_v34 = vadd.f32 %v4130_v50, %v3623_v41  ;;  %v7820_v31 = vpop.f32.mrb[233].mxu1  ;;  %v7966_v39 = vpop.f32.mrb[233].mxu0  ;;  %v6496_v41 = vld [vmem:[%s12594_s0 + $0x3b9] sm:$0xff] }
 0x4ad   :  { %v3514_v10 = vpop.f32.mrb[234].mxu1  ;;  %v4133_v3 = vpop.f32.mrb[234].mxu0 }
 0x4ae   :  { %12793 = vst [vmem:[#allocation20_spill] sm:$0xff] %v11811_v34  ;;  %v3626_v13 = vadd.f32 %v3514_v10, %v12794_v6  ;;  %v11814_v32 = vadd.f32 %v4133_v3, %v3624_v18  ;;  %v7967_v55 = vpop.f32.mrb[235].mxu0  ;;  %v7821_v25 = vpop.f32.mrb[235].mxu1  ;;  %v6497_v18 = vld [vmem:[%s12594_s0 + $0x3c1] sm:$0xff]  ;;  %v12797_v10 = vld [vmem:[#allocation24_spill] sm:$0xff] }
 0x4af   :  { %v4932_v25 = vld [vmem:[%s12594_s0 + $0x152] sm:$0xff]  ;;  %v4933_v55 = vld [vmem:[%s12594_s0 + $0x15a] sm:$0xff]  ;;  %v4359_v31 = vpack.c.bf16 %v6497_v18, %v6496_v41 }
 0x4b0   :  { %12795 = vst [vmem:[#allocation21_spill] sm:$0xff] %v11814_v32  ;;  %8079 = vmatmul.mubr.msk.bf16.gmra.mrb[84].mxu1 %vm239_vm3, %v4358_v42  ;;  %8225 = vmatmul.mubr.msk.bf16.gmra.mrb[84].mxu0 %vm239_vm3, %v4984_v5  ;;  %v4985_v39 = vpack.c.bf16 %v4933_v55, %v4932_v25 }
 0x4b1   :  { %8082 = vmatprep.mubr.msk.bf16.mxu1 %vm8304_vm2, %v12619_v1  ;;  %8228 = vmatprep.mubr.msk.bf16.mxu0 %vm8304_vm2, %v12619_v1 }
 0x4b3   :  { %v3519_v60 = vpop.f32.mrb[236].mxu1  ;;  %v4138_v2 = vpop.f32.mrb[236].mxu0 }
 0x4b4   :  { %v3627_v20 = vadd.f32 %v3519_v60, %v12796_v63  ;;  %v11835_v58 = vadd.f32 %v4138_v2, %v3625_v7  ;;  %v7824_v50 = vpop.f32.mrb[237].mxu1  ;;  %v7970_v9 = vpop.f32.mrb[237].mxu0  ;;  %v6498_v7 = vld [vmem:[%s12594_s0 + $0x3c9] sm:$0xff] }
 0x4b5   :  { %v3522_v42 = vpop.f32.mrb[238].mxu1  ;;  %v4141_v5 = vpop.f32.mrb[238].mxu0 }
 0x4b6   :  { %v3628_v3 = vadd.f32 %v3522_v42, %v12797_v10  ;;  %v11838_v6 = vadd.f32 %v4141_v5, %v3626_v13  ;;  %v7971_v32 = vpop.f32.mrb[239].mxu0  ;;  %v7825_v34 = vpop.f32.mrb[239].mxu1  ;;  %v6499_v13 = vld [vmem:[%s12594_s0 + $0x3d1] sm:$0xff] }
 0x4b7   :  { %v4934_v34 = vld [vmem:[%s12594_s0 + $0x162] sm:$0xff]  ;;  %v4935_v32 = vld [vmem:[%s12594_s0 + $0x16a] sm:$0xff]  ;;  %v4360_v63 = vpack.c.bf16 %v6499_v13, %v6498_v7 }
 0x4b8   :  { %8083 = vmatmul.mubr.msk.bf16.gmra.mrb[88].mxu1 %vm239_vm3, %v4359_v31  ;;  %8229 = vmatmul.mubr.msk.bf16.gmra.mrb[88].mxu0 %vm239_vm3, %v4985_v39  ;;  %v4986_v50 = vpack.c.bf16 %v4935_v32, %v4934_v34 }
 0x4b9   :  { %8086 = vmatprep.mubr.msk.bf16.mxu1 %vm8304_vm2, %v12619_v1  ;;  %8232 = vmatprep.mubr.msk.bf16.mxu0 %vm8304_vm2, %v12619_v1 }
 0x4bb   :  { %v3527_v41 = vpop.f32.mrb[240].mxu1  ;;  %v4146_v18 = vpop.f32.mrb[240].mxu0 }
 0x4bc   :  { %v3629_v25 = vadd.f32 %v3527_v41, %v11004_v37  ;;  %v11859_v55 = vadd.f32 %v4146_v18, %v3627_v20  ;;  %v7828_v60 = vpop.f32.mrb[241].mxu1  ;;  %v7974_v2 = vpop.f32.mrb[241].mxu0  ;;  %v6500_v37 = vld [vmem:[%s12594_s0 + $0x3d9] sm:$0xff] }
 0x4bd   :  { %v3530_v9 = vpop.f32.mrb[242].mxu1  ;;  %v4149_v31 = vpop.f32.mrb[242].mxu0  ;;  %v4936_v20 = vld [vmem:[%s12594_s0 + $0x172] sm:$0xff] }
 0x4be   :  { %v3630_v39 = vadd.f32 %v3530_v9, %v11007_v52  ;;  %v11862_v42 = vadd.f32 %v4149_v31, %v3628_v3  ;;  %v7975_v5 = vpop.f32.mrb[243].mxu0  ;;  %v7829_v10 = vpop.f32.mrb[243].mxu1  ;;  %v6501_v52 = vld [vmem:[%s12594_s0 + $0x3e1] sm:$0xff] }
 0x4bf   :  { %v4937_v3 = vld [vmem:[%s12594_s0 + $0x17a] sm:$0xff]  ;;  %v4361_v60 = vpack.c.bf16 %v6501_v52, %v6500_v37 }
 0x4c0   :  { %8087 = vmatmul.mubr.msk.bf16.gmra.mrb[92].mxu1 %vm239_vm3, %v4360_v63  ;;  %8233 = vmatmul.mubr.msk.bf16.gmra.mrb[92].mxu0 %vm239_vm3, %v4986_v50  ;;  %v4987_v2 = vpack.c.bf16 %v4937_v3, %v4936_v20 }
 0x4c1   :  { %8090 = vmatprep.mubr.msk.bf16.mxu1 %vm8304_vm2, %v12619_v1  ;;  %8236 = vmatprep.mubr.msk.bf16.mxu0 %vm8304_vm2, %v12619_v1 }
 0x4c3   :  { %v3535_v7 = vpop.f32.mrb[244].mxu1  ;;  %v4154_v13 = vpop.f32.mrb[244].mxu0 }
 0x4c4   :  { %v3631_v34 = vadd.f32 %v3535_v7, %v11028_v33  ;;  %v11883_v32 = vadd.f32 %v4154_v13, %v3629_v25  ;;  %v7832_v41 = vpop.f32.mrb[245].mxu1  ;;  %v7978_v18 = vpop.f32.mrb[245].mxu0  ;;  %v6502_v33 = vld [vmem:[%s12594_s0 + $0x3e9] sm:$0xff] }
 0x4c5   :  { %v3538_v63 = vpop.f32.mrb[246].mxu1  ;;  %v4157_v50 = vpop.f32.mrb[246].mxu0  ;;  %v4938_v25 = vld [vmem:[%s12594_s0 + $0x182] sm:$0xff] }
 0x4c6   :  { %v3632_v9 = vadd.f32 %v3538_v63, %v11031_v51  ;;  %v11886_v31 = vadd.f32 %v4157_v50, %v3630_v39  ;;  %v7979_v5 = vpop.f32.mrb[247].mxu0  ;;  %v7833_v10 = vpop.f32.mrb[247].mxu1  ;;  %v6503_v51 = vld [vmem:[%s12594_s0 + $0x3f1] sm:$0xff] }
 0x4c7   :  { %v4939_v39 = vld [vmem:[%s12594_s0 + $0x18a] sm:$0xff]  ;;  %v4362_v41 = vpack.c.bf16 %v6503_v51, %v6502_v33 }
 0x4c8   :  { %8091 = vmatmul.mubr.msk.bf16.gmra.mrb[96].mxu1 %vm239_vm3, %v4361_v60  ;;  %8237 = vmatmul.mubr.msk.bf16.gmra.mrb[96].mxu0 %vm239_vm3, %v4987_v2  ;;  %v4988_v18 = vpack.c.bf16 %v4939_v39, %v4938_v25 }
 0x4c9   :  { %8094 = vmatprep.mubr.msk.bf16.mxu1 %vm8304_vm2, %v12619_v1  ;;  %8240 = vmatprep.mubr.msk.bf16.mxu0 %vm8304_vm2, %v12619_v1 }
 0x4cb   :  { %v3543_v37 = vpop.f32.mrb[248].mxu1  ;;  %v4162_v52 = vpop.f32.mrb[248].mxu0 }
 0x4cc   :  { %v3633_v20 = vadd.f32 %v3543_v37, %v11052_v11  ;;  %v11907_v3 = vadd.f32 %v4162_v52, %v3631_v34  ;;  %v7836_v7 = vpop.f32.mrb[249].mxu1  ;;  %v7982_v13 = vpop.f32.mrb[249].mxu0  ;;  %v6504_v11 = vld [vmem:[%s12594_s0 + $0x3f9] sm:$0xff] }
 0x4cd   :  { %v3546_v60 = vpop.f32.mrb[250].mxu1  ;;  %v4165_v2 = vpop.f32.mrb[250].mxu0  ;;  %v4940_v34 = vld [vmem:[%s12594_s0 + $0x192] sm:$0xff] }
 0x4ce   :  { %v3634_v63 = vadd.f32 %v3546_v60, %v11055_v26  ;;  %v11910_v50 = vadd.f32 %v4165_v2, %v3632_v9  ;;  %v7983_v5 = vpop.f32.mrb[251].mxu0  ;;  %v7837_v10 = vpop.f32.mrb[251].mxu1  ;;  %v6505_v26 = vld [vmem:[%s12594_s0 + $0x401] sm:$0xff] }
 0x4cf   :  { %v4941_v9 = vld [vmem:[%s12594_s0 + $0x19a] sm:$0xff]  ;;  %v4363_v7 = vpack.c.bf16 %v6505_v26, %v6504_v11 }
 0x4d0   :  { %8095 = vmatmul.mubr.msk.bf16.gmra.mrb[100].mxu1 %vm239_vm3, %v4362_v41  ;;  %8241 = vmatmul.mubr.msk.bf16.gmra.mrb[100].mxu0 %vm239_vm3, %v4988_v18  ;;  %v4989_v13 = vpack.c.bf16 %v4941_v9, %v4940_v34  ;;  %v12800_v34 = vld [vmem:[#allocation25_spill] sm:$0xff] }
 0x4d1   :  { %8098 = vmatprep.mubr.msk.bf16.mxu1 %vm8304_vm2, %v12619_v1  ;;  %8244 = vmatprep.mubr.msk.bf16.mxu0 %vm8304_vm2, %v12619_v1 }
 0x4d3   :  { %v3551_v33 = vpop.f32.mrb[252].mxu1  ;;  %v4170_v51 = vpop.f32.mrb[252].mxu0 }
 0x4d4   :  { %v3635_v25 = vadd.f32 %v3551_v33, %v11076_v17  ;;  %v11931_v39 = vadd.f32 %v4170_v51, %v3633_v20  ;;  %v7840_v37 = vpop.f32.mrb[253].mxu1  ;;  %v7986_v52 = vpop.f32.mrb[253].mxu0  ;;  %v6506_v17 = vld [vmem:[%s12594_s0 + $0x409] sm:$0xff] }
 0x4d5   :  { %v3554_v41 = vpop.f32.mrb[254].mxu1  ;;  %v4173_v18 = vpop.f32.mrb[254].mxu0  ;;  %v4942_v20 = vld [vmem:[%s12594_s0 + $0x1a2] sm:$0xff] }
 0x4d6   :  { %12798 = vst [vmem:[#allocation22_spill] sm:$0xff] %v11931_v39  ;;  %v3636_v60 = vadd.f32 %v3554_v41, %v11078_v22  ;;  %v11934_v2 = vadd.f32 %v4173_v18, %v3634_v63  ;;  %v7987_v5 = vpop.f32.mrb[255].mxu0  ;;  %v7841_v10 = vpop.f32.mrb[255].mxu1  ;;  %v6507_v22 = vld [vmem:[%s12594_s0 + $0x411] sm:$0xff] }
 0x4d7   :  { %v4943_v63 = vld [vmem:[%s12594_s0 + $0x1aa] sm:$0xff]  ;;  %v4364_v52 = vpack.c.bf16 %v6507_v22, %v6506_v17  ;;  %v4945_v17 = vld [vmem:[%s12594_s0 + $0x1ba] sm:$0xff] }
 0x4d8   :  { %12799 = vst [vmem:[#allocation23_spill] sm:$0xff] %v11934_v2  ;;  %8099 = vmatmul.mubr.msk.bf16.gmra.mrb[104].mxu1 %vm239_vm3, %v4363_v7  ;;  %8245 = vmatmul.mubr.msk.bf16.gmra.mrb[104].mxu0 %vm239_vm3, %v4989_v13  ;;  %v4990_v7 = vpack.c.bf16 %v4943_v63, %v4942_v20 }
 0x4d9   :  { %8102 = vmatprep.mubr.msk.bf16.mxu1 %vm8304_vm2, %v12619_v1  ;;  %8248 = vmatprep.mubr.msk.bf16.mxu0 %vm8304_vm2, %v12619_v1 }
 0x4db   :  { %v3559_v11 = vpop.f32.mrb[0].mxu1  ;;  %v4178_v26 = vpop.f32.mrb[0].mxu0 }
 0x4dc   :  { %v3637_v9 = vadd.f32 %v3559_v11, %v12800_v34  ;;  %v11955_v33 = vadd.f32 %v4178_v26, %v3635_v25  ;;  %v7990_v51 = vpop.f32.mrb[1].mxu0  ;;  %v7844_v37 = vpop.f32.mrb[1].mxu1  ;;  %v6508_v11 = vld [vmem:[%s12594_s0 + $0x419] sm:$0xff]  ;;  %v6509_v25 = vld [vmem:[%s12594_s0 + $0x421] sm:$0xff] }
 0x4dd   :  { %v4181_v13 = vpop.f32.mrb[2].mxu0  ;;  %v3562_v41 = vpop.f32.mrb[2].mxu1  ;;  %v4365_v37 = vpack.c.bf16 %v6509_v25, %v6508_v11  ;;  %v4947_v11 = vld [vmem:[%s12594_s0 + $0x1ca] sm:$0xff] }
 0x4de   :  { %12801 = vst [vmem:[#allocation24_spill] sm:$0xff] %v11955_v33  ;;  %v11957_v18 = vadd.f32 %v4181_v13, %v3636_v60  ;;  %v7991_v5 = vpop.f32.mrb[3].mxu0  ;;  %v7845_v10 = vpop.f32.mrb[3].mxu1  ;;  %v4944_v60 = vld [vmem:[%s12594_s0 + $0x1b2] sm:$0xff] }
 0x4e0   :  { %12802 = vst [vmem:[#allocation25_spill] sm:$0xff] %v11957_v18  ;;  %8103 = vmatmul.mubr.msk.bf16.gmra.mrb[108].mxu1 %vm239_vm3, %v4364_v52  ;;  %8249 = vmatmul.mubr.msk.bf16.gmra.mrb[108].mxu0 %vm239_vm3, %v4990_v7  ;;  %v4991_v52 = vpack.c.bf16 %v4945_v17, %v4944_v60  ;;  %v12002_v17 = vld [vmem:[%s12595_s2] ss:$0 sm:$0xff] }
 0x4e1   :  { %8106 = vmatprep.mubr.msk.bf16.mxu1 %vm8304_vm2, %v12619_v1  ;;  %8252 = vmatprep.mubr.msk.bf16.mxu0 %vm8304_vm2, %v12619_v1 }
 0x4e3   :  { %v4186_v22 = vpop.f32.mrb[4].mxu0  ;;  %v4525_v20 = vpop.f32.mrb[4].mxu1 }
 0x4e4   :  { %v11977_v63 = vadd.f32 %v4186_v22, %v3637_v9  ;;  %v4819_v26 = vadd.f32 %v4525_v20, %v11121_v53  ;;  %v7994_v34 = vpop.f32.mrb[5].mxu0  ;;  %v8000_v51 = vpop.f32.mrb[5].mxu1  ;;  %v6510_v9 = vld [vmem:[%s12594_s0 + $0x429] sm:$0xff] }
 0x4e5   :  { %v4189_v7 = vpop.f32.mrb[6].mxu0  ;;  %v4528_v13 = vpop.f32.mrb[6].mxu1  ;;  %v4946_v53 = vld [vmem:[%s12594_s0 + $0x1c2] sm:$0xff] }
 0x4e6   :  { %12803 = vst [vmem:[#allocation33_spill] sm:$0xff] %v11977_v63  ;;  %v4820_v41 = vadd.f32 %v4528_v13, %v11124_v27  ;;  %v7995_v5 = vpop.f32.mrb[7].mxu0  ;;  %v8001_v10 = vpop.f32.mrb[7].mxu1  ;;  %v6511_v27 = vld [vmem:[%s12594_s0 + $0x431] sm:$0xff] }
 0x4e8   :  { %8107 = vmatmul.mubr.msk.bf16.gmra.mrb[112].mxu1 %vm239_vm3, %v4365_v37  ;;  %8253 = vmatmul.mubr.msk.bf16.gmra.mrb[112].mxu0 %vm239_vm3, %v4991_v52  ;;  %v4366_v37 = vpack.c.bf16 %v6511_v27, %v6510_v9  ;;  %v4992_v52 = vpack.c.bf16 %v4947_v11, %v4946_v53 }
 0x4e9   :  { %8110 = vmatprep.mubr.msk.bf16.mxu1 %vm8304_vm2, %v12619_v1  ;;  %8256 = vmatprep.mubr.msk.bf16.mxu0 %vm8304_vm2, %v12619_v1 }
 0x4eb   :  { %v4533_v25 = vpop.f32.mrb[8].mxu1  ;;  %v5152_v60 = vpop.f32.mrb[8].mxu0 }
 0x4ec   :  { %v4821_v22 = vadd.f32 %v4533_v25, %v11145_v38  ;;  %v5446_v20 = vadd.f32 %v5152_v60, %v4819_v26  ;;  %v8004_v34 = vpop.f32.mrb[9].mxu1  ;;  %v8150_v51 = vpop.f32.mrb[9].mxu0  ;;  %v6512_v38 = vld [vmem:[%s12594_s0 + $0x439] sm:$0xff] }
 0x4ed   :  { %v4536_v7 = vpop.f32.mrb[10].mxu1  ;;  %v5155_v13 = vpop.f32.mrb[10].mxu0 }
 0x4ee   :  { %v5526_v5 = vadd.f32 %v12002_v17, %v5446_v20  ;;  %v4822_v10 = vadd.f32 %v4536_v7, %v11148_v40  ;;  %v5447_v63 = vadd.f32 %v5155_v13, %v4820_v41  ;;  %v8151_v18 = vpop.f32.mrb[11].mxu0  ;;  %v8005_v33 = vpop.f32.mrb[11].mxu1  ;;  %v6513_v40 = vld [vmem:[%s12594_s0 + $0x441] sm:$0xff] }
 0x4ef   :  { %v4948_v33 = vld [vmem:[%s12594_s0 + $0x1d2] sm:$0xff]  ;;  %v4949_v18 = vld [vmem:[%s12594_s0 + $0x1da] sm:$0xff]  ;;  %v4367_v27 = vpack.c.bf16 %v6513_v40, %v6512_v38 }
 0x4f0   :  { %vm5599_vm4 = vcmp.ge.f32.partialorder %v5526_v5, 0.0  ;;  %v5672_v2 = vmul.f32 0.2, %v5526_v5  ;;  %v5527_v39 = vadd.f32 %v12002_v17, %v5447_v63  ;;  %8111 = vmatmul.mubr.msk.bf16.gmra.mrb[116].mxu1 %vm239_vm3, %v4366_v37  ;;  %8257 = vmatmul.mubr.msk.bf16.gmra.mrb[116].mxu0 %vm239_vm3, %v4992_v52  ;;  %v4993_v34 = vpack.c.bf16 %v4949_v18, %v4948_v33  ;;  %v6515_v38 = vld [vmem:[%s12594_s0 + $0x451] sm:$0xff] }
 0x4f1   :  { %8114 = vmatprep.mubr.msk.bf16.mxu1 %vm8304_vm2, %v12619_v1  ;;  %8260 = vmatprep.mubr.msk.bf16.mxu0 %vm8304_vm2, %v12619_v1 }
 0x4f2   :  { %v5745_v63 = vsel %vm5599_vm4, %v5526_v5, %v5672_v2  ;;  %vm5600_vm6 = vcmp.ge.f32.partialorder %v5527_v39, 0.0  ;;  %v5673_v26 = vmul.f32 0.2, %v5527_v39  ;;  %v6514_v5 = vld [vmem:[%s12594_s0 + $0x449] sm:$0xff] }
 0x4f3   :  { %5819 = vst.msk [vmem:[%s12596_s3] sm:$0xff] %vm5818_vm5, %v5745_v63  ;;  %v4541_v41 = vpop.f32.mrb[12].mxu1  ;;  %v5160_v9 = vpop.f32.mrb[12].mxu0 }
 0x4f4   :  { %v5746_v53 = vsel %vm5600_vm6, %v5527_v39, %v5673_v26  ;;  %v4823_v11 = vadd.f32 %v4541_v41, %v11169_v62  ;;  %v5448_v25 = vadd.f32 %v5160_v9, %v4821_v22  ;;  %v8008_v60 = vpop.f32.mrb[13].mxu1  ;;  %v8154_v20 = vpop.f32.mrb[13].mxu0  ;;  %v4368_v26 = vpack.c.bf16 %v6515_v38, %v6514_v5 }
 0x4f5   :  { %5820 = vst.msk [vmem:[%s12596_s3 + $0x8] sm:$0xff] %vm5818_vm5, %v5746_v53  ;;  %v4544_v2 = vpop.f32.mrb[14].mxu1  ;;  %v5163_v51 = vpop.f32.mrb[14].mxu0 }
 0x4f6   :  { %v5528_v37 = vadd.f32 %v12002_v17, %v5448_v25  ;;  %v4824_v52 = vadd.f32 %v4544_v2, %v11172_v44  ;;  %v5449_v7 = vadd.f32 %v5163_v51, %v4822_v10  ;;  %v8155_v13 = vpop.f32.mrb[15].mxu0  ;;  %v8009_v39 = vpop.f32.mrb[15].mxu1  ;;  %v4950_v44 = vld [vmem:[%s12594_s0 + $0x1e2] sm:$0xff]  ;;  %v4951_v10 = vld [vmem:[%s12594_s0 + $0x1ea] sm:$0xff] }
 0x4f7   :  { %v4994_v60 = vpack.c.bf16 %v4951_v10, %v4950_v44  ;;  %v6516_v39 = vld [vmem:[%s12594_s0 + $0x459] sm:$0xff] }
 0x4f8   :  { %vm5601_vm7 = vcmp.ge.f32.partialorder %v5528_v37, 0.0  ;;  %v5674_v62 = vmul.f32 0.2, %v5528_v37  ;;  %v5529_v22 = vadd.f32 %v12002_v17, %v5449_v7  ;;  %8115 = vmatmul.mubr.msk.bf16.gmra.mrb[120].mxu1 %vm239_vm3, %v4367_v27  ;;  %8261 = vmatmul.mubr.msk.bf16.gmra.mrb[120].mxu0 %vm239_vm3, %v4993_v34 }
 0x4f9   :  { %8118 = vmatprep.mubr.msk.bf16.mxu1 %vm8304_vm2, %v12619_v1  ;;  %8264 = vmatprep.mubr.msk.bf16.mxu0 %vm8304_vm2, %v12619_v1 }
 0x4fa   :  { %v5747_v40 = vsel %vm5601_vm7, %v5528_v37, %v5674_v62  ;;  %vm5602_vm8 = vcmp.ge.f32.partialorder %v5529_v22, 0.0  ;;  %v5675_v33 = vmul.f32 0.2, %v5529_v22  ;;  %v6517_v62 = vld [vmem:[%s12594_s0 + $0x461] sm:$0xff] }
 0x4fb   :  { %5821 = vst.msk [vmem:[%s12596_s3 + $0x10] sm:$0xff] %vm5818_vm5, %v5747_v40  ;;  %v4549_v18 = vpop.f32.mrb[16].mxu1  ;;  %v5168_v63 = vpop.f32.mrb[16].mxu0  ;;  %v4369_v10 = vpack.c.bf16 %v6517_v62, %v6516_v39 }
 0x4fc   :  { %v5748_v41 = vsel %vm5602_vm8, %v5529_v22, %v5675_v33  ;;  %v4825_v9 = vadd.f32 %v4549_v18, %v11193_v4  ;;  %v5450_v27 = vadd.f32 %v5168_v63, %v4823_v11  ;;  %v8012_v53 = vpop.f32.mrb[17].mxu1  ;;  %v8158_v25 = vpop.f32.mrb[17].mxu0 }
 0x4fd   :  { %5822 = vst.msk [vmem:[%s12596_s3 + $0x18] sm:$0xff] %vm5818_vm5, %v5748_v41  ;;  %v4552_v20 = vpop.f32.mrb[18].mxu1  ;;  %v5171_v34 = vpop.f32.mrb[18].mxu0 }
 0x4fe   :  { %v5530_v2 = vadd.f32 %v12002_v17, %v5450_v27  ;;  %v4826_v51 = vadd.f32 %v4552_v20, %v11196_v45  ;;  %v5451_v37 = vadd.f32 %v5171_v34, %v4824_v52  ;;  %v8159_v7 = vpop.f32.mrb[19].mxu0  ;;  %v8013_v13 = vpop.f32.mrb[19].mxu1  ;;  %v4952_v45 = vld [vmem:[%s12594_s0 + $0x1f2] sm:$0xff]  ;;  %v4953_v52 = vld [vmem:[%s12594_s0 + $0x1fa] sm:$0xff] }
 0x4ff   :  { %v4995_v41 = vpack.c.bf16 %v4953_v52, %v4952_v45  ;;  %v6518_v7 = vld [vmem:[%s12594_s0 + $0x469] sm:$0xff]  ;;  %v6519_v13 = vld [vmem:[%s12594_s0 + $0x471] sm:$0xff] }
 0x500   :  { %vm5603_vm9 = vcmp.ge.f32.partialorder %v5530_v2, 0.0  ;;  %v5676_v4 = vmul.f32 0.2, %v5530_v2  ;;  %v5531_v11 = vadd.f32 %v12002_v17, %v5451_v37  ;;  %8119 = vmatmul.mubr.msk.bf16.gmra.mrb[124].mxu1 %vm239_vm3, %v4368_v26  ;;  %8265 = vmatmul.mubr.msk.bf16.gmra.mrb[124].mxu0 %vm239_vm3, %v4994_v60  ;;  %v12804_v60 = vld [vmem:[#allocation26_spill] sm:$0xff]  ;;  %v4370_v52 = vpack.c.bf16 %v6519_v13, %v6518_v7 }
 0x501   :  { %8122 = vmatprep.mubr.msk.bf16.mxu1 %vm8304_vm2, %v12619_v1  ;;  %8268 = vmatprep.mubr.msk.bf16.mxu0 %vm8304_vm2, %v12619_v1 }
 0x502   :  { %v5749_v22 = vsel %vm5603_vm9, %v5530_v2, %v5676_v4  ;;  %vm5604_vm10 = vcmp.ge.f32.partialorder %v5531_v11, 0.0  ;;  %v5677_v5 = vmul.f32 0.2, %v5531_v11  ;;  %v4955_v4 = vld [vmem:[%s12594_s0 + $0x20a] sm:$0xff] }
 0x503   :  { %5823 = vst.msk [vmem:[%s12596_s3 + $0x20] sm:$0xff] %vm5818_vm5, %v5749_v22  ;;  %v4557_v38 = vpop.f32.mrb[20].mxu1  ;;  %v5176_v44 = vpop.f32.mrb[20].mxu0 }
 0x504   :  { %v5750_v40 = vsel %vm5604_vm10, %v5531_v11, %v5677_v5  ;;  %v4827_v33 = vadd.f32 %v4557_v38, %v11217_v54  ;;  %v5452_v18 = vadd.f32 %v5176_v44, %v4825_v9  ;;  %v8016_v63 = vpop.f32.mrb[21].mxu1  ;;  %v8162_v26 = vpop.f32.mrb[21].mxu0 }
 0x505   :  { %5824 = vst.msk [vmem:[%s12596_s3 + $0x28] sm:$0xff] %vm5818_vm5, %v5750_v40  ;;  %v4560_v27 = vpop.f32.mrb[22].mxu1  ;;  %v5179_v53 = vpop.f32.mrb[22].mxu0 }
 0x506   :  { %v5532_v25 = vadd.f32 %v12002_v17, %v5452_v18  ;;  %v4828_v20 = vadd.f32 %v4560_v27, %v12804_v60  ;;  %v5453_v34 = vadd.f32 %v5179_v53, %v4826_v51  ;;  %v8163_v2 = vpop.f32.mrb[23].mxu0  ;;  %v8017_v37 = vpop.f32.mrb[23].mxu1  ;;  %v4954_v51 = vld [vmem:[%s12594_s0 + $0x202] sm:$0xff]  ;;  %v6520_v60 = vld [vmem:[%s12594_s0 + $0x479] sm:$0xff] }
 0x507   :  { %v4996_v40 = vpack.c.bf16 %v4955_v4, %v4954_v51  ;;  %v12805_v51 = vld [vmem:[#allocation27_spill] sm:$0xff] }
 0x508   :  { %vm5605_vm11 = vcmp.ge.f32.partialorder %v5532_v25, 0.0  ;;  %v5678_v54 = vmul.f32 0.2, %v5532_v25  ;;  %v5533_v9 = vadd.f32 %v12002_v17, %v5453_v34  ;;  %8123 = vmatmul.mubr.msk.bf16.gmra.mrb[128].mxu1 %vm239_vm3, %v4369_v10  ;;  %8269 = vmatmul.mubr.msk.bf16.gmra.mrb[128].mxu0 %vm239_vm3, %v4995_v41  ;;  %v6521_v34 = vld [vmem:[%s12594_s0 + $0x481] sm:$0xff] }
 0x509   :  { %8126 = vmatprep.mubr.msk.bf16.mxu1 %vm8304_vm2, %v12619_v1  ;;  %8272 = vmatprep.mubr.msk.bf16.mxu0 %vm8304_vm2, %v12619_v1  ;;  %v4371_v7 = vpack.c.bf16 %v6521_v34, %v6520_v60 }
 0x50a   :  { %v5751_v11 = vsel %vm5605_vm11, %v5532_v25, %v5678_v54  ;;  %vm5606_vm12 = vcmp.ge.f32.partialorder %v5533_v9, 0.0  ;;  %v5679_v39 = vmul.f32 0.2, %v5533_v9 }
 0x50b   :  { %5825 = vst.msk [vmem:[%s12596_s3 + $0x30] sm:$0xff] %vm5818_vm5, %v5751_v11  ;;  %v4565_v62 = vpop.f32.mrb[24].mxu1  ;;  %v5184_v45 = vpop.f32.mrb[24].mxu0 }
 0x50c   :  { %v5752_v22 = vsel %vm5606_vm12, %v5533_v9, %v5679_v39  ;;  %v4829_v5 = vadd.f32 %v4565_v62, %v11241_v14  ;;  %v5454_v38 = vadd.f32 %v5184_v45, %v4827_v33  ;;  %v8020_v44 = vpop.f32.mrb[25].mxu1  ;;  %v8166_v10 = vpop.f32.mrb[25].mxu0 }
 0x50d   :  { %5826 = vst.msk [vmem:[%s12596_s3 + $0x38] sm:$0xff] %vm5818_vm5, %v5752_v22  ;;  %v4568_v18 = vpop.f32.mrb[26].mxu1  ;;  %v5187_v63 = vpop.f32.mrb[26].mxu0  ;;  %v12806_v44 = vld [vmem:[#allocation28_spill] sm:$0xff] }
 0x50e   :  { %v5534_v26 = vadd.f32 %v12002_v17, %v5454_v38  ;;  %v4830_v41 = vadd.f32 %v4568_v18, %v11244_v12  ;;  %v5455_v27 = vadd.f32 %v5187_v63, %v4828_v20  ;;  %v8167_v53 = vpop.f32.mrb[27].mxu0  ;;  %v8021_v25 = vpop.f32.mrb[27].mxu1  ;;  %v4956_v12 = vld [vmem:[%s12594_s0 + $0x212] sm:$0xff]  ;;  %v4957_v20 = vld [vmem:[%s12594_s0 + $0x21a] sm:$0xff] }
 0x50f   :  { %v4997_v45 = vpack.c.bf16 %v4957_v20, %v4956_v12  ;;  %v6523_v53 = vld [vmem:[%s12594_s0 + $0x491] sm:$0xff] }
 0x510   :  { %vm5607_vm13 = vcmp.ge.f32.partialorder %v5534_v26, 0.0  ;;  %v5680_v14 = vmul.f32 0.2, %v5534_v26  ;;  %v5535_v33 = vadd.f32 %v12002_v17, %v5455_v27  ;;  %8127 = vmatmul.mubr.msk.bf16.gmra.mrb[132].mxu1 %vm239_vm3, %v4370_v52  ;;  %8273 = vmatmul.mubr.msk.bf16.gmra.mrb[132].mxu0 %vm239_vm3, %v4996_v40  ;;  %v6522_v27 = vld [vmem:[%s12594_s0 + $0x489] sm:$0xff] }
 0x511   :  { %8130 = vmatprep.mubr.msk.bf16.mxu1 %vm8304_vm2, %v12619_v1  ;;  %8276 = vmatprep.mubr.msk.bf16.mxu0 %vm8304_vm2, %v12619_v1  ;;  %v4959_v25 = vld [vmem:[%s12594_s0 + $0x22a] sm:$0xff]  ;;  %v4372_v12 = vpack.c.bf16 %v6523_v53, %v6522_v27 }
 0x512   :  { %v5753_v2 = vsel %vm5607_vm13, %v5534_v26, %v5680_v14  ;;  %vm5608_vm14 = vcmp.ge.f32.partialorder %v5535_v33, 0.0  ;;  %v5681_v37 = vmul.f32 0.2, %v5535_v33 }
 0x513   :  { %5827 = vst.msk [vmem:[%s12596_s3 + $0x40] sm:$0xff] %vm5818_vm5, %v5753_v2  ;;  %v4573_v54 = vpop.f32.mrb[28].mxu1  ;;  %v5192_v9 = vpop.f32.mrb[28].mxu0 }
 0x514   :  { %v5754_v13 = vsel %vm5608_vm14, %v5535_v33, %v5681_v37  ;;  %v4831_v4 = vadd.f32 %v4573_v54, %v12805_v51  ;;  %v5456_v11 = vadd.f32 %v5192_v9, %v4829_v5  ;;  %v8024_v39 = vpop.f32.mrb[29].mxu1  ;;  %v8170_v62 = vpop.f32.mrb[29].mxu0 }
 0x515   :  { %5828 = vst.msk [vmem:[%s12596_s3 + $0x48] sm:$0xff] %vm5818_vm5, %v5754_v13  ;;  %v4576_v52 = vpop.f32.mrb[30].mxu1  ;;  %v5195_v22 = vpop.f32.mrb[30].mxu0 }
 0x516   :  { %v5536_v38 = vadd.f32 %v12002_v17, %v5456_v11  ;;  %v4832_v10 = vadd.f32 %v4576_v52, %v12806_v44  ;;  %v5457_v40 = vadd.f32 %v5195_v22, %v4830_v41  ;;  %v8171_v18 = vpop.f32.mrb[31].mxu0  ;;  %v8025_v63 = vpop.f32.mrb[31].mxu1  ;;  %v4958_v41 = vld [vmem:[%s12594_s0 + $0x222] sm:$0xff]  ;;  %v6524_v22 = vld [vmem:[%s12594_s0 + $0x499] sm:$0xff] }
 0x517   :  { %v4961_v44 = vld [vmem:[%s12594_s0 + $0x23a] sm:$0xff] }
 0x518   :  { %vm5609_vm15 = vcmp.ge.f32.partialorder %v5536_v38, 0.0  ;;  %v5682_v26 = vmul.f32 0.2, %v5536_v38  ;;  %v5537_v5 = vadd.f32 %v12002_v17, %v5457_v40  ;;  %8131 = vmatmul.mubr.msk.bf16.gmra.mrb[136].mxu1 %vm239_vm3, %v4371_v7  ;;  %8277 = vmatmul.mubr.msk.bf16.gmra.mrb[136].mxu0 %vm239_vm3, %v4997_v45  ;;  %v4998_v7 = vpack.c.bf16 %v4959_v25, %v4958_v41 }
 0x519   :  { %8134 = vmatprep.mubr.msk.bf16.mxu1 %vm8304_vm2, %v12619_v1  ;;  %8280 = vmatprep.mubr.msk.bf16.mxu0 %vm8304_vm2, %v12619_v1 }
 0x51a   :  { %v5755_v14 = vsel %vm5609_vm15, %v5536_v38, %v5682_v26  ;;  %vm5610_vm0 = vcmp.ge.f32.partialorder %v5537_v5, 0.0  ;;  %v5683_v33 = vmul.f32 0.2, %v5537_v5  ;;  %v6525_v38 = vld [vmem:[%s12594_s0 + $0x4a1] sm:$0xff] }
 0x51b   :  { %5829 = vst.msk [vmem:[%s12596_s3 + $0x50] sm:$0xff] %vm5818_vm5, %v5755_v14  ;;  %v4581_v60 = vpop.f32.mrb[32].mxu1  ;;  %v5200_v34 = vpop.f32.mrb[32].mxu0  ;;  %v4373_v26 = vpack.c.bf16 %v6525_v38, %v6524_v22 }
 0x51c   :  { %v5756_v20 = vsel %vm5610_vm0, %v5537_v5, %v5683_v33  ;;  %v4833_v2 = vadd.f32 %v4581_v60, %v11289_v30  ;;  %v5458_v37 = vadd.f32 %v5200_v34, %v4831_v4  ;;  %v8028_v54 = vpop.f32.mrb[33].mxu1  ;;  %v8174_v9 = vpop.f32.mrb[33].mxu0 }
 0x51d   :  { %5830 = vst.msk [vmem:[%s12596_s3 + $0x58] sm:$0xff] %vm5818_vm5, %v5756_v20  ;;  %v4584_v13 = vpop.f32.mrb[34].mxu1  ;;  %v5203_v51 = vpop.f32.mrb[34].mxu0  ;;  %v6526_v9 = vld [vmem:[%s12594_s0 + $0x4a9] sm:$0x3] }
 0x51e   :  { %v5538_v11 = vadd.f32 %v12002_v17, %v5458_v37  ;;  %v4834_v39 = vadd.f32 %v4584_v13, %v11292_v19  ;;  %v5459_v62 = vadd.f32 %v5203_v51, %v4832_v10  ;;  %v8175_v45 = vpop.f32.mrb[35].mxu0  ;;  %v8029_v52 = vpop.f32.mrb[35].mxu1  ;;  %v4960_v19 = vld [vmem:[%s12594_s0 + $0x232] sm:$0xff] }
 0x51f   :  { %v4999_v14 = vpack.c.bf16 %v4961_v44, %v4960_v19 }
 0x520   :  { %vm5611_vm1 = vcmp.ge.f32.partialorder %v5538_v11, 0.0  ;;  %v5684_v30 = vmul.f32 0.2, %v5538_v11  ;;  %v5539_v4 = vadd.f32 %v12002_v17, %v5459_v62  ;;  %8135 = vmatmul.mubr.msk.bf16.gmra.mrb[140].mxu1 %vm239_vm3, %v4372_v12  ;;  %8281 = vmatmul.mubr.msk.bf16.gmra.mrb[140].mxu0 %vm239_vm3, %v4998_v7  ;;  %v4963_v7 = vld [vmem:[%s12594_s0 + $0x24a] sm:$0xff]  ;;  %v4374_v62 = vpack.c.bf16 %v6526_v9, %v6526_v9 }
 0x521   :  { %8138 = vmatprep.mubr.msk.bf16.mxu1 %vm8304_vm2, %v12619_v1  ;;  %8284 = vmatprep.mubr.msk.bf16.mxu0 %vm8304_vm2, %v12619_v1 }
 0x522   :  { %v5757_v10 = vsel %vm5611_vm1, %v5538_v11, %v5684_v30  ;;  %vm5612_vm4 = vcmp.ge.f32.partialorder %v5539_v4, 0.0  ;;  %v5685_v40 = vmul.f32 0.2, %v5539_v4 }
 0x523   :  { %5831 = vst.msk [vmem:[%s12596_s3 + $0x60] sm:$0xff] %vm5818_vm5, %v5757_v10  ;;  %v4589_v18 = vpop.f32.mrb[36].mxu1  ;;  %v5208_v63 = vpop.f32.mrb[36].mxu0 }
 0x524   :  { %v5758_v5 = vsel %vm5612_vm4, %v5539_v4, %v5685_v40  ;;  %v4835_v27 = vadd.f32 %v4589_v18, %v11310_v24  ;;  %v5460_v53 = vadd.f32 %v5208_v63, %v4833_v2  ;;  %v8032_v41 = vpop.f32.mrb[37].mxu1  ;;  %v8178_v25 = vpop.f32.mrb[37].mxu0  ;;  %v12807_v40 = vld [vmem:[#allocation29_spill] sm:$0xff] }
 0x525   :  { %5832 = vst.msk [vmem:[%s12596_s3 + $0x68] sm:$0xff] %vm5818_vm5, %v5758_v5  ;;  %v4592_v33 = vpop.f32.mrb[38].mxu1  ;;  %v5211_v60 = vpop.f32.mrb[38].mxu0 }
 0x526   :  { %v5540_v34 = vadd.f32 %v12002_v17, %v5460_v53  ;;  %v4836_v12 = vadd.f32 %v4592_v33, %v11313_v21  ;;  %v5461_v20 = vadd.f32 %v5211_v60, %v4834_v39  ;;  %v8179_v37 = vpop.f32.mrb[39].mxu0  ;;  %v8033_v54 = vpop.f32.mrb[39].mxu1  ;;  %v4962_v21 = vld [vmem:[%s12594_s0 + $0x242] sm:$0xff]  ;;  %v4964_v53 = vld [vmem:[%s12594_s0 + $0x252] sm:$0x3] }
 0x527   :  { %v5000_v38 = vpack.c.bf16 %v4963_v7, %v4962_v21  ;;  %v5001_v37 = vpack.c.bf16 %v4964_v53, %v4964_v53 }
 0x528   :  { %vm5613_vm6 = vcmp.ge.f32.partialorder %v5540_v34, 0.0  ;;  %v5686_v24 = vmul.f32 0.2, %v5540_v34  ;;  %v5541_v2 = vadd.f32 %v12002_v17, %v5461_v20  ;;  %8139 = vmatmul.mubr.msk.bf16.gmra.mrb[144].mxu1 %vm239_vm3, %v4373_v26  ;;  %8285 = vmatmul.mubr.msk.bf16.gmra.mrb[144].mxu0 %vm239_vm3, %v4999_v14 }
 0x529   :  { %8142 = vmatprep.mubr.msk.bf16.mxu1 %vm8304_vm2, %v12619_v1  ;;  %8288 = vmatprep.mubr.msk.bf16.mxu0 %vm8304_vm2, %v12619_v1 }
 0x52a   :  { %v5759_v13 = vsel %vm5613_vm6, %v5540_v34, %v5686_v24  ;;  %vm5614_vm7 = vcmp.ge.f32.partialorder %v5541_v2, 0.0  ;;  %v5687_v51 = vmul.f32 0.2, %v5541_v2 }
 0x52b   :  { %5833 = vst.msk [vmem:[%s12596_s3 + $0x70] sm:$0xff] %vm5818_vm5, %v5759_v13  ;;  %v4597_v11 = vpop.f32.mrb[40].mxu1  ;;  %v5216_v39 = vpop.f32.mrb[40].mxu0 }
 0x52c   :  { %v5760_v45 = vsel %vm5614_vm7, %v5541_v2, %v5687_v51  ;;  %v4837_v52 = vadd.f32 %v4597_v11, %v11331_v59  ;;  %v5462_v30 = vadd.f32 %v5216_v39, %v4835_v27  ;;  %v8036_v4 = vpop.f32.mrb[41].mxu1  ;;  %v8182_v22 = vpop.f32.mrb[41].mxu0 }
 0x52d   :  { %5834 = vst.msk [vmem:[%s12596_s3 + $0x78] sm:$0xff] %vm5818_vm5, %v5760_v45  ;;  %v4600_v19 = vpop.f32.mrb[42].mxu1  ;;  %v5219_v44 = vpop.f32.mrb[42].mxu0 }
 0x52e   :  { %v5542_v10 = vadd.f32 %v12002_v17, %v5462_v30  ;;  %v4838_v18 = vadd.f32 %v4600_v19, %v12807_v40  ;;  %v5463_v63 = vadd.f32 %v5219_v44, %v4836_v12  ;;  %v8183_v26 = vpop.f32.mrb[43].mxu0  ;;  %v8037_v5 = vpop.f32.mrb[43].mxu1 }
 0x530   :  { %vm5615_vm8 = vcmp.ge.f32.partialorder %v5542_v10, 0.0  ;;  %v5688_v59 = vmul.f32 0.2, %v5542_v10  ;;  %v5543_v27 = vadd.f32 %v12002_v17, %v5463_v63  ;;  %8143 = vmatmul.mubr.msk.bf16.gmra.mrb[148].mxu1 %vm239_vm3, %v4374_v62  ;;  %8289 = vmatmul.mubr.msk.bf16.gmra.mrb[148].mxu0 %vm239_vm3, %v5000_v38 }
 0x531   :  { %8292 = vmatprep.mubr.msk.bf16.mxu0 %vm8304_vm2, %v12619_v1 }
 0x532   :  { %v5761_v41 = vsel %vm5615_vm8, %v5542_v10, %v5688_v59  ;;  %vm5616_vm9 = vcmp.ge.f32.partialorder %v5543_v27, 0.0  ;;  %v5689_v25 = vmul.f32 0.2, %v5543_v27 }
 0x533   :  { %5835 = vst.msk [vmem:[%s12596_s3 + $0x80] sm:$0xff] %vm5818_vm5, %v5761_v41  ;;  %v4605_v14 = vpop.f32.mrb[44].mxu1  ;;  %v5224_v33 = vpop.f32.mrb[44].mxu0 }
 0x534   :  { %v5762_v60 = vsel %vm5616_vm9, %v5543_v27, %v5689_v25  ;;  %v4839_v34 = vadd.f32 %v4605_v14, %v11355_v29  ;;  %v5464_v12 = vadd.f32 %v5224_v33, %v4837_v52  ;;  %v8040_v20 = vpop.f32.mrb[45].mxu1  ;;  %v8186_v1 = vpop.f32.mrb[45].mxu0 }
 0x535   :  { %5836 = vst.msk [vmem:[%s12596_s3 + $0x88] sm:$0xff] %vm5818_vm5, %v5762_v60  ;;  %v4608_v54 = vpop.f32.mrb[46].mxu1  ;;  %v5227_v24 = vpop.f32.mrb[46].mxu0 }
 0x536   :  { %v5544_v2 = vadd.f32 %v12002_v17, %v5464_v12  ;;  %v4840_v9 = vadd.f32 %v4608_v54, %v11358_v43  ;;  %v5465_v21 = vadd.f32 %v5227_v24, %v4838_v18  ;;  %v8187_v7 = vpop.f32.mrb[47].mxu0  ;;  %v8041_v13 = vpop.f32.mrb[47].mxu1 }
 0x538   :  { %vm5617_vm2 = vcmp.ge.f32.partialorder %v5544_v2, 0.0  ;;  %v5690_v29 = vmul.f32 0.2, %v5544_v2  ;;  %v5545_v51 = vadd.f32 %v12002_v17, %v5465_v21  ;;  %8293 = vmatmul.mubr.msk.bf16.gmra.mrb[152].mxu0 %vm239_vm3, %v5001_v37 }
 0x53a   :  { %v5763_v11 = vsel %vm5617_vm2, %v5544_v2, %v5690_v29  ;;  %vm5618_vm10 = vcmp.ge.f32.partialorder %v5545_v51, 0.0  ;;  %v5691_v39 = vmul.f32 0.2, %v5545_v51 }
 0x53b   :  { %5837 = vst.msk [vmem:[%s12596_s3 + $0x90] sm:$0xff] %vm5818_vm5, %v5763_v11  ;;  %v4613_v62 = vpop.f32.mrb[48].mxu1  ;;  %v5232_v45 = vpop.f32.mrb[48].mxu0 }
 0x53c   :  { %v5764_v43 = vsel %vm5618_vm10, %v5545_v51, %v5691_v39  ;;  %v4841_v52 = vadd.f32 %v4613_v62, %v11379_v15  ;;  %v5466_v30 = vadd.f32 %v5232_v45, %v4839_v34  ;;  %v8044_v4 = vpop.f32.mrb[49].mxu1  ;;  %v8190_v22 = vpop.f32.mrb[49].mxu0 }
 0x53d   :  { %5838 = vst.msk [vmem:[%s12596_s3 + $0x98] sm:$0xff] %vm5818_vm5, %v5764_v43  ;;  %v4616_v38 = vpop.f32.mrb[50].mxu1  ;;  %v5235_v19 = vpop.f32.mrb[50].mxu0 }
 0x53e   :  { %v5546_v44 = vadd.f32 %v12002_v17, %v5466_v30  ;;  %v4842_v10 = vadd.f32 %v4616_v38, %v11382_v28  ;;  %v5467_v40 = vadd.f32 %v5235_v19, %v4840_v9  ;;  %v8191_v18 = vpop.f32.mrb[51].mxu0  ;;  %v8045_v63 = vpop.f32.mrb[51].mxu1 }
 0x540   :  { %vm5619_vm3 = vcmp.ge.f32.partialorder %v5546_v44, 0.0  ;;  %v5692_v26 = vmul.f32 0.2, %v5546_v44  ;;  %v5547_v15 = vadd.f32 %v12002_v17, %v5467_v40 }
 0x542   :  { %v5765_v5 = vsel %vm5619_vm3, %v5546_v44, %v5692_v26  ;;  %vm5620_vm11 = vcmp.ge.f32.partialorder %v5547_v15, 0.0  ;;  %v5693_v59 = vmul.f32 0.2, %v5547_v15 }
 0x543   :  { %5839 = vst.msk [vmem:[%s12596_s3 + $0xa0] sm:$0xff] %vm5818_vm5, %v5765_v5  ;;  %v4621_v27 = vpop.f32.mrb[52].mxu1  ;;  %v5240_v53 = vpop.f32.mrb[52].mxu0 }
 0x544   :  { %v5766_v41 = vsel %vm5620_vm11, %v5547_v15, %v5693_v59  ;;  %v4843_v28 = vadd.f32 %v4621_v27, %v11403_v57  ;;  %v5468_v25 = vadd.f32 %v5240_v53, %v4841_v52  ;;  %v8048_v14 = vpop.f32.mrb[53].mxu1  ;;  %v8194_v33 = vpop.f32.mrb[53].mxu0 }
 0x545   :  { %5840 = vst.msk [vmem:[%s12596_s3 + $0xa8] sm:$0xff] %vm5818_vm5, %v5766_v41  ;;  %v4624_v60 = vpop.f32.mrb[54].mxu1  ;;  %v5243_v34 = vpop.f32.mrb[54].mxu0 }
 0x546   :  { %v5548_v12 = vadd.f32 %v12002_v17, %v5468_v25  ;;  %v4844_v20 = vadd.f32 %v4624_v60, %v11406_v47  ;;  %v5469_v1 = vadd.f32 %v5243_v34, %v4842_v10  ;;  %v8195_v37 = vpop.f32.mrb[55].mxu0  ;;  %v8049_v54 = vpop.f32.mrb[55].mxu1 }
 0x548   :  { %vm5621_vm12 = vcmp.ge.f32.partialorder %v5548_v12, 0.0  ;;  %v5694_v24 = vmul.f32 0.2, %v5548_v12  ;;  %v5549_v57 = vadd.f32 %v12002_v17, %v5469_v1 }
 0x54a   :  { %v5767_v2 = vsel %vm5621_vm12, %v5548_v12, %v5694_v24  ;;  %vm5622_vm13 = vcmp.ge.f32.partialorder %v5549_v57, 0.0  ;;  %v5695_v9 = vmul.f32 0.2, %v5549_v57 }
 0x54b   :  { %5841 = vst.msk [vmem:[%s12596_s3 + $0xb0] sm:$0xff] %vm5818_vm5, %v5767_v2  ;;  %v4629_v21 = vpop.f32.mrb[56].mxu1  ;;  %v5248_v7 = vpop.f32.mrb[56].mxu0 }
 0x54c   :  { %v5768_v13 = vsel %vm5622_vm13, %v5549_v57, %v5695_v9  ;;  %v4845_v47 = vadd.f32 %v4629_v21, %v11427_v23  ;;  %v5470_v29 = vadd.f32 %v5248_v7, %v4843_v28  ;;  %v8052_v51 = vpop.f32.mrb[57].mxu1  ;;  %v8198_v11 = vpop.f32.mrb[57].mxu0 }
 0x54d   :  { %5842 = vst.msk [vmem:[%s12596_s3 + $0xb8] sm:$0xff] %vm5818_vm5, %v5768_v13  ;;  %v4632_v39 = vpop.f32.mrb[58].mxu1  ;;  %v5251_v62 = vpop.f32.mrb[58].mxu0 }
 0x54e   :  { %v5550_v45 = vadd.f32 %v12002_v17, %v5470_v29  ;;  %v4846_v43 = vadd.f32 %v4632_v39, %v11430_v48  ;;  %v5471_v52 = vadd.f32 %v5251_v62, %v4844_v20  ;;  %v8199_v30 = vpop.f32.mrb[59].mxu0  ;;  %v8053_v4 = vpop.f32.mrb[59].mxu1 }
 0x550   :  { %vm5623_vm14 = vcmp.ge.f32.partialorder %v5550_v45, 0.0  ;;  %v5696_v22 = vmul.f32 0.2, %v5550_v45  ;;  %v5551_v23 = vadd.f32 %v12002_v17, %v5471_v52 }
 0x552   :  { %v5769_v38 = vsel %vm5623_vm14, %v5550_v45, %v5696_v22  ;;  %vm5624_vm15 = vcmp.ge.f32.partialorder %v5551_v23, 0.0  ;;  %v5697_v19 = vmul.f32 0.2, %v5551_v23 }
 0x553   :  { %5843 = vst.msk [vmem:[%s12596_s3 + $0xc0] sm:$0xff] %vm5818_vm5, %v5769_v38  ;;  %v4637_v44 = vpop.f32.mrb[60].mxu1  ;;  %v5256_v10 = vpop.f32.mrb[60].mxu0 }
 0x554   :  { %v5770_v40 = vsel %vm5624_vm15, %v5551_v23, %v5697_v19  ;;  %v4847_v48 = vadd.f32 %v4637_v44, %v11451_v35  ;;  %v5472_v18 = vadd.f32 %v5256_v10, %v4845_v47  ;;  %v8056_v63 = vpop.f32.mrb[61].mxu1  ;;  %v8202_v26 = vpop.f32.mrb[61].mxu0 }
 0x555   :  { %5844 = vst.msk [vmem:[%s12596_s3 + $0xc8] sm:$0xff] %vm5818_vm5, %v5770_v40  ;;  %v4640_v15 = vpop.f32.mrb[62].mxu1  ;;  %v5259_v5 = vpop.f32.mrb[62].mxu0 }
 0x556   :  { %v5552_v59 = vadd.f32 %v12002_v17, %v5472_v18  ;;  %v4848_v27 = vadd.f32 %v4640_v15, %v11454_v61  ;;  %v5473_v53 = vadd.f32 %v5259_v5, %v4846_v43  ;;  %v8203_v41 = vpop.f32.mrb[63].mxu0  ;;  %v8057_v28 = vpop.f32.mrb[63].mxu1 }
 0x558   :  { %vm5625_vm0 = vcmp.ge.f32.partialorder %v5552_v59, 0.0  ;;  %v5698_v25 = vmul.f32 0.2, %v5552_v59  ;;  %v5553_v35 = vadd.f32 %v12002_v17, %v5473_v53 }
 0x55a   :  { %v5771_v14 = vsel %vm5625_vm0, %v5552_v59, %v5698_v25  ;;  %vm5626_vm1 = vcmp.ge.f32.partialorder %v5553_v35, 0.0  ;;  %v5699_v33 = vmul.f32 0.2, %v5553_v35 }
 0x55b   :  { %5845 = vst.msk [vmem:[%s12596_s3 + $0xd0] sm:$0xff] %vm5818_vm5, %v5771_v14  ;;  %v4645_v60 = vpop.f32.mrb[64].mxu1  ;;  %v5264_v34 = vpop.f32.mrb[64].mxu0 }
 0x55c   :  { %v5772_v12 = vsel %vm5626_vm1, %v5553_v35, %v5699_v33  ;;  %v4849_v61 = vadd.f32 %v4645_v60, %v11475_v0  ;;  %v5474_v20 = vadd.f32 %v5264_v34, %v4847_v48  ;;  %v8060_v1 = vpop.f32.mrb[65].mxu1  ;;  %v8206_v37 = vpop.f32.mrb[65].mxu0 }
 0x55d   :  { %5846 = vst.msk [vmem:[%s12596_s3 + $0xd8] sm:$0xff] %vm5818_vm5, %v5772_v12  ;;  %v4648_v54 = vpop.f32.mrb[66].mxu1  ;;  %v5267_v24 = vpop.f32.mrb[66].mxu0 }
 0x55e   :  { %v5554_v57 = vadd.f32 %v12002_v17, %v5474_v20  ;;  %v4850_v2 = vadd.f32 %v4648_v54, %v11478_v16  ;;  %v5475_v9 = vadd.f32 %v5267_v24, %v4848_v27  ;;  %v8207_v21 = vpop.f32.mrb[67].mxu0  ;;  %v8061_v7 = vpop.f32.mrb[67].mxu1 }
 0x560   :  { %vm5627_vm4 = vcmp.ge.f32.partialorder %v5554_v57, 0.0  ;;  %v5700_v13 = vmul.f32 0.2, %v5554_v57  ;;  %v5555_v0 = vadd.f32 %v12002_v17, %v5475_v9 }
 0x562   :  { %v5773_v47 = vsel %vm5627_vm4, %v5554_v57, %v5700_v13  ;;  %vm5628_vm6 = vcmp.ge.f32.partialorder %v5555_v0, 0.0  ;;  %v5701_v29 = vmul.f32 0.2, %v5555_v0 }
 0x563   :  { %5847 = vst.msk [vmem:[%s12596_s3 + $0xe0] sm:$0xff] %vm5818_vm5, %v5773_v47  ;;  %v4653_v51 = vpop.f32.mrb[68].mxu1  ;;  %v5272_v11 = vpop.f32.mrb[68].mxu0 }
 0x564   :  { %v5774_v39 = vsel %vm5628_vm6, %v5555_v0, %v5701_v29  ;;  %v4851_v16 = vadd.f32 %v4653_v51, %v11499_v49  ;;  %v5476_v62 = vadd.f32 %v5272_v11, %v4849_v61  ;;  %v8064_v45 = vpop.f32.mrb[69].mxu1  ;;  %v8210_v43 = vpop.f32.mrb[69].mxu0 }
 0x565   :  { %5848 = vst.msk [vmem:[%s12596_s3 + $0xe8] sm:$0xff] %vm5818_vm5, %v5774_v39  ;;  %v4656_v52 = vpop.f32.mrb[70].mxu1  ;;  %v5275_v30 = vpop.f32.mrb[70].mxu0 }
 0x566   :  { %v5556_v4 = vadd.f32 %v12002_v17, %v5476_v62  ;;  %v4852_v22 = vadd.f32 %v4656_v52, %v11502_v46  ;;  %v5477_v23 = vadd.f32 %v5275_v30, %v4850_v2  ;;  %v8211_v38 = vpop.f32.mrb[71].mxu0  ;;  %v8065_v19 = vpop.f32.mrb[71].mxu1  ;;  %v12808_v2 = vld [vmem:[#allocation30_spill] sm:$0xff] }
 0x568   :  { %vm5629_vm7 = vcmp.ge.f32.partialorder %v5556_v4, 0.0  ;;  %v5702_v44 = vmul.f32 0.2, %v5556_v4  ;;  %v5557_v49 = vadd.f32 %v12002_v17, %v5477_v23  ;;  %v12810_v23 = vld [vmem:[#allocation32_spill] sm:$0xff] }
 0x56a   :  { %v5775_v10 = vsel %vm5629_vm7, %v5556_v4, %v5702_v44  ;;  %vm5630_vm8 = vcmp.ge.f32.partialorder %v5557_v49, 0.0  ;;  %v5703_v40 = vmul.f32 0.2, %v5557_v49 }
 0x56b   :  { %5849 = vst.msk [vmem:[%s12596_s3 + $0xf0] sm:$0xff] %vm5818_vm5, %v5775_v10  ;;  %v4661_v48 = vpop.f32.mrb[72].mxu1  ;;  %v5280_v18 = vpop.f32.mrb[72].mxu0 }
 0x56c   :  { %v5776_v63 = vsel %vm5630_vm8, %v5557_v49, %v5703_v40  ;;  %v4853_v46 = vadd.f32 %v4661_v48, %v11523_v8  ;;  %v5478_v26 = vadd.f32 %v5280_v18, %v4851_v16  ;;  %v8068_v15 = vpop.f32.mrb[73].mxu1  ;;  %v8214_v5 = vpop.f32.mrb[73].mxu0  ;;  %v12809_v16 = vld [vmem:[#allocation31_spill] sm:$0xff] }
 0x56d   :  { %5850 = vst.msk [vmem:[%s12596_s3 + $0xf8] sm:$0xff] %vm5818_vm5, %v5776_v63  ;;  %v4664_v59 = vpop.f32.mrb[74].mxu1  ;;  %v5283_v27 = vpop.f32.mrb[74].mxu0  ;;  %v12811_v15 = vld [vmem:[#allocation2_spill] sm:$0xff] }
 0x56e   :  { %v5558_v53 = vadd.f32 %v12002_v17, %v5478_v26  ;;  %v4854_v41 = vadd.f32 %v4664_v59, %v11526_v36  ;;  %v5479_v28 = vadd.f32 %v5283_v27, %v4852_v22  ;;  %v8215_v25 = vpop.f32.mrb[75].mxu0  ;;  %v8069_v35 = vpop.f32.mrb[75].mxu1 }
 0x56f   :  { %v12812_v35 = vld [vmem:[#allocation3_spill] sm:$0xff] }
 0x570   :  { %vm5631_vm9 = vcmp.ge.f32.partialorder %v5558_v53, 0.0  ;;  %v5704_v14 = vmul.f32 0.2, %v5558_v53  ;;  %v5559_v8 = vadd.f32 %v12002_v17, %v5479_v28  ;;  %v12385_v28 = vld [vmem:[%s12595_s2] ss:$0 sm:$0xff] }
 0x572   :  { %v5777_v33 = vsel %vm5631_vm9, %v5558_v53, %v5704_v14  ;;  %vm5632_vm2 = vcmp.ge.f32.partialorder %v5559_v8, 0.0  ;;  %v5705_v60 = vmul.f32 0.2, %v5559_v8 }
 0x573   :  { %5851 = vst.msk [vmem:[%s12596_s3 + $0x100] sm:$0xff] %vm5818_vm5, %v5777_v33  ;;  %v4669_v34 = vpop.f32.mrb[76].mxu1  ;;  %v5288_v12 = vpop.f32.mrb[76].mxu0 }
 0x574   :  { %v5778_v61 = vsel %vm5632_vm2, %v5559_v8, %v5705_v60  ;;  %v4855_v36 = vadd.f32 %v4669_v34, %v11547_v56  ;;  %v5480_v20 = vadd.f32 %v5288_v12, %v4853_v46  ;;  %v8072_v1 = vpop.f32.mrb[77].mxu1  ;;  %v8218_v37 = vpop.f32.mrb[77].mxu0 }
 0x575   :  { %5852 = vst.msk [vmem:[%s12596_s3 + $0x108] sm:$0xff] %vm5818_vm5, %v5778_v61  ;;  %v4672_v54 = vpop.f32.mrb[78].mxu1  ;;  %v5291_v24 = vpop.f32.mrb[78].mxu0 }
 0x576   :  { %v5560_v57 = vadd.f32 %v12002_v17, %v5480_v20  ;;  %v4856_v9 = vadd.f32 %v4672_v54, %v12808_v2  ;;  %v5481_v21 = vadd.f32 %v5291_v24, %v4854_v41  ;;  %v8219_v7 = vpop.f32.mrb[79].mxu0  ;;  %v8073_v13 = vpop.f32.mrb[79].mxu1  ;;  %v12813_v54 = vld [vmem:[#allocation4_spill] sm:$0xff] }
 0x578   :  { %vm5633_vm10 = vcmp.ge.f32.partialorder %v5560_v57, 0.0  ;;  %v5706_v0 = vmul.f32 0.2, %v5560_v57  ;;  %v5561_v56 = vadd.f32 %v12002_v17, %v5481_v21 }
 0x57a   :  { %v5779_v47 = vsel %vm5633_vm10, %v5560_v57, %v5706_v0  ;;  %vm5634_vm3 = vcmp.ge.f32.partialorder %v5561_v56, 0.0  ;;  %v5707_v29 = vmul.f32 0.2, %v5561_v56  ;;  %v12814_v0 = vld [vmem:[#allocation5_spill] sm:$0xff] }
 0x57b   :  { %5853 = vst.msk [vmem:[%s12596_s3 + $0x110] sm:$0xff] %vm5818_vm5, %v5779_v47  ;;  %v4677_v51 = vpop.f32.mrb[80].mxu1  ;;  %v5296_v11 = vpop.f32.mrb[80].mxu0 }
 0x57c   :  { %v5780_v39 = vsel %vm5634_vm3, %v5561_v56, %v5707_v29  ;;  %v4857_v62 = vadd.f32 %v4677_v51, %v12809_v16  ;;  %v5482_v45 = vadd.f32 %v5296_v11, %v4855_v36  ;;  %v8076_v43 = vpop.f32.mrb[81].mxu1  ;;  %v8222_v52 = vpop.f32.mrb[81].mxu0 }
 0x57d   :  { %5854 = vst.msk [vmem:[%s12596_s3 + $0x118] sm:$0xff] %vm5818_vm5, %v5780_v39  ;;  %v4680_v30 = vpop.f32.mrb[82].mxu1  ;;  %v5299_v4 = vpop.f32.mrb[82].mxu0 }
 0x57e   :  { %v5562_v22 = vadd.f32 %v12002_v17, %v5482_v45  ;;  %v4858_v38 = vadd.f32 %v4680_v30, %v12810_v23  ;;  %v5483_v19 = vadd.f32 %v5299_v4, %v4856_v9  ;;  %v8223_v44 = vpop.f32.mrb[83].mxu0  ;;  %v8077_v49 = vpop.f32.mrb[83].mxu1  ;;  %v12815_v30 = vld [vmem:[#allocation6_spill] sm:$0xff] }
 0x580   :  { %vm5635_vm11 = vcmp.ge.f32.partialorder %v5562_v22, 0.0  ;;  %v5708_v10 = vmul.f32 0.2, %v5562_v22  ;;  %v5563_v40 = vadd.f32 %v12002_v17, %v5483_v19 }
 0x582   :  { %v5781_v48 = vsel %vm5635_vm11, %v5562_v22, %v5708_v10  ;;  %vm5636_vm12 = vcmp.ge.f32.partialorder %v5563_v40, 0.0  ;;  %v5709_v18 = vmul.f32 0.2, %v5563_v40  ;;  %v12816_v10 = vld [vmem:[#allocation7_spill] sm:$0xff] }
 0x583   :  { %5855 = vst.msk [vmem:[%s12596_s3 + $0x120] sm:$0xff] %vm5818_vm5, %v5781_v48  ;;  %v4685_v63 = vpop.f32.mrb[84].mxu1  ;;  %v5304_v46 = vpop.f32.mrb[84].mxu0 }
 0x584   :  { %v5782_v26 = vsel %vm5636_vm12, %v5563_v40, %v5709_v18  ;;  %v4859_v5 = vadd.f32 %v4685_v63, %v12811_v15  ;;  %v5484_v59 = vadd.f32 %v5304_v46, %v4857_v62  ;;  %v8080_v27 = vpop.f32.mrb[85].mxu1  ;;  %v8226_v53 = vpop.f32.mrb[85].mxu0 }
 0x585   :  { %5856 = vst.msk [vmem:[%s12596_s3 + $0x128] sm:$0xff] %vm5818_vm5, %v5782_v26  ;;  %v4688_v17 = vpop.f32.mrb[86].mxu1  ;;  %v5307_v41 = vpop.f32.mrb[86].mxu0 }
 0x586   :  { %v5564_v25 = vadd.f32 %v12385_v28, %v5484_v59  ;;  %v4860_v14 = vadd.f32 %v4688_v17, %v12812_v35  ;;  %v5485_v8 = vadd.f32 %v5307_v41, %v4858_v38  ;;  %v8227_v33 = vpop.f32.mrb[87].mxu0  ;;  %v8081_v60 = vpop.f32.mrb[87].mxu1  ;;  %v12817_v17 = vld [vmem:[#allocation8_spill] sm:$0xff] }
 0x588   :  { %vm5637_vm13 = vcmp.ge.f32.partialorder %v5564_v25, 0.0  ;;  %v5710_v34 = vmul.f32 0.2, %v5564_v25  ;;  %v5565_v12 = vadd.f32 %v12385_v28, %v5485_v8 }
 0x58a   :  { %v5783_v61 = vsel %vm5637_vm13, %v5564_v25, %v5710_v34  ;;  %vm5638_vm14 = vcmp.ge.f32.partialorder %v5565_v12, 0.0  ;;  %v5711_v36 = vmul.f32 0.2, %v5565_v12  ;;  %v12818_v34 = vld [vmem:[#allocation9_spill] sm:$0xff] }
 0x58b   :  { %5857 = vst.msk [vmem:[%s12596_s3 + $0x130] sm:$0xff] %vm5818_vm5, %v5783_v61  ;;  %v4693_v20 = vpop.f32.mrb[88].mxu1  ;;  %v5312_v1 = vpop.f32.mrb[88].mxu0 }
 0x58c   :  { %v5784_v37 = vsel %vm5638_vm14, %v5565_v12, %v5711_v36  ;;  %v4861_v24 = vadd.f32 %v4693_v20, %v12813_v54  ;;  %v5486_v57 = vadd.f32 %v5312_v1, %v4859_v5  ;;  %v8084_v2 = vpop.f32.mrb[89].mxu1  ;;  %v8230_v9 = vpop.f32.mrb[89].mxu0 }
 0x58d   :  { %5858 = vst.msk [vmem:[%s12596_s3 + $0x138] sm:$0xff] %vm5818_vm5, %v5784_v37  ;;  %v4696_v21 = vpop.f32.mrb[90].mxu1  ;;  %v5315_v7 = vpop.f32.mrb[90].mxu0 }
 0x58e   :  { %v5566_v13 = vadd.f32 %v12385_v28, %v5486_v57  ;;  %v4862_v56 = vadd.f32 %v4696_v21, %v12814_v0  ;;  %v5487_v47 = vadd.f32 %v5315_v7, %v4860_v14  ;;  %v8231_v29 = vpop.f32.mrb[91].mxu0  ;;  %v8085_v51 = vpop.f32.mrb[91].mxu1  ;;  %v12819_v21 = vld [vmem:[#allocation10_spill] sm:$0xff] }
 0x590   :  { %vm5639_vm15 = vcmp.ge.f32.partialorder %v5566_v13, 0.0  ;;  %v5712_v11 = vmul.f32 0.2, %v5566_v13  ;;  %v5567_v39 = vadd.f32 %v12385_v28, %v5487_v47 }
 0x592   :  { %v5785_v16 = vsel %vm5639_vm15, %v5566_v13, %v5712_v11  ;;  %vm5640_vm0 = vcmp.ge.f32.partialorder %v5567_v39, 0.0  ;;  %v5713_v62 = vmul.f32 0.2, %v5567_v39  ;;  %v12820_v11 = vld [vmem:[#allocation11_spill] sm:$0xff] }
 0x593   :  { %5859 = vst.msk [vmem:[%s12596_s3 + $0x140] sm:$0xff] %vm5818_vm5, %v5785_v16  ;;  %v4701_v45 = vpop.f32.mrb[92].mxu1  ;;  %v5320_v43 = vpop.f32.mrb[92].mxu0 }
 0x594   :  { %v5786_v52 = vsel %vm5640_vm0, %v5567_v39, %v5713_v62  ;;  %v4863_v4 = vadd.f32 %v4701_v45, %v12815_v30  ;;  %v5488_v22 = vadd.f32 %v5320_v43, %v4861_v24  ;;  %v8088_v23 = vpop.f32.mrb[93].mxu1  ;;  %v8234_v38 = vpop.f32.mrb[93].mxu0 }
 0x595   :  { %5860 = vst.msk [vmem:[%s12596_s3 + $0x148] sm:$0xff] %vm5818_vm5, %v5786_v52  ;;  %v4704_v19 = vpop.f32.mrb[94].mxu1  ;;  %v5323_v44 = vpop.f32.mrb[94].mxu0 }
 0x596   :  { %v5568_v49 = vadd.f32 %v12385_v28, %v5488_v22  ;;  %v4864_v40 = vadd.f32 %v4704_v19, %v12816_v10  ;;  %v5489_v48 = vadd.f32 %v5323_v44, %v4862_v56  ;;  %v8235_v18 = vpop.f32.mrb[95].mxu0  ;;  %v8089_v63 = vpop.f32.mrb[95].mxu1  ;;  %v12821_v19 = vld [vmem:[#allocation12_spill] sm:$0xff] }
 0x598   :  { %vm5641_vm1 = vcmp.ge.f32.partialorder %v5568_v49, 0.0  ;;  %v5714_v46 = vmul.f32 0.2, %v5568_v49  ;;  %v5569_v26 = vadd.f32 %v12385_v28, %v5489_v48 }
 0x59a   :  { %v5787_v15 = vsel %vm5641_vm1, %v5568_v49, %v5714_v46  ;;  %vm5642_vm4 = vcmp.ge.f32.partialorder %v5569_v26, 0.0  ;;  %v5715_v5 = vmul.f32 0.2, %v5569_v26  ;;  %v12822_v46 = vld [vmem:[#allocation13_spill] sm:$0xff] }
 0x59b   :  { %5861 = vst.msk [vmem:[%s12596_s3 + $0x150] sm:$0xff] %vm5818_vm5, %v5787_v15  ;;  %v4709_v59 = vpop.f32.mrb[96].mxu1  ;;  %v5328_v27 = vpop.f32.mrb[96].mxu0 }
 0x59c   :  { %v5788_v53 = vsel %vm5642_vm4, %v5569_v26, %v5715_v5  ;;  %v4865_v41 = vadd.f32 %v4709_v59, %v12817_v17  ;;  %v5490_v25 = vadd.f32 %v5328_v27, %v4863_v4  ;;  %v8092_v35 = vpop.f32.mrb[97].mxu1  ;;  %v8238_v14 = vpop.f32.mrb[97].mxu0 }
 0x59d   :  { %5862 = vst.msk [vmem:[%s12596_s3 + $0x158] sm:$0xff] %vm5818_vm5, %v5788_v53  ;;  %v4712_v8 = vpop.f32.mrb[98].mxu1  ;;  %v5331_v33 = vpop.f32.mrb[98].mxu0 }
 0x59e   :  { %v5570_v60 = vadd.f32 %v12385_v28, %v5490_v25  ;;  %v4866_v12 = vadd.f32 %v4712_v8, %v12818_v34  ;;  %v5491_v61 = vadd.f32 %v5331_v33, %v4864_v40  ;;  %v8239_v36 = vpop.f32.mrb[99].mxu0  ;;  %v8093_v20 = vpop.f32.mrb[99].mxu1  ;;  %v12823_v8 = vld [vmem:[#allocation14_spill] sm:$0xff] }
 0x5a0   :  { %vm5643_vm6 = vcmp.ge.f32.partialorder %v5570_v60, 0.0  ;;  %v5716_v1 = vmul.f32 0.2, %v5570_v60  ;;  %v5571_v37 = vadd.f32 %v12385_v28, %v5491_v61 }
 0x5a2   :  { %v5789_v54 = vsel %vm5643_vm6, %v5570_v60, %v5716_v1  ;;  %vm5644_vm7 = vcmp.ge.f32.partialorder %v5571_v37, 0.0  ;;  %v5717_v24 = vmul.f32 0.2, %v5571_v37  ;;  %v12824_v1 = vld [vmem:[#allocation15_spill] sm:$0xff] }
 0x5a3   :  { %5863 = vst.msk [vmem:[%s12596_s3 + $0x160] sm:$0xff] %vm5818_vm5, %v5789_v54  ;;  %v4717_v57 = vpop.f32.mrb[100].mxu1  ;;  %v5336_v2 = vpop.f32.mrb[100].mxu0 }
 0x5a4   :  { %v5790_v9 = vsel %vm5644_vm7, %v5571_v37, %v5717_v24  ;;  %v4867_v7 = vadd.f32 %v4717_v57, %v12819_v21  ;;  %v5492_v13 = vadd.f32 %v5336_v2, %v4865_v41  ;;  %v8096_v0 = vpop.f32.mrb[101].mxu1  ;;  %v8242_v56 = vpop.f32.mrb[101].mxu0 }
 0x5a5   :  { %5864 = vst.msk [vmem:[%s12596_s3 + $0x168] sm:$0xff] %vm5818_vm5, %v5790_v9  ;;  %v4720_v47 = vpop.f32.mrb[102].mxu1  ;;  %v5339_v29 = vpop.f32.mrb[102].mxu0 }
 0x5a6   :  { %v5572_v51 = vadd.f32 %v12385_v28, %v5492_v13  ;;  %v4868_v39 = vadd.f32 %v4720_v47, %v12820_v11  ;;  %v5493_v16 = vadd.f32 %v5339_v29, %v4866_v12  ;;  %v8243_v62 = vpop.f32.mrb[103].mxu0  ;;  %v8097_v45 = vpop.f32.mrb[103].mxu1  ;;  %v12825_v47 = vld [vmem:[#allocation16_spill] sm:$0xff] }
 0x5a8   :  { %vm5645_vm8 = vcmp.ge.f32.partialorder %v5572_v51, 0.0  ;;  %v5718_v43 = vmul.f32 0.2, %v5572_v51  ;;  %v5573_v52 = vadd.f32 %v12385_v28, %v5493_v16 }
 0x5aa   :  { %v5791_v30 = vsel %vm5645_vm8, %v5572_v51, %v5718_v43  ;;  %vm5646_vm9 = vcmp.ge.f32.partialorder %v5573_v52, 0.0  ;;  %v5719_v4 = vmul.f32 0.2, %v5573_v52  ;;  %v12826_v43 = vld [vmem:[#allocation17_spill] sm:$0xff] }
 0x5ab   :  { %5865 = vst.msk [vmem:[%s12596_s3 + $0x170] sm:$0xff] %vm5818_vm5, %v5791_v30  ;;  %v4725_v22 = vpop.f32.mrb[104].mxu1  ;;  %v5344_v23 = vpop.f32.mrb[104].mxu0 }
 0x5ac   :  { %v5792_v38 = vsel %vm5646_vm9, %v5573_v52, %v5719_v4  ;;  %v4869_v44 = vadd.f32 %v4725_v22, %v12821_v19  ;;  %v5494_v49 = vadd.f32 %v5344_v23, %v4867_v7  ;;  %v8100_v10 = vpop.f32.mrb[105].mxu1  ;;  %v8246_v40 = vpop.f32.mrb[105].mxu0 }
 0x5ad   :  { %5866 = vst.msk [vmem:[%s12596_s3 + $0x178] sm:$0xff] %vm5818_vm5, %v5792_v38  ;;  %v4728_v48 = vpop.f32.mrb[106].mxu1  ;;  %v5347_v18 = vpop.f32.mrb[106].mxu0 }
 0x5ae   :  { %v5574_v63 = vadd.f32 %v12385_v28, %v5494_v49  ;;  %v4870_v26 = vadd.f32 %v4728_v48, %v12822_v46  ;;  %v5495_v15 = vadd.f32 %v5347_v18, %v4868_v39  ;;  %v8247_v5 = vpop.f32.mrb[107].mxu0  ;;  %v8101_v59 = vpop.f32.mrb[107].mxu1  ;;  %v12827_v48 = vld [vmem:[#allocation18_spill] sm:$0xff] }
 0x5b0   :  { %vm5647_vm2 = vcmp.ge.f32.partialorder %v5574_v63, 0.0  ;;  %v5720_v27 = vmul.f32 0.2, %v5574_v63  ;;  %v5575_v53 = vadd.f32 %v12385_v28, %v5495_v15 }
 0x5b2   :  { %v5793_v17 = vsel %vm5647_vm2, %v5574_v63, %v5720_v27  ;;  %vm5648_vm10 = vcmp.ge.f32.partialorder %v5575_v53, 0.0  ;;  %v5721_v41 = vmul.f32 0.2, %v5575_v53  ;;  %v12828_v27 = vld [vmem:[#allocation19_spill] sm:$0xff] }
 0x5b3   :  { %5867 = vst.msk [vmem:[%s12596_s3 + $0x180] sm:$0xff] %vm5818_vm5, %v5793_v17  ;;  %v4733_v25 = vpop.f32.mrb[108].mxu1  ;;  %v5352_v35 = vpop.f32.mrb[108].mxu0 }
 0x5b4   :  { %v5794_v14 = vsel %vm5648_vm10, %v5575_v53, %v5721_v41  ;;  %v4871_v33 = vadd.f32 %v4733_v25, %v12823_v8  ;;  %v5496_v60 = vadd.f32 %v5352_v35, %v4869_v44  ;;  %v8104_v34 = vpop.f32.mrb[109].mxu1  ;;  %v8250_v12 = vpop.f32.mrb[109].mxu0 }
 0x5b5   :  { %5868 = vst.msk [vmem:[%s12596_s3 + $0x188] sm:$0xff] %vm5818_vm5, %v5794_v14  ;;  %v4736_v61 = vpop.f32.mrb[110].mxu1  ;;  %v5355_v36 = vpop.f32.mrb[110].mxu0 }
 0x5b6   :  { %v5576_v20 = vadd.f32 %v12385_v28, %v5496_v60  ;;  %v4872_v37 = vadd.f32 %v4736_v61, %v12824_v1  ;;  %v5497_v54 = vadd.f32 %v5355_v36, %v4870_v26  ;;  %v8251_v24 = vpop.f32.mrb[111].mxu0  ;;  %v8105_v57 = vpop.f32.mrb[111].mxu1  ;;  %v12829_v61 = vld [vmem:[#allocation20_spill] sm:$0xff] }
 0x5b8   :  { %vm5649_vm3 = vcmp.ge.f32.partialorder %v5576_v20, 0.0  ;;  %v5722_v2 = vmul.f32 0.2, %v5576_v20  ;;  %v5577_v9 = vadd.f32 %v12385_v28, %v5497_v54 }
 0x5ba   :  { %v5795_v21 = vsel %vm5649_vm3, %v5576_v20, %v5722_v2  ;;  %vm5650_vm11 = vcmp.ge.f32.partialorder %v5577_v9, 0.0  ;;  %v5723_v7 = vmul.f32 0.2, %v5577_v9  ;;  %v12830_v2 = vld [vmem:[#allocation21_spill] sm:$0xff] }
 0x5bb   :  { %5869 = vst.msk [vmem:[%s12596_s3 + $0x190] sm:$0xff] %vm5818_vm5, %v5795_v21  ;;  %v4741_v13 = vpop.f32.mrb[112].mxu1  ;;  %v5360_v0 = vpop.f32.mrb[112].mxu0 }
 0x5bc   :  { %v5796_v56 = vsel %vm5650_vm11, %v5577_v9, %v5723_v7  ;;  %v4873_v29 = vadd.f32 %v4741_v13, %v12825_v47  ;;  %v5498_v51 = vadd.f32 %v5360_v0, %v4871_v33  ;;  %v8108_v11 = vpop.f32.mrb[113].mxu1  ;;  %v8254_v39 = vpop.f32.mrb[113].mxu0 }
 0x5bd   :  { %5870 = vst.msk [vmem:[%s12596_s3 + $0x198] sm:$0xff] %vm5818_vm5, %v5796_v56  ;;  %v4744_v16 = vpop.f32.mrb[114].mxu1  ;;  %v5363_v62 = vpop.f32.mrb[114].mxu0 }
 0x5be   :  { %v5578_v45 = vadd.f32 %v12385_v28, %v5498_v51  ;;  %v4874_v52 = vadd.f32 %v4744_v16, %v12826_v43  ;;  %v5499_v30 = vadd.f32 %v5363_v62, %v4872_v37  ;;  %v8255_v4 = vpop.f32.mrb[115].mxu0  ;;  %v8109_v22 = vpop.f32.mrb[115].mxu1 }
 0x5c0   :  { %vm5651_vm12 = vcmp.ge.f32.partialorder %v5578_v45, 0.0  ;;  %v5724_v23 = vmul.f32 0.2, %v5578_v45  ;;  %v5579_v38 = vadd.f32 %v12385_v28, %v5499_v30 }
 0x5c2   :  { %v5797_v19 = vsel %vm5651_vm12, %v5578_v45, %v5724_v23  ;;  %vm5652_vm13 = vcmp.ge.f32.partialorder %v5579_v38, 0.0  ;;  %v5725_v44 = vmul.f32 0.2, %v5579_v38 }
 0x5c3   :  { %5871 = vst.msk [vmem:[%s12596_s3 + $0x1a0] sm:$0xff] %vm5818_vm5, %v5797_v19  ;;  %v4749_v49 = vpop.f32.mrb[116].mxu1  ;;  %v5368_v10 = vpop.f32.mrb[116].mxu0 }
 0x5c4   :  { %v5798_v40 = vsel %vm5652_vm13, %v5579_v38, %v5725_v44  ;;  %v4875_v18 = vadd.f32 %v4749_v49, %v12827_v48  ;;  %v5500_v63 = vadd.f32 %v5368_v10, %v4873_v29  ;;  %v8112_v46 = vpop.f32.mrb[117].mxu1  ;;  %v8258_v26 = vpop.f32.mrb[117].mxu0 }
 0x5c5   :  { %5872 = vst.msk [vmem:[%s12596_s3 + $0x1a8] sm:$0xff] %vm5818_vm5, %v5798_v40  ;;  %v4752_v15 = vpop.f32.mrb[118].mxu1  ;;  %v5371_v5 = vpop.f32.mrb[118].mxu0 }
 0x5c6   :  { %v5580_v59 = vadd.f32 %v12385_v28, %v5500_v63  ;;  %v4876_v53 = vadd.f32 %v4752_v15, %v12828_v27  ;;  %v5501_v17 = vadd.f32 %v5371_v5, %v4874_v52  ;;  %v8259_v41 = vpop.f32.mrb[119].mxu0  ;;  %v8113_v25 = vpop.f32.mrb[119].mxu1 }
 0x5c8   :  { %vm5653_vm14 = vcmp.ge.f32.partialorder %v5580_v59, 0.0  ;;  %v5726_v35 = vmul.f32 0.2, %v5580_v59  ;;  %v5581_v14 = vadd.f32 %v12385_v28, %v5501_v17 }
 0x5ca   :  { %v5799_v8 = vsel %vm5653_vm14, %v5580_v59, %v5726_v35  ;;  %vm5654_vm15 = vcmp.ge.f32.partialorder %v5581_v14, 0.0  ;;  %v5727_v33 = vmul.f32 0.2, %v5581_v14 }
 0x5cb   :  { %5873 = vst.msk [vmem:[%s12596_s3 + $0x1b0] sm:$0xff] %vm5818_vm5, %v5799_v8  ;;  %v4757_v60 = vpop.f32.mrb[120].mxu1  ;;  %v5376_v34 = vpop.f32.mrb[120].mxu0 }
 0x5cc   :  { %v5800_v12 = vsel %vm5654_vm15, %v5581_v14, %v5727_v33  ;;  %v4877_v36 = vadd.f32 %v4757_v60, %v12829_v61  ;;  %v5502_v20 = vadd.f32 %v5376_v34, %v4875_v18  ;;  %v8116_v1 = vpop.f32.mrb[121].mxu1  ;;  %v8262_v37 = vpop.f32.mrb[121].mxu0 }
 0x5cd   :  { %5874 = vst.msk [vmem:[%s12596_s3 + $0x1b8] sm:$0xff] %vm5818_vm5, %v5800_v12  ;;  %v4760_v54 = vpop.f32.mrb[122].mxu1  ;;  %v5379_v24 = vpop.f32.mrb[122].mxu0 }
 0x5ce   :  { %v5582_v57 = vadd.f32 %v12385_v28, %v5502_v20  ;;  %v4878_v9 = vadd.f32 %v4760_v54, %v12830_v2  ;;  %v5503_v21 = vadd.f32 %v5379_v24, %v4876_v53  ;;  %v8263_v7 = vpop.f32.mrb[123].mxu0  ;;  %v8117_v13 = vpop.f32.mrb[123].mxu1 }
 0x5d0   :  { %vm5655_vm0 = vcmp.ge.f32.partialorder %v5582_v57, 0.0  ;;  %v5728_v0 = vmul.f32 0.2, %v5582_v57  ;;  %v5583_v56 = vadd.f32 %v12385_v28, %v5503_v21 }
 0x5d2   :  { %v5801_v47 = vsel %vm5655_vm0, %v5582_v57, %v5728_v0  ;;  %vm5656_vm1 = vcmp.ge.f32.partialorder %v5583_v56, 0.0  ;;  %v5729_v29 = vmul.f32 0.2, %v5583_v56 }
 0x5d3   :  { %5875 = vst.msk [vmem:[%s12596_s3 + $0x1c0] sm:$0xff] %vm5818_vm5, %v5801_v47  ;;  %v4765_v51 = vpop.f32.mrb[124].mxu1  ;;  %v5384_v11 = vpop.f32.mrb[124].mxu0 }
 0x5d4   :  { %v5802_v39 = vsel %vm5656_vm1, %v5583_v56, %v5729_v29  ;;  %v4879_v16 = vadd.f32 %v4765_v51, %v11835_v58  ;;  %v5504_v62 = vadd.f32 %v5384_v11, %v4877_v36  ;;  %v8120_v45 = vpop.f32.mrb[125].mxu1  ;;  %v8266_v43 = vpop.f32.mrb[125].mxu0 }
 0x5d5   :  { %5876 = vst.msk [vmem:[%s12596_s3 + $0x1c8] sm:$0xff] %vm5818_vm5, %v5802_v39  ;;  %v4768_v52 = vpop.f32.mrb[126].mxu1  ;;  %v5387_v30 = vpop.f32.mrb[126].mxu0 }
 0x5d6   :  { %v5584_v4 = vadd.f32 %v12385_v28, %v5504_v62  ;;  %v4880_v22 = vadd.f32 %v4768_v52, %v11838_v6  ;;  %v5505_v23 = vadd.f32 %v5387_v30, %v4878_v9  ;;  %v8267_v38 = vpop.f32.mrb[127].mxu0  ;;  %v8121_v19 = vpop.f32.mrb[127].mxu1 }
 0x5d7   :  { %v12831_v19 = vld [vmem:[#allocation22_spill] sm:$0xff] }
 0x5d8   :  { %vm5657_vm4 = vcmp.ge.f32.partialorder %v5584_v4, 0.0  ;;  %v5730_v44 = vmul.f32 0.2, %v5584_v4  ;;  %v5585_v58 = vadd.f32 %v12385_v28, %v5505_v23 }
 0x5da   :  { %v5803_v49 = vsel %vm5657_vm4, %v5584_v4, %v5730_v44  ;;  %vm5658_vm6 = vcmp.ge.f32.partialorder %v5585_v58, 0.0  ;;  %v5731_v10 = vmul.f32 0.2, %v5585_v58  ;;  %vm5891_vm4 = vcmask 58368  }
 0x5db   :  { %5877 = vst.msk [vmem:[%s12596_s3 + $0x1d0] sm:$0xff] %vm5818_vm5, %v5803_v49  ;;  %v4773_v40 = vpop.f32.mrb[128].mxu1  ;;  %v5392_v48 = vpop.f32.mrb[128].mxu0 }
 0x5dc   :  { %v5804_v18 = vsel %vm5658_vm6, %v5585_v58, %v5731_v10  ;;  %v4881_v6 = vadd.f32 %v4773_v40, %v11859_v55  ;;  %v5506_v63 = vadd.f32 %v5392_v48, %v4879_v16  ;;  %v8124_v46 = vpop.f32.mrb[129].mxu1  ;;  %v8270_v26 = vpop.f32.mrb[129].mxu0 }
 0x5dd   :  { %5878 = vst.msk [vmem:[%s12596_s3 + $0x1d8] sm:$0xff] %vm5818_vm5, %v5804_v18  ;;  %v4776_v15 = vpop.f32.mrb[130].mxu1  ;;  %v5395_v5 = vpop.f32.mrb[130].mxu0  ;;  %v12832_v18 = vld [vmem:[#allocation23_spill] sm:$0xff] }
 0x5de   :  { %v5586_v59 = vadd.f32 %v12385_v28, %v5506_v63  ;;  %v4882_v27 = vadd.f32 %v4776_v15, %v11862_v42  ;;  %v5507_v53 = vadd.f32 %v5395_v5, %v4880_v22  ;;  %v8271_v17 = vpop.f32.mrb[131].mxu0  ;;  %v8125_v41 = vpop.f32.mrb[131].mxu1 }
 0x5e0   :  { %vm5659_vm7 = vcmp.ge.f32.partialorder %v5586_v59, 0.0  ;;  %v5732_v25 = vmul.f32 0.2, %v5586_v59  ;;  %v5587_v55 = vadd.f32 %v12385_v28, %v5507_v53 }
 0x5e2   :  { %v5805_v35 = vsel %vm5659_vm7, %v5586_v59, %v5732_v25  ;;  %vm5660_vm8 = vcmp.ge.f32.partialorder %v5587_v55, 0.0  ;;  %v5733_v14 = vmul.f32 0.2, %v5587_v55  ;;  %v12833_v25 = vld [vmem:[#allocation24_spill] sm:$0xff] }
 0x5e3   :  { %5879 = vst.msk [vmem:[%s12596_s3 + $0x1e0] sm:$0xff] %vm5818_vm5, %v5805_v35  ;;  %v4781_v8 = vpop.f32.mrb[132].mxu1  ;;  %v5400_v33 = vpop.f32.mrb[132].mxu0 }
 0x5e4   :  { %v5806_v60 = vsel %vm5660_vm8, %v5587_v55, %v5733_v14  ;;  %v4883_v42 = vadd.f32 %v4781_v8, %v11883_v32  ;;  %v5508_v34 = vadd.f32 %v5400_v33, %v4881_v6  ;;  %v8128_v12 = vpop.f32.mrb[133].mxu1  ;;  %v8274_v61 = vpop.f32.mrb[133].mxu0 }
 0x5e5   :  { %5880 = vst.msk [vmem:[%s12596_s3 + $0x1e8] sm:$0xff] %vm5818_vm5, %v5806_v60  ;;  %v4784_v36 = vpop.f32.mrb[134].mxu1  ;;  %v5403_v20 = vpop.f32.mrb[134].mxu0 }
 0x5e6   :  { %v5588_v1 = vadd.f32 %v12385_v28, %v5508_v34  ;;  %v4884_v37 = vadd.f32 %v4784_v36, %v11886_v31  ;;  %v5509_v54 = vadd.f32 %v5403_v20, %v4882_v27  ;;  %v8275_v24 = vpop.f32.mrb[135].mxu0  ;;  %v8129_v57 = vpop.f32.mrb[135].mxu1  ;;  %v12834_v34 = vld [vmem:[#allocation25_spill] sm:$0xff] }
 0x5e8   :  { %vm5661_vm9 = vcmp.ge.f32.partialorder %v5588_v1, 0.0  ;;  %v5734_v2 = vmul.f32 0.2, %v5588_v1  ;;  %v5589_v32 = vadd.f32 %v12385_v28, %v5509_v54 }
 0x5ea   :  { %v5807_v9 = vsel %vm5661_vm9, %v5588_v1, %v5734_v2  ;;  %vm5662_vm2 = vcmp.ge.f32.partialorder %v5589_v32, 0.0  ;;  %v5735_v21 = vmul.f32 0.2, %v5589_v32 }
 0x5eb   :  { %5881 = vst.msk [vmem:[%s12596_s3 + $0x1f0] sm:$0xff] %vm5818_vm5, %v5807_v9  ;;  %v4789_v7 = vpop.f32.mrb[136].mxu1  ;;  %v5408_v13 = vpop.f32.mrb[136].mxu0  ;;  %v12835_v9 = vld [vmem:[#allocation33_spill] sm:$0xff] }
 0x5ec   :  { %v5808_v0 = vsel %vm5662_vm2, %v5589_v32, %v5735_v21  ;;  %v4885_v31 = vadd.f32 %v4789_v7, %v11907_v3  ;;  %v5510_v56 = vadd.f32 %v5408_v13, %v4883_v42  ;;  %v8132_v47 = vpop.f32.mrb[137].mxu1  ;;  %v8278_v29 = vpop.f32.mrb[137].mxu0 }
 0x5ed   :  { %5882 = vst.msk [vmem:[%s12596_s3 + $0x1f8] sm:$0xff] %vm5818_vm5, %v5808_v0  ;;  %v4792_v51 = vpop.f32.mrb[138].mxu1  ;;  %v5411_v11 = vpop.f32.mrb[138].mxu0 }
 0x5ee   :  { %v5590_v39 = vadd.f32 %v12385_v28, %v5510_v56  ;;  %v4886_v16 = vadd.f32 %v4792_v51, %v11910_v50  ;;  %v5511_v62 = vadd.f32 %v5411_v11, %v4884_v37  ;;  %v8279_v45 = vpop.f32.mrb[139].mxu0  ;;  %v8133_v43 = vpop.f32.mrb[139].mxu1 }
 0x5f0   :  { %vm5663_vm10 = vcmp.ge.f32.partialorder %v5590_v39, 0.0  ;;  %v5736_v52 = vmul.f32 0.2, %v5590_v39  ;;  %v5591_v3 = vadd.f32 %v12385_v28, %v5511_v62 }
 0x5f2   :  { %v5809_v30 = vsel %vm5663_vm10, %v5590_v39, %v5736_v52  ;;  %vm5664_vm3 = vcmp.ge.f32.partialorder %v5591_v3, 0.0  ;;  %v5737_v4 = vmul.f32 0.2, %v5591_v3 }
 0x5f3   :  { %5883 = vst.msk [vmem:[%s12596_s3 + $0x200] sm:$0xff] %vm5818_vm5, %v5809_v30  ;;  %v4797_v22 = vpop.f32.mrb[140].mxu1  ;;  %v5416_v23 = vpop.f32.mrb[140].mxu0 }
 0x5f4   :  { %v5810_v38 = vsel %vm5664_vm3, %v5591_v3, %v5737_v4  ;;  %v4887_v50 = vadd.f32 %v4797_v22, %v12831_v19  ;;  %v5512_v44 = vadd.f32 %v5416_v23, %v4885_v31  ;;  %v8136_v58 = vpop.f32.mrb[141].mxu1  ;;  %v8282_v49 = vpop.f32.mrb[141].mxu0 }
 0x5f5   :  { %5884 = vst.msk [vmem:[%s12596_s3 + $0x208] sm:$0xff] %vm5818_vm5, %v5810_v38  ;;  %v4800_v10 = vpop.f32.mrb[142].mxu1  ;;  %v5419_v40 = vpop.f32.mrb[142].mxu0 }
 0x5f6   :  { %v5592_v48 = vadd.f32 %v12385_v28, %v5512_v44  ;;  %v4888_v6 = vadd.f32 %v4800_v10, %v12832_v18  ;;  %v5513_v63 = vadd.f32 %v5419_v40, %v4886_v16  ;;  %v8283_v46 = vpop.f32.mrb[143].mxu0  ;;  %v8137_v26 = vpop.f32.mrb[143].mxu1 }
 0x5f8   :  { %vm5665_vm11 = vcmp.ge.f32.partialorder %v5592_v48, 0.0  ;;  %v5738_v15 = vmul.f32 0.2, %v5592_v48  ;;  %v5593_v5 = vadd.f32 %v12385_v28, %v5513_v63 }
 0x5fa   :  { %v5811_v59 = vsel %vm5665_vm11, %v5592_v48, %v5738_v15  ;;  %vm5666_vm12 = vcmp.ge.f32.partialorder %v5593_v5, 0.0  ;;  %v5739_v27 = vmul.f32 0.2, %v5593_v5 }
 0x5fb   :  { %5885 = vst.msk [vmem:[%s12596_s3 + $0x210] sm:$0xff] %vm5818_vm5, %v5811_v59  ;;  %v4805_v53 = vpop.f32.mrb[144].mxu1  ;;  %v5424_v17 = vpop.f32.mrb[144].mxu0 }
 0x5fc   :  { %v5812_v41 = vsel %vm5666_vm12, %v5593_v5, %v5739_v27  ;;  %v4889_v55 = vadd.f32 %v4805_v53, %v12833_v25  ;;  %v5514_v35 = vadd.f32 %v5424_v17, %v4887_v50  ;;  %v8140_v14 = vpop.f32.mrb[145].mxu1  ;;  %v8286_v8 = vpop.f32.mrb[145].mxu0 }
 0x5fd   :  { %5886 = vst.msk [vmem:[%s12596_s3 + $0x218] sm:$0xff] %vm5818_vm5, %v5812_v41  ;;  %v4808_v33 = vpop.f32.mrb[146].mxu1  ;;  %v5427_v60 = vpop.f32.mrb[146].mxu0 }
 0x5fe   :  { %v5594_v42 = vadd.f32 %v12385_v28, %v5514_v35  ;;  %v4890_v12 = vadd.f32 %v4808_v33, %v12834_v34  ;;  %v5515_v61 = vadd.f32 %v5427_v60, %v4888_v6  ;;  %v8287_v36 = vpop.f32.mrb[147].mxu0  ;;  %v8141_v20 = vpop.f32.mrb[147].mxu1 }
 0x600   :  { %vm5667_vm13 = vcmp.ge.f32.partialorder %v5594_v42, 0.0  ;;  %v5740_v1 = vmul.f32 0.2, %v5594_v42  ;;  %v5595_v37 = vadd.f32 %v12385_v28, %v5515_v61 }
 0x602   :  { %v5813_v54 = vsel %vm5667_vm13, %v5594_v42, %v5740_v1  ;;  %vm5668_vm14 = vcmp.ge.f32.partialorder %v5595_v37, 0.0  ;;  %v5741_v24 = vmul.f32 0.2, %v5595_v37 }
 0x603   :  { %5887 = vst.msk [vmem:[%s12596_s3 + $0x220] sm:$0xff] %vm5818_vm5, %v5813_v54  ;;  %v4813_v57 = vpop.f32.mrb[148].mxu1  ;;  %v5432_v2 = vpop.f32.mrb[148].mxu0 }
 0x604   :  { %v5814_v32 = vsel %vm5668_vm14, %v5595_v37, %v5741_v24  ;;  %v4891_v21 = vadd.f32 %v4813_v57, %v12835_v9  ;;  %v5516_v7 = vadd.f32 %v5432_v2, %v4889_v55  ;;  %v8290_v13 = vpop.f32.mrb[149].mxu0  ;;  %v8144_v0 = vpop.f32.mrb[149].mxu1 }
 0x605   :  { %5888 = vst.msk [vmem:[%s12596_s3 + $0x228] sm:$0xff] %vm5818_vm5, %v5814_v32  ;;  %v5435_v31 = vpop.f32.mrb[150].mxu0  ;;  %v4816_v56 = vpop.f32.mrb[150].mxu1 }
 0x606   :  { %v5596_v47 = vadd.f32 %v12385_v28, %v5516_v7  ;;  %v5517_v29 = vadd.f32 %v5435_v31, %v4890_v12  ;;  %v8291_v51 = vpop.f32.mrb[151].mxu0  ;;  %v8145_v11 = vpop.f32.mrb[151].mxu1 }
 0x608   :  { %vm5669_vm15 = vcmp.ge.f32.partialorder %v5596_v47, 0.0  ;;  %v5742_v39 = vmul.f32 0.2, %v5596_v47  ;;  %v5597_v16 = vadd.f32 %v12385_v28, %v5517_v29 }
 0x60a   :  { %v5815_v62 = vsel %vm5669_vm15, %v5596_v47, %v5742_v39  ;;  %vm5670_vm0 = vcmp.ge.f32.partialorder %v5597_v16, 0.0  ;;  %v5743_v45 = vmul.f32 0.2, %v5597_v16 }
 0x60b   :  { %5889 = vst.msk [vmem:[%s12596_s3 + $0x230] sm:$0xff] %vm5818_vm5, %v5815_v62  ;;  %v5440_v43 = vpop.f32.mrb[152].mxu0 }
 0x60c   :  { %v5816_v52 = vsel %vm5670_vm0, %v5597_v16, %v5743_v45  ;;  %v5518_v3 = vadd.f32 %v5440_v43, %v4891_v21  ;;  %v8294_v30 = vpop.f32.mrb[153].mxu0 }
 0x60d   :  { %5890 = vst.msk [vmem:[%s12596_s3 + $0x238] sm:$0xff] %vm5818_vm5, %v5816_v52  ;;  %v5443_v4 = vpop.f32.mrb[154].mxu0 }
 0x60e   :  { %v5598_v22 = vadd.f32 %v12385_v28, %v5518_v3  ;;  %v8295_v23 = vpop.f32.mrb[155].mxu0 }
 0x610   :  { %vm5671_vm1 = vcmp.ge.f32.partialorder %v5598_v22, 0.0  ;;  %v5744_v38 = vmul.f32 0.2, %v5598_v22 }
 0x612   :  { %v5817_v19 = vsel %vm5671_vm1, %v5598_v22, %v5744_v38 }
 0x613   :  { %5892 = vst.msk [vmem:[%s12596_s3 + $0x240] sm:$0x3] %vm5891_vm4, %v5817_v19 }

// kernel: shape_cam_tex_net_forward.7
= control target key start
LH: loop header
LB: loop body
LE: loop exit
PB: predicated region body
PF: predicated region fallthrough
CT: control target
= control target key end

     0   :  { %vm49_vm0 = vcmask 130048   ;;  %vm966_vm1 = vcmask 261120   ;;  %vm973_vm7 = vcmask 254976   ;;  %s1574_s1 = inlined_call_operand.vmem [shape: bf16[9,16,32], index: 1, kind: input, shape index: {}]   ;;  %s1575_s0 = inlined_call_operand.vmem [shape: f32[2,2,56,16], index: 0, kind: input, shape index: {}]   ;;  %s1576_s2 = inlined_call_operand.vmem [shape: f32[1,32], index: 2, kind: input, shape index: {}]   ;;  %s1577_s3 = inlined_call_operand.vmem [shape: f32[50,32], index: 3, kind: output, shape index: {}]  }
   0x1   :  { %v1245_v0 = vld [vmem:[%s1574_s1 + $0x8] sm:$0xff]   ;;  %v1280_v1 = vld [vmem:[%s1574_s1 + $0x20] sm:$0xff]   ;;  %v979_v2 = vld [vmem:[%s1575_s0 + $0x38] sm:$0xff] }
   0x2   :  { %1121 = vmatprep.subr.bf16.mxu1 %v1245_v0  ;;  %v980_v3 = vld [vmem:[%s1575_s0 + $0x40] sm:$0xff]  ;;  %v1019_v4 = vld [vmem:[%s1575_s0 + $0xa8] sm:$0xff]  ;;  %1161 = vmatprep.subr.bf16.mxu0 %v1280_v1  ;;  %v1020_v6 = vld [vmem:[%s1575_s0 + $0xb0] sm:$0xff] }
   0x3   :  { %1122 = vmatpush3.bf16.msra.mxu1 %v1245_v0  ;;  %v36_v5 = vpack.c.bf16 %v980_v3, %v979_v2  ;;  %v981_v7 = vld [vmem:[%s1575_s0 + $0x48] sm:$0xff]  ;;  %v982_v8 = vld [vmem:[%s1575_s0 + $0x50] sm:$0xff]  ;;  %1162 = vmatpush3.bf16.msra.mxu0 %v1280_v1  ;;  %v423_v9 = vpack.c.bf16 %v1020_v6, %v1019_v4  ;;  %v1247_v11 = vld [vmem:[%s1574_s1] sm:$0xff]  }
   0x4   :  { %v37_v10 = vpack.c.bf16 %v982_v8, %v981_v7  ;;  %v1021_v12 = vld [vmem:[%s1575_s0 + $0xb8] sm:$0xff]  ;;  %v1022_v13 = vld [vmem:[%s1575_s0 + $0xc0] sm:$0xff]  ;;  %v1248_v15 = vld [vmem:[%s1574_s1 + $0x28] sm:$0xff]   ;;  %1131 = vmatprep.subr.bf16.mxu1 %v1247_v11 }
   0x5   :  { %1123 = vmatprep.mubr.msk.bf16.mxu1 %vm49_vm0, %v36_v5  ;;  %1163 = vmatprep.mubr.msk.bf16.mxu0 %vm49_vm0, %v423_v9  ;;  %v424_v14 = vpack.c.bf16 %v1022_v13, %v1021_v12  ;;  %v983_v16 = vld [vmem:[%s1575_s0 + $0x58] sm:$0xff]  ;;  %v984_v17 = vld [vmem:[%s1575_s0 + $0x60] sm:$0xff]  ;;  %v985_v18 = vld [vmem:[%s1575_s0 + $0x68] sm:$0x3] }
   0x6   :  { %1124 = vmatmul.mubr.msk.bf16.vlgmr.msra.gmra.mrb[0].mxu1 %vm49_vm0, %v37_v10  ;;  %v1033_v19 = vld [vmem:[%s1575_s0 + $0x71] sm:$0xff]  ;;  %v38_v20 = vpack.c.bf16 %v984_v17, %v983_v16  ;;  %v1034_v21 = vld [vmem:[%s1575_s0 + $0x79] sm:$0xff]  ;;  %1171 = vmatprep.subr.bf16.mxu0 %v1248_v15  ;;  %v16_v24 = vld [vmem:[%s1575_s0 + $0x8] sm:$0xff]  ;;  %v39_v25 = vpack.c.bf16 %v985_v18, %v985_v18 }
   0x7   :  { %1164 = vmatmul.mubr.msk.bf16.vlgmr.msra.gmra.mrb[0].mxu0 %vm49_vm0, %v424_v14  ;;  %1132 = vmatpush3.bf16.msra.mxu1 %v1247_v11  ;;  %v526_v22 = vpack.c.bf16 %v1034_v21, %v1033_v19  ;;  %v15_v23 = vld [vmem:[%s1575_s0] sm:$0xff]  ;;  %v1249_v27 = vld [vmem:[%s1574_s1 + $0x10] sm:$0xff]   ;;  %v18_v34 = vld [vmem:[%s1575_s0 + $0x18] sm:$0xff] }
   0x8   :  { %1172 = vmatpush3.bf16.msra.mxu0 %v1248_v15  ;;  %1127 = vmatprep.mubr.msk.bf16.mxu1 %vm49_vm0, %v38_v20  ;;  %v22_v26 = vpack.c.bf16 %v16_v24, %v15_v23  ;;  %v1250_v28 = vld [vmem:[%s1574_s1 + $0x30] sm:$0xff]   ;;  %v1035_v29 = vld [vmem:[%s1575_s0 + $0x81] sm:$0xff]  ;;  %v1038_v32 = vld [vmem:[%s1575_s0 + $0x99] sm:$0xff] }
   0x9   :  { %1173 = vmatprep.mubr.msk.bf16.mxu0 %vm49_vm0, %v526_v22  ;;  %v1036_v30 = vld [vmem:[%s1575_s0 + $0x89] sm:$0xff]  ;;  %1141 = vmatprep.subr.bf16.mxu1 %v1249_v27  ;;  %v1037_v31 = vld [vmem:[%s1575_s0 + $0x91] sm:$0xff]  ;;  %v19_v36 = vld [vmem:[%s1575_s0 + $0x20] sm:$0xff] }
   0xa   :  { %1181 = vmatprep.subr.bf16.mxu0 %v1250_v28  ;;  %v17_v33 = vld [vmem:[%s1575_s0 + $0x10] sm:$0xff]  ;;  %v527_v35 = vpack.c.bf16 %v1036_v30, %v1035_v29  ;;  %v20_v37 = vld [vmem:[%s1575_s0 + $0x28] sm:$0xff]  ;;  %v528_v38 = vpack.c.bf16 %v1038_v32, %v1037_v31  ;;  %v1252_v40 = vld [vmem:[%s1574_s1 + $0x38] sm:$0xff]  }
   0xb   :  { %v23_v39 = vpack.c.bf16 %v18_v34, %v17_v33  ;;  %v24_v41 = vpack.c.bf16 %v20_v37, %v19_v36  ;;  %v1251_v42 = vld [vmem:[%s1574_s1 + $0x18] sm:$0xff]   ;;  %v1039_v43 = vld [vmem:[%s1575_s0 + $0xa1] sm:$0x3]  ;;  %v622_v44 = vld [vmem:[%s1575_s0 + $0x5] sm:$0xff] }
   0xc   :  { %v623_v45 = vld [vmem:[%s1575_s0 + $0xd] sm:$0xff]  ;;  %v529_v47 = vpack.c.bf16 %v1039_v43, %v1039_v43  ;;  %v208_v48 = vld [vmem:[%s1575_s0 + $0x1] sm:$0xff]  ;;  %v624_v53 = vld [vmem:[%s1575_s0 + $0x15] sm:$0xff] }
   0xd   :  { %v21_v46 = vld [vmem:[%s1575_s0 + $0x30] sm:$0x3]  ;;  %v629_v50 = vpack.c.bf16 %v623_v45, %v622_v44  ;;  %v625_v54 = vld [vmem:[%s1575_s0 + $0x1d] sm:$0xff]  ;;  %v626_v55 = vld [vmem:[%s1575_s0 + $0x25] sm:$0xff] }
   0xe   :  { %1128 = vmatmul.mubr.msk.bf16.gmra.mrb[4].mxu1 %vm49_vm0, %v39_v25  ;;  %v209_v49 = vld [vmem:[%s1575_s0 + $0x9] sm:$0xff]  ;;  %v25_v51 = vpack.c.bf16 %v21_v46, %v21_v46  ;;  %v210_v57 = vld [vmem:[%s1575_s0 + $0x11] sm:$0xff]  ;;  %v211_v58 = vld [vmem:[%s1575_s0 + $0x19] sm:$0xff]  ;;  %v630_v59 = vpack.c.bf16 %v625_v54, %v624_v53 }
   0xf   :  { %1133 = vmatprep.mubr.msk.bf16.mxu1 %vm49_vm0, %v22_v26  ;;  %v215_v52 = vpack.c.bf16 %v209_v49, %v208_v48  ;;  %v627_v56 = vld [vmem:[%s1575_s0 + $0x2d] sm:$0xff]  ;;  %v212_v60 = vld [vmem:[%s1575_s0 + $0x21] sm:$0xff]  ;;  %v216_v63 = vpack.c.bf16 %v211_v58, %v210_v57  ;;  %v628_v3 = vld [vmem:[%s1575_s0 + $0x35] sm:$0x3] }
  0x10   :  { %v213_v61 = vld [vmem:[%s1575_s0 + $0x29] sm:$0xff]  ;;  %v631_v62 = vpack.c.bf16 %v627_v56, %v626_v55  ;;  %v1253_v0 = vld [vmem:[%s1574_s1 + $0x40] sm:$0xff]   ;;  %v214_v6 = vld [vmem:[%s1575_s0 + $0x31] sm:$0x3]  ;;  %v632_v7 = vpack.c.bf16 %v628_v3, %v628_v3 }
  0x11   :  { %v217_v2 = vpack.c.bf16 %v213_v61, %v212_v60  ;;  %v1054_v4 = vld [vmem:[%s1575_s0 + $0x3d] sm:$0xff]  ;;  %v1055_v5 = vld [vmem:[%s1575_s0 + $0x45] sm:$0xff]  ;;  %v1005_v8 = vld [vmem:[%s1575_s0 + $0x70] sm:$0xff]  ;;  %v218_v11 = vpack.c.bf16 %v214_v6, %v214_v6 }
  0x12   :  { %v1006_v9 = vld [vmem:[%s1575_s0 + $0x78] sm:$0xff]  ;;  %v732_v10 = vpack.c.bf16 %v1055_v5, %v1054_v4  ;;  %v1056_v13 = vld [vmem:[%s1575_s0 + $0x4d] sm:$0xff]  ;;  %v1059_v16 = vld [vmem:[%s1575_s0 + $0x65] sm:$0xff] }
  0x13   :  { %1174 = vmatmul.mubr.msk.bf16.vlgmr.msra.gmra.mrb[0].mxu0 %vm49_vm0, %v527_v35  ;;  %v319_v12 = vpack.c.bf16 %v1006_v9, %v1005_v8  ;;  %v1057_v14 = vld [vmem:[%s1575_s0 + $0x55] sm:$0xff]  ;;  %v1058_v15 = vld [vmem:[%s1575_s0 + $0x5d] sm:$0xff]  ;;  %v1008_v18 = vld [vmem:[%s1575_s0 + $0x88] sm:$0xff] }
  0x14   :  { %1182 = vmatpush3.bf16.msra.mxu0 %v1250_v28  ;;  %1177 = vmatprep.mubr.msk.bf16.mxu0 %vm49_vm0, %v528_v38  ;;  %v1007_v17 = vld [vmem:[%s1575_s0 + $0x80] sm:$0xff]  ;;  %v733_v19 = vpack.c.bf16 %v1057_v14, %v1056_v13  ;;  %v1009_v20 = vld [vmem:[%s1575_s0 + $0x90] sm:$0xff]  ;;  %v1010_v21 = vld [vmem:[%s1575_s0 + $0x98] sm:$0xff]  ;;  %v734_v22 = vpack.c.bf16 %v1059_v16, %v1058_v15 }
  0x15   :  { %1191 = vmatprep.subr.bf16.mxu0 %v1252_v40  ;;  %v320_v23 = vpack.c.bf16 %v1008_v18, %v1007_v17  ;;  %v321_v24 = vpack.c.bf16 %v1010_v21, %v1009_v20  ;;  %v1060_v25 = vld [vmem:[%s1575_s0 + $0x6d] sm:$0x3]  ;;  %v1011_v28 = vld [vmem:[%s1575_s0 + $0xa0] sm:$0x3]  ;;  %v1024_v31 = vld [vmem:[%s1575_s0 + $0xd0] sm:$0xff] }
  0x16   :  { %1134 = vmatmul.mubr.msk.bf16.vlgmr.msra.gmra.mrb[0].mxu1 %vm49_vm0, %v23_v39  ;;  %v828_v26 = vld [vmem:[%s1575_s0 + $0x6] sm:$0xff]  ;;  %v735_v29 = vpack.c.bf16 %v1060_v25, %v1060_v25  ;;  %v322_v33 = vpack.c.bf16 %v1011_v28, %v1011_v28  ;;  %v831_v35 = vld [vmem:[%s1575_s0 + $0x1e] sm:$0xff]  ;;  %v833_v37 = vld [vmem:[%s1575_s0 + $0x2e] sm:$0xff] }
  0x17   :  { %1142 = vmatpush3.bf16.msra.mxu1 %v1249_v27  ;;  %1137 = vmatprep.mubr.msk.bf16.mxu1 %vm49_vm0, %v24_v41  ;;  %v829_v27 = vld [vmem:[%s1575_s0 + $0xe] sm:$0xff]  ;;  %v832_v36 = vld [vmem:[%s1575_s0 + $0x26] sm:$0xff]  ;;  %v1025_v38 = vld [vmem:[%s1575_s0 + $0xd8] sm:$0x3] }
  0x18   :  { %1151 = vmatprep.subr.bf16.mxu1 %v1251_v42  ;;  %v1023_v30 = vld [vmem:[%s1575_s0 + $0xc8] sm:$0xff]  ;;  %v835_v32 = vpack.c.bf16 %v829_v27, %v828_v26  ;;  %v426_v41 = vpack.c.bf16 %v1025_v38, %v1025_v38 }
  0x19   :  { %v425_v34 = vpack.c.bf16 %v1024_v31, %v1023_v30 }
  0x1b   :  { %1178 = vmatmul.mubr.msk.bf16.gmra.mrb[4].mxu0 %vm49_vm0, %v529_v47 }
  0x1c   :  { %1183 = vmatprep.mubr.msk.bf16.mxu0 %vm49_vm0, %v629_v50 }
  0x1e   :  { %1138 = vmatmul.mubr.msk.bf16.gmra.mrb[8].mxu1 %vm49_vm0, %v25_v51 }
  0x1f   :  { %1143 = vmatprep.mubr.msk.bf16.mxu1 %vm49_vm0, %v215_v52 }
  0x23   :  { %1184 = vmatmul.mubr.msk.bf16.vlgmr.msra.gmra.mrb[0].mxu0 %vm49_vm0, %v630_v59 }
  0x24   :  { %1192 = vmatpush3.bf16.msra.mxu0 %v1252_v40  ;;  %1187 = vmatprep.mubr.msk.bf16.mxu0 %vm49_vm0, %v631_v62  ;;  %v837_v40 = vpack.c.bf16 %v833_v37, %v832_v36 }
  0x25   :  { %1201 = vmatprep.subr.bf16.mxu0 %v1253_v0 }
  0x26   :  { %1144 = vmatmul.mubr.msk.bf16.vlgmr.msra.gmra.mrb[0].mxu1 %vm49_vm0, %v216_v63 }
  0x27   :  { %1152 = vmatpush3.bf16.msra.mxu1 %v1251_v42  ;;  %1147 = vmatprep.mubr.msk.bf16.mxu1 %vm49_vm0, %v217_v2  ;;  %v834_v42 = vld [vmem:[%s1575_s0 + $0x36] sm:$0x3] }
  0x28   :  { %1211 = vmatprep.subr.bf16.mxu1 %v1280_v1  ;;  %v838_v43 = vpack.c.bf16 %v834_v42, %v834_v42 }
  0x2b   :  { %1188 = vmatmul.mubr.msk.bf16.gmra.mrb[8].mxu0 %vm49_vm0, %v632_v7 }
  0x2c   :  { %1193 = vmatprep.mubr.msk.bf16.mxu0 %vm49_vm0, %v732_v10 }
  0x2e   :  { %1148 = vmatmul.mubr.msk.bf16.gmra.mrb[12].mxu1 %vm49_vm0, %v218_v11 }
  0x2f   :  { %1153 = vmatprep.mubr.msk.bf16.mxu1 %vm49_vm0, %v319_v12 }
  0x33   :  { %1194 = vmatmul.mubr.msk.bf16.vlgmr.msra.gmra.mrb[0].mxu0 %vm49_vm0, %v733_v19 }
  0x34   :  { %1202 = vmatpush3.bf16.msra.mxu0 %v1253_v0  ;;  %1197 = vmatprep.mubr.msk.bf16.mxu0 %vm49_vm0, %v734_v22 }
  0x36   :  { %1154 = vmatmul.mubr.msk.bf16.vlgmr.msra.gmra.mrb[0].mxu1 %vm49_vm0, %v320_v23  ;;  %v1075_v23 = vld [vmem:[%s1576_s2] ss:$0 sm:$0xff] }
  0x37   :  { %1212 = vmatpush3.bf16.msra.mxu1 %v1280_v1  ;;  %1157 = vmatprep.mubr.msk.bf16.mxu1 %vm49_vm0, %v321_v24  ;;  %v830_v1 = vld [vmem:[%s1575_s0 + $0x16] sm:$0xff] }
  0x38   :  { %v836_v39 = vpack.c.bf16 %v831_v35, %v830_v1 }
  0x3b   :  { %1198 = vmatmul.mubr.msk.bf16.gmra.mrb[12].mxu0 %vm49_vm0, %v735_v29 }
  0x3c   :  { %1203 = vmatprep.mubr.msk.bf16.mxu0 %vm49_vm0, %v835_v32 }
  0x3e   :  { %1158 = vmatmul.mubr.msk.bf16.gmra.mrb[16].mxu1 %vm49_vm0, %v322_v33 }
  0x3f   :  { %1167 = vmatprep.mubr.msk.bf16.mxu1 %vm49_vm0, %v425_v34 }
  0x43   :  { %1204 = vmatmul.mubr.msk.bf16.vlgmr.msra.gmra.mrb[0].mxu0 %vm49_vm0, %v836_v39 }
  0x44   :  { %1207 = vmatprep.mubr.msk.bf16.mxu0 %vm49_vm0, %v837_v40 }
  0x46   :  { %1168 = vmatmul.mubr.msk.bf16.vlgmr.msra.gmra.mrb[20].mxu1 %vm49_vm0, %v426_v41 }
  0x4b   :  { %1208 = vmatmul.mubr.msk.bf16.gmra.mrb[16].mxu0 %vm49_vm0, %v838_v43 }
  0xe1   :  { %v1129_v44 = vpop.f32.mrb[4].mxu1 }
  0xe2   :  { %v112_v45 = vpop.f32.mrb[5].mxu1 }
  0xe3   :  { %v1130_v46 = vpop.f32.mrb[6].mxu1 }
  0xe4   :  { %v115_v47 = vpop.f32.mrb[7].mxu1 }
  0xee   :  { %v1179_v48 = vpop.f32.mrb[4].mxu0 }
  0xef   :  { %v1532_v49 = vpop.f32.mrb[5].mxu0 }
  0xf0   :  { %v1180_v51 = vpop.f32.mrb[6].mxu0 }
  0xf1   :  { %v1139_v50 = vpop.f32.mrb[8].mxu1  ;;  %v1534_v54 = vpop.f32.mrb[7].mxu0 }
  0xf2   :  { %v203_v52 = vadd.f32 %v1139_v50, %v1129_v44  ;;  %v194_v53 = vpop.f32.mrb[9].mxu1 }
  0xf3   :  { %v195_v55 = vadd.f32 %v194_v53, %v112_v45  ;;  %v1140_v56 = vpop.f32.mrb[10].mxu1 }
  0xf4   :  { %v197_v57 = vpop.f32.mrb[11].mxu1 }
  0xf5   :  { %v198_v58 = vadd.f32 %v197_v57, %v115_v47 }
  0xfe   :  { %v1189_v59 = vpop.f32.mrb[8].mxu0 }
  0xff   :  { %v1536_v60 = vpop.f32.mrb[9].mxu0 }
 0x100   :  { %v1190_v62 = vpop.f32.mrb[10].mxu0 }
 0x101   :  { %v1149_v61 = vpop.f32.mrb[12].mxu1  ;;  %v1538_v2 = vpop.f32.mrb[11].mxu0 }
 0x102   :  { %v310_v63 = vadd.f32 %v1149_v61, %v203_v52  ;;  %v290_v0 = vpop.f32.mrb[13].mxu1 }
 0x103   :  { %v308_v3 = vadd.f32 %v290_v0, %v195_v55  ;;  %v1150_v4 = vpop.f32.mrb[14].mxu1 }
 0x104   :  { %v293_v5 = vpop.f32.mrb[15].mxu1 }
 0x105   :  { %v309_v6 = vadd.f32 %v293_v5, %v198_v58 }
 0x109   :  { %v1155_v7 = vpop.f32.mrb[0].mxu1 }
 0x10a   :  { %v378_v8 = vpop.f32.mrb[1].mxu1 }
 0x10b   :  { %v1156_v9 = vpop.f32.mrb[2].mxu1 }
 0x10c   :  { %v381_v10 = vpop.f32.mrb[3].mxu1 }
 0x10e   :  { %v1199_v11 = vpop.f32.mrb[12].mxu0 }
 0x10f   :  { %v807_v12 = vpop.f32.mrb[13].mxu0 }
 0x110   :  { %v1200_v14 = vpop.f32.mrb[14].mxu0 }
 0x111   :  { %v1159_v13 = vpop.f32.mrb[16].mxu1  ;;  %v810_v17 = vpop.f32.mrb[15].mxu0 }
 0x112   :  { %v414_v15 = vadd.f32 %v1159_v13, %v310_v63  ;;  %v394_v16 = vpop.f32.mrb[17].mxu1 }
 0x113   :  { %v412_v18 = vadd.f32 %v394_v16, %v308_v3  ;;  %v1160_v19 = vpop.f32.mrb[18].mxu1 }
 0x114   :  { %v397_v20 = vpop.f32.mrb[19].mxu1 }
 0x115   :  { %v413_v21 = vadd.f32 %v397_v20, %v309_v6 }
 0x116   :  { %v1205_v22 = vpop.f32.mrb[0].mxu0 }
 0x117   :  { %v1213_v24 = vadd.f32 %v1205_v22, %v1155_v7  ;;  %v894_v25 = vpop.f32.mrb[1].mxu0 }
 0x118   :  { %v1214_v26 = vadd.f32 %v894_v25, %v378_v8  ;;  %v1206_v27 = vpop.f32.mrb[2].mxu0 }
 0x119   :  { %v1169_v28 = vpop.f32.mrb[20].mxu1  ;;  %v940_v29 = vadd.f32 %v1213_v24, %v1075_v23  ;;  %v1215_v30 = vadd.f32 %v1206_v27, %v1156_v9  ;;  %v897_v31 = vpop.f32.mrb[3].mxu0 }
 0x11a   :  { %v518_v32 = vadd.f32 %v1169_v28, %v414_v15  ;;  %v498_v33 = vpop.f32.mrb[21].mxu1  ;;  %v938_v34 = vadd.f32 %v1214_v26, %v1075_v23  ;;  %v1216_v1 = vadd.f32 %v897_v31, %v381_v10 }
 0x11b   :  { %v516_v35 = vadd.f32 %v498_v33, %v412_v18  ;;  %v1170_v36 = vpop.f32.mrb[22].mxu1  ;;  %vm947_vm2 = vcmp.ge.f32.partialorder %v940_v29, 0.0  ;;  %v954_v37 = vmul.f32 0.2, %v940_v29  ;;  %v941_v38 = vadd.f32 %v1215_v30, %v1075_v23 }
 0x11c   :  { %v621_v39 = vadd.f32 %v1179_v48, %v518_v32  ;;  %v501_v40 = vpop.f32.mrb[23].mxu1  ;;  %vm945_vm3 = vcmp.ge.f32.partialorder %v938_v34, 0.0  ;;  %v952_v41 = vmul.f32 0.2, %v938_v34  ;;  %v939_v42 = vadd.f32 %v1216_v1, %v1075_v23 }
 0x11d   :  { %v619_v43 = vadd.f32 %v1532_v49, %v516_v35  ;;  %v961_v44 = vsel %vm947_vm2, %v940_v29, %v954_v37  ;;  %vm948_vm4 = vcmp.ge.f32.partialorder %v941_v38, 0.0  ;;  %v955_v45 = vmul.f32 0.2, %v941_v38 }
 0x11e   :  { %v517_v46 = vadd.f32 %v501_v40, %v413_v21  ;;  %969 = vst.msk [vmem:[%s1577_s3 + $0x10] sm:$0xff] %vm966_vm1, %v961_v44  ;;  %v959_v47 = vsel %vm945_vm3, %v938_v34, %v952_v41  ;;  %vm946_vm5 = vcmp.ge.f32.partialorder %v939_v42, 0.0  ;;  %v953_v50 = vmul.f32 0.2, %v939_v42  ;;  %v1209_v48 = vpop.f32.mrb[16].mxu0 }
 0x11f   :  { %v724_v51 = vadd.f32 %v1189_v59, %v621_v39  ;;  %967 = vst.msk [vmem:[%s1577_s3] sm:$0xff] %vm966_vm1, %v959_v47  ;;  %v962_v49 = vsel %vm948_vm4, %v941_v38, %v955_v45  ;;  %v722_v53 = vadd.f32 %v1536_v60, %v619_v43  ;;  %v910_v55 = vpop.f32.mrb[17].mxu0 }
 0x120   :  { %v620_v52 = vadd.f32 %v1534_v54, %v517_v46  ;;  %970 = vst.msk [vmem:[%s1577_s3 + $0x18] sm:$0xff] %vm966_vm1, %v962_v49  ;;  %v960_v56 = vsel %vm946_vm5, %v939_v42, %v953_v50  ;;  %v1210_v58 = vpop.f32.mrb[18].mxu0 }
 0x121   :  { %v827_v57 = vadd.f32 %v1199_v11, %v724_v51  ;;  %968 = vst.msk [vmem:[%s1577_s3 + $0x8] sm:$0xff] %vm966_vm1, %v960_v56  ;;  %v825_v59 = vadd.f32 %v807_v12, %v722_v53  ;;  %v913_v54 = vpop.f32.mrb[19].mxu0 }
 0x122   :  { %v723_v61 = vadd.f32 %v1538_v2, %v620_v52 }
 0x123   :  { %v930_v62 = vadd.f32 %v1209_v48, %v827_v57  ;;  %v928_v60 = vadd.f32 %v910_v55, %v825_v59 }
 0x124   :  { %v826_v63 = vadd.f32 %v810_v17, %v723_v61 }
 0x125   :  { %v944_v0 = vadd.f32 %v1075_v23, %v930_v62  ;;  %v942_v3 = vadd.f32 %v1075_v23, %v928_v60 }
 0x126   :  { %v929_v4 = vadd.f32 %v913_v54, %v826_v63 }
 0x127   :  { %vm951_vm6 = vcmp.ge.f32.partialorder %v944_v0, 0.0  ;;  %v958_v5 = vmul.f32 0.2, %v944_v0  ;;  %vm949_vm8 = vcmp.ge.f32.partialorder %v942_v3, 0.0  ;;  %v956_v6 = vmul.f32 0.2, %v942_v3 }
 0x128   :  { %v943_v7 = vadd.f32 %v1075_v23, %v929_v4 }
 0x129   :  { %v965_v8 = vsel %vm951_vm6, %v944_v0, %v958_v5  ;;  %v963_v9 = vsel %vm949_vm8, %v942_v3, %v956_v6 }
 0x12a   :  { %974 = vst.msk [vmem:[%s1577_s3 + $0x30] sm:$0x3] %vm973_vm7, %v965_v8  ;;  %vm950_vm9 = vcmp.ge.f32.partialorder %v943_v7, 0.0  ;;  %v957_v2 = vmul.f32 0.2, %v943_v7 }
 0x12b   :  { %971 = vst.msk [vmem:[%s1577_s3 + $0x20] sm:$0xff] %vm966_vm1, %v963_v9 }
 0x12c   :  { %v964_v10 = vsel %vm950_vm9, %v943_v7, %v957_v2 }
 0x12d   :  { %972 = vst.msk [vmem:[%s1577_s3 + $0x28] sm:$0xff] %vm966_vm1, %v964_v10 }

// kernel: shape_cam_tex_net_forward.8
= control target key start
LH: loop header
LB: loop body
LE: loop exit
PB: predicated region body
PF: predicated region fallthrough
CT: control target
= control target key end

     0   :  { %vm47_vm0 = vcmask 261120   ;;  %vm745_vm2 = vcmask 517120   ;;  %vm742_vm4 = vcmask 523264   ;;  %s1146_s1 = inlined_call_operand.vmem [shape: bf16[9,32,64], index: 1, kind: input, shape index: {}]   ;;  %s1147_s0 = inlined_call_operand.vmem [shape: f32[2,2,22,32], index: 0, kind: input, shape index: {}]   ;;  %s1148_s2 = inlined_call_operand.vmem [shape: f32[1,64], index: 2, kind: input, shape index: {}]   ;;  %s1149_s3 = inlined_call_operand.vmem [shape: f32[18,64], index: 3, kind: output, shape index: {}]  }
   0x1   :  { %v943_v0 = vld [vmem:[%s1146_s1 + $0x10] sm:$0xff]   ;;  %v944_v1 = vld [vmem:[%s1146_s1] sm:$0xff]   ;;  %v945_v2 = vld [vmem:[%s1146_s1 + $0x18] sm:$0xff]  }
   0x2   :  { %871 = vmatprep.subr.bf16.mxu0 %v943_v0  ;;  %879 = vmatprep.subr.bf16.mxu1 %v944_v1  ;;  %v946_v3 = vld [vmem:[%s1146_s1 + $0x8] sm:$0xff]   ;;  %v751_v4 = vld [vmem:[%s1147_s0 + $0x18] sm:$0xff]  ;;  %v752_v5 = vld [vmem:[%s1147_s0 + $0x20] sm:$0xff] }
   0x3   :  { %872 = vmatpush3.bf16.msra.mxu0 %v943_v0  ;;  %880 = vmatpush3.bf16.msra.mxu1 %v944_v1  ;;  %v15_v6 = vld [vmem:[%s1147_s0] sm:$0xff]  ;;  %v28_v7 = vpack.c.bf16 %v752_v5, %v751_v4  ;;  %v16_v8 = vld [vmem:[%s1147_s0 + $0x8] sm:$0xff]  ;;  %v17_v10 = vld [vmem:[%s1147_s0 + $0x10] sm:$0x3] }
   0x4   :  { %873 = vmatprep.subr.bf16.mxu0 %v945_v2  ;;  %881 = vmatprep.subr.bf16.mxu1 %v946_v3  ;;  %v753_v9 = vld [vmem:[%s1147_s0 + $0x28] sm:$0x3]  ;;  %v18_v11 = vpack.c.bf16 %v16_v8, %v15_v6  ;;  %v947_v13 = vld [vmem:[%s1146_s1 + $0x20] sm:$0xff]   ;;  %v19_v14 = vpack.c.bf16 %v17_v10, %v17_v10  ;;  %v948_v15 = vld [vmem:[%s1146_s1 + $0x30] sm:$0xff]  }
   0x5   :  { %v29_v12 = vpack.c.bf16 %v753_v9, %v753_v9  ;;  %875 = vmatprep.mubr.msk.bf16.mxu0 %vm47_vm0, %v28_v7  ;;  %v949_v16 = vld [vmem:[%s1146_s1 + $0x28] sm:$0xff]   ;;  %v950_v17 = vld [vmem:[%s1146_s1 + $0x38] sm:$0xff]   ;;  %v170_v20 = vld [vmem:[%s1147_s0 + $0x11] sm:$0x3] }
   0x6   :  { %883 = vmatprep.mubr.msk.bf16.mxu1 %vm47_vm0, %v18_v11  ;;  %v168_v18 = vld [vmem:[%s1147_s0 + $0x1] sm:$0xff]  ;;  %v169_v19 = vld [vmem:[%s1147_s0 + $0x9] sm:$0xff]  ;;  %v775_v24 = vld [vmem:[%s1147_s0 + $0x38] sm:$0xff]  ;;  %v172_v28 = vpack.c.bf16 %v170_v20, %v170_v20 }
   0x7   :  { %874 = vmatpush3.bf16.msra.mxu0 %v945_v2  ;;  %882 = vmatpush3.bf16.msra.mxu1 %v946_v3  ;;  %v171_v21 = vpack.c.bf16 %v169_v19, %v168_v18  ;;  %v951_v22 = vld [vmem:[%s1146_s1 + $0x40] sm:$0xff]   ;;  %v774_v23 = vld [vmem:[%s1147_s0 + $0x30] sm:$0xff]  ;;  %v953_v30 = vld [vmem:[%s1146_s1 + $0x48] sm:$0xff]  }
   0x8   :  { %887 = vmatprep.subr.bf16.mxu0 %v947_v13  ;;  %895 = vmatprep.subr.bf16.mxu1 %v948_v15  ;;  %v776_v25 = vld [vmem:[%s1147_s0 + $0x40] sm:$0x3]  ;;  %v251_v26 = vpack.c.bf16 %v775_v24, %v774_v23  ;;  %v952_v27 = vld [vmem:[%s1146_s1 + $0x50] sm:$0xff]   ;;  %v785_v31 = vld [vmem:[%s1147_s0 + $0x48] sm:$0xff] }
   0x9   :  { %v252_v29 = vpack.c.bf16 %v776_v25, %v776_v25  ;;  %v786_v32 = vld [vmem:[%s1147_s0 + $0x50] sm:$0xff]  ;;  %v954_v33 = vld [vmem:[%s1146_s1 + $0x58] sm:$0xff]   ;;  %v955_v38 = vld [vmem:[%s1146_s1 + $0x60] sm:$0xff]  }
   0xa   :  { %876 = vmatmul.mubr.msk.bf16.vlgmr.msra.gmra.mrb[0].mxu0 %vm47_vm0, %v29_v12  ;;  %884 = vmatmul.mubr.msk.bf16.vlgmr.msra.gmra.mrb[0].mxu1 %vm47_vm0, %v19_v14  ;;  %v331_v34 = vpack.c.bf16 %v786_v32, %v785_v31  ;;  %v787_v35 = vld [vmem:[%s1147_s0 + $0x58] sm:$0x3]  ;;  %v798_v40 = vld [vmem:[%s1147_s0 + $0x41] sm:$0x3]  ;;  %v956_v41 = vld [vmem:[%s1146_s1 + $0x70] sm:$0xff]  }
   0xb   :  { %888 = vmatpush3.bf16.msra.mxu0 %v947_v13  ;;  %896 = vmatpush3.bf16.msra.mxu1 %v948_v15  ;;  %v796_v36 = vld [vmem:[%s1147_s0 + $0x31] sm:$0xff]  ;;  %v797_v37 = vld [vmem:[%s1147_s0 + $0x39] sm:$0xff]  ;;  %v332_v42 = vpack.c.bf16 %v787_v35, %v787_v35  ;;  %v486_v43 = vld [vmem:[%s1147_s0 + $0x3] sm:$0xff]  ;;  %v411_v45 = vpack.c.bf16 %v798_v40, %v798_v40 }
   0xc   :  { %889 = vmatprep.subr.bf16.mxu0 %v949_v16  ;;  %897 = vmatprep.subr.bf16.mxu1 %v950_v17  ;;  %v410_v39 = vpack.c.bf16 %v797_v37, %v796_v36  ;;  %v487_v44 = vld [vmem:[%s1147_s0 + $0xb] sm:$0xff]  ;;  %v815_v47 = vld [vmem:[%s1147_s0 + $0x1b] sm:$0xff]  ;;  %v816_v48 = vld [vmem:[%s1147_s0 + $0x23] sm:$0xff] }
   0xd   :  { %891 = vmatprep.mubr.msk.bf16.mxu0 %vm47_vm0, %v171_v21  ;;  %899 = vmatprep.mubr.msk.bf16.mxu1 %vm47_vm0, %v251_v26  ;;  %v957_v46 = vld [vmem:[%s1146_s1 + $0x68] sm:$0xff]   ;;  %v958_v49 = vld [vmem:[%s1146_s1 + $0x78] sm:$0xff]   ;;  %v489_v50 = vpack.c.bf16 %v487_v44, %v486_v43  ;;  %v568_v51 = vpack.c.bf16 %v816_v48, %v815_v47  ;;  %v488_v52 = vld [vmem:[%s1147_s0 + $0x13] sm:$0x3] }
   0xe   :  { %v959_v53 = vld [vmem:[%s1146_s1 + $0x80] sm:$0xff]   ;;  %v817_v54 = vld [vmem:[%s1147_s0 + $0x2b] sm:$0x3]  ;;  %v490_v57 = vpack.c.bf16 %v488_v52, %v488_v52  ;;  %v646_v61 = vld [vmem:[%s1147_s0 + $0x14] sm:$0x3] }
   0xf   :  { %890 = vmatpush3.bf16.msra.mxu0 %v949_v16  ;;  %898 = vmatpush3.bf16.msra.mxu1 %v950_v17  ;;  %v644_v55 = vld [vmem:[%s1147_s0 + $0x4] sm:$0xff]  ;;  %v645_v56 = vld [vmem:[%s1147_s0 + $0xc] sm:$0xff]  ;;  %v569_v58 = vpack.c.bf16 %v817_v54, %v817_v54  ;;  %v648_v62 = vpack.c.bf16 %v646_v61, %v646_v61 }
  0x10   :  { %903 = vmatprep.subr.bf16.mxu0 %v951_v22  ;;  %911 = vmatprep.subr.bf16.mxu1 %v952_v27  ;;  %v960_v59 = vld [vmem:[%s1146_s1 + $0x88] sm:$0xff]   ;;  %v647_v60 = vpack.c.bf16 %v645_v56, %v644_v55 }
  0x12   :  { %892 = vmatmul.mubr.msk.bf16.vlgmr.msra.gmra.mrb[4].mxu0 %vm47_vm0, %v172_v28  ;;  %900 = vmatmul.mubr.msk.bf16.vlgmr.msra.gmra.mrb[4].mxu1 %vm47_vm0, %v252_v29 }
  0x13   :  { %904 = vmatpush3.bf16.msra.mxu0 %v951_v22  ;;  %912 = vmatpush3.bf16.msra.mxu1 %v952_v27 }
  0x14   :  { %905 = vmatprep.subr.bf16.mxu0 %v953_v30  ;;  %913 = vmatprep.subr.bf16.mxu1 %v954_v33 }
  0x15   :  { %907 = vmatprep.mubr.msk.bf16.mxu0 %vm47_vm0, %v331_v34  ;;  %915 = vmatprep.mubr.msk.bf16.mxu1 %vm47_vm0, %v410_v39 }
  0x17   :  { %906 = vmatpush3.bf16.msra.mxu0 %v953_v30  ;;  %914 = vmatpush3.bf16.msra.mxu1 %v954_v33 }
  0x18   :  { %919 = vmatprep.subr.bf16.mxu0 %v955_v38  ;;  %927 = vmatprep.subr.bf16.mxu1 %v956_v41 }
  0x1a   :  { %908 = vmatmul.mubr.msk.bf16.vlgmr.msra.gmra.mrb[8].mxu0 %vm47_vm0, %v332_v42  ;;  %916 = vmatmul.mubr.msk.bf16.vlgmr.msra.gmra.mrb[8].mxu1 %vm47_vm0, %v411_v45 }
  0x1b   :  { %920 = vmatpush3.bf16.msra.mxu0 %v955_v38  ;;  %928 = vmatpush3.bf16.msra.mxu1 %v956_v41 }
  0x1c   :  { %921 = vmatprep.subr.bf16.mxu0 %v957_v46  ;;  %929 = vmatprep.subr.bf16.mxu1 %v958_v49 }
  0x1d   :  { %923 = vmatprep.mubr.msk.bf16.mxu0 %vm47_vm0, %v489_v50  ;;  %931 = vmatprep.mubr.msk.bf16.mxu1 %vm47_vm0, %v568_v51 }
  0x1f   :  { %922 = vmatpush3.bf16.msra.mxu0 %v957_v46  ;;  %930 = vmatpush3.bf16.msra.mxu1 %v958_v49 }
  0x20   :  { %935 = vmatprep.subr.bf16.mxu0 %v959_v53 }
  0x22   :  { %924 = vmatmul.mubr.msk.bf16.vlgmr.msra.gmra.mrb[12].mxu0 %vm47_vm0, %v490_v57  ;;  %932 = vmatmul.mubr.msk.bf16.vlgmr.msra.gmra.mrb[12].mxu1 %vm47_vm0, %v569_v58 }
  0x23   :  { %936 = vmatpush3.bf16.msra.mxu0 %v959_v53  ;;  %939 = vmatprep.mubr.msk.bf16.mxu0 %vm47_vm0, %v647_v60  ;;  %v834_v53 = vld [vmem:[%s1148_s2] ss:$0 sm:$0xff] }
  0x24   :  { %937 = vmatprep.subr.bf16.mxu0 %v960_v59 }
  0x27   :  { %938 = vmatpush3.bf16.msra.mxu0 %v960_v59 }
  0x2a   :  { %940 = vmatmul.mubr.msk.bf16.vlgmr.msra.gmra.mrb[16].mxu0 %vm47_vm0, %v648_v62 }
  0xdd   :  { %v877_v63 = vpop.f32.mrb[0].mxu0  ;;  %v885_v0 = vpop.f32.mrb[0].mxu1 }
  0xde   :  { %v88_v1 = vpop.f32.mrb[1].mxu0  ;;  %v163_v2 = vadd.f32 %v885_v0, %v877_v63  ;;  %v154_v3 = vpop.f32.mrb[1].mxu1 }
  0xdf   :  { %v878_v4 = vpop.f32.mrb[2].mxu0  ;;  %v155_v5 = vadd.f32 %v154_v3, %v88_v1  ;;  %v886_v6 = vpop.f32.mrb[2].mxu1 }
  0xe0   :  { %v91_v7 = vpop.f32.mrb[3].mxu0  ;;  %v157_v8 = vpop.f32.mrb[3].mxu1 }
  0xe1   :  { %v158_v9 = vadd.f32 %v157_v8, %v91_v7 }
  0xe5   :  { %v893_v10 = vpop.f32.mrb[4].mxu0  ;;  %v901_v13 = vpop.f32.mrb[4].mxu1 }
  0xe6   :  { %v246_v11 = vadd.f32 %v893_v10, %v163_v2  ;;  %v230_v12 = vpop.f32.mrb[5].mxu0  ;;  %v310_v16 = vpop.f32.mrb[5].mxu1 }
  0xe7   :  { %v244_v14 = vadd.f32 %v230_v12, %v155_v5  ;;  %v894_v15 = vpop.f32.mrb[6].mxu0  ;;  %v902_v19 = vpop.f32.mrb[6].mxu1 }
  0xe8   :  { %v326_v17 = vadd.f32 %v901_v13, %v246_v11  ;;  %v233_v18 = vpop.f32.mrb[7].mxu0  ;;  %v313_v22 = vpop.f32.mrb[7].mxu1 }
  0xe9   :  { %v245_v20 = vadd.f32 %v233_v18, %v158_v9  ;;  %v324_v21 = vadd.f32 %v310_v16, %v244_v14 }
  0xeb   :  { %v325_v23 = vadd.f32 %v313_v22, %v245_v20 }
  0xed   :  { %v909_v24 = vpop.f32.mrb[8].mxu0  ;;  %v917_v27 = vpop.f32.mrb[8].mxu1 }
  0xee   :  { %v406_v25 = vadd.f32 %v909_v24, %v326_v17  ;;  %v390_v26 = vpop.f32.mrb[9].mxu0  ;;  %v469_v30 = vpop.f32.mrb[9].mxu1 }
  0xef   :  { %v404_v28 = vadd.f32 %v390_v26, %v324_v21  ;;  %v910_v29 = vpop.f32.mrb[10].mxu0  ;;  %v918_v33 = vpop.f32.mrb[10].mxu1 }
  0xf0   :  { %v485_v31 = vadd.f32 %v917_v27, %v406_v25  ;;  %v393_v32 = vpop.f32.mrb[11].mxu0  ;;  %v472_v36 = vpop.f32.mrb[11].mxu1 }
  0xf1   :  { %v405_v34 = vadd.f32 %v393_v32, %v325_v23  ;;  %v483_v35 = vadd.f32 %v469_v30, %v404_v28 }
  0xf3   :  { %v484_v37 = vadd.f32 %v472_v36, %v405_v34 }
  0xf5   :  { %v925_v38 = vpop.f32.mrb[12].mxu0  ;;  %v933_v41 = vpop.f32.mrb[12].mxu1 }
  0xf6   :  { %v564_v39 = vadd.f32 %v925_v38, %v485_v31  ;;  %v548_v40 = vpop.f32.mrb[13].mxu0  ;;  %v627_v44 = vpop.f32.mrb[13].mxu1 }
  0xf7   :  { %v562_v42 = vadd.f32 %v548_v40, %v483_v35  ;;  %v926_v43 = vpop.f32.mrb[14].mxu0  ;;  %v934_v47 = vpop.f32.mrb[14].mxu1 }
  0xf8   :  { %v643_v45 = vadd.f32 %v933_v41, %v564_v39  ;;  %v551_v46 = vpop.f32.mrb[15].mxu0  ;;  %v630_v50 = vpop.f32.mrb[15].mxu1 }
  0xf9   :  { %v563_v48 = vadd.f32 %v551_v46, %v484_v37  ;;  %v641_v49 = vadd.f32 %v627_v44, %v562_v42 }
  0xfb   :  { %v642_v51 = vadd.f32 %v630_v50, %v563_v48 }
  0xfd   :  { %v941_v52 = vpop.f32.mrb[16].mxu0 }
  0xfe   :  { %v722_v54 = vadd.f32 %v941_v52, %v643_v45  ;;  %v706_v55 = vpop.f32.mrb[17].mxu0 }
  0xff   :  { %v720_v56 = vadd.f32 %v706_v55, %v641_v49  ;;  %v942_v57 = vpop.f32.mrb[18].mxu0 }
 0x100   :  { %v732_v58 = vadd.f32 %v834_v53, %v722_v54  ;;  %v709_v59 = vpop.f32.mrb[19].mxu0 }
 0x101   :  { %v730_v60 = vadd.f32 %v834_v53, %v720_v56  ;;  %v721_v61 = vadd.f32 %v709_v59, %v642_v51 }
 0x102   :  { %vm735_vm1 = vcmp.ge.f32.partialorder %v732_v58, 0.0  ;;  %v738_v62 = vmul.f32 0.2, %v732_v58 }
 0x103   :  { %vm733_vm3 = vcmp.ge.f32.partialorder %v730_v60, 0.0  ;;  %v736_v63 = vmul.f32 0.2, %v730_v60  ;;  %v731_v0 = vadd.f32 %v834_v53, %v721_v61 }
 0x104   :  { %v741_v1 = vsel %vm735_vm1, %v732_v58, %v738_v62 }
 0x105   :  { %746 = vst.msk [vmem:[%s1149_s3 + $0x10] sm:$0x3] %vm745_vm2, %v741_v1  ;;  %v739_v2 = vsel %vm733_vm3, %v730_v60, %v736_v63  ;;  %vm734_vm5 = vcmp.ge.f32.partialorder %v731_v0, 0.0  ;;  %v737_v3 = vmul.f32 0.2, %v731_v0 }
 0x106   :  { %743 = vst.msk [vmem:[%s1149_s3] sm:$0xff] %vm742_vm4, %v739_v2 }
 0x107   :  { %v740_v4 = vsel %vm734_vm5, %v731_v0, %v737_v3 }
 0x108   :  { %744 = vst.msk [vmem:[%s1149_s3 + $0x8] sm:$0xff] %vm742_vm4, %v740_v4 }

// kernel: shape_cam_tex_net_forward.9
= control target key start
LH: loop header
LB: loop body
LE: loop exit
PB: predicated region body
PF: predicated region fallthrough
CT: control target
= control target key end

     0   :  { %v519_v1 = vmov 0.0   ;;  %v520_v7 = vmov 1966171168   ;;  %v79_v9 = vlaneseq  ;;  %vm521_vm0 = vmmov 0   ;;  %s663_s1 = inlined_call_operand.vmem [shape: bf16[256,64], index: 1, kind: input, shape index: {}]   ;;  %s664_s0 = inlined_call_operand.vmem [shape: bf16[2,256], index: 0, kind: input, shape index: {}]   ;;  %s665_s3 = inlined_call_operand.vmem [shape: bf16[64,64], index: 3, kind: input, shape index: {}]   ;;  %s666_s5 = inlined_call_operand.vmem [shape: bf16[64,128], index: 5, kind: input, shape index: {}]   ;;  %s667_s2 = inlined_call_operand.vmem [shape: f32[1,64], index: 2, kind: input, shape index: {}]   ;;  %s668_s4 = inlined_call_operand.vmem [shape: f32[1,64], index: 4, kind: input, shape index: {}]   ;;  %s669_s6 = inlined_call_operand.vmem [shape: f32[1,128], index: 6, kind: input, shape index: {}]   ;;  %s670_s7 = inlined_call_operand.vmem [shape: f32[2,128], index: 7, kind: output, shape index: {}]  }
   0x1   :  { %v495_v0 = vld [vmem:[%s663_s1 + $0x40] sm:$0xff]   ;;  %468 = vmatprep.subr.bf16.mxu1 %v519_v1  ;;  %v497_v3 = vld [vmem:[%s663_s1 + $0x48] sm:$0xff]   ;;  %v499_v5 = vld [vmem:[%s663_s1 + $0x50] sm:$0xff]   ;;  %v77_v8 = vunpack.c.l.s4 %v520_v7  ;;  %476 = vmatprep.mubr.msk.bf16.mxu1 %vm521_vm0, %v519_v1  ;;  %vm271_vm2 = vcmask 523264  }
   0x2   :  { %v496_v2 = vld [vmem:[%s663_s1] sm:$0xff]   ;;  %436 = vmatprep.subr.bf16.mxu0 %v495_v0  ;;  %v498_v4 = vld [vmem:[%s663_s1 + $0x8] sm:$0xff]   ;;  %v500_v6 = vld [vmem:[%s663_s1 + $0x10] sm:$0xff]   ;;  %v80_v13 = vshrl.u32 %v79_v9, 7 }
   0x3   :  { %437 = vmatpush3.bf16.msra.mxu0 %v496_v2  ;;  %v501_v10 = vld [vmem:[%s663_s1 + $0x58] sm:$0xff]   ;;  %v78_v12 = vunpack.c.0.s8 %v77_v8  ;;  %v503_v14 = vld [vmem:[%s663_s1 + $0x60] sm:$0xff]   ;;  %v505_v16 = vld [vmem:[%s663_s1 + $0x68] sm:$0xff]  }
   0x4   :  { %438 = vmatprep.subr.bf16.mxu0 %v497_v3  ;;  %v502_v11 = vld [vmem:[%s663_s1 + $0x18] sm:$0xff]   ;;  %v504_v15 = vld [vmem:[%s663_s1 + $0x20] sm:$0xff]   ;;  %v506_v21 = vld [vmem:[%s663_s1 + $0x28] sm:$0xff]  }
   0x5   :  { %v81_v17 = vsub.s32 %v78_v12, %v80_v13  ;;  %v407_v18 = vld.sshfl [vmem:[%s664_s0] sm:$0x11 pattern:$0x75316420]  ;;  %v507_v23 = vld [vmem:[%s663_s1 + $0x70] sm:$0xff]   ;;  %v509_v25 = vld [vmem:[%s663_s1 + $0x78] sm:$0xff]  }
   0x6   :  { %v75_v19 = vcombine.high %v407_v18, %v407_v18  ;;  %v511_v20 = vld [vmem:[%s665_s3] sm:$0xff]   ;;  %v508_v24 = vld [vmem:[%s663_s1 + $0x30] sm:$0xff]   ;;  %v510_v26 = vld [vmem:[%s663_s1 + $0x38] sm:$0xff]  }
   0x7   :  { %439 = vmatpush3.bf16.msra.mxu0 %v498_v4  ;;  %469 = vmatpush3.bf16.msra.mxu1 %v511_v20  ;;  %v82_v27 = vrot.slane %v407_v18, %v81_v17  ;;  %v512_v28 = vld [vmem:[%s665_s3 + $0x8] sm:$0xff]   ;;  %v513_v29 = vld [vmem:[%s665_s3 + $0x10] sm:$0xff]   ;;  %v514_v30 = vld [vmem:[%s665_s3 + $0x18] sm:$0xff]  }
   0x8   :  { %440 = vmatprep.subr.bf16.mxu0 %v499_v5  ;;  %v89_v22 = vrot.slane %v75_v19, %v81_v17  ;;  %470 = vmatprep.subr.bf16.mxu1 %v519_v1  ;;  %v406_v32 = vld [vmem:[%s667_s2] ss:$0 sm:$0xff]  ;;  %v516_v42 = vld [vmem:[%s666_s5 + $0x8] sm:$0xff]   ;;  %v517_v43 = vld [vmem:[%s666_s5 + $0x10] sm:$0xff]  }
   0x9   :  { %v515_v40 = vld [vmem:[%s666_s5] sm:$0xff]   ;;  %v518_v44 = vld [vmem:[%s666_s5 + $0x18] sm:$0xff]  }
   0xa   :  { %220 = vmatprep.mubr.bf16.mxu0 %v89_v22  ;;  %v424_v45 = vld [vmem:[%s668_s4] ss:$0 sm:$0xff] }
   0xb   :  { %441 = vmatpush3.bf16.msra.mxu0 %v500_v6  ;;  %471 = vmatpush3.bf16.msra.mxu1 %v512_v28  ;;  %v430_v54 = vld [vmem:[%s669_s6] ss:$0 sm:$0xff] }
   0xc   :  { %442 = vmatprep.subr.bf16.mxu0 %v501_v10  ;;  %472 = vmatprep.subr.bf16.mxu1 %v519_v1 }
   0xf   :  { %443 = vmatpush3.bf16.msra.mxu0 %v502_v11  ;;  %473 = vmatpush3.bf16.msra.mxu1 %v513_v29 }
  0x10   :  { %444 = vmatprep.subr.bf16.mxu0 %v503_v14  ;;  %474 = vmatprep.subr.bf16.mxu1 %v519_v1 }
  0x13   :  { %445 = vmatpush3.bf16.msra.mxu0 %v504_v15  ;;  %475 = vmatpush3.bf16.msra.mxu1 %v514_v30 }
  0x14   :  { %446 = vmatprep.subr.bf16.mxu0 %v505_v16  ;;  %480 = vmatprep.subr.bf16.mxu1 %v519_v1 }
  0x17   :  { %447 = vmatpush3.bf16.msra.mxu0 %v506_v21 }
  0x18   :  { %448 = vmatprep.subr.bf16.mxu0 %v507_v23 }
  0x1b   :  { %449 = vmatpush3.bf16.msra.mxu0 %v508_v24 }
  0x1c   :  { %450 = vmatprep.subr.bf16.mxu0 %v509_v25 }
  0x1f   :  { %451 = vmatpush3.bf16.msra.mxu0 %v510_v26 }
  0x22   :  { %221 = vmatmul.mubr.bf16.vlgmr.msra.gmra.mrb[0].mxu0 %v82_v27 }
  0xf5   :  { %v452_v31 = vpop.f32.mrb[0].mxu0 }
  0xf6   :  { %v453_v33 = vpop.f32.mrb[1].mxu0 }
  0xf7   :  { %v454_v34 = vadd.f32 %v453_v33, %v452_v31  ;;  %v455_v35 = vpop.f32.mrb[2].mxu0 }
  0xf8   :  { %v456_v36 = vpop.f32.mrb[3].mxu0 }
  0xf9   :  { %v223_v37 = vadd.f32 %v454_v34, %v406_v32 }
  0xfb   :  { %vm228_vm1 = vcmp.ge.f32.partialorder %v223_v37, 0.0  ;;  %v229_v38 = vmul.f32 0.2, %v223_v37 }
  0xfd   :  { %v230_v39 = vsel %vm228_vm1, %v223_v37, %v229_v38 }
  0xfe   :  { %v231_v41 = vpack.c.bf16 %v230_v39, %v230_v39 }
 0x100   :  { %477 = vmatmul.mubr.msk.bf16.vlgmr.msra.gmra.mrb[0].mxu1 %vm271_vm2, %v231_v41 }
 0x101   :  { %481 = vmatpush3.bf16.msra.mxu1 %v515_v40  ;;  %488 = vmatprep.mubr.msk.bf16.mxu1 %vm521_vm0, %v519_v1 }
 0x102   :  { %482 = vmatprep.subr.bf16.mxu1 %v519_v1 }
 0x105   :  { %483 = vmatpush3.bf16.msra.mxu1 %v516_v42 }
 0x106   :  { %484 = vmatprep.subr.bf16.mxu1 %v519_v1 }
 0x109   :  { %485 = vmatpush3.bf16.msra.mxu1 %v517_v43 }
 0x10a   :  { %486 = vmatprep.subr.bf16.mxu1 %v519_v1 }
 0x10d   :  { %487 = vmatpush3.bf16.msra.mxu1 %v518_v44 }
 0x1d3   :  { %v309_v46 = vpop.f32.mrb[0].mxu1 }
 0x1d4   :  { %v310_v47 = vadd.f32 %v424_v45, %v309_v46  ;;  %v478_v48 = vpop.f32.mrb[1].mxu1 }
 0x1d5   :  { %v312_v49 = vpop.f32.mrb[2].mxu1 }
 0x1d6   :  { %vm315_vm3 = vcmp.ge.f32.partialorder %v310_v47, 0.0  ;;  %v316_v50 = vmul.f32 0.2, %v310_v47  ;;  %v479_v51 = vpop.f32.mrb[3].mxu1 }
 0x1d8   :  { %v317_v52 = vsel %vm315_vm3, %v310_v47, %v316_v50 }
 0x1d9   :  { %v318_v53 = vpack.c.bf16 %v317_v52, %v317_v52 }
 0x1db   :  { %489 = vmatmul.mubr.msk.bf16.vlgmr.msra.gmra.mrb[4].mxu1 %vm271_vm2, %v318_v53 }
 0x2ae   :  { %v395_v55 = vpop.f32.mrb[4].mxu1 }
 0x2af   :  { %v396_v56 = vadd.f32 %v430_v54, %v395_v55  ;;  %v490_v57 = vpop.f32.mrb[5].mxu1 }
 0x2b0   :  { %v398_v58 = vpop.f32.mrb[6].mxu1 }
 0x2b1   :  { %401 = vst [vmem:[%s670_s7] sm:$0x3] %v396_v56  ;;  %v491_v59 = vpop.f32.mrb[7].mxu1 }

</bundles_post_ra>
